<compile_context>
chip_gen: v5e
topology: v5e:2x2
jax: 0.10.0
libtpu: 0.0.40
codegen_flags: <defaults>
</compile_context>

<pallas_src>
import functools

import numpy as np

import jax
import jax.numpy as jnp
from jax.experimental import pallas as pl
from jax.experimental.pallas import tpu as pltpu

EPS = 1e-5  # PyTorch BatchNorm2d default


# --------------------------------------------------------------------------- #
# One-time host-side weight preparation (hoisted out of the forward pass).
# --------------------------------------------------------------------------- #

def _toeplitz_weight(w, wi, stride, pad):
    """ConvTranspose2d weight (Cin, Cout, kH, kW) -> stack of kH width-Toeplitz
    matrices M[j] of shape (Wi*Cin, Wo*Cout), correlation-ordered over the
    height taps of the height-dilated/padded input:

        out_row[yo] = sum_j  x_dilpad_row[yo + j] @ M[j]

    The width-direction stride / padding / kernel taps are folded into M."""
    w = np.asarray(w, np.float32)
    cin, cout, kh, kw = w.shape
    wo = (wi - 1) * stride - 2 * pad + kw
    m = np.zeros((kh, wi * cin, wo * cout), np.float32)
    for j in range(kh):
        ky = kh - 1 - j                       # correlation order over height
        for xi in range(wi):
            for xo in range(wo):
                kx = xo + pad - xi * stride   # direct ConvT width tap
                if 0 <= kx < kw:
                    m[j, xi * cin:(xi + 1) * cin,
                         xo * cout:(xo + 1) * cout] = w[:, :, ky, kx]
    return m


def prepare_params(p, *, nz, ngf, nc):
    """Pre-transform weights (flip/transpose/Toeplitz, bf16) and BN helpers."""
    c8, c4, c2, c1 = ngf * 8, ngf * 4, ngf * 2, ngf

    # Layer 1: ConvT(nz, 8ngf, 7, 1, 0) on a 1x1 input: one (nz, 7*C8) matrix
    # per output row yo.  W1r[yo, ci, xo*C8 + co] = w1[ci, co, yo, xo].
    w1 = np.asarray(p["w1"], np.float32)                       # (nz, c8, 7, 7)
    w1r = np.transpose(w1, (2, 0, 3, 1)).reshape(7, nz, 7 * c8)

    m2 = _toeplitz_weight(p["w2"], wi=7, stride=1, pad=1)      # (3, 7*c8, 7*c4)
    m3 = _toeplitz_weight(p["w3"], wi=7, stride=2, pad=1)      # (4, 7*c4, 14*c2)
    m4 = _toeplitz_weight(p["w4"], wi=14, stride=1, pad=1)     # (3, 14*c2, 14*c1)
    m5 = _toeplitz_weight(p["w5"], wi=14, stride=2, pad=1)     # (4, 14*c1, 28*nc)

    # Pad the final output width up to a multiple of 128 lanes so the single HBM
    # store of the result is an unmasked, lane-dense store (wrapper slices it off).
    out_cols = ((28 * nc + 127) // 128) * 128
    m5p = np.zeros((m5.shape[0], m5.shape[1], out_cols), np.float32)
    m5p[:, :, :28 * nc] = m5

    prep = {
        "w1r": jnp.asarray(w1r, jnp.bfloat16),
        "m2": jnp.asarray(m2, jnp.bfloat16),
        "m3": jnp.asarray(m3, jnp.bfloat16),
        "m4": jnp.asarray(m4, jnp.bfloat16),
        "m5": jnp.asarray(m5p, jnp.bfloat16),
    }

    # Per-BN 0/1 selector matrices: S (Wo*C, C) reduces lane groups (xo, c) -> c,
    # T = S^T broadcasts per-channel values back to the (xo, c) lane grouping.
    for idx, (c, wo) in enumerate(((c8, 7), (c4, 7), (c2, 14), (c1, 14)), start=1):
        s = np.tile(np.eye(c, dtype=np.float32), (wo, 1))
        prep[f"g{idx}"] = jnp.asarray(np.asarray(p[f"g{idx}"], np.float32).reshape(1, c))
        prep[f"b{idx}"] = jnp.asarray(np.asarray(p[f"b{idx}"], np.float32).reshape(1, c))
        prep[f"S{idx}"] = jnp.asarray(s)
        prep[f"T{idx}"] = jnp.asarray(np.ascontiguousarray(s.T))
    return prep


# --------------------------------------------------------------------------- #
# In-kernel helpers (traced inside the single fused Pallas kernel).
# --------------------------------------------------------------------------- #

def _bn_relu(x, g_ref, b_ref, s_ref, t_ref, count):
    """Training-mode BatchNorm2d + ReLU on a (H*N, W*C) slab (stats per channel)."""
    s = s_ref[...]                                   # (W*C, C) 0/1 selector
    t = t_ref[...]                                   # (C, W*C) broadcast-back
    inv_cnt = 1.0 / count
    mean_c = jnp.dot(jnp.sum(x, axis=0, keepdims=True), s,
                     preferred_element_type=jnp.float32) * inv_cnt       # (1, C)
    xc = x - jnp.dot(mean_c, t, preferred_element_type=jnp.float32)
    # Two-pass (centered) variance: avoids E[x^2] - mean^2 cancellation.
    var_c = jnp.dot(jnp.sum(xc * xc, axis=0, keepdims=True), s,
                    preferred_element_type=jnp.float32) * inv_cnt        # (1, C)
    scale_c = g_ref[...] * jax.lax.rsqrt(var_c + EPS)
    y = xc * jnp.dot(scale_c, t, preferred_element_type=jnp.float32) \
        + jnp.dot(b_ref[...], t, preferred_element_type=jnp.float32)
    return jnp.maximum(y, 0.0)


def _conv_rows(y, xp_ref, m_ref, *, n, hi, ho, kh, stride, padh):
    """ConvTranspose2d on row-major (H*N, W*C) slabs.

    y       : (hi*n, Wi*Cin) f32 activation value.
    xp_ref  : VMEM scratch (((hi-1)*stride + 1 + 2*padh)*n, Wi*Cin) f32 — holds the
              height-dilated / height-padded copy of y (width handled by m_ref).
    m_ref   : (kh, Wi*Cin, Wo*Cout) bf16 block-Toeplitz weights.
    returns : (ho*n, Wo*Cout) f32 accumulator (kept in registers).
    """
    xp_ref[...] = jnp.zeros_like(xp_ref)
    if stride == 1:
        xp_ref[padh * n:(padh + hi) * n, :] = y
    else:
        for yi in range(hi):                      # zero-interleave rows (dilation)
            r = (padh + yi * stride) * n
            xp_ref[r:r + n, :] = y[yi * n:(yi + 1) * n, :]

    acc = jnp.zeros((ho * n, m_ref.shape[2]), jnp.float32)
    for j in range(kh):                           # kH shifted-row MXU matmuls
        acc = acc + jnp.dot(
            xp_ref[pl.ds(j * n, ho * n), :].astype(jnp.bfloat16),
            m_ref[j],
            preferred_element_type=jnp.float32)
    return acc


def _generator_kernel(z_ref, w1_ref, m2_ref, m3_ref, m4_ref, m5_ref,
                      g1_ref, b1_ref, s1_ref, t1_ref,
                      g2_ref, b2_ref, s2_ref, t2_ref,
                      g3_ref, b3_ref, s3_ref, t3_ref,
                      g4_ref, b4_ref, s4_ref, t4_ref,
                      o_ref,
                      h1_ref, xp2_ref, xp3_ref, xp4_ref, xp5_ref,
                      *, n):
    # ---- Layer 1: ConvT(nz, 8ngf, 7, 1, 0) on 1x1 input == 7 per-row matmuls ----
    z = z_ref[...].astype(jnp.bfloat16)                       # (n, nz)
    for yo in range(7):
        h1_ref[yo * n:(yo + 1) * n, :] = jnp.dot(
            z, w1_ref[yo], preferred_element_type=jnp.float32)
    h = _bn_relu(h1_ref[...], g1_ref, b1_ref, s1_ref, t1_ref, float(n * 49))

    # ---- Layer 2: ConvT(8ngf, 4ngf, 3, 1, 1)  7x7 -> 7x7 ----
    h = _conv_rows(h, xp2_ref, m2_ref, n=n, hi=7, ho=7, kh=3, stride=1, padh=1)
    h = _bn_relu(h, g2_ref, b2_ref, s2_ref, t2_ref, float(n * 49))

    # ---- Layer 3: ConvT(4ngf, 2ngf, 4, 2, 1)  7x7 -> 14x14 ----
    h = _conv_rows(h, xp3_ref, m3_ref, n=n, hi=7, ho=14, kh=4, stride=2, padh=2)
    h = _bn_relu(h, g3_ref, b3_ref, s3_ref, t3_ref, float(n * 196))

    # ---- Layer 4: ConvT(2ngf, ngf, 3, 1, 1)  14x14 -> 14x14 ----
    h = _conv_rows(h, xp4_ref, m4_ref, n=n, hi=14, ho=14, kh=3, stride=1, padh=1)
    h = _bn_relu(h, g4_ref, b4_ref, s4_ref, t4_ref, float(n * 196))

    # ---- Layer 5: ConvT(ngf, nc, 4, 2, 1)  14x14 -> 28x28, then Tanh ----
    h = _conv_rows(h, xp5_ref, m5_ref, n=n, hi=14, ho=28, kh=4, stride=2, padh=2)
    o_ref[...] = jnp.tanh(h)                 # lane-dense (28*n, 128-padded) store


# --------------------------------------------------------------------------- #
# Public forward pass (single pallas_call).
# --------------------------------------------------------------------------- #

def generator_forward(x_nchw, prep, *, nz, nc):
    """x_nchw: (N, nz, 1, 1) -> (N, nc, 28, 28), matching the PyTorch module."""
    N = x_nchw.shape[0]
    z = x_nchw.reshape(N, nz).astype(jnp.float32)

    c8 = prep["g1"].shape[1]
    c4 = prep["g2"].shape[1]
    c2 = prep["g3"].shape[1]
    c1 = prep["g4"].shape[1]
    out_cols = prep["m5"].shape[2]

    args = (z, prep["w1r"], prep["m2"], prep["m3"], prep["m4"], prep["m5"],
            prep["g1"], prep["b1"], prep["S1"], prep["T1"],
            prep["g2"], prep["b2"], prep["S2"], prep["T2"],
            prep["g3"], prep["b3"], prep["S3"], prep["T3"],
            prep["g4"], prep["b4"], prep["S4"], prep["T4"])

    def full_spec(a):
        nd = a.ndim
        return pl.BlockSpec(a.shape, lambda i, _nd=nd: (0,) * _nd)

    out = pl.pallas_call(
        functools.partial(_generator_kernel, n=N),
        grid=(1,),
        in_specs=[full_spec(a) for a in args],
        out_specs=pl.BlockSpec((28 * N, out_cols), lambda i: (0, 0)),
        out_shape=jax.ShapeDtypeStruct((28 * N, out_cols), jnp.float32),
        scratch_shapes=[
            pltpu.VMEM((7 * N, 7 * c8), jnp.float32),    # layer-1 row assembly
            pltpu.VMEM((9 * N, 7 * c8), jnp.float32),    # layer-2 padded input
            pltpu.VMEM((17 * N, 7 * c4), jnp.float32),   # layer-3 dilated+padded
            pltpu.VMEM((16 * N, 14 * c2), jnp.float32),  # layer-4 padded input
            pltpu.VMEM((31 * N, 14 * c1), jnp.float32),  # layer-5 dilated+padded
        ],
        compiler_params=pltpu.CompilerParams(
            dimension_semantics=("arbitrary",)),
    )(*args)

    # (yo*N + n, xo*nc + c) -> NCHW
    out = out[:, :28 * nc].reshape(28, N, 28, nc)
    return jnp.transpose(out, (1, 3, 0, 2))


# --------------------------------------------------------------------------- #
# Parameter init (matches module structure; BatchNorm uses batch statistics,
# i.e. training-mode behaviour of a freshly constructed torch module).
# --------------------------------------------------------------------------- #

def init_params(key, nz, ngf, nc):
    ks = jax.random.split(key, 13)
    n = lambda k, shape, s: s * jax.random.normal(k, shape, jnp.float32)
    p = {}
    p["w1"] = n(ks[0], (nz, ngf * 8, 7, 7), 0.02)
    p["g1"] = 1.0 + n(ks[1], (ngf * 8,), 0.1)
    p["b1"] = n(ks[2], (ngf * 8,), 0.1)
    p["w2"] = n(ks[3], (ngf * 8, ngf * 4, 3, 3), 0.02)
    p["g2"] = 1.0 + n(ks[4], (ngf * 4,), 0.1)
    p["b2"] = n(ks[5], (ngf * 4,), 0.1)
    p["w3"] = n(ks[6], (ngf * 4, ngf * 2, 4, 4), 0.02)
    p["g3"] = 1.0 + n(ks[7], (ngf * 2,), 0.1)
    p["b3"] = n(ks[8], (ngf * 2,), 0.1)
    p["w4"] = n(ks[9], (ngf * 2, ngf, 3, 3), 0.02)
    p["g4"] = 1.0 + n(ks[10], (ngf,), 0.1)
    p["b4"] = n(ks[11], (ngf,), 0.1)
    p["w5"] = n(ks[12], (ngf, nc, 4, 4), 0.02)
    return p


if __name__ == "__main__":
    nz, ngf, nc, batch = 16, 8, 3, 2

    key = jax.random.PRNGKey(0)
    kp, kx = jax.random.split(key)
    params = init_params(kp, nz, ngf, nc)
    prep = prepare_params(params, nz=nz, ngf=ngf, nc=nc)   # one-time weight prep
    x = jax.random.normal(kx, (batch, nz, 1, 1), jnp.float32)

    fwd = jax.jit(functools.partial(generator_forward, nz=nz, nc=nc))
    y = jax.block_until_ready(fwd(x, prep))

    assert y.shape == (batch, nc, 28, 28), y.shape
    assert bool(jnp.all(jnp.isfinite(y)))
    assert bool(jnp.all(jnp.abs(y) <= 1.0))   # tanh range
    print("KERNEL_OK")
</pallas_src>

<mosaic_0001>
module attributes {stable_mosaic.version = 11 : i64} {
  func.func @_generator_kernel(%arg0: i32, %arg1: memref<2x16xf32, #tpu.memory_space<vmem>>, %arg2: memref<7x16x448xbf16, #tpu.memory_space<vmem>>, %arg3: memref<3x448x224xbf16, #tpu.memory_space<vmem>>, %arg4: memref<4x224x224xbf16, #tpu.memory_space<vmem>>, %arg5: memref<3x224x112xbf16, #tpu.memory_space<vmem>>, %arg6: memref<4x112x128xbf16, #tpu.memory_space<vmem>>, %arg7: memref<1x64xf32, #tpu.memory_space<vmem>>, %arg8: memref<1x64xf32, #tpu.memory_space<vmem>>, %arg9: memref<448x64xf32, #tpu.memory_space<vmem>>, %arg10: memref<64x448xf32, #tpu.memory_space<vmem>>, %arg11: memref<1x32xf32, #tpu.memory_space<vmem>>, %arg12: memref<1x32xf32, #tpu.memory_space<vmem>>, %arg13: memref<224x32xf32, #tpu.memory_space<vmem>>, %arg14: memref<32x224xf32, #tpu.memory_space<vmem>>, %arg15: memref<1x16xf32, #tpu.memory_space<vmem>>, %arg16: memref<1x16xf32, #tpu.memory_space<vmem>>, %arg17: memref<224x16xf32, #tpu.memory_space<vmem>>, %arg18: memref<16x224xf32, #tpu.memory_space<vmem>>, %arg19: memref<1x8xf32, #tpu.memory_space<vmem>>, %arg20: memref<1x8xf32, #tpu.memory_space<vmem>>, %arg21: memref<112x8xf32, #tpu.memory_space<vmem>>, %arg22: memref<8x112xf32, #tpu.memory_space<vmem>>, %arg23: memref<56x128xf32, #tpu.memory_space<vmem>>, %arg24: memref<14x448xf32, #tpu.memory_space<vmem>>, %arg25: memref<18x448xf32, #tpu.memory_space<vmem>>, %arg26: memref<34x224xf32, #tpu.memory_space<vmem>>, %arg27: memref<32x224xf32, #tpu.memory_space<vmem>>, %arg28: memref<62x112xf32, #tpu.memory_space<vmem>>) attributes {dimension_semantics = [#tpu.dimension_semantics<arbitrary>], iteration_bounds = array<i64: 1>, scalar_prefetch = 0 : i64, scratch_operands = 5 : i64, tpu.core_type = #tpu.core_type<tc>, window_params = [{pipeline_mode = #tpu.pipeline_mode<synchronous>, transform_indices = @transform_0, window_bounds = array<i64: 2, 16>}, {pipeline_mode = #tpu.pipeline_mode<synchronous>, transform_indices = @transform_1, window_bounds = array<i64: 7, 16, 448>}, {pipeline_mode = #tpu.pipeline_mode<synchronous>, transform_indices = @transform_2, window_bounds = array<i64: 3, 448, 224>}, {pipeline_mode = #tpu.pipeline_mode<synchronous>, transform_indices = @transform_3, window_bounds = array<i64: 4, 224, 224>}, {pipeline_mode = #tpu.pipeline_mode<synchronous>, transform_indices = @transform_4, window_bounds = array<i64: 3, 224, 112>}, {pipeline_mode = #tpu.pipeline_mode<synchronous>, transform_indices = @transform_5, window_bounds = array<i64: 4, 112, 128>}, {pipeline_mode = #tpu.pipeline_mode<synchronous>, transform_indices = @transform_6, window_bounds = array<i64: 1, 64>}, {pipeline_mode = #tpu.pipeline_mode<synchronous>, transform_indices = @transform_7, window_bounds = array<i64: 1, 64>}, {pipeline_mode = #tpu.pipeline_mode<synchronous>, transform_indices = @transform_8, window_bounds = array<i64: 448, 64>}, {pipeline_mode = #tpu.pipeline_mode<synchronous>, transform_indices = @transform_9, window_bounds = array<i64: 64, 448>}, {pipeline_mode = #tpu.pipeline_mode<synchronous>, transform_indices = @transform_10, window_bounds = array<i64: 1, 32>}, {pipeline_mode = #tpu.pipeline_mode<synchronous>, transform_indices = @transform_11, window_bounds = array<i64: 1, 32>}, {pipeline_mode = #tpu.pipeline_mode<synchronous>, transform_indices = @transform_12, window_bounds = array<i64: 224, 32>}, {pipeline_mode = #tpu.pipeline_mode<synchronous>, transform_indices = @transform_13, window_bounds = array<i64: 32, 224>}, {pipeline_mode = #tpu.pipeline_mode<synchronous>, transform_indices = @transform_14, window_bounds = array<i64: 1, 16>}, {pipeline_mode = #tpu.pipeline_mode<synchronous>, transform_indices = @transform_15, window_bounds = array<i64: 1, 16>}, {pipeline_mode = #tpu.pipeline_mode<synchronous>, transform_indices = @transform_16, window_bounds = array<i64: 224, 16>}, {pipeline_mode = #tpu.pipeline_mode<synchronous>, transform_indices = @transform_17, window_bounds = array<i64: 16, 224>}, {pipeline_mode = #tpu.pipeline_mode<synchronous>, transform_indices = @transform_18, window_bounds = array<i64: 1, 8>}, {pipeline_mode = #tpu.pipeline_mode<synchronous>, transform_indices = @transform_19, window_bounds = array<i64: 1, 8>}, {pipeline_mode = #tpu.pipeline_mode<synchronous>, transform_indices = @transform_20, window_bounds = array<i64: 112, 8>}, {pipeline_mode = #tpu.pipeline_mode<synchronous>, transform_indices = @transform_21, window_bounds = array<i64: 8, 112>}, {pipeline_mode = #tpu.pipeline_mode<synchronous>, transform_indices = @transform_22, window_bounds = array<i64: 56, 128>}]} {
    %c0 = arith.constant 0 : index
    %c0_0 = arith.constant 0 : index
    %0 = vector.load %arg1[%c0, %c0_0] : memref<2x16xf32, #tpu.memory_space<vmem>>, vector<2x16xf32>
    %1 = arith.truncf %0 : vector<2x16xf32> to vector<2x16xbf16>
    %c0_1 = arith.constant 0 : index
    %c0_2 = arith.constant 0 : index
    %c0_3 = arith.constant 0 : index
    %2 = vector.load %arg2[%c0_1, %c0_2, %c0_3] : memref<7x16x448xbf16, #tpu.memory_space<vmem>>, vector<1x16x448xbf16>
    %3 = vector.shape_cast %2 : vector<1x16x448xbf16> to vector<16x448xbf16>
    %cst = arith.constant dense<0.000000e+00> : vector<2x448xf32>
    %4 = tpu.matmul %1, %3, %cst {dimension_numbers = #tpu.dot_dimension_numbers<[1], [0], [0], [1], [0, 0, 1, 1], [], []>} : vector<2x16xbf16>, vector<16x448xbf16>, vector<2x448xf32> -> vector<2x448xf32>
    %c0_4 = arith.constant 0 : index
    %c0_5 = arith.constant 0 : index
    %5 = vector.load %arg24[%c0_4, %c0_5] : memref<14x448xf32, #tpu.memory_space<vmem>>, vector<2x448xf32>
    tpu.vector_store %arg24[%c0_4, %c0_5], %4 {strides = array<i32>} : memref<14x448xf32, #tpu.memory_space<vmem>>, vector<2x448xf32>,
    %c1 = arith.constant 1 : index
    %c0_6 = arith.constant 0 : index
    %c0_7 = arith.constant 0 : index
    %6 = vector.load %arg2[%c1, %c0_6, %c0_7] : memref<7x16x448xbf16, #tpu.memory_space<vmem>>, vector<1x16x448xbf16>
    %7 = vector.shape_cast %6 : vector<1x16x448xbf16> to vector<16x448xbf16>
    %cst_8 = arith.constant dense<0.000000e+00> : vector<2x448xf32>
    %8 = tpu.matmul %1, %7, %cst_8 {dimension_numbers = #tpu.dot_dimension_numbers<[1], [0], [0], [1], [0, 0, 1, 1], [], []>} : vector<2x16xbf16>, vector<16x448xbf16>, vector<2x448xf32> -> vector<2x448xf32>
    %c2 = arith.constant 2 : index
    %c0_9 = arith.constant 0 : index
    %9 = vector.load %arg24[%c2, %c0_9] : memref<14x448xf32, #tpu.memory_space<vmem>>, vector<2x448xf32>
    tpu.vector_store %arg24[%c2, %c0_9], %8 {strides = array<i32>} : memref<14x448xf32, #tpu.memory_space<vmem>>, vector<2x448xf32>,
    %c2_10 = arith.constant 2 : index
    %c0_11 = arith.constant 0 : index
    %c0_12 = arith.constant 0 : index
    %10 = vector.load %arg2[%c2_10, %c0_11, %c0_12] : memref<7x16x448xbf16, #tpu.memory_space<vmem>>, vector<1x16x448xbf16>
    %11 = vector.shape_cast %10 : vector<1x16x448xbf16> to vector<16x448xbf16>
    %cst_13 = arith.constant dense<0.000000e+00> : vector<2x448xf32>
    %12 = tpu.matmul %1, %11, %cst_13 {dimension_numbers = #tpu.dot_dimension_numbers<[1], [0], [0], [1], [0, 0, 1, 1], [], []>} : vector<2x16xbf16>, vector<16x448xbf16>, vector<2x448xf32> -> vector<2x448xf32>
    %c4 = arith.constant 4 : index
    %c0_14 = arith.constant 0 : index
    %13 = vector.load %arg24[%c4, %c0_14] : memref<14x448xf32, #tpu.memory_space<vmem>>, vector<2x448xf32>
    tpu.vector_store %arg24[%c4, %c0_14], %12 {strides = array<i32>} : memref<14x448xf32, #tpu.memory_space<vmem>>, vector<2x448xf32>,
    %c3 = arith.constant 3 : index
    %c0_15 = arith.constant 0 : index
    %c0_16 = arith.constant 0 : index
    %14 = vector.load %arg2[%c3, %c0_15, %c0_16] : memref<7x16x448xbf16, #tpu.memory_space<vmem>>, vector<1x16x448xbf16>
    %15 = vector.shape_cast %14 : vector<1x16x448xbf16> to vector<16x448xbf16>
    %cst_17 = arith.constant dense<0.000000e+00> : vector<2x448xf32>
    %16 = tpu.matmul %1, %15, %cst_17 {dimension_numbers = #tpu.dot_dimension_numbers<[1], [0], [0], [1], [0, 0, 1, 1], [], []>} : vector<2x16xbf16>, vector<16x448xbf16>, vector<2x448xf32> -> vector<2x448xf32>
    %c6 = arith.constant 6 : index
    %c0_18 = arith.constant 0 : index
    %17 = vector.load %arg24[%c6, %c0_18] : memref<14x448xf32, #tpu.memory_space<vmem>>, vector<2x448xf32>
    tpu.vector_store %arg24[%c6, %c0_18], %16 {strides = array<i32>} : memref<14x448xf32, #tpu.memory_space<vmem>>, vector<2x448xf32>,
    %c4_19 = arith.constant 4 : index
    %c0_20 = arith.constant 0 : index
    %c0_21 = arith.constant 0 : index
    %18 = vector.load %arg2[%c4_19, %c0_20, %c0_21] : memref<7x16x448xbf16, #tpu.memory_space<vmem>>, vector<1x16x448xbf16>
    %19 = vector.shape_cast %18 : vector<1x16x448xbf16> to vector<16x448xbf16>
    %cst_22 = arith.constant dense<0.000000e+00> : vector<2x448xf32>
    %20 = tpu.matmul %1, %19, %cst_22 {dimension_numbers = #tpu.dot_dimension_numbers<[1], [0], [0], [1], [0, 0, 1, 1], [], []>} : vector<2x16xbf16>, vector<16x448xbf16>, vector<2x448xf32> -> vector<2x448xf32>
    %c8 = arith.constant 8 : index
    %c0_23 = arith.constant 0 : index
    %21 = vector.load %arg24[%c8, %c0_23] : memref<14x448xf32, #tpu.memory_space<vmem>>, vector<2x448xf32>
    tpu.vector_store %arg24[%c8, %c0_23], %20 {strides = array<i32>} : memref<14x448xf32, #tpu.memory_space<vmem>>, vector<2x448xf32>,
    %c5 = arith.constant 5 : index
    %c0_24 = arith.constant 0 : index
    %c0_25 = arith.constant 0 : index
    %22 = vector.load %arg2[%c5, %c0_24, %c0_25] : memref<7x16x448xbf16, #tpu.memory_space<vmem>>, vector<1x16x448xbf16>
    %23 = vector.shape_cast %22 : vector<1x16x448xbf16> to vector<16x448xbf16>
    %cst_26 = arith.constant dense<0.000000e+00> : vector<2x448xf32>
    %24 = tpu.matmul %1, %23, %cst_26 {dimension_numbers = #tpu.dot_dimension_numbers<[1], [0], [0], [1], [0, 0, 1, 1], [], []>} : vector<2x16xbf16>, vector<16x448xbf16>, vector<2x448xf32> -> vector<2x448xf32>
    %c10 = arith.constant 10 : index
    %c0_27 = arith.constant 0 : index
    %25 = vector.load %arg24[%c10, %c0_27] : memref<14x448xf32, #tpu.memory_space<vmem>>, vector<2x448xf32>
    tpu.vector_store %arg24[%c10, %c0_27], %24 {strides = array<i32>} : memref<14x448xf32, #tpu.memory_space<vmem>>, vector<2x448xf32>,
    %c6_28 = arith.constant 6 : index
    %c0_29 = arith.constant 0 : index
    %c0_30 = arith.constant 0 : index
    %26 = vector.load %arg2[%c6_28, %c0_29, %c0_30] : memref<7x16x448xbf16, #tpu.memory_space<vmem>>, vector<1x16x448xbf16>
    %27 = vector.shape_cast %26 : vector<1x16x448xbf16> to vector<16x448xbf16>
    %cst_31 = arith.constant dense<0.000000e+00> : vector<2x448xf32>
    %28 = tpu.matmul %1, %27, %cst_31 {dimension_numbers = #tpu.dot_dimension_numbers<[1], [0], [0], [1], [0, 0, 1, 1], [], []>} : vector<2x16xbf16>, vector<16x448xbf16>, vector<2x448xf32> -> vector<2x448xf32>
    %c12 = arith.constant 12 : index
    %c0_32 = arith.constant 0 : index
    %29 = vector.load %arg24[%c12, %c0_32] : memref<14x448xf32, #tpu.memory_space<vmem>>, vector<2x448xf32>
    tpu.vector_store %arg24[%c12, %c0_32], %28 {strides = array<i32>} : memref<14x448xf32, #tpu.memory_space<vmem>>, vector<2x448xf32>,
    %c0_33 = arith.constant 0 : index
    %c0_34 = arith.constant 0 : index
    %30 = vector.load %arg24[%c0_33, %c0_34] : memref<14x448xf32, #tpu.memory_space<vmem>>, vector<14x448xf32>
    %c0_35 = arith.constant 0 : index
    %c0_36 = arith.constant 0 : index
    %31 = vector.load %arg9[%c0_35, %c0_36] : memref<448x64xf32, #tpu.memory_space<vmem>>, vector<448x64xf32>
    %c0_37 = arith.constant 0 : index
    %c0_38 = arith.constant 0 : index
    %32 = vector.load %arg10[%c0_37, %c0_38] : memref<64x448xf32, #tpu.memory_space<vmem>>, vector<64x448xf32>
    %cst_39 = arith.constant dense<0.000000e+00> : vector<448xf32>
    %33 = vector.multi_reduction <add>, %30, %cst_39 [0] : vector<14x448xf32> to vector<448xf32>
    %34 = vector.shape_cast %33 : vector<448xf32> to vector<1x448xf32>
    %cst_40 = arith.constant dense<0.000000e+00> : vector<1x64xf32>
    %35 = tpu.matmul %34, %31, %cst_40 {dimension_numbers = #tpu.dot_dimension_numbers<[1], [0], [0], [1], [0, 0, 1, 1], [], []>} : vector<1x448xf32>, vector<448x64xf32>, vector<1x64xf32> -> vector<1x64xf32>
    %cst_41 = arith.constant 0.0102040814 : f32
    %36 = vector.broadcast %cst_41 : f32 to vector<1x64xf32>
    %37 = arith.mulf %35, %36 : vector<1x64xf32>
    %cst_42 = arith.constant dense<0.000000e+00> : vector<1x448xf32>
    %38 = tpu.matmul %37, %32, %cst_42 {dimension_numbers = #tpu.dot_dimension_numbers<[1], [0], [0], [1], [0, 0, 1, 1], [], []>} : vector<1x64xf32>, vector<64x448xf32>, vector<1x448xf32> -> vector<1x448xf32>
    %39 = vector.broadcast %38 : vector<1x448xf32> to vector<14x448xf32>
    %40 = arith.subf %30, %39 : vector<14x448xf32>
    %41 = arith.mulf %40, %40 : vector<14x448xf32>
    %cst_43 = arith.constant dense<0.000000e+00> : vector<448xf32>
    %42 = vector.multi_reduction <add>, %41, %cst_43 [0] : vector<14x448xf32> to vector<448xf32>
    %43 = vector.shape_cast %42 : vector<448xf32> to vector<1x448xf32>
    %cst_44 = arith.constant dense<0.000000e+00> : vector<1x64xf32>
    %44 = tpu.matmul %43, %31, %cst_44 {dimension_numbers = #tpu.dot_dimension_numbers<[1], [0], [0], [1], [0, 0, 1, 1], [], []>} : vector<1x448xf32>, vector<448x64xf32>, vector<1x64xf32> -> vector<1x64xf32>
    %cst_45 = arith.constant 0.0102040814 : f32
    %45 = vector.broadcast %cst_45 : f32 to vector<1x64xf32>
    %46 = arith.mulf %44, %45 : vector<1x64xf32>
    %c0_46 = arith.constant 0 : index
    %c0_47 = arith.constant 0 : index
    %47 = vector.load %arg7[%c0_46, %c0_47] : memref<1x64xf32, #tpu.memory_space<vmem>>, vector<1x64xf32>
    %cst_48 = arith.constant 9.99999974E-6 : f32
    %48 = vector.broadcast %cst_48 : f32 to vector<1x64xf32>
    %49 = arith.addf %46, %48 : vector<1x64xf32>
    %50 = math.rsqrt %49 : vector<1x64xf32>
    %51 = arith.mulf %47, %50 : vector<1x64xf32>
    %cst_49 = arith.constant dense<0.000000e+00> : vector<1x448xf32>
    %52 = tpu.matmul %51, %32, %cst_49 {dimension_numbers = #tpu.dot_dimension_numbers<[1], [0], [0], [1], [0, 0, 1, 1], [], []>} : vector<1x64xf32>, vector<64x448xf32>, vector<1x448xf32> -> vector<1x448xf32>
    %53 = vector.broadcast %52 : vector<1x448xf32> to vector<14x448xf32>
    %54 = arith.mulf %40, %53 : vector<14x448xf32>
    %c0_50 = arith.constant 0 : index
    %c0_51 = arith.constant 0 : index
    %55 = vector.load %arg8[%c0_50, %c0_51] : memref<1x64xf32, #tpu.memory_space<vmem>>, vector<1x64xf32>
    %cst_52 = arith.constant dense<0.000000e+00> : vector<1x448xf32>
    %56 = tpu.matmul %55, %32, %cst_52 {dimension_numbers = #tpu.dot_dimension_numbers<[1], [0], [0], [1], [0, 0, 1, 1], [], []>} : vector<1x64xf32>, vector<64x448xf32>, vector<1x448xf32> -> vector<1x448xf32>
    %57 = vector.broadcast %56 : vector<1x448xf32> to vector<14x448xf32>
    %58 = arith.addf %54, %57 : vector<14x448xf32>
    %cst_53 = arith.constant 0.000000e+00 : f32
    %59 = vector.broadcast %cst_53 : f32 to vector<14x448xf32>
    %60 = arith.maximumf %58, %59 : vector<14x448xf32>
    %cst_54 = arith.constant 0.000000e+00 : f32
    %61 = vector.broadcast %cst_54 : f32 to vector<18x448xf32>
    %c0_55 = arith.constant 0 : index
    %c0_56 = arith.constant 0 : index
    %62 = vector.load %arg25[%c0_55, %c0_56] : memref<18x448xf32, #tpu.memory_space<vmem>>, vector<18x448xf32>
    tpu.vector_store %arg25[%c0_55, %c0_56], %61 {strides = array<i32>} : memref<18x448xf32, #tpu.memory_space<vmem>>, vector<18x448xf32>,
    %c2_57 = arith.constant 2 : index
    %c0_58 = arith.constant 0 : index
    %63 = vector.load %arg25[%c2_57, %c0_58] : memref<18x448xf32, #tpu.memory_space<vmem>>, vector<14x448xf32>
    tpu.vector_store %arg25[%c2_57, %c0_58], %60 {strides = array<i32>} : memref<18x448xf32, #tpu.memory_space<vmem>>, vector<14x448xf32>,
    %cst_59 = arith.constant 0.000000e+00 : f32
    %64 = vector.broadcast %cst_59 : f32 to vector<14x224xf32>
    %c0_60 = arith.constant 0 : index
    %c0_61 = arith.constant 0 : index
    %65 = vector.load %arg25[%c0_60, %c0_61] : memref<18x448xf32, #tpu.memory_space<vmem>>, vector<14x448xf32>
    %66 = arith.truncf %65 : vector<14x448xf32> to vector<14x448xbf16>
    %c0_62 = arith.constant 0 : index
    %c0_63 = arith.constant 0 : index
    %c0_64 = arith.constant 0 : index
    %67 = vector.load %arg3[%c0_62, %c0_63, %c0_64] : memref<3x448x224xbf16, #tpu.memory_space<vmem>>, vector<1x448x224xbf16>
    %68 = vector.shape_cast %67 : vector<1x448x224xbf16> to vector<448x224xbf16>
    %cst_65 = arith.constant dense<0.000000e+00> : vector<14x224xf32>
    %69 = tpu.matmul %66, %68, %cst_65 {dimension_numbers = #tpu.dot_dimension_numbers<[1], [0], [0], [1], [0, 0, 1, 1], [], []>} : vector<14x448xbf16>, vector<448x224xbf16>, vector<14x224xf32> -> vector<14x224xf32>
    %70 = arith.addf %64, %69 : vector<14x224xf32>
    %c2_66 = arith.constant 2 : index
    %c0_67 = arith.constant 0 : index
    %71 = vector.load %arg25[%c2_66, %c0_67] : memref<18x448xf32, #tpu.memory_space<vmem>>, vector<14x448xf32>
    %72 = arith.truncf %71 : vector<14x448xf32> to vector<14x448xbf16>
    %c1_68 = arith.constant 1 : index
    %c0_69 = arith.constant 0 : index
    %c0_70 = arith.constant 0 : index
    %73 = vector.load %arg3[%c1_68, %c0_69, %c0_70] : memref<3x448x224xbf16, #tpu.memory_space<vmem>>, vector<1x448x224xbf16>
    %74 = vector.shape_cast %73 : vector<1x448x224xbf16> to vector<448x224xbf16>
    %cst_71 = arith.constant dense<0.000000e+00> : vector<14x224xf32>
    %75 = tpu.matmul %72, %74, %cst_71 {dimension_numbers = #tpu.dot_dimension_numbers<[1], [0], [0], [1], [0, 0, 1, 1], [], []>} : vector<14x448xbf16>, vector<448x224xbf16>, vector<14x224xf32> -> vector<14x224xf32>
    %76 = arith.addf %70, %75 : vector<14x224xf32>
    %c4_72 = arith.constant 4 : index
    %c0_73 = arith.constant 0 : index
    %77 = vector.load %arg25[%c4_72, %c0_73] : memref<18x448xf32, #tpu.memory_space<vmem>>, vector<14x448xf32>
    %78 = arith.truncf %77 : vector<14x448xf32> to vector<14x448xbf16>
    %c2_74 = arith.constant 2 : index
    %c0_75 = arith.constant 0 : index
    %c0_76 = arith.constant 0 : index
    %79 = vector.load %arg3[%c2_74, %c0_75, %c0_76] : memref<3x448x224xbf16, #tpu.memory_space<vmem>>, vector<1x448x224xbf16>
    %80 = vector.shape_cast %79 : vector<1x448x224xbf16> to vector<448x224xbf16>
    %cst_77 = arith.constant dense<0.000000e+00> : vector<14x224xf32>
    %81 = tpu.matmul %78, %80, %cst_77 {dimension_numbers = #tpu.dot_dimension_numbers<[1], [0], [0], [1], [0, 0, 1, 1], [], []>} : vector<14x448xbf16>, vector<448x224xbf16>, vector<14x224xf32> -> vector<14x224xf32>
    %82 = arith.addf %76, %81 : vector<14x224xf32>
    %c0_78 = arith.constant 0 : index
    %c0_79 = arith.constant 0 : index
    %83 = vector.load %arg13[%c0_78, %c0_79] : memref<224x32xf32, #tpu.memory_space<vmem>>, vector<224x32xf32>
    %c0_80 = arith.constant 0 : index
    %c0_81 = arith.constant 0 : index
    %84 = vector.load %arg14[%c0_80, %c0_81] : memref<32x224xf32, #tpu.memory_space<vmem>>, vector<32x224xf32>
    %cst_82 = arith.constant dense<0.000000e+00> : vector<224xf32>
    %85 = vector.multi_reduction <add>, %82, %cst_82 [0] : vector<14x224xf32> to vector<224xf32>
    %86 = vector.shape_cast %85 : vector<224xf32> to vector<1x224xf32>
    %cst_83 = arith.constant dense<0.000000e+00> : vector<1x32xf32>
    %87 = tpu.matmul %86, %83, %cst_83 {dimension_numbers = #tpu.dot_dimension_numbers<[1], [0], [0], [1], [0, 0, 1, 1], [], []>} : vector<1x224xf32>, vector<224x32xf32>, vector<1x32xf32> -> vector<1x32xf32>
    %cst_84 = arith.constant 0.0102040814 : f32
    %88 = vector.broadcast %cst_84 : f32 to vector<1x32xf32>
    %89 = arith.mulf %87, %88 : vector<1x32xf32>
    %cst_85 = arith.constant dense<0.000000e+00> : vector<1x224xf32>
    %90 = tpu.matmul %89, %84, %cst_85 {dimension_numbers = #tpu.dot_dimension_numbers<[1], [0], [0], [1], [0, 0, 1, 1], [], []>} : vector<1x32xf32>, vector<32x224xf32>, vector<1x224xf32> -> vector<1x224xf32>
    %91 = vector.broadcast %90 : vector<1x224xf32> to vector<14x224xf32>
    %92 = arith.subf %82, %91 : vector<14x224xf32>
    %93 = arith.mulf %92, %92 : vector<14x224xf32>
    %cst_86 = arith.constant dense<0.000000e+00> : vector<224xf32>
    %94 = vector.multi_reduction <add>, %93, %cst_86 [0] : vector<14x224xf32> to vector<224xf32>
    %95 = vector.shape_cast %94 : vector<224xf32> to vector<1x224xf32>
    %cst_87 = arith.constant dense<0.000000e+00> : vector<1x32xf32>
    %96 = tpu.matmul %95, %83, %cst_87 {dimension_numbers = #tpu.dot_dimension_numbers<[1], [0], [0], [1], [0, 0, 1, 1], [], []>} : vector<1x224xf32>, vector<224x32xf32>, vector<1x32xf32> -> vector<1x32xf32>
    %cst_88 = arith.constant 0.0102040814 : f32
    %97 = vector.broadcast %cst_88 : f32 to vector<1x32xf32>
    %98 = arith.mulf %96, %97 : vector<1x32xf32>
    %c0_89 = arith.constant 0 : index
    %c0_90 = arith.constant 0 : index
    %99 = vector.load %arg11[%c0_89, %c0_90] : memref<1x32xf32, #tpu.memory_space<vmem>>, vector<1x32xf32>
    %cst_91 = arith.constant 9.99999974E-6 : f32
    %100 = vector.broadcast %cst_91 : f32 to vector<1x32xf32>
    %101 = arith.addf %98, %100 : vector<1x32xf32>
    %102 = math.rsqrt %101 : vector<1x32xf32>
    %103 = arith.mulf %99, %102 : vector<1x32xf32>
    %cst_92 = arith.constant dense<0.000000e+00> : vector<1x224xf32>
    %104 = tpu.matmul %103, %84, %cst_92 {dimension_numbers = #tpu.dot_dimension_numbers<[1], [0], [0], [1], [0, 0, 1, 1], [], []>} : vector<1x32xf32>, vector<32x224xf32>, vector<1x224xf32> -> vector<1x224xf32>
    %105 = vector.broadcast %104 : vector<1x224xf32> to vector<14x224xf32>
    %106 = arith.mulf %92, %105 : vector<14x224xf32>
    %c0_93 = arith.constant 0 : index
    %c0_94 = arith.constant 0 : index
    %107 = vector.load %arg12[%c0_93, %c0_94] : memref<1x32xf32, #tpu.memory_space<vmem>>, vector<1x32xf32>
    %cst_95 = arith.constant dense<0.000000e+00> : vector<1x224xf32>
    %108 = tpu.matmul %107, %84, %cst_95 {dimension_numbers = #tpu.dot_dimension_numbers<[1], [0], [0], [1], [0, 0, 1, 1], [], []>} : vector<1x32xf32>, vector<32x224xf32>, vector<1x224xf32> -> vector<1x224xf32>
    %109 = vector.broadcast %108 : vector<1x224xf32> to vector<14x224xf32>
    %110 = arith.addf %106, %109 : vector<14x224xf32>
    %cst_96 = arith.constant 0.000000e+00 : f32
    %111 = vector.broadcast %cst_96 : f32 to vector<14x224xf32>
    %112 = arith.maximumf %110, %111 : vector<14x224xf32>
    %cst_97 = arith.constant 0.000000e+00 : f32
    %113 = vector.broadcast %cst_97 : f32 to vector<34x224xf32>
    %c0_98 = arith.constant 0 : index
    %c0_99 = arith.constant 0 : index
    %114 = vector.load %arg26[%c0_98, %c0_99] : memref<34x224xf32, #tpu.memory_space<vmem>>, vector<34x224xf32>
    tpu.vector_store %arg26[%c0_98, %c0_99], %113 {strides = array<i32>} : memref<34x224xf32, #tpu.memory_space<vmem>>, vector<34x224xf32>,
    %115 = vector.extract_strided_slice %112 {offsets = [0, 0], sizes = [2, 224], strides = [1, 1]} : vector<14x224xf32> to vector<2x224xf32>
    %c4_100 = arith.constant 4 : index
    %c0_101 = arith.constant 0 : index
    %116 = vector.load %arg26[%c4_100, %c0_101] : memref<34x224xf32, #tpu.memory_space<vmem>>, vector<2x224xf32>
    tpu.vector_store %arg26[%c4_100, %c0_101], %115 {strides = array<i32>} : memref<34x224xf32, #tpu.memory_space<vmem>>, vector<2x224xf32>,
    %117 = vector.extract_strided_slice %112 {offsets = [2, 0], sizes = [2, 224], strides = [1, 1]} : vector<14x224xf32> to vector<2x224xf32>
    %c8_102 = arith.constant 8 : index
    %c0_103 = arith.constant 0 : index
    %118 = vector.load %arg26[%c8_102, %c0_103] : memref<34x224xf32, #tpu.memory_space<vmem>>, vector<2x224xf32>
    tpu.vector_store %arg26[%c8_102, %c0_103], %117 {strides = array<i32>} : memref<34x224xf32, #tpu.memory_space<vmem>>, vector<2x224xf32>,
    %119 = vector.extract_strided_slice %112 {offsets = [4, 0], sizes = [2, 224], strides = [1, 1]} : vector<14x224xf32> to vector<2x224xf32>
    %c12_104 = arith.constant 12 : index
    %c0_105 = arith.constant 0 : index
    %120 = vector.load %arg26[%c12_104, %c0_105] : memref<34x224xf32, #tpu.memory_space<vmem>>, vector<2x224xf32>
    tpu.vector_store %arg26[%c12_104, %c0_105], %119 {strides = array<i32>} : memref<34x224xf32, #tpu.memory_space<vmem>>, vector<2x224xf32>,
    %121 = vector.extract_strided_slice %112 {offsets = [6, 0], sizes = [2, 224], strides = [1, 1]} : vector<14x224xf32> to vector<2x224xf32>
    %c16 = arith.constant 16 : index
    %c0_106 = arith.constant 0 : index
    %122 = vector.load %arg26[%c16, %c0_106] : memref<34x224xf32, #tpu.memory_space<vmem>>, vector<2x224xf32>
    tpu.vector_store %arg26[%c16, %c0_106], %121 {strides = array<i32>} : memref<34x224xf32, #tpu.memory_space<vmem>>, vector<2x224xf32>,
    %123 = vector.extract_strided_slice %112 {offsets = [8, 0], sizes = [2, 224], strides = [1, 1]} : vector<14x224xf32> to vector<2x224xf32>
    %c20 = arith.constant 20 : index
    %c0_107 = arith.constant 0 : index
    %124 = vector.load %arg26[%c20, %c0_107] : memref<34x224xf32, #tpu.memory_space<vmem>>, vector<2x224xf32>
    tpu.vector_store %arg26[%c20, %c0_107], %123 {strides = array<i32>} : memref<34x224xf32, #tpu.memory_space<vmem>>, vector<2x224xf32>,
    %125 = vector.extract_strided_slice %112 {offsets = [10, 0], sizes = [2, 224], strides = [1, 1]} : vector<14x224xf32> to vector<2x224xf32>
    %c24 = arith.constant 24 : index
    %c0_108 = arith.constant 0 : index
    %126 = vector.load %arg26[%c24, %c0_108] : memref<34x224xf32, #tpu.memory_space<vmem>>, vector<2x224xf32>
    tpu.vector_store %arg26[%c24, %c0_108], %125 {strides = array<i32>} : memref<34x224xf32, #tpu.memory_space<vmem>>, vector<2x224xf32>,
    %127 = vector.extract_strided_slice %112 {offsets = [12, 0], sizes = [2, 224], strides = [1, 1]} : vector<14x224xf32> to vector<2x224xf32>
    %c28 = arith.constant 28 : index
    %c0_109 = arith.constant 0 : index
    %128 = vector.load %arg26[%c28, %c0_109] : memref<34x224xf32, #tpu.memory_space<vmem>>, vector<2x224xf32>
    tpu.vector_store %arg26[%c28, %c0_109], %127 {strides = array<i32>} : memref<34x224xf32, #tpu.memory_space<vmem>>, vector<2x224xf32>,
    %cst_110 = arith.constant 0.000000e+00 : f32
    %129 = vector.broadcast %cst_110 : f32 to vector<28x224xf32>
    %c0_111 = arith.constant 0 : index
    %c0_112 = arith.constant 0 : index
    %130 = vector.load %arg26[%c0_111, %c0_112] : memref<34x224xf32, #tpu.memory_space<vmem>>, vector<28x224xf32>
    %131 = arith.truncf %130 : vector<28x224xf32> to vector<28x224xbf16>
    %c0_113 = arith.constant 0 : index
    %c0_114 = arith.constant 0 : index
    %c0_115 = arith.constant 0 : index
    %132 = vector.load %arg4[%c0_113, %c0_114, %c0_115] : memref<4x224x224xbf16, #tpu.memory_space<vmem>>, vector<1x224x224xbf16>
    %133 = vector.shape_cast %132 : vector<1x224x224xbf16> to vector<224x224xbf16>
    %cst_116 = arith.constant dense<0.000000e+00> : vector<28x224xf32>
    %134 = tpu.matmul %131, %133, %cst_116 {dimension_numbers = #tpu.dot_dimension_numbers<[1], [0], [0], [1], [0, 0, 1, 1], [], []>} : vector<28x224xbf16>, vector<224x224xbf16>, vector<28x224xf32> -> vector<28x224xf32>
    %135 = arith.addf %129, %134 : vector<28x224xf32>
    %c2_117 = arith.constant 2 : index
    %c0_118 = arith.constant 0 : index
    %136 = vector.load %arg26[%c2_117, %c0_118] : memref<34x224xf32, #tpu.memory_space<vmem>>, vector<28x224xf32>
    %137 = arith.truncf %136 : vector<28x224xf32> to vector<28x224xbf16>
    %c1_119 = arith.constant 1 : index
    %c0_120 = arith.constant 0 : index
    %c0_121 = arith.constant 0 : index
    %138 = vector.load %arg4[%c1_119, %c0_120, %c0_121] : memref<4x224x224xbf16, #tpu.memory_space<vmem>>, vector<1x224x224xbf16>
    %139 = vector.shape_cast %138 : vector<1x224x224xbf16> to vector<224x224xbf16>
    %cst_122 = arith.constant dense<0.000000e+00> : vector<28x224xf32>
    %140 = tpu.matmul %137, %139, %cst_122 {dimension_numbers = #tpu.dot_dimension_numbers<[1], [0], [0], [1], [0, 0, 1, 1], [], []>} : vector<28x224xbf16>, vector<224x224xbf16>, vector<28x224xf32> -> vector<28x224xf32>
    %141 = arith.addf %135, %140 : vector<28x224xf32>
    %c4_123 = arith.constant 4 : index
    %c0_124 = arith.constant 0 : index
    %142 = vector.load %arg26[%c4_123, %c0_124] : memref<34x224xf32, #tpu.memory_space<vmem>>, vector<28x224xf32>
    %143 = arith.truncf %142 : vector<28x224xf32> to vector<28x224xbf16>
    %c2_125 = arith.constant 2 : index
    %c0_126 = arith.constant 0 : index
    %c0_127 = arith.constant 0 : index
    %144 = vector.load %arg4[%c2_125, %c0_126, %c0_127] : memref<4x224x224xbf16, #tpu.memory_space<vmem>>, vector<1x224x224xbf16>
    %145 = vector.shape_cast %144 : vector<1x224x224xbf16> to vector<224x224xbf16>
    %cst_128 = arith.constant dense<0.000000e+00> : vector<28x224xf32>
    %146 = tpu.matmul %143, %145, %cst_128 {dimension_numbers = #tpu.dot_dimension_numbers<[1], [0], [0], [1], [0, 0, 1, 1], [], []>} : vector<28x224xbf16>, vector<224x224xbf16>, vector<28x224xf32> -> vector<28x224xf32>
    %147 = arith.addf %141, %146 : vector<28x224xf32>
    %c6_129 = arith.constant 6 : index
    %c0_130 = arith.constant 0 : index
    %148 = vector.load %arg26[%c6_129, %c0_130] : memref<34x224xf32, #tpu.memory_space<vmem>>, vector<28x224xf32>
    %149 = arith.truncf %148 : vector<28x224xf32> to vector<28x224xbf16>
    %c3_131 = arith.constant 3 : index
    %c0_132 = arith.constant 0 : index
    %c0_133 = arith.constant 0 : index
    %150 = vector.load %arg4[%c3_131, %c0_132, %c0_133] : memref<4x224x224xbf16, #tpu.memory_space<vmem>>, vector<1x224x224xbf16>
    %151 = vector.shape_cast %150 : vector<1x224x224xbf16> to vector<224x224xbf16>
    %cst_134 = arith.constant dense<0.000000e+00> : vector<28x224xf32>
    %152 = tpu.matmul %149, %151, %cst_134 {dimension_numbers = #tpu.dot_dimension_numbers<[1], [0], [0], [1], [0, 0, 1, 1], [], []>} : vector<28x224xbf16>, vector<224x224xbf16>, vector<28x224xf32> -> vector<28x224xf32>
    %153 = arith.addf %147, %152 : vector<28x224xf32>
    %c0_135 = arith.constant 0 : index
    %c0_136 = arith.constant 0 : index
    %154 = vector.load %arg17[%c0_135, %c0_136] : memref<224x16xf32, #tpu.memory_space<vmem>>, vector<224x16xf32>
    %c0_137 = arith.constant 0 : index
    %c0_138 = arith.constant 0 : index
    %155 = vector.load %arg18[%c0_137, %c0_138] : memref<16x224xf32, #tpu.memory_space<vmem>>, vector<16x224xf32>
    %cst_139 = arith.constant dense<0.000000e+00> : vector<224xf32>
    %156 = vector.multi_reduction <add>, %153, %cst_139 [0] : vector<28x224xf32> to vector<224xf32>
    %157 = vector.shape_cast %156 : vector<224xf32> to vector<1x224xf32>
    %cst_140 = arith.constant dense<0.000000e+00> : vector<1x16xf32>
    %158 = tpu.matmul %157, %154, %cst_140 {dimension_numbers = #tpu.dot_dimension_numbers<[1], [0], [0], [1], [0, 0, 1, 1], [], []>} : vector<1x224xf32>, vector<224x16xf32>, vector<1x16xf32> -> vector<1x16xf32>
    %cst_141 = arith.constant 0.00255102036 : f32
    %159 = vector.broadcast %cst_141 : f32 to vector<1x16xf32>
    %160 = arith.mulf %158, %159 : vector<1x16xf32>
    %cst_142 = arith.constant dense<0.000000e+00> : vector<1x224xf32>
    %161 = tpu.matmul %160, %155, %cst_142 {dimension_numbers = #tpu.dot_dimension_numbers<[1], [0], [0], [1], [0, 0, 1, 1], [], []>} : vector<1x16xf32>, vector<16x224xf32>, vector<1x224xf32> -> vector<1x224xf32>
    %162 = vector.broadcast %161 : vector<1x224xf32> to vector<28x224xf32>
    %163 = arith.subf %153, %162 : vector<28x224xf32>
    %164 = arith.mulf %163, %163 : vector<28x224xf32>
    %cst_143 = arith.constant dense<0.000000e+00> : vector<224xf32>
    %165 = vector.multi_reduction <add>, %164, %cst_143 [0] : vector<28x224xf32> to vector<224xf32>
    %166 = vector.shape_cast %165 : vector<224xf32> to vector<1x224xf32>
    %cst_144 = arith.constant dense<0.000000e+00> : vector<1x16xf32>
    %167 = tpu.matmul %166, %154, %cst_144 {dimension_numbers = #tpu.dot_dimension_numbers<[1], [0], [0], [1], [0, 0, 1, 1], [], []>} : vector<1x224xf32>, vector<224x16xf32>, vector<1x16xf32> -> vector<1x16xf32>
    %cst_145 = arith.constant 0.00255102036 : f32
    %168 = vector.broadcast %cst_145 : f32 to vector<1x16xf32>
    %169 = arith.mulf %167, %168 : vector<1x16xf32>
    %c0_146 = arith.constant 0 : index
    %c0_147 = arith.constant 0 : index
    %170 = vector.load %arg15[%c0_146, %c0_147] : memref<1x16xf32, #tpu.memory_space<vmem>>, vector<1x16xf32>
    %cst_148 = arith.constant 9.99999974E-6 : f32
    %171 = vector.broadcast %cst_148 : f32 to vector<1x16xf32>
    %172 = arith.addf %169, %171 : vector<1x16xf32>
    %173 = math.rsqrt %172 : vector<1x16xf32>
    %174 = arith.mulf %170, %173 : vector<1x16xf32>
    %cst_149 = arith.constant dense<0.000000e+00> : vector<1x224xf32>
    %175 = tpu.matmul %174, %155, %cst_149 {dimension_numbers = #tpu.dot_dimension_numbers<[1], [0], [0], [1], [0, 0, 1, 1], [], []>} : vector<1x16xf32>, vector<16x224xf32>, vector<1x224xf32> -> vector<1x224xf32>
    %176 = vector.broadcast %175 : vector<1x224xf32> to vector<28x224xf32>
    %177 = arith.mulf %163, %176 : vector<28x224xf32>
    %c0_150 = arith.constant 0 : index
    %c0_151 = arith.constant 0 : index
    %178 = vector.load %arg16[%c0_150, %c0_151] : memref<1x16xf32, #tpu.memory_space<vmem>>, vector<1x16xf32>
    %cst_152 = arith.constant dense<0.000000e+00> : vector<1x224xf32>
    %179 = tpu.matmul %178, %155, %cst_152 {dimension_numbers = #tpu.dot_dimension_numbers<[1], [0], [0], [1], [0, 0, 1, 1], [], []>} : vector<1x16xf32>, vector<16x224xf32>, vector<1x224xf32> -> vector<1x224xf32>
    %180 = vector.broadcast %179 : vector<1x224xf32> to vector<28x224xf32>
    %181 = arith.addf %177, %180 : vector<28x224xf32>
    %cst_153 = arith.constant 0.000000e+00 : f32
    %182 = vector.broadcast %cst_153 : f32 to vector<28x224xf32>
    %183 = arith.maximumf %181, %182 : vector<28x224xf32>
    %cst_154 = arith.constant 0.000000e+00 : f32
    %184 = vector.broadcast %cst_154 : f32 to vector<32x224xf32>
    %c0_155 = arith.constant 0 : index
    %c0_156 = arith.constant 0 : index
    %185 = vector.load %arg27[%c0_155, %c0_156] : memref<32x224xf32, #tpu.memory_space<vmem>>, vector<32x224xf32>
    tpu.vector_store %arg27[%c0_155, %c0_156], %184 {strides = array<i32>} : memref<32x224xf32, #tpu.memory_space<vmem>>, vector<32x224xf32>,
    %c2_157 = arith.constant 2 : index
    %c0_158 = arith.constant 0 : index
    %186 = vector.load %arg27[%c2_157, %c0_158] : memref<32x224xf32, #tpu.memory_space<vmem>>, vector<28x224xf32>
    tpu.vector_store %arg27[%c2_157, %c0_158], %183 {strides = array<i32>} : memref<32x224xf32, #tpu.memory_space<vmem>>, vector<28x224xf32>,
    %cst_159 = arith.constant 0.000000e+00 : f32
    %187 = vector.broadcast %cst_159 : f32 to vector<28x112xf32>
    %c0_160 = arith.constant 0 : index
    %c0_161 = arith.constant 0 : index
    %188 = vector.load %arg27[%c0_160, %c0_161] : memref<32x224xf32, #tpu.memory_space<vmem>>, vector<28x224xf32>
    %189 = arith.truncf %188 : vector<28x224xf32> to vector<28x224xbf16>
    %c0_162 = arith.constant 0 : index
    %c0_163 = arith.constant 0 : index
    %c0_164 = arith.constant 0 : index
    %190 = vector.load %arg5[%c0_162, %c0_163, %c0_164] : memref<3x224x112xbf16, #tpu.memory_space<vmem>>, vector<1x224x112xbf16>
    %191 = vector.shape_cast %190 : vector<1x224x112xbf16> to vector<224x112xbf16>
    %cst_165 = arith.constant dense<0.000000e+00> : vector<28x112xf32>
    %192 = tpu.matmul %189, %191, %cst_165 {dimension_numbers = #tpu.dot_dimension_numbers<[1], [0], [0], [1], [0, 0, 1, 1], [], []>} : vector<28x224xbf16>, vector<224x112xbf16>, vector<28x112xf32> -> vector<28x112xf32>
    %193 = arith.addf %187, %192 : vector<28x112xf32>
    %c2_166 = arith.constant 2 : index
    %c0_167 = arith.constant 0 : index
    %194 = vector.load %arg27[%c2_166, %c0_167] : memref<32x224xf32, #tpu.memory_space<vmem>>, vector<28x224xf32>
    %195 = arith.truncf %194 : vector<28x224xf32> to vector<28x224xbf16>
    %c1_168 = arith.constant 1 : index
    %c0_169 = arith.constant 0 : index
    %c0_170 = arith.constant 0 : index
    %196 = vector.load %arg5[%c1_168, %c0_169, %c0_170] : memref<3x224x112xbf16, #tpu.memory_space<vmem>>, vector<1x224x112xbf16>
    %197 = vector.shape_cast %196 : vector<1x224x112xbf16> to vector<224x112xbf16>
    %cst_171 = arith.constant dense<0.000000e+00> : vector<28x112xf32>
    %198 = tpu.matmul %195, %197, %cst_171 {dimension_numbers = #tpu.dot_dimension_numbers<[1], [0], [0], [1], [0, 0, 1, 1], [], []>} : vector<28x224xbf16>, vector<224x112xbf16>, vector<28x112xf32> -> vector<28x112xf32>
    %199 = arith.addf %193, %198 : vector<28x112xf32>
    %c4_172 = arith.constant 4 : index
    %c0_173 = arith.constant 0 : index
    %200 = vector.load %arg27[%c4_172, %c0_173] : memref<32x224xf32, #tpu.memory_space<vmem>>, vector<28x224xf32>
    %201 = arith.truncf %200 : vector<28x224xf32> to vector<28x224xbf16>
    %c2_174 = arith.constant 2 : index
    %c0_175 = arith.constant 0 : index
    %c0_176 = arith.constant 0 : index
    %202 = vector.load %arg5[%c2_174, %c0_175, %c0_176] : memref<3x224x112xbf16, #tpu.memory_space<vmem>>, vector<1x224x112xbf16>
    %203 = vector.shape_cast %202 : vector<1x224x112xbf16> to vector<224x112xbf16>
    %cst_177 = arith.constant dense<0.000000e+00> : vector<28x112xf32>
    %204 = tpu.matmul %201, %203, %cst_177 {dimension_numbers = #tpu.dot_dimension_numbers<[1], [0], [0], [1], [0, 0, 1, 1], [], []>} : vector<28x224xbf16>, vector<224x112xbf16>, vector<28x112xf32> -> vector<28x112xf32>
    %205 = arith.addf %199, %204 : vector<28x112xf32>
    %c0_178 = arith.constant 0 : index
    %c0_179 = arith.constant 0 : index
    %206 = vector.load %arg21[%c0_178, %c0_179] : memref<112x8xf32, #tpu.memory_space<vmem>>, vector<112x8xf32>
    %c0_180 = arith.constant 0 : index
    %c0_181 = arith.constant 0 : index
    %207 = vector.load %arg22[%c0_180, %c0_181] : memref<8x112xf32, #tpu.memory_space<vmem>>, vector<8x112xf32>
    %cst_182 = arith.constant dense<0.000000e+00> : vector<112xf32>
    %208 = vector.multi_reduction <add>, %205, %cst_182 [0] : vector<28x112xf32> to vector<112xf32>
    %209 = vector.shape_cast %208 : vector<112xf32> to vector<1x112xf32>
    %cst_183 = arith.constant dense<0.000000e+00> : vector<1x8xf32>
    %210 = tpu.matmul %209, %206, %cst_183 {dimension_numbers = #tpu.dot_dimension_numbers<[1], [0], [0], [1], [0, 0, 1, 1], [], []>} : vector<1x112xf32>, vector<112x8xf32>, vector<1x8xf32> -> vector<1x8xf32>
    %cst_184 = arith.constant 0.00255102036 : f32
    %211 = vector.broadcast %cst_184 : f32 to vector<1x8xf32>
    %212 = arith.mulf %210, %211 : vector<1x8xf32>
    %cst_185 = arith.constant dense<0.000000e+00> : vector<1x112xf32>
    %213 = tpu.matmul %212, %207, %cst_185 {dimension_numbers = #tpu.dot_dimension_numbers<[1], [0], [0], [1], [0, 0, 1, 1], [], []>} : vector<1x8xf32>, vector<8x112xf32>, vector<1x112xf32> -> vector<1x112xf32>
    %214 = vector.broadcast %213 : vector<1x112xf32> to vector<28x112xf32>
    %215 = arith.subf %205, %214 : vector<28x112xf32>
    %216 = arith.mulf %215, %215 : vector<28x112xf32>
    %cst_186 = arith.constant dense<0.000000e+00> : vector<112xf32>
    %217 = vector.multi_reduction <add>, %216, %cst_186 [0] : vector<28x112xf32> to vector<112xf32>
    %218 = vector.shape_cast %217 : vector<112xf32> to vector<1x112xf32>
    %cst_187 = arith.constant dense<0.000000e+00> : vector<1x8xf32>
    %219 = tpu.matmul %218, %206, %cst_187 {dimension_numbers = #tpu.dot_dimension_numbers<[1], [0], [0], [1], [0, 0, 1, 1], [], []>} : vector<1x112xf32>, vector<112x8xf32>, vector<1x8xf32> -> vector<1x8xf32>
    %cst_188 = arith.constant 0.00255102036 : f32
    %220 = vector.broadcast %cst_188 : f32 to vector<1x8xf32>
    %221 = arith.mulf %219, %220 : vector<1x8xf32>
    %c0_189 = arith.constant 0 : index
    %c0_190 = arith.constant 0 : index
    %222 = vector.load %arg19[%c0_189, %c0_190] : memref<1x8xf32, #tpu.memory_space<vmem>>, vector<1x8xf32>
    %cst_191 = arith.constant 9.99999974E-6 : f32
    %223 = vector.broadcast %cst_191 : f32 to vector<1x8xf32>
    %224 = arith.addf %221, %223 : vector<1x8xf32>
    %225 = math.rsqrt %224 : vector<1x8xf32>
    %226 = arith.mulf %222, %225 : vector<1x8xf32>
    %cst_192 = arith.constant dense<0.000000e+00> : vector<1x112xf32>
    %227 = tpu.matmul %226, %207, %cst_192 {dimension_numbers = #tpu.dot_dimension_numbers<[1], [0], [0], [1], [0, 0, 1, 1], [], []>} : vector<1x8xf32>, vector<8x112xf32>, vector<1x112xf32> -> vector<1x112xf32>
    %228 = vector.broadcast %227 : vector<1x112xf32> to vector<28x112xf32>
    %229 = arith.mulf %215, %228 : vector<28x112xf32>
    %c0_193 = arith.constant 0 : index
    %c0_194 = arith.constant 0 : index
    %230 = vector.load %arg20[%c0_193, %c0_194] : memref<1x8xf32, #tpu.memory_space<vmem>>, vector<1x8xf32>
    %cst_195 = arith.constant dense<0.000000e+00> : vector<1x112xf32>
    %231 = tpu.matmul %230, %207, %cst_195 {dimension_numbers = #tpu.dot_dimension_numbers<[1], [0], [0], [1], [0, 0, 1, 1], [], []>} : vector<1x8xf32>, vector<8x112xf32>, vector<1x112xf32> -> vector<1x112xf32>
    %232 = vector.broadcast %231 : vector<1x112xf32> to vector<28x112xf32>
    %233 = arith.addf %229, %232 : vector<28x112xf32>
    %cst_196 = arith.constant 0.000000e+00 : f32
    %234 = vector.broadcast %cst_196 : f32 to vector<28x112xf32>
    %235 = arith.maximumf %233, %234 : vector<28x112xf32>
    %cst_197 = arith.constant 0.000000e+00 : f32
    %236 = vector.broadcast %cst_197 : f32 to vector<62x112xf32>
    %c0_198 = arith.constant 0 : index
    %c0_199 = arith.constant 0 : index
    %237 = vector.load %arg28[%c0_198, %c0_199] : memref<62x112xf32, #tpu.memory_space<vmem>>, vector<62x112xf32>
    tpu.vector_store %arg28[%c0_198, %c0_199], %236 {strides = array<i32>} : memref<62x112xf32, #tpu.memory_space<vmem>>, vector<62x112xf32>,
    %238 = vector.extract_strided_slice %235 {offsets = [0, 0], sizes = [2, 112], strides = [1, 1]} : vector<28x112xf32> to vector<2x112xf32>
    %c4_200 = arith.constant 4 : index
    %c0_201 = arith.constant 0 : index
    %239 = vector.load %arg28[%c4_200, %c0_201] : memref<62x112xf32, #tpu.memory_space<vmem>>, vector<2x112xf32>
    tpu.vector_store %arg28[%c4_200, %c0_201], %238 {strides = array<i32>} : memref<62x112xf32, #tpu.memory_space<vmem>>, vector<2x112xf32>,
    %240 = vector.extract_strided_slice %235 {offsets = [2, 0], sizes = [2, 112], strides = [1, 1]} : vector<28x112xf32> to vector<2x112xf32>
    %c8_202 = arith.constant 8 : index
    %c0_203 = arith.constant 0 : index
    %241 = vector.load %arg28[%c8_202, %c0_203] : memref<62x112xf32, #tpu.memory_space<vmem>>, vector<2x112xf32>
    tpu.vector_store %arg28[%c8_202, %c0_203], %240 {strides = array<i32>} : memref<62x112xf32, #tpu.memory_space<vmem>>, vector<2x112xf32>,
    %242 = vector.extract_strided_slice %235 {offsets = [4, 0], sizes = [2, 112], strides = [1, 1]} : vector<28x112xf32> to vector<2x112xf32>
    %c12_204 = arith.constant 12 : index
    %c0_205 = arith.constant 0 : index
    %243 = vector.load %arg28[%c12_204, %c0_205] : memref<62x112xf32, #tpu.memory_space<vmem>>, vector<2x112xf32>
    tpu.vector_store %arg28[%c12_204, %c0_205], %242 {strides = array<i32>} : memref<62x112xf32, #tpu.memory_space<vmem>>, vector<2x112xf32>,
    %244 = vector.extract_strided_slice %235 {offsets = [6, 0], sizes = [2, 112], strides = [1, 1]} : vector<28x112xf32> to vector<2x112xf32>
    %c16_206 = arith.constant 16 : index
    %c0_207 = arith.constant 0 : index
    %245 = vector.load %arg28[%c16_206, %c0_207] : memref<62x112xf32, #tpu.memory_space<vmem>>, vector<2x112xf32>
    tpu.vector_store %arg28[%c16_206, %c0_207], %244 {strides = array<i32>} : memref<62x112xf32, #tpu.memory_space<vmem>>, vector<2x112xf32>,
    %246 = vector.extract_strided_slice %235 {offsets = [8, 0], sizes = [2, 112], strides = [1, 1]} : vector<28x112xf32> to vector<2x112xf32>
    %c20_208 = arith.constant 20 : index
    %c0_209 = arith.constant 0 : index
    %247 = vector.load %arg28[%c20_208, %c0_209] : memref<62x112xf32, #tpu.memory_space<vmem>>, vector<2x112xf32>
    tpu.vector_store %arg28[%c20_208, %c0_209], %246 {strides = array<i32>} : memref<62x112xf32, #tpu.memory_space<vmem>>, vector<2x112xf32>,
    %248 = vector.extract_strided_slice %235 {offsets = [10, 0], sizes = [2, 112], strides = [1, 1]} : vector<28x112xf32> to vector<2x112xf32>
    %c24_210 = arith.constant 24 : index
    %c0_211 = arith.constant 0 : index
    %249 = vector.load %arg28[%c24_210, %c0_211] : memref<62x112xf32, #tpu.memory_space<vmem>>, vector<2x112xf32>
    tpu.vector_store %arg28[%c24_210, %c0_211], %248 {strides = array<i32>} : memref<62x112xf32, #tpu.memory_space<vmem>>, vector<2x112xf32>,
    %250 = vector.extract_strided_slice %235 {offsets = [12, 0], sizes = [2, 112], strides = [1, 1]} : vector<28x112xf32> to vector<2x112xf32>
    %c28_212 = arith.constant 28 : index
    %c0_213 = arith.constant 0 : index
    %251 = vector.load %arg28[%c28_212, %c0_213] : memref<62x112xf32, #tpu.memory_space<vmem>>, vector<2x112xf32>
    tpu.vector_store %arg28[%c28_212, %c0_213], %250 {strides = array<i32>} : memref<62x112xf32, #tpu.memory_space<vmem>>, vector<2x112xf32>,
    %252 = vector.extract_strided_slice %235 {offsets = [14, 0], sizes = [2, 112], strides = [1, 1]} : vector<28x112xf32> to vector<2x112xf32>
    %c32 = arith.constant 32 : index
    %c0_214 = arith.constant 0 : index
    %253 = vector.load %arg28[%c32, %c0_214] : memref<62x112xf32, #tpu.memory_space<vmem>>, vector<2x112xf32>
    tpu.vector_store %arg28[%c32, %c0_214], %252 {strides = array<i32>} : memref<62x112xf32, #tpu.memory_space<vmem>>, vector<2x112xf32>,
    %254 = vector.extract_strided_slice %235 {offsets = [16, 0], sizes = [2, 112], strides = [1, 1]} : vector<28x112xf32> to vector<2x112xf32>
    %c36 = arith.constant 36 : index
    %c0_215 = arith.constant 0 : index
    %255 = vector.load %arg28[%c36, %c0_215] : memref<62x112xf32, #tpu.memory_space<vmem>>, vector<2x112xf32>
    tpu.vector_store %arg28[%c36, %c0_215], %254 {strides = array<i32>} : memref<62x112xf32, #tpu.memory_space<vmem>>, vector<2x112xf32>,
    %256 = vector.extract_strided_slice %235 {offsets = [18, 0], sizes = [2, 112], strides = [1, 1]} : vector<28x112xf32> to vector<2x112xf32>
    %c40 = arith.constant 40 : index
    %c0_216 = arith.constant 0 : index
    %257 = vector.load %arg28[%c40, %c0_216] : memref<62x112xf32, #tpu.memory_space<vmem>>, vector<2x112xf32>
    tpu.vector_store %arg28[%c40, %c0_216], %256 {strides = array<i32>} : memref<62x112xf32, #tpu.memory_space<vmem>>, vector<2x112xf32>,
    %258 = vector.extract_strided_slice %235 {offsets = [20, 0], sizes = [2, 112], strides = [1, 1]} : vector<28x112xf32> to vector<2x112xf32>
    %c44 = arith.constant 44 : index
    %c0_217 = arith.constant 0 : index
    %259 = vector.load %arg28[%c44, %c0_217] : memref<62x112xf32, #tpu.memory_space<vmem>>, vector<2x112xf32>
    tpu.vector_store %arg28[%c44, %c0_217], %258 {strides = array<i32>} : memref<62x112xf32, #tpu.memory_space<vmem>>, vector<2x112xf32>,
    %260 = vector.extract_strided_slice %235 {offsets = [22, 0], sizes = [2, 112], strides = [1, 1]} : vector<28x112xf32> to vector<2x112xf32>
    %c48 = arith.constant 48 : index
    %c0_218 = arith.constant 0 : index
    %261 = vector.load %arg28[%c48, %c0_218] : memref<62x112xf32, #tpu.memory_space<vmem>>, vector<2x112xf32>
    tpu.vector_store %arg28[%c48, %c0_218], %260 {strides = array<i32>} : memref<62x112xf32, #tpu.memory_space<vmem>>, vector<2x112xf32>,
    %262 = vector.extract_strided_slice %235 {offsets = [24, 0], sizes = [2, 112], strides = [1, 1]} : vector<28x112xf32> to vector<2x112xf32>
    %c52 = arith.constant 52 : index
    %c0_219 = arith.constant 0 : index
    %263 = vector.load %arg28[%c52, %c0_219] : memref<62x112xf32, #tpu.memory_space<vmem>>, vector<2x112xf32>
    tpu.vector_store %arg28[%c52, %c0_219], %262 {strides = array<i32>} : memref<62x112xf32, #tpu.memory_space<vmem>>, vector<2x112xf32>,
    %264 = vector.extract_strided_slice %235 {offsets = [26, 0], sizes = [2, 112], strides = [1, 1]} : vector<28x112xf32> to vector<2x112xf32>
    %c56 = arith.constant 56 : index
    %c0_220 = arith.constant 0 : index
    %265 = vector.load %arg28[%c56, %c0_220] : memref<62x112xf32, #tpu.memory_space<vmem>>, vector<2x112xf32>
    tpu.vector_store %arg28[%c56, %c0_220], %264 {strides = array<i32>} : memref<62x112xf32, #tpu.memory_space<vmem>>, vector<2x112xf32>,
    %cst_221 = arith.constant 0.000000e+00 : f32
    %266 = vector.broadcast %cst_221 : f32 to vector<56x128xf32>
    %c0_222 = arith.constant 0 : index
    %c0_223 = arith.constant 0 : index
    %267 = vector.load %arg28[%c0_222, %c0_223] : memref<62x112xf32, #tpu.memory_space<vmem>>, vector<56x112xf32>
    %268 = arith.truncf %267 : vector<56x112xf32> to vector<56x112xbf16>
    %c0_224 = arith.constant 0 : index
    %c0_225 = arith.constant 0 : index
    %c0_226 = arith.constant 0 : index
    %269 = vector.load %arg6[%c0_224, %c0_225, %c0_226] : memref<4x112x128xbf16, #tpu.memory_space<vmem>>, vector<1x112x128xbf16>
    %270 = vector.shape_cast %269 : vector<1x112x128xbf16> to vector<112x128xbf16>
    %cst_227 = arith.constant dense<0.000000e+00> : vector<56x128xf32>
    %271 = tpu.matmul %268, %270, %cst_227 {dimension_numbers = #tpu.dot_dimension_numbers<[1], [0], [0], [1], [0, 0, 1, 1], [], []>} : vector<56x112xbf16>, vector<112x128xbf16>, vector<56x128xf32> -> vector<56x128xf32>
    %272 = arith.addf %266, %271 : vector<56x128xf32>
    %c2_228 = arith.constant 2 : index
    %c0_229 = arith.constant 0 : index
    %273 = vector.load %arg28[%c2_228, %c0_229] : memref<62x112xf32, #tpu.memory_space<vmem>>, vector<56x112xf32>
    %274 = arith.truncf %273 : vector<56x112xf32> to vector<56x112xbf16>
    %c1_230 = arith.constant 1 : index
    %c0_231 = arith.constant 0 : index
    %c0_232 = arith.constant 0 : index
    %275 = vector.load %arg6[%c1_230, %c0_231, %c0_232] : memref<4x112x128xbf16, #tpu.memory_space<vmem>>, vector<1x112x128xbf16>
    %276 = vector.shape_cast %275 : vector<1x112x128xbf16> to vector<112x128xbf16>
    %cst_233 = arith.constant dense<0.000000e+00> : vector<56x128xf32>
    %277 = tpu.matmul %274, %276, %cst_233 {dimension_numbers = #tpu.dot_dimension_numbers<[1], [0], [0], [1], [0, 0, 1, 1], [], []>} : vector<56x112xbf16>, vector<112x128xbf16>, vector<56x128xf32> -> vector<56x128xf32>
    %278 = arith.addf %272, %277 : vector<56x128xf32>
    %c4_234 = arith.constant 4 : index
    %c0_235 = arith.constant 0 : index
    %279 = vector.load %arg28[%c4_234, %c0_235] : memref<62x112xf32, #tpu.memory_space<vmem>>, vector<56x112xf32>
    %280 = arith.truncf %279 : vector<56x112xf32> to vector<56x112xbf16>
    %c2_236 = arith.constant 2 : index
    %c0_237 = arith.constant 0 : index
    %c0_238 = arith.constant 0 : index
    %281 = vector.load %arg6[%c2_236, %c0_237, %c0_238] : memref<4x112x128xbf16, #tpu.memory_space<vmem>>, vector<1x112x128xbf16>
    %282 = vector.shape_cast %281 : vector<1x112x128xbf16> to vector<112x128xbf16>
    %cst_239 = arith.constant dense<0.000000e+00> : vector<56x128xf32>
    %283 = tpu.matmul %280, %282, %cst_239 {dimension_numbers = #tpu.dot_dimension_numbers<[1], [0], [0], [1], [0, 0, 1, 1], [], []>} : vector<56x112xbf16>, vector<112x128xbf16>, vector<56x128xf32> -> vector<56x128xf32>
    %284 = arith.addf %278, %283 : vector<56x128xf32>
    %c6_240 = arith.constant 6 : index
    %c0_241 = arith.constant 0 : index
    %285 = vector.load %arg28[%c6_240, %c0_241] : memref<62x112xf32, #tpu.memory_space<vmem>>, vector<56x112xf32>
    %286 = arith.truncf %285 : vector<56x112xf32> to vector<56x112xbf16>
    %c3_242 = arith.constant 3 : index
    %c0_243 = arith.constant 0 : index
    %c0_244 = arith.constant 0 : index
    %287 = vector.load %arg6[%c3_242, %c0_243, %c0_244] : memref<4x112x128xbf16, #tpu.memory_space<vmem>>, vector<1x112x128xbf16>
    %288 = vector.shape_cast %287 : vector<1x112x128xbf16> to vector<112x128xbf16>
    %cst_245 = arith.constant dense<0.000000e+00> : vector<56x128xf32>
    %289 = tpu.matmul %286, %288, %cst_245 {dimension_numbers = #tpu.dot_dimension_numbers<[1], [0], [0], [1], [0, 0, 1, 1], [], []>} : vector<56x112xbf16>, vector<112x128xbf16>, vector<56x128xf32> -> vector<56x128xf32>
    %290 = arith.addf %284, %289 : vector<56x128xf32>
    %291 = math.tanh %290 : vector<56x128xf32>
    %c0_246 = arith.constant 0 : index
    %c0_247 = arith.constant 0 : index
    %292 = vector.load %arg23[%c0_246, %c0_247] : memref<56x128xf32, #tpu.memory_space<vmem>>, vector<56x128xf32>
    tpu.vector_store %arg23[%c0_246, %c0_247], %291 {strides = array<i32>} : memref<56x128xf32, #tpu.memory_space<vmem>>, vector<56x128xf32>,
    return
  }
  func.func @transform_0(%arg0: i32) -> (i32, i32) {
    %c0_i32 = arith.constant 0 : i32
    %c0_i32_0 = arith.constant 0 : i32
    %c0_i32_1 = arith.constant 0 : i32
    return %c0_i32, %c0_i32_0 : i32, i32
  }
  func.func @transform_1(%arg0: i32) -> (i32, i32, i32) {
    %c0_i32 = arith.constant 0 : i32
    %c0_i32_0 = arith.constant 0 : i32
    %c0_i32_1 = arith.constant 0 : i32
    %c0_i32_2 = arith.constant 0 : i32
    return %c0_i32, %c0_i32_0, %c0_i32_1 : i32, i32, i32
  }
  func.func @transform_2(%arg0: i32) -> (i32, i32, i32) {
    %c0_i32 = arith.constant 0 : i32
    %c0_i32_0 = arith.constant 0 : i32
    %c0_i32_1 = arith.constant 0 : i32
    %c0_i32_2 = arith.constant 0 : i32
    return %c0_i32, %c0_i32_0, %c0_i32_1 : i32, i32, i32
  }
  func.func @transform_3(%arg0: i32) -> (i32, i32, i32) {
    %c0_i32 = arith.constant 0 : i32
    %c0_i32_0 = arith.constant 0 : i32
    %c0_i32_1 = arith.constant 0 : i32
    %c0_i32_2 = arith.constant 0 : i32
    return %c0_i32, %c0_i32_0, %c0_i32_1 : i32, i32, i32
  }
  func.func @transform_4(%arg0: i32) -> (i32, i32, i32) {
    %c0_i32 = arith.constant 0 : i32
    %c0_i32_0 = arith.constant 0 : i32
    %c0_i32_1 = arith.constant 0 : i32
    %c0_i32_2 = arith.constant 0 : i32
    return %c0_i32, %c0_i32_0, %c0_i32_1 : i32, i32, i32
  }
  func.func @transform_5(%arg0: i32) -> (i32, i32, i32) {
    %c0_i32 = arith.constant 0 : i32
    %c0_i32_0 = arith.constant 0 : i32
    %c0_i32_1 = arith.constant 0 : i32
    %c0_i32_2 = arith.constant 0 : i32
    return %c0_i32, %c0_i32_0, %c0_i32_1 : i32, i32, i32
  }
  func.func @transform_6(%arg0: i32) -> (i32, i32) {
    %c0_i32 = arith.constant 0 : i32
    %c0_i32_0 = arith.constant 0 : i32
    %c0_i32_1 = arith.constant 0 : i32
    return %c0_i32, %c0_i32_0 : i32, i32
  }
  func.func @transform_7(%arg0: i32) -> (i32, i32) {
    %c0_i32 = arith.constant 0 : i32
    %c0_i32_0 = arith.constant 0 : i32
    %c0_i32_1 = arith.constant 0 : i32
    return %c0_i32, %c0_i32_0 : i32, i32
  }
  func.func @transform_8(%arg0: i32) -> (i32, i32) {
    %c0_i32 = arith.constant 0 : i32
    %c0_i32_0 = arith.constant 0 : i32
    %c0_i32_1 = arith.constant 0 : i32
    return %c0_i32, %c0_i32_0 : i32, i32
  }
  func.func @transform_9(%arg0: i32) -> (i32, i32) {
    %c0_i32 = arith.constant 0 : i32
    %c0_i32_0 = arith.constant 0 : i32
    %c0_i32_1 = arith.constant 0 : i32
    return %c0_i32, %c0_i32_0 : i32, i32
  }
  func.func @transform_10(%arg0: i32) -> (i32, i32) {
    %c0_i32 = arith.constant 0 : i32
    %c0_i32_0 = arith.constant 0 : i32
    %c0_i32_1 = arith.constant 0 : i32
    return %c0_i32, %c0_i32_0 : i32, i32
  }
  func.func @transform_11(%arg0: i32) -> (i32, i32) {
    %c0_i32 = arith.constant 0 : i32
    %c0_i32_0 = arith.constant 0 : i32
    %c0_i32_1 = arith.constant 0 : i32
    return %c0_i32, %c0_i32_0 : i32, i32
  }
  func.func @transform_12(%arg0: i32) -> (i32, i32) {
    %c0_i32 = arith.constant 0 : i32
    %c0_i32_0 = arith.constant 0 : i32
    %c0_i32_1 = arith.constant 0 : i32
    return %c0_i32, %c0_i32_0 : i32, i32
  }
  func.func @transform_13(%arg0: i32) -> (i32, i32) {
    %c0_i32 = arith.constant 0 : i32
    %c0_i32_0 = arith.constant 0 : i32
    %c0_i32_1 = arith.constant 0 : i32
    return %c0_i32, %c0_i32_0 : i32, i32
  }
  func.func @transform_14(%arg0: i32) -> (i32, i32) {
    %c0_i32 = arith.constant 0 : i32
    %c0_i32_0 = arith.constant 0 : i32
    %c0_i32_1 = arith.constant 0 : i32
    return %c0_i32, %c0_i32_0 : i32, i32
  }
  func.func @transform_15(%arg0: i32) -> (i32, i32) {
    %c0_i32 = arith.constant 0 : i32
    %c0_i32_0 = arith.constant 0 : i32
    %c0_i32_1 = arith.constant 0 : i32
    return %c0_i32, %c0_i32_0 : i32, i32
  }
  func.func @transform_16(%arg0: i32) -> (i32, i32) {
    %c0_i32 = arith.constant 0 : i32
    %c0_i32_0 = arith.constant 0 : i32
    %c0_i32_1 = arith.constant 0 : i32
    return %c0_i32, %c0_i32_0 : i32, i32
  }
  func.func @transform_17(%arg0: i32) -> (i32, i32) {
    %c0_i32 = arith.constant 0 : i32
    %c0_i32_0 = arith.constant 0 : i32
    %c0_i32_1 = arith.constant 0 : i32
    return %c0_i32, %c0_i32_0 : i32, i32
  }
  func.func @transform_18(%arg0: i32) -> (i32, i32) {
    %c0_i32 = arith.constant 0 : i32
    %c0_i32_0 = arith.constant 0 : i32
    %c0_i32_1 = arith.constant 0 : i32
    return %c0_i32, %c0_i32_0 : i32, i32
  }
  func.func @transform_19(%arg0: i32) -> (i32, i32) {
    %c0_i32 = arith.constant 0 : i32
    %c0_i32_0 = arith.constant 0 : i32
    %c0_i32_1 = arith.constant 0 : i32
    return %c0_i32, %c0_i32_0 : i32, i32
  }
  func.func @transform_20(%arg0: i32) -> (i32, i32) {
    %c0_i32 = arith.constant 0 : i32
    %c0_i32_0 = arith.constant 0 : i32
    %c0_i32_1 = arith.constant 0 : i32
    return %c0_i32, %c0_i32_0 : i32, i32
  }
  func.func @transform_21(%arg0: i32) -> (i32, i32) {
    %c0_i32 = arith.constant 0 : i32
    %c0_i32_0 = arith.constant 0 : i32
    %c0_i32_1 = arith.constant 0 : i32
    return %c0_i32, %c0_i32_0 : i32, i32
  }
  func.func @transform_22(%arg0: i32) -> (i32, i32) {
    %c0_i32 = arith.constant 0 : i32
    %c0_i32_0 = arith.constant 0 : i32
    %c0_i32_1 = arith.constant 0 : i32
    return %c0_i32, %c0_i32_0 : i32, i32
  }
}

</mosaic_0001>

<bundles_post_ra>
// kernel: generator_forward.1
= control target key start
LH: loop header
LB: loop body
LE: loop exit
PB: predicated region body
PF: predicated region fallthrough
CT: control target
= control target key end

     0   :  { %s10866_s0 = inlined_call_operand.vmem [shape: f32[2,16], index: 0, kind: input, shape index: {}]   ;;  %s10867_s1 = inlined_call_operand.hbm [shape: bf16[7,16,448], index: 1, kind: input, shape index: {}]   ;;  %s10868_s2 = inlined_call_operand.hbm [shape: bf16[3,448,224], index: 2, kind: input, shape index: {}]   ;;  %s10869_s3 = inlined_call_operand.vmem [shape: bf16[4,224,224], index: 3, kind: input, shape index: {}]   ;;  %s10870_s4 = inlined_call_operand.hbm [shape: bf16[3,224,112], index: 4, kind: input, shape index: {}]   ;;  %s10871_s5 = inlined_call_operand.hbm [shape: bf16[4,112,128], index: 5, kind: input, shape index: {}]   ;;  %s10872_s6 = inlined_call_operand.vmem [shape: f32[1,64], index: 6, kind: input, shape index: {}]   ;;  %s10873_s7 = inlined_call_operand.vmem [shape: f32[1,64], index: 7, kind: input, shape index: {}]   ;;  %s10874_s8 = inlined_call_operand.vmem [shape: f32[448,64], index: 8, kind: input, shape index: {}]   ;;  %s10875_s9 = inlined_call_operand.hbm [shape: f32[64,448], index: 9, kind: input, shape index: {}]   ;;  %s10876_s10 = inlined_call_operand.vmem [shape: f32[1,32], index: 10, kind: input, shape index: {}]   ;;  %s10877_s11 = inlined_call_operand.vmem [shape: f32[1,32], index: 11, kind: input, shape index: {}]   ;;  %s10878_s12 = inlined_call_operand.vmem [shape: f32[224,32], index: 12, kind: input, shape index: {}]   ;;  %s10879_s13 = inlined_call_operand.vmem [shape: f32[32,224], index: 13, kind: input, shape index: {}]   ;;  %s10880_s14 = inlined_call_operand.vmem [shape: f32[1,16], index: 14, kind: input, shape index: {}]   ;;  %s10881_s15 = inlined_call_operand.vmem [shape: f32[1,16], index: 15, kind: input, shape index: {}]   ;;  %s10882_s16 = inlined_call_operand.vmem [shape: f32[224,16], index: 16, kind: input, shape index: {}]   ;;  %s10883_s17 = inlined_call_operand.vmem [shape: f32[16,224], index: 17, kind: input, shape index: {}]   ;;  %s10884_s18 = inlined_call_operand.vmem [shape: f32[1,8], index: 18, kind: input, shape index: {}]   ;;  %s10885_s19 = inlined_call_operand.vmem [shape: f32[1,8], index: 19, kind: input, shape index: {}]   ;;  %s10886_s20 = inlined_call_operand.vmem [shape: f32[112,8], index: 20, kind: input, shape index: {}]   ;;  %s10887_s21 = inlined_call_operand.vmem [shape: f32[8,112], index: 21, kind: input, shape index: {}]   ;;  %s10888_s22 = inlined_call_operand.vmem [shape: f32[56,128], index: 22, kind: output, shape index: {}]  }
   0x1   :  { %10936 = sst [smem:[#allocation50_spill]] %s10866_s0 }
   0x2   :  { %10937 = sst [smem:[#allocation51_spill]] %s10867_s1 }
   0x3   :  { %10938 = sst [smem:[#allocation52_spill]] %s10868_s2 }
   0x4   :  { %10939 = sst [smem:[#allocation53_spill]] %s10869_s3 }
   0x5   :  { %10940 = sst [smem:[#allocation54_spill]] %s10870_s4 }
   0x6   :  { %10941 = sst [smem:[#allocation55_spill]] %s10871_s5 }
   0x7   :  { %10942 = sst [smem:[#allocation56_spill]] %s10872_s6 }
   0x8   :  { %10943 = sst [smem:[#allocation57_spill]] %s10884_s18 }
   0x9   :  { %10944 = sst [smem:[#allocation58_spill]] %s10885_s19 }
   0xa   :  { %10945 = sst [smem:[#allocation59_spill]] %s10887_s21 }
   0xb   :  { %10946 = sst [smem:[#allocation60_spill]] %s10888_s22 }
   0xc   :  { %27 = vsyncpa [#allocation8], 0 }
   0xd   :  { %28 = vsyncpa [#allocation10], 0  ;;  %s10947_s29 = sld [smem:[#allocation52_spill]] }
  0x13   :  { %s49_s30 = sshll.u32 %s10947_s29, 4  ;;  %s50_s30 = int_to_ptr.hbm [resolvable:$true] %s49_s30 }
  0x14   :  { %29 = vsyncpa [#allocation13], 0  ;;  %s8274_s4 = smov [#allocation9]   ;;  %s8275_s23 = smov 128  }
  0x15   :  { %s51_s0 = sshll.u32 %s8274_s4, 4  ;;  %s8276_s1 = smov 8   ;;  %s52_s0 = int_to_ptr.vmem [resolvable:$true] %s51_s0 }
  0x16   :  { %57 = dma.hbm_to_vmem [thread:$0]  %s50_s30, 21504, %s52_s0, [#allocation10], %s8275_s23, %s8275_s23, %s8276_s1  }
  0x17   :  { %s10948_s6 = sld [smem:[#allocation55_spill]]  ;;  %s8277_s26 = smov [#allocation12]  }
  0x18   :  { %s79_s2 = sshll.u32 %s8277_s26, 4  ;;  %s10949_s18 = sld [smem:[#allocation51_spill]]  ;;  %s80_s2 = int_to_ptr.vmem [resolvable:$true] %s79_s2 }
  0x19   :  { %s8278_s28 = smov 64   ;;  %s8279_s29 = smov 4  }
  0x1a   :  { %s8280_s4 = smov [#allocation7]   ;;  %s10950_s23 = sld [smem:[#allocation54_spill]] }
  0x1b   :  { %s38_s19 = sshll.u32 %s8280_s4, 4  ;;  %s8281_s5 = smov 256   ;;  %s39_s19 = int_to_ptr.vmem [resolvable:$true] %s38_s19 }
  0x1c   :  { %s8282_s24 = smov 16   ;;  %s96_s27 = sshll.u32 %s10875_s9, 4  ;;  %s97_s27 = int_to_ptr.hbm [resolvable:$true] %s96_s27 }
  0x1d   :  { %s77_s25 = sshll.u32 %s10948_s6, 4  ;;  %s8283_s6 = smov [#allocation11]   ;;  %s78_s25 = int_to_ptr.hbm [resolvable:$true] %s77_s25 }
  0x1e   :  { %s36_s3 = sshll.u32 %s10949_s18, 4  ;;  %s66_s26 = sshll.u32 %s8283_s6, 4  ;;  %s37_s3 = int_to_ptr.hbm [resolvable:$true] %s36_s3  ;;  %s67_s26 = int_to_ptr.vmem [resolvable:$true] %s66_s26 }
  0x1f   :  { %85 = dma.hbm_to_vmem [thread:$0]  %s78_s25, 3584, %s80_s2, [#allocation13], %s8278_s28, %s8278_s28, %s8279_s29  }
  0x20   :  { %s64_s1 = sshll.u32 %s10950_s23, 4  ;;  %s8284_s25 = smov [#allocation14]   ;;  %s65_s1 = int_to_ptr.hbm [resolvable:$true] %s64_s1 }
  0x21   :  { %44 = dma.hbm_to_vmem [thread:$0]  %s37_s3, 3584, %s39_s19, [#allocation8], %s8281_s5, %s8281_s5, %s8282_s24  }
  0x22   :  { %72 = dma.hbm_to_vmem [thread:$0]  %s65_s1, 5376, %s67_s26, [#allocation10], %s8278_s28, %s8278_s28, %s8279_s29  }
  0x23   :  { %s98_s2 = sshll.u32 %s8284_s25, 4  ;;  %s8285_s4 = smov 512   ;;  %s99_s2 = int_to_ptr.vmem [resolvable:$true] %s98_s2 }
  0x24   :  { %s8286_s21 = smov 32  }
  0x25   :  { %104 = dma.hbm_to_vmem [thread:$0]  %s97_s27, 4096, %s99_s2, [#allocation13], %s8285_s4, %s8285_s4, %s8286_s21  }
  0x26   :  { %8268 = dma.done.wait [#allocation8], 3584  }
  0x27   :  { %8269 = vsyncadd [#allocation8], 4294963712 }
  0x28   :  { %8270 = dma.done.wait [#allocation10], 26880  }
  0x29   :  { %8271 = vsyncadd [#allocation10], 4294940416 }
  0x2a   :  { %8272 = dma.done.wait [#allocation13], 7680  }
  0x2b   :  { %8273 = vsyncadd [#allocation13], 4294959616  ;;  %vm176_vm0 = vcmask 130048   ;;  %v6032_v0 = vld [vmem:[#allocation7] sm:$0xf]  ;;  %s10951_s21 = sld [smem:[#allocation50_spill]] }
  0x2c   :  { %v7735_v1 = vld [vmem:[#allocation7 + $0xc] sm:$0xf0]  ;;  %v7733_v2 = vld [vmem:[#allocation7 + $0x4] sm:$0xf]  ;;  %v6034_v4 = vld [vmem:[#allocation7 + $0x10] sm:$0xf0] }
  0x2d   :  { %v6033_v3 = vor.u32 %v7735_v1, %v6032_v0  ;;  %v6040_v5 = vld [vmem:[#allocation7 + $0x8] sm:$0xf]  ;;  %v7736_v6 = vld [vmem:[#allocation7 + $0x14] sm:$0xf0]  ;;  %v6037_v7 = vor.u32 %v7733_v2, %v6034_v4  ;;  %v6052_v9 = vld [vmem:[#allocation7 + $0x20] sm:$0xf] }
  0x2e   :  { %v6041_v8 = vor.u32 %v7736_v6, %v6040_v5  ;;  %v7739_v10 = vld [vmem:[#allocation7 + $0x2c] sm:$0xf0]  ;;  %v7734_v14 = vld [vmem:[#allocation7 + $0xc] sm:$0xf]  ;;  %v6042_v15 = vld [vmem:[#allocation7 + $0x18] sm:$0xf0] }
  0x2f   :  { %187 = vmatpush.bf16.msra.mxu3 %v6033_v3  ;;  %v6053_v12 = vor.u32 %v7739_v10, %v6052_v9  ;;  %v7737_v16 = vld [vmem:[#allocation7 + $0x24] sm:$0xf]  ;;  %200 = vmatpush.bf16.msra.mxu1 %v6037_v7  ;;  %v6045_v17 = vor.u32 %v7734_v14, %v6042_v15  ;;  %v6054_v18 = vld [vmem:[#allocation7 + $0x30] sm:$0xf0]  ;;  %v6060_v19 = vld [vmem:[#allocation7 + $0x28] sm:$0xf] }
  0x30   :  { %213 = vmatpush.bf16.msra.mxu2 %v6041_v8  ;;  %v7740_v20 = vld [vmem:[#allocation7 + $0x34] sm:$0xf0]  ;;  %v6057_v21 = vor.u32 %v7737_v16, %v6054_v18  ;;  %v6072_v23 = vld [vmem:[#allocation7 + $0x40] sm:$0xf]  ;;  %v7743_v24 = vld [vmem:[#allocation7 + $0x4c] sm:$0xf0] }
  0x31   :  { %v150_v11 = vld [vmem:[%s10951_s21] sm:$0x3]  ;;  %269 = vmatpush.bf16.msra.mxu0 %v6053_v12  ;;  %v6061_v22 = vor.u32 %v7740_v20, %v6060_v19  ;;  %v7738_v25 = vld [vmem:[#allocation7 + $0x2c] sm:$0xf]  ;;  %v6073_v26 = vor.u32 %v7743_v24, %v6072_v23  ;;  %v6062_v27 = vld [vmem:[#allocation7 + $0x38] sm:$0xf0] }
  0x32   :  { %v8421_v13 = vpack.c.bf16 %v150_v11, %v150_v11  ;;  %v7741_v28 = vld [vmem:[#allocation7 + $0x44] sm:$0xf]  ;;  %v6074_v29 = vld [vmem:[#allocation7 + $0x50] sm:$0xf0]  ;;  %v6065_v30 = vor.u32 %v7738_v25, %v6062_v27  ;;  %v6080_v32 = vld [vmem:[#allocation7 + $0x48] sm:$0xf] }
  0x33   :  { %v6077_v31 = vor.u32 %v7741_v28, %v6074_v29  ;;  %v7744_v33 = vld [vmem:[#allocation7 + $0x54] sm:$0xf0]  ;;  %v6092_v34 = vld [vmem:[#allocation7 + $0x60] sm:$0xf]  ;;  %226 = vmatpush.bf16.msrb.mxu3 %v6045_v17  ;;  %v7747_v36 = vld [vmem:[#allocation7 + $0x6c] sm:$0xf0]  ;;  %282 = vmatpush.bf16.msrb.mxu1 %v6057_v21 }
  0x34   :  { %6046 = vmatmul.msk.bf16.vlgmr.msra.gmra.mxu3 %vm176_vm0, %v8421_v13  ;;  %6047 = vmatmul.msk.bf16.vlgmr.msra.gmra.mxu1 %vm176_vm0, %v8421_v13  ;;  %v6081_v35 = vor.u32 %v7744_v33, %v6080_v32  ;;  %v6093_v37 = vor.u32 %v7747_v36, %v6092_v34  ;;  %v7742_v38 = vld [vmem:[#allocation7 + $0x4c] sm:$0xf]  ;;  %v6082_v39 = vld [vmem:[#allocation7 + $0x58] sm:$0xf0]  ;;  %v7745_v40 = vld [vmem:[#allocation7 + $0x64] sm:$0xf] }
  0x35   :  { %6048 = vmatmul.msk.bf16.vlgmr.msra.gmra.mxu2 %vm176_vm0, %v8421_v13  ;;  %6066 = vmatmul.msk.bf16.vlgmr.msra.gmra.mxu0 %vm176_vm0, %v8421_v13  ;;  %v6094_v41 = vld [vmem:[#allocation7 + $0x70] sm:$0xf0]  ;;  %v6100_v42 = vld [vmem:[#allocation7 + $0x68] sm:$0xf]  ;;  %v7748_v43 = vld [vmem:[#allocation7 + $0x74] sm:$0xf0]  ;;  %v6085_v46 = vor.u32 %v7742_v38, %v6082_v39 }
  0x36   :  { %295 = vmatpush.bf16.msrb.mxu2 %v6061_v22  ;;  %363 = vmatpush.bf16.msrb.mxu0 %v6073_v26  ;;  %v6112_v44 = vld [vmem:[#allocation7 + $0x80] sm:$0xf]  ;;  %v7751_v45 = vld [vmem:[#allocation7 + $0x8c] sm:$0xf0]  ;;  %v6097_v47 = vor.u32 %v7745_v40, %v6094_v41  ;;  %v6101_v48 = vor.u32 %v7748_v43, %v6100_v42  ;;  %v7746_v50 = vld [vmem:[#allocation7 + $0x6c] sm:$0xf] }
  0x37   :  { %308 = vmatpush.bf16.msra.mxu3 %v6065_v30  ;;  %376 = vmatpush.bf16.msra.mxu1 %v6077_v31  ;;  %v6113_v49 = vor.u32 %v7751_v45, %v6112_v44  ;;  %v6102_v51 = vld [vmem:[#allocation7 + $0x78] sm:$0xf0]  ;;  %v7749_v52 = vld [vmem:[#allocation7 + $0x84] sm:$0xf]  ;;  %v6114_v53 = vld [vmem:[#allocation7 + $0x90] sm:$0xf0] }
  0x38   :  { %v6120_v54 = vld [vmem:[#allocation7 + $0x88] sm:$0xf]  ;;  %v7752_v55 = vld [vmem:[#allocation7 + $0x94] sm:$0xf0]  ;;  %v6132_v56 = vld [vmem:[#allocation7 + $0xa0] sm:$0xf]  ;;  %v6105_v58 = vor.u32 %v7746_v50, %v6102_v51  ;;  %v6117_v59 = vor.u32 %v7749_v52, %v6114_v53 }
  0x39   :  { %v7755_v57 = vld [vmem:[#allocation7 + $0xac] sm:$0xf0]  ;;  %v6121_v60 = vor.u32 %v7752_v55, %v6120_v54  ;;  %v7750_v62 = vld [vmem:[#allocation7 + $0x8c] sm:$0xf]  ;;  %v6122_v63 = vld [vmem:[#allocation7 + $0x98] sm:$0xf0] }
  0x3a   :  { %389 = vmatpush.bf16.msra.mxu2 %v6081_v35  ;;  %457 = vmatpush.bf16.msra.mxu0 %v6093_v37  ;;  %v6133_v61 = vor.u32 %v7755_v57, %v6132_v56  ;;  %v7753_v0 = vld [vmem:[#allocation7 + $0xa4] sm:$0xf]  ;;  %v6134_v1 = vld [vmem:[#allocation7 + $0xb0] sm:$0xf0]  ;;  %v6140_v2 = vld [vmem:[#allocation7 + $0xa8] sm:$0xf]  ;;  %v6125_v6 = vor.u32 %v7750_v62, %v6122_v63 }
  0x3b   :  { %v7756_v3 = vld [vmem:[#allocation7 + $0xb4] sm:$0xf0]  ;;  %v6152_v4 = vld [vmem:[#allocation7 + $0xc0] sm:$0xf]  ;;  %v7759_v5 = vld [vmem:[#allocation7 + $0xcc] sm:$0xf0]  ;;  %v6137_v7 = vor.u32 %v7753_v0, %v6134_v1 }
  0x3c   :  { %v6141_v8 = vor.u32 %v7756_v3, %v6140_v2  ;;  %v6153_v9 = vor.u32 %v7759_v5, %v6152_v4  ;;  %v7754_v10 = vld [vmem:[#allocation7 + $0xac] sm:$0xf]  ;;  %v6142_v11 = vld [vmem:[#allocation7 + $0xb8] sm:$0xf0]  ;;  %v7757_v12 = vld [vmem:[#allocation7 + $0xc4] sm:$0xf] }
  0x3d   :  { %v6154_v14 = vld [vmem:[#allocation7 + $0xd0] sm:$0xf0]  ;;  %v6160_v15 = vld [vmem:[#allocation7 + $0xc8] sm:$0xf]  ;;  %v7760_v16 = vld [vmem:[#allocation7 + $0xd4] sm:$0xf0]  ;;  %v6145_v17 = vor.u32 %v7754_v10, %v6142_v11 }
  0x3e   :  { %v6157_v18 = vor.u32 %v7757_v12, %v6154_v14  ;;  %v6161_v19 = vor.u32 %v7760_v16, %v6160_v15  ;;  %v7758_v20 = vld [vmem:[#allocation7 + $0xcc] sm:$0xf]  ;;  %v6162_v21 = vld [vmem:[#allocation7 + $0xd8] sm:$0xf0]  ;;  %vm235_vm1 = vcmask 517120   ;;  %v8287_v23 = vmov 0.0  }
  0x3f   :  { %v6165_v22 = vor.u32 %v7758_v20, %v6162_v21  ;;  %1445 = vst.msk [vmem:[#allocation3 + $0x58] sm:$0x3] %vm235_vm1, %v8287_v23  ;;  %vm329_vm2 = vcmask 519170   ;;  %v8499_v53 = vld [vmem:[%s10874_s8 + $0x78] sm:$0xff]  ;;  %v8504_v54 = vld [vmem:[%s10874_s8 + $0x70] sm:$0xff]  ;;  %v8511_v57 = vld [vmem:[%s10874_s8 + $0x68] sm:$0xff] }
  0x40   :  { %1434 = vst [vmem:[#allocation3] sm:$0xff] %v8287_v23  ;;  %v8523_v62 = vld [vmem:[%s10874_s8 + $0x58] sm:$0xff]  ;;  %vm907_vm3 = vcmask 523264   ;;  %v8529_v63 = vld [vmem:[%s10874_s8 + $0x50] sm:$0xff]  ;;  %vm423_vm4 = vcmask 521220   ;;  %v8539_v4 = vld [vmem:[%s10874_s8 + $0x48] sm:$0xff] }
  0x41   :  { %1435 = vst [vmem:[#allocation3 + $0x8] sm:$0xff] %v8287_v23  ;;  %v8563_v10 = vld [vmem:[%s10874_s8 + $0xf0] sm:$0xff]  ;;  %v8576_v15 = vld [vmem:[%s10874_s8 + $0x28] sm:$0xff]  ;;  %v8593_v20 = vld [vmem:[%s10874_s8 + $0xe0] sm:$0xff]  ;;  %vm517_vm5 = vcmask 523270   ;;  %vm882_vm6 = vcmask 1045504  }
  0x42   :  { %1436 = vst [vmem:[#allocation3 + $0x10] sm:$0xff] %v8287_v23  ;;  %v8568_v11 = vld [vmem:[%s10874_s8 + $0x30] sm:$0xff]  ;;  %v8581_v16 = vld [vmem:[%s10874_s8 + $0xe8] sm:$0xff]  ;;  %v8598_v21 = vld [vmem:[%s10874_s8 + $0x178] sm:$0xff]  ;;  %vm909_vm7 = vcmask 521216   ;;  %s11016_s27 = sld [smem:[#allocation56_spill]] }
  0x43   :  { %1442 = vst [vmem:[#allocation3 + $0x40] sm:$0x3] %v8287_v23  ;;  %vm1454_vm11 = vcmask 1041408   ;;  %vm1478_vm12 = vcmask 523266   ;;  %vm2966_vm13 = vcmask 785408   ;;  %vm2968_vm14 = vcmask 783360  }
  0x44   :  { %6049 = vmatmul.msk.bf16.vlgmr.msrb.gmra.mxu3 %vm176_vm0, %v8421_v13  ;;  %6067 = vmatmul.msk.bf16.vlgmr.msrb.gmra.mxu1 %vm176_vm0, %v8421_v13  ;;  %1443 = vst [vmem:[#allocation3 + $0x48] sm:$0x3] %v8287_v23  ;;  %vm3021_vm15 = vcmask 261120   ;;  %s11017_s28 = sld [smem:[#allocation53_spill]] }
  0x45   :  { %6068 = vmatmul.msk.bf16.vlgmr.msrb.gmra.mxu2 %vm176_vm0, %v8421_v13  ;;  %6086 = vmatmul.msk.bf16.vlgmr.msrb.gmra.mxu0 %vm176_vm0, %v8421_v13  ;;  %1444 = vst [vmem:[#allocation3 + $0x50] sm:$0x3] %v8287_v23  ;;  %s11018_s23 = sld [smem:[#allocation59_spill]] }
  0x46   :  { %402 = vmatpush.bf16.msrb.mxu3 %v6085_v46  ;;  %470 = vmatpush.bf16.msrb.mxu1 %v6097_v47  ;;  %3252 = vst [vmem:[#allocation4] sm:$0xff] %v8287_v23  ;;  %s11019_s18 = sld [smem:[#allocation58_spill]] }
  0x47   :  { %483 = vmatpush.bf16.msrb.mxu2 %v6101_v48  ;;  %551 = vmatpush.bf16.msrb.mxu0 %v6113_v49  ;;  %3254 = vst [vmem:[#allocation4 + $0x10] sm:$0xff] %v8287_v23  ;;  %s11020_s2 = sld [smem:[#allocation57_spill]] }
  0x48   :  { %3256 = vst [vmem:[#allocation4 + $0x20] sm:$0xff] %v8287_v23  ;;  %s11021_s4 = sld [smem:[#allocation60_spill]] }
  0x49   :  { %3258 = vst [vmem:[#allocation4 + $0x30] sm:$0xff] %v8287_v23 }
  0x4a   :  { %3260 = vst [vmem:[#allocation4 + $0x40] sm:$0x3] %v8287_v23 }
  0x4b   :  { %4766 = vst [vmem:[#allocation5] sm:$0xff] %v8287_v23 }
  0x4c   :  { %4772 = vst [vmem:[#allocation5 + $0x30] sm:$0xff] %v8287_v23 }
  0x4d   :  { %1437 = vst.msk [vmem:[#allocation3 + $0x18] sm:$0xff] %vm907_vm3, %v8287_v23 }
  0x4e   :  { %1441 = vst.msk [vmem:[#allocation3 + $0x38] sm:$0xff] %vm907_vm3, %v8287_v23  ;;  %v8606_v23 = vld [vmem:[%s10874_s8 + $0x18] sm:$0xff] }
  0x4f   :  { %10952 = vst [vmem:[#allocation18_spill] sm:$0xff] %v8606_v23 }
  0x54   :  { %6069 = vmatmul.msk.bf16.vlgmr.msra.gmra.mxu3 %vm176_vm0, %v8421_v13  ;;  %6087 = vmatmul.msk.bf16.vlgmr.msra.gmra.mxu1 %vm176_vm0, %v8421_v13 }
  0x55   :  { %6088 = vmatmul.msk.bf16.vlgmr.msra.gmra.mxu2 %vm176_vm0, %v8421_v13  ;;  %6106 = vmatmul.msk.bf16.vlgmr.msra.gmra.mxu0 %vm176_vm0, %v8421_v13 }
  0x56   :  { %496 = vmatpush.bf16.msra.mxu3 %v6105_v58  ;;  %564 = vmatpush.bf16.msra.mxu1 %v6117_v59 }
  0x57   :  { %577 = vmatpush.bf16.msra.mxu2 %v6121_v60  ;;  %632 = vmatpush.bf16.msra.mxu0 %v6133_v61  ;;  %v8517_v61 = vld [vmem:[%s10874_s8 + $0x60] sm:$0xff] }
  0x64   :  { %6089 = vmatmul.msk.bf16.vlgmr.msrb.gmra.mxu3 %vm176_vm0, %v8421_v13  ;;  %6107 = vmatmul.msk.bf16.vlgmr.msrb.gmra.mxu1 %vm176_vm0, %v8421_v13 }
  0x65   :  { %6108 = vmatmul.msk.bf16.vlgmr.msrb.gmra.mxu2 %vm176_vm0, %v8421_v13  ;;  %6126 = vmatmul.msk.bf16.vlgmr.msrb.gmra.mxu0 %vm176_vm0, %v8421_v13 }
  0x66   :  { %590 = vmatpush.bf16.msrb.mxu3 %v6125_v6  ;;  %645 = vmatpush.bf16.msrb.mxu1 %v6137_v7  ;;  %v8546_v7 = vld [vmem:[%s10874_s8 + $0x40] sm:$0xff] }
  0x67   :  { %658 = vmatpush.bf16.msrb.mxu2 %v6141_v8  ;;  %725 = vmatpush.bf16.msrb.mxu0 %v6153_v9  ;;  %v8551_v8 = vld [vmem:[%s10874_s8 + $0x38] sm:$0xff] }
  0x68   :  { %v8556_v9 = vld [vmem:[%s10874_s8 + $0xf8] sm:$0xff] }
  0x74   :  { %6109 = vmatmul.msk.bf16.vlgmr.msra.gmra.mxu3 %vm176_vm0, %v8421_v13  ;;  %6127 = vmatmul.msk.bf16.vlgmr.msra.gmra.mxu1 %vm176_vm0, %v8421_v13 }
  0x75   :  { %6128 = vmatmul.msk.bf16.vlgmr.msra.gmra.mxu2 %vm176_vm0, %v8421_v13  ;;  %6146 = vmatmul.msk.bf16.vlgmr.msra.gmra.mxu0 %vm176_vm0, %v8421_v13 }
  0x76   :  { %671 = vmatpush.bf16.msra.mxu3 %v6145_v17  ;;  %738 = vmatpush.bf16.msra.mxu1 %v6157_v18 }
  0x77   :  { %751 = vmatpush.bf16.msra.mxu2 %v6161_v19  ;;  %921 = vmatpush.msra.mxu0 %v8499_v53  ;;  %v8588_v19 = vld [vmem:[%s10874_s8 + $0x20] sm:$0xff] }
  0x79   :  { %922 = vmatpush.msra.mxu0 %v8504_v54 }
  0x7b   :  { %923 = vmatpush.msra.mxu0 %v8511_v57 }
  0x7d   :  { %924 = vmatpush.msra.mxu0 %v8517_v61 }
  0x7f   :  { %925 = vmatpush.msra.mxu0 %v8523_v62 }
  0x81   :  { %926 = vmatpush.msra.mxu0 %v8529_v63 }
  0x83   :  { %927 = vmatpush.msra.mxu0 %v8539_v4 }
  0x84   :  { %6129 = vmatmul.msk.bf16.vlgmr.msrb.gmra.mxu3 %vm176_vm0, %v8421_v13  ;;  %6147 = vmatmul.msk.bf16.vlgmr.msrb.gmra.mxu1 %vm176_vm0, %v8421_v13 }
  0x85   :  { %6148 = vmatmul.msk.bf16.vlgmr.msrb.gmra.mxu2 %vm176_vm0, %v8421_v13  ;;  %6166 = vmatmul.msk.bf16.vlgmr.msrb.gmra.mxu0 %vm176_vm0, %v8421_v13 }
  0x86   :  { %764 = vmatpush.bf16.msrb.mxu3 %v6165_v22  ;;  %928 = vmatpush.msra.mxu0 %v8546_v7 }
  0x87   :  { %941 = vmatpush.msrb.mxu1 %v8556_v9  ;;  %961 = vmatpush.msrb.mxu2 %v8598_v21 }
  0x88   :  { %929 = vmatpush.msra.mxu0 %v8551_v8 }
  0x89   :  { %942 = vmatpush.msrb.mxu1 %v8563_v10 }
  0x8a   :  { %930 = vmatpush.msra.mxu0 %v8568_v11 }
  0x8b   :  { %943 = vmatpush.msrb.mxu1 %v8581_v16 }
  0x8c   :  { %931 = vmatpush.msra.mxu0 %v8576_v15 }
  0x8d   :  { %944 = vmatpush.msrb.mxu1 %v8593_v20 }
  0x8e   :  { %932 = vmatpush.msra.mxu0 %v8588_v19 }
  0x90   :  { %933 = vmatpush.msra.mxu0 %v8606_v23 }
  0x94   :  { %6149 = vmatmul.msk.bf16.vlgmr.msra.gmra.mxu3 %vm176_vm0, %v8421_v13  ;;  %6167 = vmatmul.msk.bf16.vlgmr.msra.gmra.mxu1 %vm176_vm0, %v8421_v13 }
  0x95   :  { %6168 = vmatmul.msk.bf16.vlgmr.msra.gmra.mxu2 %vm176_vm0, %v8421_v13 }
  0xa4   :  { %6169 = vmatmul.msk.bf16.vlgmr.msrb.gmra.mxu3 %vm176_vm0, %v8421_v13 }
  0xb1   :  { %v202_v13 = vpop.f32.mrf.mxu1 }
  0xb2   :  { %233 = vst [vmem:[#allocation2 + $0x8] sm:$0x3] %v202_v13  ;;  %v271_v24 = vpop.f32.mrf.mxu0  ;;  %v8611_v13 = vld [vmem:[%s10874_s8 + $0xd8] sm:$0xff] }
  0xb3   :  { %v318_v25 = vrot.slane %v271_v24, 6  ;;  %v8616_v24 = vld [vmem:[%s10874_s8 + $0x170] sm:$0xff]  ;;  %945 = vmatpush.msrb.mxu1 %v8611_v13 }
  0xb4   :  { %962 = vmatpush.msrb.mxu2 %v8616_v24 }
  0xb5   :  { %326 = vst [vmem:[#allocation2] sm:$0xc] %v318_v25  ;;  %v8623_v25 = vld [vmem:[%s10874_s8 + $0x10] sm:$0xff] }
  0xb6   :  { %10953 = vst [vmem:[#allocation19_spill] sm:$0xff] %v8623_v25  ;;  %934 = vmatpush.msra.mxu0 %v8623_v25 }
  0xb7   :  { %v189_v26 = vpop.f32.mrf.mxu3 }
  0xb8   :  { %232 = vst [vmem:[#allocation2] sm:$0x3] %v189_v26  ;;  %v215_v27 = vpop.f32.mrf.mxu2  ;;  %v8628_v26 = vld [vmem:[%s10874_s8 + $0xd0] sm:$0xff] }
  0xb9   :  { %234 = vst [vmem:[#allocation2 + $0x10] sm:$0x3] %v215_v27  ;;  %v204_v28 = vpop.f32.mrf.mxu1  ;;  %v8633_v27 = vld [vmem:[%s10874_s8 + $0x168] sm:$0xff]  ;;  %946 = vmatpush.msrb.mxu1 %v8628_v26 }
  0xba   :  { %v273_v29 = vpop.f32.mrf.mxu0  ;;  %963 = vmatpush.msrb.mxu2 %v8633_v27 }
  0xbf   :  { %v191_v30 = vpop.f32.mrf.mxu3 }
  0xc0   :  { %v217_v31 = vpop.f32.mrf.mxu2 }
  0xc1   :  { %v284_v32 = vpop.f32.mrf.mxu1  ;;  %v8642_v31 = vld [vmem:[%s10874_s8 + $0x8] sm:$0xff] }
  0xc2   :  { %v319_v33 = vrot.slane %v284_v32, 6  ;;  %v365_v34 = vpop.f32.mrf.mxu0  ;;  %10954 = vst [vmem:[#allocation20_spill] sm:$0xff] %v8642_v31  ;;  %v8647_v32 = vld [vmem:[%s10874_s8 + $0xc8] sm:$0xff]  ;;  %935 = vmatpush.msra.mxu0 %v8642_v31 }
  0xc3   :  { %v412_v35 = vrot.slane %v365_v34, 4  ;;  %947 = vmatpush.msrb.mxu1 %v8647_v32 }
  0xc4   :  { %327 = vst [vmem:[#allocation2 + $0x8] sm:$0xc] %v319_v33  ;;  %v8652_v33 = vld [vmem:[%s10874_s8 + $0x160] sm:$0xff] }
  0xc5   :  { %420 = vst [vmem:[#allocation2] sm:$0x30] %v412_v35  ;;  %964 = vmatpush.msrb.mxu2 %v8652_v33 }
  0xc7   :  { %v228_v36 = vpop.f32.mrf.mxu3 }
  0xc8   :  { %236 = vst.msk [vmem:[#allocation2 + $0x18] sm:$0x3] %vm235_vm1, %v228_v36  ;;  %v297_v37 = vpop.f32.mrf.mxu2  ;;  %v8660_v36 = vld [vmem:[%s10874_s8] sm:$0xff] }
  0xc9   :  { %v320_v38 = vrot.slane %v297_v37, 6  ;;  %v286_v39 = vpop.f32.mrf.mxu1  ;;  %10955 = vst [vmem:[#allocation21_spill] sm:$0xff] %v8660_v36  ;;  %v8665_v37 = vld [vmem:[%s10874_s8 + $0xc0] sm:$0xff]  ;;  %936 = vmatpush.msra.mxu0 %v8660_v36 }
  0xca   :  { %v367_v40 = vpop.f32.mrf.mxu0  ;;  %948 = vmatpush.msrb.mxu1 %v8665_v37  ;;  %v8678_v39 = vld [vmem:[%s10874_s8 + $0xb8] sm:$0xff] }
  0xcb   :  { %328 = vst [vmem:[#allocation2 + $0x10] sm:$0xc] %v320_v38  ;;  %v8670_v38 = vld [vmem:[%s10874_s8 + $0x158] sm:$0xff]  ;;  %v8683_v40 = vld [vmem:[%s10874_s8 + $0x150] sm:$0xff] }
  0xcc   :  { %965 = vmatpush.msrb.mxu2 %v8670_v38  ;;  %949 = vmatpush.msrb.mxu1 %v8678_v39 }
  0xce   :  { %966 = vmatpush.msrb.mxu2 %v8683_v40 }
  0xcf   :  { %v230_v41 = vpop.f32.mrf.mxu3 }
  0xd0   :  { %v299_v42 = vpop.f32.mrf.mxu2  ;;  %v8688_v41 = vld [vmem:[%s10874_s8 + $0xb0] sm:$0xff] }
  0xd1   :  { %v378_v43 = vpop.f32.mrf.mxu1  ;;  %v8694_v42 = vld [vmem:[%s10874_s8 + $0x148] sm:$0xff]  ;;  %950 = vmatpush.msrb.mxu1 %v8688_v41 }
  0xd2   :  { %v413_v44 = vrot.slane %v378_v43, 4  ;;  %v459_v45 = vpop.f32.mrf.mxu0  ;;  %967 = vmatpush.msrb.mxu2 %v8694_v42 }
  0xd3   :  { %v506_v46 = vrot.slane %v459_v45, 2 }
  0xd4   :  { %421 = vst [vmem:[#allocation2 + $0x8] sm:$0x30] %v413_v44  ;;  %v8700_v44 = vld [vmem:[%s10874_s8 + $0xa8] sm:$0xff] }
  0xd5   :  { %514 = vst [vmem:[#allocation2] sm:$0xc0] %v506_v46  ;;  %v8706_v46 = vld [vmem:[%s10874_s8 + $0x140] sm:$0xff]  ;;  %951 = vmatpush.msrb.mxu1 %v8700_v44 }
  0xd6   :  { %968 = vmatpush.msrb.mxu2 %v8706_v46 }
  0xd7   :  { %v310_v47 = vpop.f32.mrf.mxu3 }
  0xd8   :  { %v321_v48 = vrot.slane %v310_v47, 6  ;;  %v391_v49 = vpop.f32.mrf.mxu2  ;;  %v8712_v47 = vld [vmem:[%s10874_s8 + $0xa0] sm:$0xff] }
  0xd9   :  { %v414_v50 = vrot.slane %v391_v49, 4  ;;  %v380_v51 = vpop.f32.mrf.mxu1  ;;  %v8718_v49 = vld [vmem:[%s10874_s8 + $0x138] sm:$0xff]  ;;  %952 = vmatpush.msrb.mxu1 %v8712_v47 }
  0xda   :  { %330 = vst.msk [vmem:[#allocation2 + $0x18] sm:$0xc] %vm329_vm2, %v321_v48  ;;  %v461_v52 = vpop.f32.mrf.mxu0  ;;  %969 = vmatpush.msrb.mxu2 %v8718_v49 }
  0xdb   :  { %422 = vst [vmem:[#allocation2 + $0x10] sm:$0x30] %v414_v50  ;;  %v8724_v52 = vld [vmem:[%s10874_s8 + $0x98] sm:$0xff] }
  0xdc   :  { %953 = vmatpush.msrb.mxu1 %v8724_v52 }
  0xdf   :  { %v312_v55 = vpop.f32.mrf.mxu3 }
  0xe0   :  { %v393_v56 = vpop.f32.mrf.mxu2 }
  0xe1   :  { %v472_v58 = vpop.f32.mrf.mxu1  ;;  %v8730_v56 = vld [vmem:[%s10874_s8 + $0x130] sm:$0xff] }
  0xe2   :  { %v507_v59 = vrot.slane %v472_v58, 2  ;;  %v553_v60 = vpop.f32.mrf.mxu0  ;;  %v8736_v58 = vld [vmem:[%s10874_s8 + $0x90] sm:$0xff]  ;;  %970 = vmatpush.msrb.mxu2 %v8730_v56 }
  0xe3   :  { %596 = vst [vmem:[#allocation2 + $0x20] sm:$0x3] %v553_v60  ;;  %954 = vmatpush.msrb.mxu1 %v8736_v58 }
  0xe4   :  { %515 = vst [vmem:[#allocation2 + $0x8] sm:$0xc0] %v507_v59  ;;  %v8742_v59 = vld [vmem:[%s10874_s8 + $0x128] sm:$0xff] }
  0xe5   :  { %10956 = vst [vmem:[#allocation22_spill] sm:$0xff] %v8736_v58  ;;  %971 = vmatpush.msrb.mxu2 %v8742_v59 }
  0xe7   :  { %v404_v0 = vpop.f32.mrf.mxu3 }
  0xe8   :  { %v415_v1 = vrot.slane %v404_v0, 4  ;;  %v485_v2 = vpop.f32.mrf.mxu2 }
  0xe9   :  { %v508_v3 = vrot.slane %v485_v2, 2  ;;  %v474_v5 = vpop.f32.mrf.mxu1  ;;  %v8751_v2 = vld [vmem:[%s10874_s8 + $0x88] sm:$0xff] }
  0xea   :  { %424 = vst.msk [vmem:[#allocation2 + $0x18] sm:$0x30] %vm423_vm4, %v415_v1  ;;  %v555_v6 = vpop.f32.mrf.mxu0  ;;  %955 = vmatpush.msrb.mxu1 %v8751_v2 }
  0xeb   :  { %516 = vst [vmem:[#allocation2 + $0x10] sm:$0xc0] %v508_v3  ;;  %v8756_v3 = vld [vmem:[%s10874_s8 + $0x120] sm:$0xff] }
  0xec   :  { %10957 = vst [vmem:[#allocation23_spill] sm:$0xff] %v8751_v2  ;;  %v8762_v6 = vld [vmem:[%s10874_s8 + $0x80] sm:$0xff]  ;;  %972 = vmatpush.msrb.mxu2 %v8756_v3 }
  0xed   :  { %10958 = vst [vmem:[#allocation24_spill] sm:$0xff] %v8762_v6  ;;  %956 = vmatpush.msrb.mxu1 %v8762_v6 }
  0xef   :  { %v406_v12 = vpop.f32.mrf.mxu3 }
  0xf0   :  { %v487_v14 = vpop.f32.mrf.mxu2  ;;  %v8767_v12 = vld [vmem:[%s10874_s8 + $0x118] sm:$0xff] }
  0xf1   :  { %v566_v17 = vpop.f32.mrf.mxu1  ;;  %10959 = vst [vmem:[#allocation25_spill] sm:$0xff] %v8767_v12  ;;  %973 = vmatpush.msrb.mxu2 %v8767_v12 }
  0xf2   :  { %597 = vst [vmem:[#allocation2 + $0x28] sm:$0x3] %v566_v17  ;;  %v634_v18 = vpop.f32.mrf.mxu0  ;;  %v8774_v17 = vld [vmem:[%s10874_s8 + $0x110] sm:$0xff] }
  0xf3   :  { %v681_v22 = vrot.slane %v634_v18, 6  ;;  %10960 = vst [vmem:[#allocation26_spill] sm:$0xff] %v8774_v17  ;;  %974 = vmatpush.msrb.mxu2 %v8774_v17 }
  0xf5   :  { %689 = vst [vmem:[#allocation2 + $0x20] sm:$0xc] %v681_v22  ;;  %v8779_v22 = vld [vmem:[#allocation2] sm:$0xff] }
  0xf6   :  { %10962 = vst [vmem:[#allocation28_spill] sm:$0xff] %v8779_v22 }
  0xf7   :  { %v498_v28 = vpop.f32.mrf.mxu3 }
  0xf8   :  { %v509_v29 = vrot.slane %v498_v28, 2  ;;  %v579_v30 = vpop.f32.mrf.mxu2 }
  0xf9   :  { %598 = vst [vmem:[#allocation2 + $0x30] sm:$0x3] %v579_v30  ;;  %v568_v34 = vpop.f32.mrf.mxu1 }
  0xfa   :  { %518 = vst.msk [vmem:[#allocation2 + $0x18] sm:$0xc0] %vm517_vm5, %v509_v29  ;;  %v636_v35 = vpop.f32.mrf.mxu0  ;;  %v8786_v29 = vld [vmem:[%s10874_s8 + $0x108] sm:$0xff]  ;;  %vm3270_vm5 = vcmask 783364  }
  0xfb   :  { %10963 = vst [vmem:[#allocation29_spill] sm:$0xff] %v8786_v29  ;;  %975 = vmatpush.msrb.mxu2 %v8786_v29 }
  0xff   :  { %v500_v43 = vpop.f32.mrf.mxu3 }
 0x100   :  { %v581_v45 = vpop.f32.mrf.mxu2  ;;  %v8793_v43 = vld [vmem:[%s10874_s8 + $0x100] sm:$0xff] }
 0x101   :  { %v647_v48 = vpop.f32.mrf.mxu1  ;;  %10964 = vst [vmem:[#allocation30_spill] sm:$0xff] %v8793_v43  ;;  %976 = vmatpush.msrb.mxu2 %v8793_v43  ;;  %v8861_v23 = vld [vmem:[#allocation2 + $0x18] sm:$0xff] }
 0x102   :  { %v682_v50 = vrot.slane %v647_v48, 6  ;;  %v727_v51 = vpop.f32.mrf.mxu0  ;;  %10969 = vst [vmem:[#allocation35_spill] sm:$0xff] %v8861_v23 }
 0x103   :  { %v774_v55 = vrot.slane %v727_v51, 4  ;;  %v8804_v51 = vld [vmem:[%s10874_s8 + $0x1b0] sm:$0xff] }
 0x104   :  { %690 = vst [vmem:[#allocation2 + $0x28] sm:$0xc] %v682_v50  ;;  %v8799_v50 = vld [vmem:[%s10874_s8 + $0x1b8] sm:$0xff] }
 0x105   :  { %782 = vst [vmem:[#allocation2 + $0x20] sm:$0x30] %v774_v55  ;;  %989 = vmatpush.msra.mxu3 %v8799_v50 }
 0x107   :  { %v592_v60 = vpop.f32.mrf.mxu3  ;;  %990 = vmatpush.msra.mxu3 %v8804_v51 }
 0x108   :  { %599 = vst.msk [vmem:[#allocation2 + $0x38] sm:$0x3] %vm235_vm1, %v592_v60  ;;  %v660_v0 = vpop.f32.mrf.mxu2 }
 0x109   :  { %v683_v1 = vrot.slane %v660_v0, 6  ;;  %v649_v5 = vpop.f32.mrf.mxu1  ;;  %v8811_v0 = vld [vmem:[%s10874_s8 + $0x1a8] sm:$0xff] }
 0x10a   :  { %v729_v14 = vpop.f32.mrf.mxu0  ;;  %v8817_v5 = vld [vmem:[%s10874_s8 + $0x1a0] sm:$0xff]  ;;  %991 = vmatpush.msra.mxu3 %v8811_v0 }
 0x10b   :  { %691 = vst [vmem:[#allocation2 + $0x30] sm:$0xc] %v683_v1 }
 0x10c   :  { %v8776_v18 = vld [vmem:[#allocation2 + $0x20] sm:$0x3f]  ;;  %992 = vmatpush.msra.mxu3 %v8817_v5 }
 0x10d   :  { %10961 = vst [vmem:[#allocation27_spill] sm:$0xff] %v8776_v18  ;;  %v883_v28 = vsel %vm882_vm6, %v8776_v18, 0.0  ;;  %v8840_v18 = vld [vmem:[#allocation2 + $0x8] sm:$0xff] }
 0x10e   :  { %v884_v34 = vadd.f32 %v883_v28, %v8779_v22  ;;  %10966 = vst [vmem:[#allocation32_spill] sm:$0xff] %v8840_v18 }
 0x10f   :  { %v594_v30 = vpop.f32.mrf.mxu3 }
 0x110   :  { %v662_v35 = vpop.f32.mrf.mxu2  ;;  %v885_v45 = vrot.slane %v884_v34, 4 }
 0x111   :  { %v740_v48 = vpop.f32.mrf.mxu1  ;;  %v8823_v35 = vld [vmem:[%s10874_s8 + $0x198] sm:$0xff] }
 0x112   :  { %v775_v55 = vrot.slane %v740_v48, 4  ;;  %v886_v60 = vadd.f32 %v885_v45, %v884_v34  ;;  %993 = vmatpush.msra.mxu3 %v8823_v35 }
 0x114   :  { %783 = vst [vmem:[#allocation2 + $0x28] sm:$0x30] %v775_v55  ;;  %v887_v1 = vrot.slane %v886_v60, 2 }
 0x116   :  { %v888_v28 = vadd.f32 %v887_v1, %v886_v60  ;;  %v8830_v60 = vld [vmem:[%s10874_s8 + $0x190] sm:$0xff] }
 0x117   :  { %v673_v14 = vpop.f32.mrf.mxu3  ;;  %994 = vmatpush.msra.mxu3 %v8830_v60 }
 0x118   :  { %v684_v30 = vrot.slane %v673_v14, 6  ;;  %v753_v34 = vpop.f32.mrf.mxu2  ;;  %v889_v48 = vrot.slane %v888_v28, 1 }
 0x119   :  { %v776_v45 = vrot.slane %v753_v34, 4  ;;  %v742_v55 = vpop.f32.mrf.mxu1  ;;  %v8838_v34 = vld [vmem:[%s10874_s8 + $0x188] sm:$0xff] }
 0x11a   :  { %692 = vst.msk [vmem:[#allocation2 + $0x38] sm:$0xc] %vm329_vm2, %v684_v30  ;;  %v890_v1 = vadd.f32 %v889_v48, %v888_v28  ;;  %v8849_v28 = vld [vmem:[%s10874_s8 + $0x180] sm:$0xff]  ;;  %995 = vmatpush.msra.mxu3 %v8838_v34 }
 0x11b   :  { %784 = vst [vmem:[#allocation2 + $0x30] sm:$0x30] %v776_v45  ;;  %v8833_v14 = vld [vmem:[#allocation2 + $0x28] sm:$0x3f] }
 0x11c   :  { %10965 = vst [vmem:[#allocation31_spill] sm:$0xff] %v8833_v14  ;;  %937 = vmatmul.f32.vlgmr.msra.gmra.mxu0 %v890_v1  ;;  %v891_v30 = vsel %vm882_vm6, %v8833_v14, 0.0  ;;  %996 = vmatpush.msra.mxu3 %v8849_v28  ;;  %v8855_v14 = vld [vmem:[#allocation2 + $0x10] sm:$0xff] }
 0x11d   :  { %v892_v45 = vadd.f32 %v891_v30, %v8840_v18  ;;  %10968 = vst [vmem:[#allocation34_spill] sm:$0xff] %v8855_v14 }
 0x11f   :  { %v675_v48 = vpop.f32.mrf.mxu3  ;;  %v893_v22 = vrot.slane %v892_v45, 4 }
 0x120   :  { %v755_v55 = vpop.f32.mrf.mxu2 }
 0x121   :  { %v894_v1 = vadd.f32 %v893_v22, %v892_v45 }
 0x122   :  { %v8853_v36 = vld [vmem:[#allocation2 + $0x30] sm:$0x3f] }
 0x123   :  { %10967 = vst [vmem:[#allocation33_spill] sm:$0xff] %v8853_v36  ;;  %v899_v30 = vsel %vm882_vm6, %v8853_v36, 0.0  ;;  %v895_v18 = vrot.slane %v894_v1, 2 }
 0x124   :  { %v900_v31 = vadd.f32 %v899_v30, %v8855_v14  ;;  %v8870_v30 = vld [vmem:[#allocation14 + $0xe0] sm:$0xff]  ;;  %v8920_v14 = vld [vmem:[#allocation14 + $0x70] sm:$0xff] }
 0x125   :  { %v896_v43 = vadd.f32 %v895_v18, %v894_v1  ;;  %v908_v18 = vsel %vm907_vm3, %v8861_v23, 0.0  ;;  %1013 = vmatpush.msrb.mxu3 %v8870_v30  ;;  %v8916_v23 = vld [vmem:[#allocation14 + $0x68] sm:$0xff]  ;;  %10978 = vst [vmem:[#allocation44_spill] sm:$0xff] %v8920_v14 }
 0x126   :  { %v901_v6 = vrot.slane %v900_v31, 4  ;;  %10977 = vst [vmem:[#allocation43_spill] sm:$0xff] %v8916_v23 }
 0x127   :  { %v766_v48 = vpop.f32.mrf.mxu3  ;;  %v897_v2 = vrot.slane %v896_v43, 1 }
 0x128   :  { %v777_v29 = vrot.slane %v766_v48, 4  ;;  %v902_v55 = vadd.f32 %v901_v6, %v900_v31  ;;  %v8878_v48 = vld [vmem:[#allocation14 + $0xf8] sm:$0xff] }
 0x129   :  { %v898_v25 = vadd.f32 %v897_v2, %v896_v43  ;;  %1073 = vmatpush.msra.mxu2 %v8878_v48 }
 0x12a   :  { %785 = vst.msk [vmem:[#allocation2 + $0x38] sm:$0x30] %vm423_vm4, %v777_v29  ;;  %v903_v22 = vrot.slane %v902_v55, 2  ;;  %vm3261_vm4 = vcmask 779264  }
 0x12b   :  { %957 = vmatmul.f32.vlgmr.msrb.gmra.mxu1 %v898_v25 }
 0x12c   :  { %v904_v45 = vadd.f32 %v903_v22, %v902_v55  ;;  %v8880_v55 = vld [vmem:[#allocation14 + $0xc0] sm:$0xff]  ;;  %v8882_v22 = vld [vmem:[#allocation14 + $0xc8] sm:$0xff] }
 0x12d   :  { %10971 = vst [vmem:[#allocation37_spill] sm:$0xff] %v8882_v22  ;;  %1014 = vmatpush.msrb.mxu3 %v8880_v55 }
 0x12e   :  { %v905_v17 = vrot.slane %v904_v45, 1 }
 0x12f   :  { %v768_v58 = vpop.f32.mrf.mxu3 }
 0x130   :  { %v906_v36 = vadd.f32 %v905_v17, %v904_v45  ;;  %v8872_v17 = vld [vmem:[#allocation14 + $0xe8] sm:$0xff]  ;;  %v8886_v45 = vld [vmem:[#allocation14 + $0xd0] sm:$0xff] }
 0x131   :  { %v8863_v12 = vld [vmem:[#allocation2 + $0x38] sm:$0x3f]  ;;  %1033 = vmatpush.msrb.mxu0 %v8872_v17 }
 0x132   :  { %10970 = vst [vmem:[#allocation36_spill] sm:$0xff] %v8863_v12  ;;  %977 = vmatmul.f32.vlgmr.msrb.gmra.mxu2 %v906_v36  ;;  %v910_v31 = vsel %vm909_vm7, %v8863_v12, 0.0  ;;  %v8874_v36 = vld [vmem:[#allocation14 + $0xf0] sm:$0xff]  ;;  %v8914_v12 = vld [vmem:[#allocation14 + $0x60] sm:$0xff] }
 0x133   :  { %v911_v6 = vadd.f32 %v910_v31, %v908_v18  ;;  %1053 = vmatpush.msra.mxu1 %v8874_v36  ;;  %v8888_v18 = vld [vmem:[#allocation14 + $0xd8] sm:$0xff]  ;;  %v8890_v31 = vld [vmem:[#allocation14 + $0xa0] sm:$0xff]  ;;  %1034 = vmatpush.msrb.mxu0 %v8882_v22  ;;  %10976 = vst [vmem:[#allocation42_spill] sm:$0xff] %v8914_v12 }
 0x134   :  { %1074 = vmatpush.msra.mxu2 %v8888_v18  ;;  %1015 = vmatpush.msrb.mxu3 %v8890_v31  ;;  %v8922_v22 = vld [vmem:[#allocation14 + $0x78] sm:$0xff] }
 0x135   :  { %v912_v2 = vrot.slane %v911_v6, 4  ;;  %1054 = vmatpush.msra.mxu1 %v8886_v45  ;;  %10979 = vst [vmem:[#allocation45_spill] sm:$0xff] %v8922_v22 }
 0x137   :  { %v913_v29 = vadd.f32 %v912_v2, %v911_v6  ;;  %v8894_v6 = vld [vmem:[#allocation14 + $0xa8] sm:$0xff]  ;;  %v8896_v2 = vld [vmem:[#allocation14 + $0xb0] sm:$0xff] }
 0x138   :  { %10972 = vst [vmem:[#allocation38_spill] sm:$0xff] %v8894_v6  ;;  %1035 = vmatpush.msrb.mxu0 %v8894_v6  ;;  %1055 = vmatpush.msra.mxu1 %v8896_v2  ;;  %v8930_v6 = vld [vmem:[#allocation14 + $0x40] sm:$0xff] }
 0x139   :  { %v914_v25 = vrot.slane %v913_v29, 2  ;;  %10980 = vst [vmem:[#allocation46_spill] sm:$0xff] %v8930_v6 }
 0x13b   :  { %v915_v43 = vadd.f32 %v914_v25, %v913_v29  ;;  %v8898_v29 = vld [vmem:[#allocation14 + $0xb8] sm:$0xff]  ;;  %v8902_v25 = vld [vmem:[#allocation14 + $0x80] sm:$0xff] }
 0x13c   :  { %10973 = vst [vmem:[#allocation39_spill] sm:$0xff] %v8902_v25  ;;  %1075 = vmatpush.msra.mxu2 %v8898_v29  ;;  %1016 = vmatpush.msrb.mxu3 %v8902_v25  ;;  %v8932_v25 = vld [vmem:[#allocation14 + $0x48] sm:$0xff] }
 0x13d   :  { %v916_v1 = vrot.slane %v915_v43, 1  ;;  %10981 = vst [vmem:[#allocation47_spill] sm:$0xff] %v8932_v25 }
 0x13e   :  { %1017 = vmatpush.msrb.mxu3 %v8914_v12  ;;  %v8950_v12 = vld [vmem:[#allocation14 + $0x38] sm:$0xff] }
 0x13f   :  { %v917_v58 = vadd.f32 %v916_v1, %v915_v43  ;;  %v8904_v43 = vld [vmem:[#allocation14 + $0x88] sm:$0xff]  ;;  %v8908_v1 = vld [vmem:[#allocation14 + $0x90] sm:$0xff] }
 0x140   :  { %10974 = vst [vmem:[#allocation40_spill] sm:$0xff] %v8904_v43  ;;  %1036 = vmatpush.msrb.mxu0 %v8904_v43  ;;  %1056 = vmatpush.msra.mxu1 %v8908_v1  ;;  %v8934_v43 = vld [vmem:[#allocation14 + $0x50] sm:$0xff] }
 0x141   :  { %6170 = vmatmul.msk.f32.vlgmr.msra.gmra.mxu3 %vm907_vm3, %v917_v58  ;;  %10975 = vst [vmem:[#allocation41_spill] sm:$0xff] %v8908_v1  ;;  %v8910_v58 = vld [vmem:[#allocation14 + $0x98] sm:$0xff] }
 0x142   :  { %1076 = vmatpush.msra.mxu2 %v8910_v58  ;;  %1037 = vmatpush.msrb.mxu0 %v8916_v23  ;;  %10982 = vst [vmem:[#allocation48_spill] sm:$0xff] %v8934_v43  ;;  %v8938_v1 = vld [vmem:[#allocation14 + $0x58] sm:$0xff]  ;;  %v8942_v23 = vld [vmem:[#allocation14 + $0x20] sm:$0xff] }
 0x143   :  { %1057 = vmatpush.msra.mxu1 %v8920_v14  ;;  %1018 = vmatpush.msrb.mxu3 %v8930_v6  ;;  %10983 = vst [vmem:[#allocation49_spill] sm:$0xff] %v8938_v1  ;;  %v8944_v14 = vld [vmem:[#allocation14 + $0x28] sm:$0xff]  ;;  %v8952_v6 = vld [vmem:[#allocation14] sm:$0xff] }
 0x144   :  { %1077 = vmatpush.msra.mxu2 %v8922_v22  ;;  %1038 = vmatpush.msrb.mxu0 %v8932_v25  ;;  %v8946_v22 = vld [vmem:[#allocation14 + $0x30] sm:$0xff]  ;;  %v8954_v25 = vld [vmem:[#allocation14 + $0x8] sm:$0xff] }
 0x145   :  { %1058 = vmatpush.msra.mxu1 %v8934_v43  ;;  %1019 = vmatpush.msrb.mxu3 %v8942_v23  ;;  %v8960_v43 = vld [vmem:[#allocation14 + $0x18] sm:$0xff] }
 0x146   :  { %1078 = vmatpush.msra.mxu2 %v8938_v1  ;;  %1039 = vmatpush.msrb.mxu0 %v8944_v14  ;;  %v8958_v1 = vld [vmem:[#allocation14 + $0x10] sm:$0xff] }
 0x147   :  { %1059 = vmatpush.msra.mxu1 %v8946_v22  ;;  %1020 = vmatpush.msrb.mxu3 %v8952_v6 }
 0x148   :  { %1079 = vmatpush.msra.mxu2 %v8950_v12  ;;  %1040 = vmatpush.msrb.mxu0 %v8954_v25 }
 0x149   :  { %1060 = vmatpush.msra.mxu1 %v8958_v1  ;;  %1141 = vmatpush.msra.mxu3 %v8499_v53 }
 0x14a   :  { %1080 = vmatpush.msra.mxu2 %v8960_v43  ;;  %1161 = vmatpush.msra.mxu0 %v8556_v9  ;;  %v10986_v9 = vld [vmem:[#allocation22_spill] sm:$0xff] }
 0x14b   :  { %1181 = vmatpush.msrb.mxu1 %v8598_v21  ;;  %1142 = vmatpush.msra.mxu3 %v8504_v54  ;;  %v10992_v21 = vld [vmem:[#allocation30_spill] sm:$0xff] }
 0x14c   :  { %1209 = vmatpush.msrb.mxu2 %v8799_v50  ;;  %1162 = vmatpush.msra.mxu0 %v8563_v10  ;;  %v10987_v10 = vld [vmem:[#allocation26_spill] sm:$0xff] }
 0x14d   :  { %1182 = vmatpush.msrb.mxu1 %v8616_v24  ;;  %1143 = vmatpush.msra.mxu3 %v8511_v57  ;;  %v10994_v24 = vld [vmem:[#allocation21_spill] sm:$0xff] }
 0x14e   :  { %1210 = vmatpush.msrb.mxu2 %v8804_v51  ;;  %1163 = vmatpush.msra.mxu0 %v8581_v16  ;;  %v10989_v16 = vld [vmem:[#allocation23_spill] sm:$0xff] }
 0x14f   :  { %1183 = vmatpush.msrb.mxu1 %v8633_v27  ;;  %1144 = vmatpush.msra.mxu3 %v8517_v61  ;;  %v10996_v27 = vld [vmem:[#allocation39_spill] sm:$0xff] }
 0x150   :  { %1211 = vmatpush.msrb.mxu2 %v8811_v0  ;;  %1164 = vmatpush.msra.mxu0 %v8593_v20  ;;  %v10990_v20 = vld [vmem:[#allocation29_spill] sm:$0xff]  ;;  %v11009_v51 = vld [vmem:[#allocation31_spill] sm:$0xff] }
 0x151   :  { %1184 = vmatpush.msrb.mxu1 %v8652_v33  ;;  %1145 = vmatpush.msra.mxu3 %v8523_v62  ;;  %v10998_v33 = vld [vmem:[#allocation41_spill] sm:$0xff] }
 0x152   :  { %1212 = vmatpush.msrb.mxu2 %v8817_v5  ;;  %1165 = vmatpush.msra.mxu0 %v8611_v13  ;;  %v10993_v13 = vld [vmem:[#allocation20_spill] sm:$0xff]  ;;  %v11010_v5 = vld [vmem:[#allocation34_spill] sm:$0xff] }
 0x153   :  { %1185 = vmatpush.msrb.mxu1 %v8670_v38  ;;  %1146 = vmatpush.msra.mxu3 %v8529_v63  ;;  %v11000_v38 = vld [vmem:[#allocation40_spill] sm:$0xff] }
 0x154   :  { %1213 = vmatpush.msrb.mxu2 %v8823_v35  ;;  %1166 = vmatpush.msra.mxu0 %v8628_v26  ;;  %v10995_v26 = vld [vmem:[#allocation37_spill] sm:$0xff] }
 0x155   :  { %1186 = vmatpush.msrb.mxu1 %v8683_v40  ;;  %1147 = vmatpush.msra.mxu3 %v8539_v4  ;;  %v10984_v4 = vld [vmem:[#allocation25_spill] sm:$0xff] }
 0x156   :  { %1214 = vmatpush.msrb.mxu2 %v8830_v60  ;;  %1167 = vmatpush.msra.mxu0 %v8647_v32  ;;  %v10997_v32 = vld [vmem:[#allocation38_spill] sm:$0xff]  ;;  %v11002_v40 = vld [vmem:[#allocation45_spill] sm:$0xff] }
 0x157   :  { %1187 = vmatpush.msrb.mxu1 %v8694_v42  ;;  %1148 = vmatpush.msra.mxu3 %v8546_v7  ;;  %v11004_v42 = vld [vmem:[#allocation43_spill] sm:$0xff]  ;;  %v11011_v60 = vld [vmem:[#allocation33_spill] sm:$0xff] }
 0x158   :  { %1215 = vmatpush.msrb.mxu2 %v8838_v34  ;;  %1168 = vmatpush.msra.mxu0 %v8665_v37  ;;  %v10999_v37 = vld [vmem:[#allocation42_spill] sm:$0xff] }
 0x159   :  { %1188 = vmatpush.msrb.mxu1 %v8706_v46  ;;  %1149 = vmatpush.msra.mxu3 %v8551_v8  ;;  %v10985_v8 = vld [vmem:[#allocation18_spill] sm:$0xff]  ;;  %v11006_v46 = vld [vmem:[#allocation49_spill] sm:$0xff] }
 0x15a   :  { %1216 = vmatpush.msrb.mxu2 %v8849_v28  ;;  %1169 = vmatpush.msra.mxu0 %v8678_v39  ;;  %v11001_v39 = vld [vmem:[#allocation44_spill] sm:$0xff] }
 0x15b   :  { %1189 = vmatpush.msrb.mxu1 %v8718_v49  ;;  %1150 = vmatpush.msra.mxu3 %v8568_v11 }
 0x15c   :  { %1170 = vmatpush.msra.mxu0 %v8688_v41  ;;  %v11003_v41 = vld [vmem:[#allocation46_spill] sm:$0xff] }
 0x15d   :  { %1190 = vmatpush.msrb.mxu1 %v8730_v56  ;;  %1151 = vmatpush.msra.mxu3 %v8576_v15  ;;  %v10988_v15 = vld [vmem:[#allocation19_spill] sm:$0xff] }
 0x15e   :  { %1171 = vmatpush.msra.mxu0 %v8700_v44  ;;  %v11005_v44 = vld [vmem:[#allocation48_spill] sm:$0xff] }
 0x15f   :  { %1191 = vmatpush.msrb.mxu1 %v8742_v59  ;;  %1152 = vmatpush.msra.mxu3 %v8588_v19  ;;  %v10991_v19 = vld [vmem:[#allocation24_spill] sm:$0xff] }
 0x160   :  { %1172 = vmatpush.msra.mxu0 %v8712_v47  ;;  %v11007_v47 = vld [vmem:[#allocation47_spill] sm:$0xff] }
 0x161   :  { %1192 = vmatpush.msrb.mxu1 %v8756_v3  ;;  %1153 = vmatpush.msra.mxu3 %v10985_v8  ;;  %v11008_v3 = vld [vmem:[#allocation32_spill] sm:$0xff] }
 0x162   :  { %1173 = vmatpush.msra.mxu0 %v8724_v52 }
 0x163   :  { %1193 = vmatpush.msrb.mxu1 %v10984_v4  ;;  %1154 = vmatpush.msra.mxu3 %v10988_v15 }
 0x164   :  { %1174 = vmatpush.msra.mxu0 %v10986_v9 }
 0x165   :  { %1194 = vmatpush.msrb.mxu1 %v10987_v10  ;;  %1155 = vmatpush.msra.mxu3 %v10993_v13 }
 0x166   :  { %1175 = vmatpush.msra.mxu0 %v10989_v16  ;;  %v11013_v16 = vld [vmem:[#allocation27_spill] sm:$0xff] }
 0x167   :  { %1195 = vmatpush.msrb.mxu1 %v10990_v20  ;;  %1156 = vmatpush.msra.mxu3 %v10994_v24  ;;  %v11015_v24 = vld [vmem:[#allocation36_spill] sm:$0xff] }
 0x168   :  { %1176 = vmatpush.msra.mxu0 %v10991_v19 }
 0x169   :  { %1196 = vmatpush.msrb.mxu1 %v10992_v21  ;;  %v11014_v21 = vld [vmem:[#allocation35_spill] sm:$0xff] }
 0x199   :  { %v938_v54 = vpop.f32.mrf.mxu0 }
 0x1a8   :  { %v958_v53 = vpop.f32.mrf.mxu1 }
 0x1a9   :  { %v959_v61 = vadd.f32 %v958_v53, %v938_v54 }
 0x1b5   :  { %v978_v57 = vpop.f32.mrf.mxu2 }
 0x1b6   :  { %v979_v62 = vadd.f32 %v978_v57, %v959_v61 }
 0x1c4   :  { %v998_v63 = vpop.f32.mrf.mxu3 }
 0x1c5   :  { %v999_v7 = vadd.f32 %v998_v63, %v979_v62 }
 0x1c7   :  { %v1001_v11 = vmul.f32 0.010204081, %v999_v7 }
 0x1c9   :  { %6171 = vmatmul.msk.f32.vlgmr.msrb.gmra.mxu3 %vm907_vm3, %v1001_v11  ;;  %6172 = vmatmul.msk.f32.vlgmr.msrb.gmra.mxu0 %vm907_vm3, %v1001_v11 }
 0x1ca   :  { %6173 = vmatmul.msk.f32.vlgmr.msra.gmra.mxu1 %vm907_vm3, %v1001_v11  ;;  %6174 = vmatmul.msk.f32.vlgmr.msra.gmra.mxu2 %vm907_vm3, %v1001_v11  ;;  %v11012_v11 = vld [vmem:[#allocation28_spill] sm:$0xff] }
 0x1cb   :  { %1246 = vmatpush.msra.mxu2 %v8870_v30  ;;  %1286 = vmatpush.msrb.mxu0 %v8874_v36 }
 0x1cc   :  { %1306 = vmatpush.msra.mxu1 %v8878_v48  ;;  %1266 = vmatpush.msrb.mxu3 %v8872_v17 }
 0x1cd   :  { %1247 = vmatpush.msra.mxu2 %v8880_v55  ;;  %1287 = vmatpush.msrb.mxu0 %v8886_v45 }
 0x1ce   :  { %1307 = vmatpush.msra.mxu1 %v8888_v18  ;;  %1267 = vmatpush.msrb.mxu3 %v10995_v26 }
 0x1cf   :  { %1248 = vmatpush.msra.mxu2 %v8890_v31  ;;  %1288 = vmatpush.msrb.mxu0 %v8896_v2 }
 0x1d0   :  { %1308 = vmatpush.msra.mxu1 %v8898_v29  ;;  %1268 = vmatpush.msrb.mxu3 %v10997_v32 }
 0x1d1   :  { %1249 = vmatpush.msra.mxu2 %v10996_v27  ;;  %1289 = vmatpush.msrb.mxu0 %v10998_v33 }
 0x1d2   :  { %1309 = vmatpush.msra.mxu1 %v8910_v58  ;;  %1269 = vmatpush.msrb.mxu3 %v11000_v38 }
 0x1d3   :  { %1250 = vmatpush.msra.mxu2 %v10999_v37  ;;  %1290 = vmatpush.msrb.mxu0 %v11001_v39 }
 0x1d4   :  { %1310 = vmatpush.msra.mxu1 %v11002_v40  ;;  %1270 = vmatpush.msrb.mxu3 %v11004_v42 }
 0x1d5   :  { %1251 = vmatpush.msra.mxu2 %v11003_v41  ;;  %1291 = vmatpush.msrb.mxu0 %v11005_v44 }
 0x1d6   :  { %1311 = vmatpush.msra.mxu1 %v11006_v46  ;;  %1271 = vmatpush.msrb.mxu3 %v11007_v47 }
 0x1d7   :  { %1252 = vmatpush.msra.mxu2 %v8942_v23  ;;  %1292 = vmatpush.msrb.mxu0 %v8946_v22 }
 0x1d8   :  { %1312 = vmatpush.msra.mxu1 %v8950_v12  ;;  %1272 = vmatpush.msrb.mxu3 %v8944_v14 }
 0x1d9   :  { %1253 = vmatpush.msra.mxu2 %v8952_v6  ;;  %1293 = vmatpush.msrb.mxu0 %v8958_v1 }
 0x1da   :  { %1313 = vmatpush.msra.mxu1 %v8960_v43  ;;  %1273 = vmatpush.msrb.mxu3 %v8954_v25 }
 0x246   :  { %v1042_v49 = vpop.f32.mrf.mxu0 }
 0x247   :  { %v1086_v52 = vperm.slane %v1042_v49, 0  ;;  %v1062_v56 = vpop.f32.mrf.mxu1 }
 0x248   :  { %v1087_v59 = vperm.slane %v1062_v56, 0 }
 0x249   :  { %v9059_v50 = vsub.f32 %v11008_v3, %v1086_v52  ;;  %v9062_v0 = vsub.f32 %v11009_v51, %v1086_v52 }
 0x24a   :  { %v9065_v35 = vsub.f32 %v11010_v5, %v1087_v59  ;;  %v9068_v34 = vsub.f32 %v11011_v60, %v1087_v59 }
 0x24b   :  { %v1098_v28 = vmul.f32 %v9059_v50, %v9059_v50  ;;  %v1102_v53 = vmul.f32 %v9062_v0, %v9062_v0 }
 0x24c   :  { %v1099_v54 = vmul.f32 %v9065_v35, %v9065_v35  ;;  %v1103_v57 = vmul.f32 %v9068_v34, %v9068_v34  ;;  %v1022_v61 = vpop.f32.mrf.mxu3 }
 0x24d   :  { %v1113_v62 = vsel %vm882_vm6, %v1102_v53, 0.0  ;;  %v1085_v63 = vperm.slane %v1022_v61, 0  ;;  %v1082_v4 = vpop.f32.mrf.mxu2 }
 0x24e   :  { %v1114_v7 = vadd.f32 %v1113_v62, %v1098_v28  ;;  %v1121_v8 = vsel %vm882_vm6, %v1103_v57, 0.0  ;;  %v1088_v9 = vperm.slane %v1082_v4, 0 }
 0x24f   :  { %v1122_v10 = vadd.f32 %v1121_v8, %v1099_v54  ;;  %v9081_v15 = vsub.f32 %v11012_v11, %v1085_v63  ;;  %v9084_v20 = vsub.f32 %v11013_v16, %v1085_v63 }
 0x250   :  { %v1115_v19 = vrot.slane %v1114_v7, 4  ;;  %v9087_v13 = vsub.f32 %v11014_v21, %v1088_v9  ;;  %v9090_v49 = vsub.f32 %v11015_v24, %v1088_v9 }
 0x251   :  { %v1123_v52 = vrot.slane %v1122_v10, 4  ;;  %v1097_v56 = vmul.f32 %v9081_v15, %v9081_v15  ;;  %v1101_v59 = vmul.f32 %v9084_v20, %v9084_v20 }
 0x252   :  { %v1116_v3 = vadd.f32 %v1115_v19, %v1114_v7  ;;  %v1100_v51 = vmul.f32 %v9087_v13, %v9087_v13  ;;  %v1104_v5 = vmul.f32 %v9090_v49, %v9090_v49 }
 0x253   :  { %v1124_v60 = vadd.f32 %v1123_v52, %v1122_v10  ;;  %v1105_v28 = vsel %vm882_vm6, %v1101_v59, 0.0 }
 0x254   :  { %v1106_v53 = vadd.f32 %v1105_v28, %v1097_v56  ;;  %v1129_v54 = vsel %vm907_vm3, %v1100_v51, 0.0  ;;  %v1130_v57 = vsel %vm909_vm7, %v1104_v5, 0.0  ;;  %v1117_v61 = vrot.slane %v1116_v3, 2 }
 0x255   :  { %v1131_v62 = vadd.f32 %v1130_v57, %v1129_v54  ;;  %v1125_v63 = vrot.slane %v1124_v60, 2  ;;  %v6362_v57 = vld [vmem:[#allocation9 + $0x320] sm:$0xf]  ;;  %vm3383_vm7 = vcmask 1046528  }
 0x256   :  { %v1107_v4 = vrot.slane %v1106_v53, 4  ;;  %v1118_v8 = vadd.f32 %v1117_v61, %v1116_v3  ;;  %v7862_v61 = vld [vmem:[#allocation9 + $0x324] sm:$0xf0] }
 0x257   :  { %v1132_v7 = vrot.slane %v1131_v62, 4  ;;  %v1126_v9 = vadd.f32 %v1125_v63, %v1124_v60  ;;  %v7870_v63 = vld [vmem:[#allocation9 + $0x364] sm:$0xf0] }
 0x258   :  { %v1108_v11 = vadd.f32 %v1107_v4, %v1106_v53  ;;  %v1119_v16 = vrot.slane %v1118_v8, 1 }
 0x259   :  { %v1133_v19 = vadd.f32 %v1132_v7, %v1131_v62  ;;  %v1127_v21 = vrot.slane %v1126_v9, 1  ;;  %v6394_v62 = vld [vmem:[#allocation9 + $0x360] sm:$0xf]  ;;  %v6226_v7 = vld [vmem:[#allocation9 + $0x210] sm:$0xf] }
 0x25a   :  { %v1109_v24 = vrot.slane %v1108_v11, 2  ;;  %v1120_v10 = vadd.f32 %v1119_v16, %v1118_v8  ;;  %v7844_v16 = vld [vmem:[#allocation9 + $0x294] sm:$0xf0] }
 0x25b   :  { %v1134_v52 = vrot.slane %v1133_v19, 2  ;;  %v1128_v59 = vadd.f32 %v1127_v21, %v1126_v9  ;;  %v7828_v9 = vld [vmem:[#allocation9 + $0x214] sm:$0xf0]  ;;  %v6395_v21 = vor.u32 %v7870_v63, %v6394_v62  ;;  %v6236_v62 = vld [vmem:[#allocation9 + $0x228] sm:$0xf0] }
 0x25c   :  { %1177 = vmatmul.f32.vlgmr.msra.gmra.mxu0 %v1120_v10  ;;  %v1110_v56 = vadd.f32 %v1109_v24, %v1108_v11  ;;  %v6290_v11 = vld [vmem:[#allocation9 + $0x290] sm:$0xf]  ;;  %v7860_v10 = vld [vmem:[#allocation9 + $0x314] sm:$0xf0]  ;;  %v6186_v63 = vld [vmem:[#allocation9 + $0x1c0] sm:$0xf] }
 0x25d   :  { %v1135_v51 = vadd.f32 %v1134_v52, %v1133_v19  ;;  %1197 = vmatmul.f32.vlgmr.msrb.gmra.mxu1 %v1128_v59  ;;  %1382 = vmatpush.msra.mxu0 %v8874_v36  ;;  %v6363_v19 = vor.u32 %v7862_v61, %v6362_v57  ;;  %v6354_v24 = vld [vmem:[#allocation9 + $0x310] sm:$0xf]  ;;  %v7868_v59 = vld [vmem:[#allocation9 + $0x354] sm:$0xf0]  ;;  %v7829_v61 = vld [vmem:[#allocation9 + $0x224] sm:$0xf] }
 0x25e   :  { %v1111_v5 = vrot.slane %v1110_v56, 1  ;;  %1402 = vmatpush.msrb.mxu1 %v8878_v48  ;;  %v6386_v52 = vld [vmem:[#allocation9 + $0x350] sm:$0xf] }
 0x25f   :  { %v1136_v3 = vrot.slane %v1135_v51, 1  ;;  %1383 = vmatpush.msra.mxu0 %v8886_v45 }
 0x260   :  { %v1112_v60 = vadd.f32 %v1111_v5, %v1110_v56  ;;  %1403 = vmatpush.msrb.mxu1 %v8888_v18  ;;  %v1330_v56 = vld [vmem:[%s10873_s7] sm:$0x1]  ;;  %v6291_v5 = vor.u32 %v7844_v16, %v6290_v11 }
 0x261   :  { %v1137_v28 = vadd.f32 %v1136_v3, %v1135_v51  ;;  %1384 = vmatpush.msra.mxu0 %v8896_v2  ;;  %v6227_v51 = vor.u32 %v7828_v9, %v6226_v7  ;;  %v6218_v3 = vld [vmem:[#allocation9 + $0x200] sm:$0xf]  ;;  %v7847_v7 = vld [vmem:[#allocation9 + $0x2b4] sm:$0xf]  ;;  %v6308_v9 = vld [vmem:[#allocation9 + $0x2b8] sm:$0xf0] }
 0x262   :  { %1157 = vmatmul.f32.vlgmr.msra.gmra.mxu3 %v1112_v60  ;;  %1404 = vmatpush.msrb.mxu1 %v8898_v29  ;;  %v7826_v60 = vld [vmem:[#allocation9 + $0x204] sm:$0xf0]  ;;  %v6311_v16 = vor.u32 %v7847_v7, %v6308_v9 }
 0x263   :  { %6175 = vmatmul.msk.f32.vlgmr.msrb.gmra.mxu2 %vm907_vm3, %v1137_v28  ;;  %1362 = vmatpush.msra.mxu3 %v8872_v17  ;;  %v6282_v28 = vld [vmem:[#allocation9 + $0x280] sm:$0xf] }
 0x264   :  { %1342 = vmatpush.msrb.mxu2 %v8870_v30  ;;  %1385 = vmatpush.msra.mxu0 %v10998_v33  ;;  %v6402_v33 = vld [vmem:[#allocation9 + $0x370] sm:$0xf] }
 0x265   :  { %1363 = vmatpush.msra.mxu3 %v10995_v26  ;;  %1405 = vmatpush.msrb.mxu1 %v8910_v58  ;;  %v7848_v26 = vld [vmem:[#allocation9 + $0x2b4] sm:$0xf0] }
 0x266   :  { %1343 = vmatpush.msrb.mxu2 %v8880_v55  ;;  %1386 = vmatpush.msra.mxu0 %v11001_v39 }
 0x267   :  { %1364 = vmatpush.msra.mxu3 %v10997_v32  ;;  %1406 = vmatpush.msrb.mxu1 %v11002_v40  ;;  %v7864_v32 = vld [vmem:[#allocation9 + $0x334] sm:$0xf0] }
 0x268   :  { %1344 = vmatpush.msrb.mxu2 %v8890_v31  ;;  %1387 = vmatpush.msra.mxu0 %v11005_v44  ;;  %v7830_v44 = vld [vmem:[#allocation9 + $0x224] sm:$0xf0] }
 0x269   :  { %1365 = vmatpush.msra.mxu3 %v11000_v38  ;;  %1407 = vmatpush.msrb.mxu1 %v11006_v46  ;;  %v6298_v46 = vld [vmem:[#allocation9 + $0x2a0] sm:$0xf] }
 0x26a   :  { %1345 = vmatpush.msrb.mxu2 %v10996_v27  ;;  %1388 = vmatpush.msra.mxu0 %v8946_v22  ;;  %v6370_v27 = vld [vmem:[#allocation9 + $0x330] sm:$0xf] }
 0x26b   :  { %1366 = vmatpush.msra.mxu3 %v11004_v42  ;;  %1408 = vmatpush.msrb.mxu1 %v8950_v12  ;;  %v6234_v42 = vld [vmem:[#allocation9 + $0x220] sm:$0xf]  ;;  %v6371_v53 = vor.u32 %v7864_v32, %v6370_v27  ;;  %v7838_v32 = vld [vmem:[#allocation9 + $0x264] sm:$0xf0] }
 0x26c   :  { %1346 = vmatpush.msrb.mxu2 %v10999_v37  ;;  %1389 = vmatpush.msra.mxu0 %v8958_v1  ;;  %v6306_v1 = vld [vmem:[#allocation9 + $0x2b0] sm:$0xf]  ;;  %v7872_v37 = vld [vmem:[#allocation9 + $0x374] sm:$0xf0]  ;;  %v6235_v4 = vor.u32 %v7830_v44, %v6234_v42 }
 0x26d   :  { %1367 = vmatpush.msra.mxu3 %v11007_v47  ;;  %1409 = vmatpush.msrb.mxu1 %v8960_v43  ;;  %v7832_v43 = vld [vmem:[#allocation9 + $0x234] sm:$0xf0]  ;;  %v7846_v47 = vld [vmem:[#allocation9 + $0x2a4] sm:$0xf0]  ;;  %v6403_v54 = vor.u32 %v7872_v37, %v6402_v33  ;;  %v7831_v33 = vld [vmem:[#allocation9 + $0x234] sm:$0xf] }
 0x26e   :  { %1347 = vmatpush.msrb.mxu2 %v11003_v41  ;;  %v6307_v41 = vor.u32 %v7848_v26, %v6306_v1  ;;  %v6299_v8 = vor.u32 %v7846_v47, %v6298_v46  ;;  %v6378_v1 = vld [vmem:[#allocation9 + $0x340] sm:$0xf]  ;;  %v6244_v37 = vld [vmem:[#allocation9 + $0x238] sm:$0xf0]  ;;  %v6338_v44 = vld [vmem:[#allocation9 + $0x2f0] sm:$0xf] }
 0x26f   :  { %1368 = vmatpush.msra.mxu3 %v8944_v14  ;;  %v6266_v26 = vld [vmem:[#allocation9 + $0x260] sm:$0xf]  ;;  %v7856_v46 = vld [vmem:[#allocation9 + $0x2f4] sm:$0xf0] }
 0x270   :  { %1348 = vmatpush.msrb.mxu2 %v8942_v23  ;;  %v1222_v23 = vld [vmem:[%s11016_s27] sm:$0x1]  ;;  %v6339_v47 = vor.u32 %v7856_v46, %v6338_v44  ;;  %v7869_v46 = vld [vmem:[#allocation9 + $0x364] sm:$0xf] }
 0x271   :  { %1369 = vmatpush.msra.mxu3 %v8954_v25 }
 0x272   :  { %1349 = vmatpush.msrb.mxu2 %v8952_v6  ;;  %v6242_v6 = vld [vmem:[#allocation9 + $0x230] sm:$0xf] }
 0x273   :  { %v6243_v40 = vor.u32 %v7832_v43, %v6242_v6  ;;  %v7858_v6 = vld [vmem:[#allocation9 + $0x304] sm:$0xf0] }
 0x2d9   :  { %v1178_v30 = vpop.f32.mrf.mxu0 }
 0x2da   :  { %v1198_v36 = vpop.f32.mrf.mxu1 }
 0x2e5   :  { %v1158_v12 = vpop.f32.mrf.mxu3 }
 0x2e6   :  { %v1179_v17 = vadd.f32 %v1178_v30, %v1158_v12  ;;  %v1218_v55 = vpop.f32.mrf.mxu2  ;;  %v7842_v30 = vld [vmem:[#allocation9 + $0x284] sm:$0xf0]  ;;  %v6355_v12 = vor.u32 %v7860_v10, %v6354_v24  ;;  %v6250_v10 = vld [vmem:[#allocation9 + $0x240] sm:$0xf] }
 0x2e8   :  { %v1199_v48 = vadd.f32 %v1198_v36, %v1179_v17  ;;  %v6387_v17 = vor.u32 %v7868_v59, %v6386_v52  ;;  %v6219_v36 = vor.u32 %v7826_v60, %v6218_v3  ;;  %v7834_v52 = vld [vmem:[#allocation9 + $0x244] sm:$0xf0]  ;;  %v6372_v60 = vld [vmem:[#allocation9 + $0x338] sm:$0xf0] }
 0x2e9   :  { %v6251_v59 = vor.u32 %v7834_v52, %v6250_v10  ;;  %v7855_v10 = vld [vmem:[#allocation9 + $0x2f4] sm:$0xf] }
 0x2ea   :  { %v1219_v22 = vadd.f32 %v1218_v55, %v1199_v48  ;;  %v6283_v48 = vor.u32 %v7842_v30, %v6282_v28  ;;  %v6210_v55 = vld [vmem:[#allocation9 + $0x1f0] sm:$0xf]  ;;  %v7845_v28 = vld [vmem:[#allocation9 + $0x2a4] sm:$0xf]  ;;  %v6300_v30 = vld [vmem:[#allocation9 + $0x2a8] sm:$0xf0] }
 0x2ec   :  { %v1221_v45 = vmul.f32 0.010204081, %v1219_v22  ;;  %v7824_v22 = vld [vmem:[#allocation9 + $0x1f4] sm:$0xf0] }
 0x2ee   :  { %v1223_v18 = vadd.f32 1e-05, %v1221_v45  ;;  %v6274_v45 = vld [vmem:[#allocation9 + $0x270] sm:$0xf] }
 0x2f0   :  { %8125 = vrsqrt.f32 %v1223_v18  ;;  %vm1230_vm9 = vweird.f32 %v1223_v18 }
 0x2f6   :  { %v8126_v31 = vpop.eup %8125 }
 0x2f7   :  { %v1225_v2 = vmul.f32 %v8126_v31, %v1223_v18  ;;  %vm1231_vm8 = vweird.f32 %v8126_v31  ;;  %v7840_v18 = vld [vmem:[#allocation9 + $0x274] sm:$0xf0] }
 0x2f8   :  { %vm1232_vm10 = vmor %vm1230_vm9, %vm1231_vm8  ;;  %vm4166_vm8 = vcmask 1044480   ;;  %vm4443_vm9 = vcmask 1043456  }
 0x2f9   :  { %v1226_v29 = vmul.f32 %v8126_v31, %v1225_v2  ;;  %v6275_v2 = vor.u32 %v7840_v18, %v6274_v45  ;;  %v6220_v45 = vld [vmem:[#allocation9 + $0x208] sm:$0xf0]  ;;  %v7861_v18 = vld [vmem:[#allocation9 + $0x324] sm:$0xf] }
 0x2fb   :  { %v1227_v14 = vmul.f32 0.5, %v1226_v29  ;;  %v6202_v29 = vld [vmem:[#allocation9 + $0x1e0] sm:$0xf] }
 0x2fd   :  { %v1228_v25 = vsub.f32 1.5, %v1227_v14  ;;  %v7822_v14 = vld [vmem:[#allocation9 + $0x1e4] sm:$0xf0] }
 0x2ff   :  { %v1229_v58 = vmul.f32 %v8126_v31, %v1228_v25  ;;  %v6346_v25 = vld [vmem:[#allocation9 + $0x300] sm:$0xf] }
 0x300   :  { %v6347_v43 = vor.u32 %v7858_v6, %v6346_v25  ;;  %v6314_v25 = vld [vmem:[#allocation9 + $0x2c0] sm:$0xf]  ;;  %v7850_v6 = vld [vmem:[#allocation9 + $0x2c4] sm:$0xf0] }
 0x301   :  { %v1233_v38 = vsel %vm1232_vm10, %v8126_v31, %v1229_v58  ;;  %v6211_v31 = vor.u32 %v7824_v22, %v6210_v55  ;;  %v7866_v58 = vld [vmem:[#allocation9 + $0x344] sm:$0xf0]  ;;  %v7825_v22 = vld [vmem:[#allocation9 + $0x204] sm:$0xf]  ;;  %vm4457_vm10 = vcmask 781312  }
 0x302   :  { %v1234_v39 = vmul.f32 %v1233_v38, %v1222_v23  ;;  %v6203_v23 = vor.u32 %v7822_v14, %v6202_v29  ;;  %v6379_v27 = vor.u32 %v7866_v58, %v6378_v1  ;;  %v6267_v38 = vor.u32 %v7838_v32, %v6266_v26  ;;  %v7843_v29 = vld [vmem:[#allocation9 + $0x294] sm:$0xf]  ;;  %v6404_v26 = vld [vmem:[#allocation9 + $0x378] sm:$0xf0] }
 0x303   :  { %v6315_v1 = vor.u32 %v7850_v6, %v6314_v25  ;;  %v7871_v58 = vld [vmem:[#allocation9 + $0x374] sm:$0xf]  ;;  %v6212_v32 = vld [vmem:[#allocation9 + $0x1f8] sm:$0xf0]  ;;  %v7833_v6 = vld [vmem:[#allocation9 + $0x244] sm:$0xf] }
 0x304   :  { %6176 = vmatmul.msk.f32.vlgmr.msra.gmra.mxu2 %vm907_vm3, %v1234_v39  ;;  %6177 = vmatmul.msk.f32.vlgmr.msrb.gmra.mxu3 %vm907_vm3, %v1234_v39 }
 0x305   :  { %6178 = vmatmul.msk.f32.vlgmr.msrb.gmra.mxu0 %vm907_vm3, %v1234_v39  ;;  %6179 = vmatmul.msk.f32.vlgmr.msra.gmra.mxu1 %vm907_vm3, %v1234_v39  ;;  %v6247_v39 = vor.u32 %v7831_v33, %v6244_v37  ;;  %v6407_v33 = vor.u32 %v7871_v58, %v6404_v26  ;;  %v7859_v37 = vld [vmem:[#allocation9 + $0x314] sm:$0xf] }
 0x306   :  { %1915 = vmatpush.bf16.msra.mxu2 %v6243_v40  ;;  %1929 = vmatpush.bf16.msrb.mxu3 %v6307_v41  ;;  %v6194_v40 = vld [vmem:[#allocation9 + $0x1d0] sm:$0xf]  ;;  %v7820_v41 = vld [vmem:[#allocation9 + $0x1d4] sm:$0xf0] }
 0x307   :  { %1943 = vmatpush.bf16.msrb.mxu0 %v6371_v53  ;;  %1961 = vmatpush.bf16.msra.mxu1 %v6403_v54  ;;  %v6195_v42 = vor.u32 %v7820_v41, %v6194_v40  ;;  %v6258_v53 = vld [vmem:[#allocation9 + $0x250] sm:$0xf]  ;;  %v7836_v54 = vld [vmem:[#allocation9 + $0x254] sm:$0xf0]  ;;  %v7841_v40 = vld [vmem:[#allocation9 + $0x284] sm:$0xf] }
 0x308   :  { %v6259_v57 = vor.u32 %v7836_v54, %v6258_v53  ;;  %v7821_v53 = vld [vmem:[#allocation9 + $0x1e4] sm:$0xf]  ;;  %v6204_v54 = vld [vmem:[#allocation9 + $0x1e8] sm:$0xf0] }
 0x30a   :  { %1916 = vmatpush.bf16.msra.mxu2 %v6235_v4  ;;  %1930 = vmatpush.bf16.msrb.mxu3 %v6299_v8  ;;  %v6239_v4 = vor.u32 %v7829_v61, %v6236_v62  ;;  %v7818_v8 = vld [vmem:[#allocation9 + $0x1c4] sm:$0xf0]  ;;  %v7857_v61 = vld [vmem:[#allocation9 + $0x304] sm:$0xf]  ;;  %v6207_v62 = vor.u32 %v7821_v53, %v6204_v54 }
 0x30b   :  { %1944 = vmatpush.bf16.msrb.mxu0 %v6363_v19  ;;  %1962 = vmatpush.bf16.msra.mxu1 %v6395_v21  ;;  %v6187_v11 = vor.u32 %v7818_v8, %v6186_v63  ;;  %v6330_v19 = vld [vmem:[#allocation9 + $0x2e0] sm:$0xf]  ;;  %v7854_v21 = vld [vmem:[#allocation9 + $0x2e4] sm:$0xf0]  ;;  %v6348_v63 = vld [vmem:[#allocation9 + $0x308] sm:$0xf0] }
 0x30c   :  { %6180 = vmatmul.msk.f32.vlgmr.msrb.gmra.mxu2 %vm907_vm3, %v1330_v56  ;;  %6181 = vmatmul.msk.f32.vlgmr.msra.gmra.mxu3 %vm907_vm3, %v1330_v56  ;;  %v6331_v24 = vor.u32 %v7854_v21, %v6330_v19  ;;  %v6276_v8 = vld [vmem:[#allocation9 + $0x278] sm:$0xf0]  ;;  %v6351_v7 = vor.u32 %v7857_v61, %v6348_v63  ;;  %v7819_v19 = vld [vmem:[#allocation9 + $0x1d4] sm:$0xf] }
 0x30d   :  { %6182 = vmatmul.msk.f32.vlgmr.msra.gmra.mxu0 %vm907_vm3, %v1330_v56  ;;  %6183 = vmatmul.msk.f32.vlgmr.msrb.gmra.mxu1 %vm907_vm3, %v1330_v56  ;;  %v7827_v56 = vld [vmem:[#allocation9 + $0x214] sm:$0xf]  ;;  %v6196_v21 = vld [vmem:[#allocation9 + $0x1d8] sm:$0xf0] }
 0x30e   :  { %1917 = vmatpush.bf16.msra.mxu2 %v6227_v51  ;;  %1931 = vmatpush.bf16.msrb.mxu3 %v6291_v5  ;;  %v6228_v51 = vld [vmem:[#allocation9 + $0x218] sm:$0xf0]  ;;  %v7863_v5 = vld [vmem:[#allocation9 + $0x334] sm:$0xf]  ;;  %v6199_v52 = vor.u32 %v7819_v19, %v6196_v21 }
 0x30f   :  { %1945 = vmatpush.bf16.msrb.mxu0 %v6355_v12  ;;  %1963 = vmatpush.bf16.msra.mxu1 %v6387_v17  ;;  %v6231_v3 = vor.u32 %v7827_v56, %v6228_v51  ;;  %v6375_v12 = vor.u32 %v7863_v5, %v6372_v60  ;;  %v6303_v17 = vor.u32 %v7845_v28, %v6300_v30  ;;  %v7837_v56 = vld [vmem:[#allocation9 + $0x264] sm:$0xf]  ;;  %v6268_v51 = vld [vmem:[#allocation9 + $0x268] sm:$0xf0] }
 0x310   :  { %v7817_v60 = vld [vmem:[#allocation9 + $0x1c4] sm:$0xf]  ;;  %v6188_v28 = vld [vmem:[#allocation9 + $0x1c8] sm:$0xf0] }
 0x311   :  { %v7865_v30 = vld [vmem:[#allocation9 + $0x344] sm:$0xf] }
 0x312   :  { %1918 = vmatpush.bf16.msra.mxu2 %v6219_v36  ;;  %1932 = vmatpush.bf16.msrb.mxu3 %v6283_v48  ;;  %v6322_v36 = vld [vmem:[#allocation9 + $0x2d0] sm:$0xf]  ;;  %v7852_v48 = vld [vmem:[#allocation9 + $0x2d4] sm:$0xf0] }
 0x313   :  { %1946 = vmatpush.bf16.msrb.mxu0 %v6347_v43  ;;  %1964 = vmatpush.bf16.msra.mxu1 %v6379_v27  ;;  %v6323_v55 = vor.u32 %v7852_v48, %v6322_v36  ;;  %v7823_v27 = vld [vmem:[#allocation9 + $0x1f4] sm:$0xf]  ;;  %v7853_v48 = vld [vmem:[#allocation9 + $0x2e4] sm:$0xf] }
 0x316   :  { %1919 = vmatpush.bf16.msra.mxu2 %v6211_v31  ;;  %1933 = vmatpush.bf16.msrb.mxu3 %v6275_v2  ;;  %v6223_v31 = vor.u32 %v7825_v22, %v6220_v45  ;;  %v6364_v2 = vld [vmem:[#allocation9 + $0x328] sm:$0xf0]  ;;  %v7835_v45 = vld [vmem:[#allocation9 + $0x254] sm:$0xf] }
 0x317   :  { %1971 = vmatpush.bf16.msrb.mxu1 %v6247_v39  ;;  %1947 = vmatpush.bf16.msrb.mxu0 %v6339_v47  ;;  %v6367_v14 = vor.u32 %v7861_v18, %v6364_v2  ;;  %v6356_v39 = vld [vmem:[#allocation9 + $0x318] sm:$0xf0]  ;;  %v6396_v47 = vld [vmem:[#allocation9 + $0x368] sm:$0xf0] }
 0x318   :  { %v6359_v41 = vor.u32 %v7859_v37, %v6356_v39  ;;  %v6260_v18 = vld [vmem:[#allocation9 + $0x258] sm:$0xf0]  ;;  %v6316_v37 = vld [vmem:[#allocation9 + $0x2c8] sm:$0xf0] }
 0x31a   :  { %1920 = vmatpush.bf16.msra.mxu2 %v6203_v23  ;;  %1934 = vmatpush.bf16.msrb.mxu3 %v6267_v38  ;;  %v6292_v23 = vld [vmem:[#allocation9 + $0x298] sm:$0xf0]  ;;  %v6215_v38 = vor.u32 %v7823_v27, %v6212_v32 }
 0x31b   :  { %1972 = vmatpush.bf16.msrb.mxu1 %v6239_v4  ;;  %1948 = vmatpush.bf16.msrb.mxu0 %v6331_v24  ;;  %v6295_v43 = vor.u32 %v7843_v29, %v6292_v23  ;;  %v7839_v4 = vld [vmem:[#allocation9 + $0x274] sm:$0xf]  ;;  %v6324_v23 = vld [vmem:[#allocation9 + $0x2d8] sm:$0xf0] }
 0x31c   :  { %v6279_v9 = vor.u32 %v7839_v4, %v6276_v8 }
 0x31e   :  { %1921 = vmatpush.bf16.msra.mxu2 %v6195_v42  ;;  %1935 = vmatpush.bf16.msrb.mxu3 %v6259_v57  ;;  %v6284_v42 = vld [vmem:[#allocation9 + $0x288] sm:$0xf0]  ;;  %v6399_v57 = vor.u32 %v7869_v46, %v6396_v47 }
 0x31f   :  { %1973 = vmatpush.bf16.msrb.mxu1 %v6231_v3  ;;  %1949 = vmatpush.bf16.msrb.mxu0 %v6323_v55  ;;  %v6287_v44 = vor.u32 %v7841_v40, %v6284_v42  ;;  %v6271_v3 = vor.u32 %v7837_v56, %v6268_v51  ;;  %v6332_v55 = vld [vmem:[#allocation9 + $0x2e8] sm:$0xf0] }
 0x320   :  { %v6335_v22 = vor.u32 %v7853_v48, %v6332_v55 }
 0x322   :  { %1922 = vmatpush.bf16.msra.mxu2 %v6187_v11  ;;  %1936 = vmatpush.bf16.msrb.mxu3 %v6251_v59  ;;  %v7867_v11 = vld [vmem:[#allocation9 + $0x354] sm:$0xf]  ;;  %v6340_v59 = vld [vmem:[#allocation9 + $0x2f8] sm:$0xf0] }
 0x323   :  { %1974 = vmatpush.bf16.msrb.mxu1 %v6223_v31  ;;  %1950 = vmatpush.bf16.msrb.mxu0 %v6315_v1  ;;  %v6343_v5 = vor.u32 %v7855_v10, %v6340_v59  ;;  %v6263_v31 = vor.u32 %v7835_v45, %v6260_v18  ;;  %v6468_v45 = vld [vmem:[#allocation9 + $0x70] sm:$0xf]  ;;  %v7776_v18 = vld [vmem:[#allocation9 + $0x74] sm:$0xf0] }
 0x326   :  { %1985 = vmatpush.bf16.msrb.mxu2 %v6311_v16  ;;  %1999 = vmatpush.bf16.msra.mxu3 %v6375_v12  ;;  %v6388_v16 = vld [vmem:[#allocation9 + $0x358] sm:$0xf0]  ;;  %v6191_v12 = vor.u32 %v7817_v60, %v6188_v28 }
 0x327   :  { %2017 = vmatpush.bf16.msra.mxu0 %v6407_v33  ;;  %1975 = vmatpush.bf16.msrb.mxu1 %v6215_v38  ;;  %v6391_v24 = vor.u32 %v7867_v11, %v6388_v16  ;;  %v7849_v33 = vld [vmem:[#allocation9 + $0x2c4] sm:$0xf] }
 0x328   :  { %v6319_v38 = vor.u32 %v7849_v33, %v6316_v37  ;;  %v6524_v37 = vld [vmem:[#allocation9 + $0xe0] sm:$0xf] }
 0x32a   :  { %1986 = vmatpush.bf16.msrb.mxu2 %v6303_v17  ;;  %2000 = vmatpush.bf16.msra.mxu3 %v6367_v14  ;;  %v6380_v17 = vld [vmem:[#allocation9 + $0x348] sm:$0xf0]  ;;  %v7851_v14 = vld [vmem:[#allocation9 + $0x2d4] sm:$0xf] }
 0x32b   :  { %2018 = vmatpush.bf16.msra.mxu0 %v6399_v57  ;;  %1976 = vmatpush.bf16.msrb.mxu1 %v6207_v62  ;;  %v6383_v36 = vor.u32 %v7865_v30, %v6380_v17  ;;  %v6327_v25 = vor.u32 %v7851_v14, %v6324_v23  ;;  %v6469_v14 = vor.u32 %v7776_v18, %v6468_v45  ;;  %v6532_v23 = vld [vmem:[#allocation9 + $0xf0] sm:$0xf]  ;;  %v6428_v45 = vld [vmem:[#allocation9 + $0x20] sm:$0xf] }
 0x32e   :  { %1987 = vmatpush.bf16.msrb.mxu2 %v6295_v43  ;;  %2001 = vmatpush.bf16.msra.mxu3 %v6359_v41  ;;  %v6252_v43 = vld [vmem:[#allocation9 + $0x248] sm:$0xf0] }
 0x32f   :  { %2019 = vmatpush.bf16.msra.mxu0 %v6391_v24  ;;  %1977 = vmatpush.bf16.msrb.mxu1 %v6199_v52  ;;  %v6255_v58 = vor.u32 %v7833_v6, %v6252_v43 }
 0x332   :  { %1988 = vmatpush.bf16.msrb.mxu2 %v6287_v44  ;;  %2002 = vmatpush.bf16.msra.mxu3 %v6351_v7 }
 0x333   :  { %2020 = vmatpush.bf16.msra.mxu0 %v6383_v36  ;;  %1978 = vmatpush.bf16.msrb.mxu1 %v6191_v12 }
 0x336   :  { %1989 = vmatpush.bf16.msrb.mxu2 %v6279_v9  ;;  %2003 = vmatpush.bf16.msra.mxu3 %v6343_v5 }
 0x33a   :  { %1990 = vmatpush.bf16.msrb.mxu2 %v6271_v3  ;;  %2004 = vmatpush.bf16.msra.mxu3 %v6335_v22 }
 0x33e   :  { %1991 = vmatpush.bf16.msrb.mxu2 %v6263_v31  ;;  %2005 = vmatpush.bf16.msra.mxu3 %v6327_v25  ;;  %v7792_v25 = vld [vmem:[#allocation9 + $0xf4] sm:$0xf0] }
 0x33f   :  { %v6533_v33 = vor.u32 %v7792_v25, %v6532_v23  ;;  %v6492_v23 = vld [vmem:[#allocation9 + $0xa0] sm:$0xf]  ;;  %v6564_v25 = vld [vmem:[#allocation9 + $0x130] sm:$0xf] }
 0x342   :  { %1992 = vmatpush.bf16.msrb.mxu2 %v6255_v58  ;;  %2006 = vmatpush.bf16.msra.mxu3 %v6319_v38  ;;  %v7774_v58 = vld [vmem:[#allocation9 + $0x64] sm:$0xf0] }
 0x343   :  { %v7790_v38 = vld [vmem:[#allocation9 + $0xe4] sm:$0xf0] }
 0x382   :  { %v1295_v2 = vpop.f32.mrf.mxu0  ;;  %v1315_v29 = vpop.f32.mrf.mxu1 }
 0x383   :  { %v1320_v1 = vperm.slane %v1295_v2, 0  ;;  %v1321_v26 = vperm.slane %v1315_v29, 0 }
 0x385   :  { %v1324_v39 = vmul.f32 %v1320_v1, %v9065_v35  ;;  %v1328_v40 = vmul.f32 %v1320_v1, %v9068_v34  ;;  %v1325_v46 = vmul.f32 %v1321_v26, %v9087_v13  ;;  %v1329_v47 = vmul.f32 %v1321_v26, %v9090_v49  ;;  %v6460_v1 = vld [vmem:[#allocation9 + $0x60] sm:$0xf] }
 0x387   :  { %v1255_v27 = vpop.f32.mrf.mxu2  ;;  %v1275_v32 = vpop.f32.mrf.mxu3 }
 0x388   :  { %v1318_v41 = vperm.slane %v1255_v27, 0  ;;  %v1319_v57 = vperm.slane %v1275_v32, 0  ;;  %v6596_v27 = vld [vmem:[#allocation9 + $0x170] sm:$0xf]  ;;  %v7808_v32 = vld [vmem:[#allocation9 + $0x174] sm:$0xf0] }
 0x38a   :  { %v1391_v42 = vpop.f32.mrf.mxu0  ;;  %v1411_v44 = vpop.f32.mrf.mxu1  ;;  %v1322_v8 = vmul.f32 %v1318_v41, %v9081_v15  ;;  %v1326_v35 = vmul.f32 %v1318_v41, %v9084_v20  ;;  %v1323_v49 = vmul.f32 %v1319_v57, %v9059_v50  ;;  %v1327_v19 = vmul.f32 %v1319_v57, %v9062_v0  ;;  %v7772_v57 = vld [vmem:[#allocation9 + $0x54] sm:$0xf0] }
 0x38b   :  { %v1416_v53 = vperm.slane %v1391_v42, 0  ;;  %v1417_v54 = vperm.slane %v1411_v44, 0  ;;  %v6461_v41 = vor.u32 %v7774_v58, %v6460_v1  ;;  %v6628_v44 = vld [vmem:[#allocation9 + $0x1b0] sm:$0xf]  ;;  %v7800_v1 = vld [vmem:[#allocation9 + $0x134] sm:$0xf0] }
 0x38d   :  { %v1420_v61 = vadd.f32 %v1416_v53, %v1324_v39  ;;  %v1424_v62 = vadd.f32 %v1416_v53, %v1328_v40  ;;  %v1421_v63 = vadd.f32 %v1417_v54, %v1325_v46  ;;  %v1425_v4 = vadd.f32 %v1417_v54, %v1329_v47  ;;  %v7816_v46 = vld [vmem:[#allocation9 + $0x1b4] sm:$0xf0]  ;;  %v6452_v54 = vld [vmem:[#allocation9 + $0x50] sm:$0xf] }
 0x38e   :  { %v6597_v53 = vor.u32 %v7808_v32, %v6596_v27  ;;  %v7775_v32 = vld [vmem:[#allocation9 + $0x74] sm:$0xf] }
 0x38f   :  { %v1428_v34 = vmax.f32 %v1420_v61, 0.0  ;;  %v1432_v7 = vmax.f32 %v1424_v62, 0.0  ;;  %v1429_v9 = vmax.f32 %v1421_v63, 0.0  ;;  %v1433_v11 = vmax.f32 %v1425_v4, 0.0  ;;  %v1351_v13 = vpop.f32.mrf.mxu2  ;;  %v1371_v16 = vpop.f32.mrf.mxu3  ;;  %v6588_v63 = vld [vmem:[#allocation9 + $0x160] sm:$0xf] }
 0x390   :  { %v1414_v21 = vperm.slane %v1351_v13, 0  ;;  %v1415_v24 = vperm.slane %v1371_v16, 0  ;;  %v7806_v4 = vld [vmem:[#allocation9 + $0x164] sm:$0xf0]  ;;  %v6620_v13 = vld [vmem:[#allocation9 + $0x1a0] sm:$0xf] }
 0x391   :  { %v1457_v10 = vrot.slane %v1428_v34, 6  ;;  %v1463_v52 = vrot.slane %v1432_v7, 6  ;;  %v1458_v59 = vrot.slane %v1429_v9, 6  ;;  %v1465_v15 = vrot.slane %v1433_v11, 6  ;;  %v7788_v34 = vld [vmem:[#allocation9 + $0xd4] sm:$0xf0] }
 0x392   :  { %v1418_v56 = vadd.f32 %v1414_v21, %v1322_v8  ;;  %v1422_v20 = vadd.f32 %v1414_v21, %v1326_v35  ;;  %v1419_v51 = vadd.f32 %v1415_v24, %v1323_v49  ;;  %v1423_v5 = vadd.f32 %v1415_v24, %v1327_v19  ;;  %v6516_v35 = vld [vmem:[#allocation9 + $0xd0] sm:$0xf]  ;;  %v7814_v16 = vld [vmem:[#allocation9 + $0x1a4] sm:$0xf0]  ;;  %v6444_v19 = vld [vmem:[#allocation9 + $0x40] sm:$0xf] }
 0x393   :  { %v1464_v3 = vsel %vm1454_vm11, %v1457_v10, %v1463_v52  ;;  %1477 = vst [vmem:[#allocation3 + $0x10] sm:$0xfc] %v1457_v10  ;;  %v1466_v60 = vsel %vm1454_vm11, %v1458_v59, %v1465_v15  ;;  %v6525_v8 = vor.u32 %v7790_v38, %v6524_v37  ;;  %v6629_v7 = vor.u32 %v7816_v46, %v6628_v44  ;;  %v7770_v21 = vld [vmem:[#allocation9 + $0x44] sm:$0xf0]  ;;  %v6580_v24 = vld [vmem:[#allocation9 + $0x150] sm:$0xf] }
 0x394   :  { %1482 = vst [vmem:[#allocation3 + $0x30] sm:$0xff] %v1464_v3  ;;  %v1426_v28 = vmax.f32 %v1418_v56, 0.0  ;;  %v1430_v50 = vmax.f32 %v1422_v20, 0.0  ;;  %v1427_v30 = vmax.f32 %v1419_v51, 0.0  ;;  %v1431_v0 = vmax.f32 %v1423_v5, 0.0 }
 0x395   :  { %1479 = vst.msk [vmem:[#allocation3 + $0x18] sm:$0xfc] %vm1478_vm12, %v1458_v59  ;;  %v6453_v11 = vor.u32 %v7772_v57, %v6452_v54  ;;  %v6589_v49 = vor.u32 %v7806_v4, %v6588_v63  ;;  %v7804_v10 = vld [vmem:[#allocation9 + $0x154] sm:$0xf0]  ;;  %v6517_v52 = vor.u32 %v7788_v34, %v6516_v35  ;;  %v6621_v59 = vor.u32 %v7814_v16, %v6620_v13  ;;  %v6508_v56 = vld [vmem:[#allocation9 + $0xc0] sm:$0xf] }
 0x396   :  { %1483 = vst.msk [vmem:[#allocation3 + $0x38] sm:$0xff] %vm907_vm3, %v1466_v60  ;;  %v1455_v12 = vrot.slane %v1426_v28, 6  ;;  %v1459_v17 = vrot.slane %v1430_v50, 6  ;;  %v1456_v36 = vrot.slane %v1427_v30, 6  ;;  %v1461_v48 = vrot.slane %v1431_v0, 6 }
 0x397   :  { %v6445_v15 = vor.u32 %v7770_v21, %v6444_v19  ;;  %v7786_v20 = vld [vmem:[#allocation9 + $0xc4] sm:$0xf0]  ;;  %v6436_v51 = vld [vmem:[#allocation9 + $0x30] sm:$0xf]  ;;  %v6581_v5 = vor.u32 %v7804_v10, %v6580_v24  ;;  %v7812_v28 = vld [vmem:[#allocation9 + $0x194] sm:$0xf0] }
 0x398   :  { %v9163_v55 = vsel %vm1454_vm11, %v1455_v12, %v1459_v17  ;;  %1475 = vst [vmem:[#allocation3] sm:$0xfc] %v1455_v12  ;;  %v9166_v22 = vsel %vm1454_vm11, %v1456_v36, %v1461_v48  ;;  %v6612_v60 = vld [vmem:[#allocation9 + $0x190] sm:$0xf]  ;;  %v6572_v50 = vld [vmem:[#allocation9 + $0x140] sm:$0xf]  ;;  %v6509_v0 = vor.u32 %v7786_v20, %v6508_v56 }
 0x399   :  { %1480 = vst [vmem:[#allocation3 + $0x20] sm:$0xff] %v9163_v55  ;;  %v7802_v30 = vld [vmem:[#allocation9 + $0x144] sm:$0xf0]  ;;  %v6500_v17 = vld [vmem:[#allocation9 + $0xb0] sm:$0xf]  ;;  %v6613_v48 = vor.u32 %v7812_v28, %v6612_v60 }
 0x39a   :  { %1476 = vst [vmem:[#allocation3 + $0x8] sm:$0xfc] %v1456_v36  ;;  %v1554_v31 = vld [vmem:[#allocation3 + $0x10] sm:$0xfc]  ;;  %v7784_v36 = vld [vmem:[#allocation9 + $0xb4] sm:$0xf0]  ;;  %v6573_v18 = vor.u32 %v7802_v30, %v6572_v50 }
 0x39b   :  { %1481 = vst [vmem:[#allocation3 + $0x28] sm:$0xff] %v9166_v22  ;;  %v1562_v2 = vpack.c.bf16 %v1464_v3, %v1554_v31  ;;  %v7768_v3 = vld [vmem:[#allocation9 + $0x34] sm:$0xf0]  ;;  %v7766_v31 = vld [vmem:[#allocation9 + $0x24] sm:$0xf0] }
 0x39c   :  { %v1555_v29 = vld [vmem:[#allocation3 + $0x18] sm:$0xfc]  ;;  %v6437_v12 = vor.u32 %v7768_v3, %v6436_v51  ;;  %v6429_v58 = vor.u32 %v7766_v31, %v6428_v45  ;;  %v6420_v37 = vld [vmem:[#allocation9 + $0x10] sm:$0xf]  ;;  %v7764_v38 = vld [vmem:[#allocation9 + $0x14] sm:$0xf0] }
 0x39d   :  { %v9170_v6 = vrot.slane %v1562_v2, 1  ;;  %v9172_v43 = vld [vmem:[#allocation3 + $0x38] sm:$0xff]  ;;  %v6604_v2 = vld [vmem:[#allocation9 + $0x180] sm:$0xf]  ;;  %v7773_v54 = vld [vmem:[#allocation9 + $0x64] sm:$0xf] }
 0x39e   :  { %v1563_v26 = vpack.c.bf16 %v9172_v43, %v1555_v29  ;;  %v7810_v29 = vld [vmem:[#allocation9 + $0x184] sm:$0xf0]  ;;  %v6556_v44 = vld [vmem:[#allocation9 + $0x120] sm:$0xf]  ;;  %v6462_v57 = vld [vmem:[#allocation9 + $0x68] sm:$0xf0] }
 0x39f   :  { %1951 = vmatmul.bf16.vlgmr.msrb.gmra.mxu0 %v9170_v6  ;;  %v1552_v39 = vld [vmem:[#allocation3] sm:$0xfc]  ;;  %v6605_v27 = vor.u32 %v7810_v29, %v6604_v2  ;;  %v7798_v46 = vld [vmem:[#allocation9 + $0x124] sm:$0xf0]  ;;  %v6465_v34 = vor.u32 %v7773_v54, %v6462_v57  ;;  %v7796_v13 = vld [vmem:[#allocation9 + $0x114] sm:$0xf0] }
 0x3a0   :  { %v9176_v40 = vrot.slane %v1563_v26, 1  ;;  %2310 = vmatpush.bf16.msrb.mxu0 %v6469_v14  ;;  %v1560_v42 = vpack.c.bf16 %v9163_v55, %v1552_v39  ;;  %v6501_v14 = vor.u32 %v7784_v36, %v6500_v17  ;;  %v7782_v26 = vld [vmem:[#allocation9 + $0xa4] sm:$0xf0]  ;;  %v6565_v39 = vor.u32 %v7800_v1, %v6564_v25  ;;  %v7791_v4 = vld [vmem:[#allocation9 + $0xf4] sm:$0xf] }
 0x3a1   :  { %v1553_v47 = vld [vmem:[#allocation3 + $0x8] sm:$0xfc]  ;;  %v7762_v63 = vld [vmem:[#allocation9 + $0x4] sm:$0xf0]  ;;  %v7771_v19 = vld [vmem:[#allocation9 + $0x54] sm:$0xf] }
 0x3a2   :  { %6408 = vmatmul.msk.bf16.vlgmr.msra.gmra.mxu1 %vm907_vm3, %v9176_v40  ;;  %v9181_v61 = vrot.slane %v1560_v42, 1  ;;  %v1561_v62 = vpack.c.bf16 %v9166_v22, %v1553_v47  ;;  %v6484_v42 = vld [vmem:[#allocation9 + $0x90] sm:$0xf]  ;;  %v6421_v47 = vor.u32 %v7764_v38, %v6420_v37  ;;  %v7807_v24 = vld [vmem:[#allocation9 + $0x174] sm:$0xf] }
 0x3a3   :  { %2324 = vmatpush.bf16.msra.mxu1 %v6533_v33  ;;  %v6470_v33 = vld [vmem:[#allocation9 + $0x78] sm:$0xf0]  ;;  %v6526_v56 = vld [vmem:[#allocation9 + $0xe8] sm:$0xf0]  ;;  %v6540_v3 = vld [vmem:[#allocation9 + $0x100] sm:$0xf] }
 0x3a4   :  { %2311 = vmatpush.bf16.msrb.mxu0 %v6461_v41  ;;  %1923 = vmatmul.bf16.vlgmr.msra.gmra.mxu2 %v9181_v61  ;;  %v9185_v9 = vrot.slane %v1561_v62, 1  ;;  %v6493_v41 = vor.u32 %v7782_v26, %v6492_v23  ;;  %v6412_v62 = vld [vmem:[#allocation9] sm:$0xf]  ;;  %v6598_v10 = vld [vmem:[#allocation9 + $0x178] sm:$0xf0] }
 0x3a5   :  { %2338 = vmatpush.bf16.msra.mxu2 %v6597_v53  ;;  %v7780_v53 = vld [vmem:[#allocation9 + $0x94] sm:$0xf0]  ;;  %v6413_v16 = vor.u32 %v7762_v63, %v6412_v62  ;;  %v7794_v60 = vld [vmem:[#allocation9 + $0x104] sm:$0xf0]  ;;  %v7769_v28 = vld [vmem:[#allocation9 + $0x44] sm:$0xf]  ;;  %v6601_v50 = vor.u32 %v7807_v24, %v6598_v10 }
 0x3a6   :  { %1937 = vmatmul.bf16.vlgmr.msrb.gmra.mxu3 %v9185_v9  ;;  %v6485_v35 = vor.u32 %v7780_v53, %v6484_v42  ;;  %v6446_v30 = vld [vmem:[#allocation9 + $0x48] sm:$0xf0]  ;;  %v1489_v17 = vld [vmem:[#allocation3 + $0x28] sm:$0x3f]  ;;  %v6541_v31 = vor.u32 %v7794_v60, %v6540_v3  ;;  %v7787_v2 = vld [vmem:[#allocation9 + $0xd4] sm:$0xf] }
 0x3a7   :  { %2325 = vmatpush.bf16.msra.mxu1 %v6525_v8  ;;  %2356 = vmatpush.bf16.msrb.mxu3 %v6629_v7  ;;  %v6534_v8 = vld [vmem:[#allocation9 + $0xf8] sm:$0xf0]  ;;  %v6476_v7 = vld [vmem:[#allocation9 + $0x80] sm:$0xf]  ;;  %v6590_v45 = vld [vmem:[#allocation9 + $0x168] sm:$0xf0]  ;;  %v6449_v23 = vor.u32 %v7769_v28, %v6446_v30 }
 0x3a8   :  { %2312 = vmatpush.bf16.msrb.mxu0 %v6453_v11  ;;  %v6548_v11 = vld [vmem:[#allocation9 + $0x110] sm:$0xf]  ;;  %v6537_v21 = vor.u32 %v7791_v4, %v6534_v8  ;;  %v6518_v29 = vld [vmem:[#allocation9 + $0xd8] sm:$0xf0]  ;;  %v1490_v1 = vld [vmem:[#allocation3 + $0x30] sm:$0x3f] }
 0x3a9   :  { %2339 = vmatpush.bf16.msra.mxu2 %v6589_v49  ;;  %v7778_v49 = vld [vmem:[#allocation9 + $0x84] sm:$0xf0]  ;;  %v7767_v26 = vld [vmem:[#allocation9 + $0x34] sm:$0xf]  ;;  %v7813_v37 = vld [vmem:[#allocation9 + $0x1a4] sm:$0xf] }
 0x3aa   :  { %v6477_v20 = vor.u32 %v7778_v49, %v6476_v7  ;;  %v6622_v38 = vld [vmem:[#allocation9 + $0x1a8] sm:$0xf0]  ;;  %v7765_v57 = vld [vmem:[#allocation9 + $0x24] sm:$0xf]  ;;  %v7811_v4 = vld [vmem:[#allocation9 + $0x194] sm:$0xf] }
 0x3ab   :  { %2326 = vmatpush.bf16.msra.mxu1 %v6517_v52  ;;  %2357 = vmatpush.bf16.msrb.mxu3 %v6621_v59  ;;  %v6549_v52 = vor.u32 %v7796_v13, %v6548_v11  ;;  %v1488_v59 = vld [vmem:[#allocation3 + $0x20] sm:$0x3f]  ;;  %v1491_v42 = vld [vmem:[#allocation3 + $0x38] sm:$0x3f]  ;;  %v6625_v54 = vor.u32 %v7813_v37, %v6622_v38  ;;  %v6614_v8 = vld [vmem:[#allocation9 + $0x198] sm:$0xf0] }
 0x3ac   :  { %2313 = vmatpush.bf16.msrb.mxu0 %v6445_v15  ;;  %v7789_v15 = vld [vmem:[#allocation9 + $0xe4] sm:$0xf]  ;;  %v6574_v7 = vld [vmem:[#allocation9 + $0x148] sm:$0xf0]  ;;  %v7783_v11 = vld [vmem:[#allocation9 + $0xb4] sm:$0xf]  ;;  %v6617_v49 = vor.u32 %v7811_v4, %v6614_v8 }
 0x3ad   :  { %2340 = vmatpush.bf16.msra.mxu2 %v6581_v5  ;;  %v1485_v5 = vld [vmem:[#allocation3 + $0x8] sm:$0xff]  ;;  %v6529_v36 = vor.u32 %v7789_v15, %v6526_v56  ;;  %v7809_v10 = vld [vmem:[#allocation9 + $0x184] sm:$0xf]  ;;  %v6694_v15 = vld [vmem:[#allocation9 + $0x3f0] sm:$0xf] }
 0x3ae   :  { %v6502_v13 = vld [vmem:[#allocation9 + $0xb8] sm:$0xf0]  ;;  %v7888_v56 = vld [vmem:[#allocation9 + $0x3f4] sm:$0xf0]  ;;  %v7797_v60 = vld [vmem:[#allocation9 + $0x124] sm:$0xf] }
 0x3af   :  { %2327 = vmatpush.bf16.msra.mxu1 %v6509_v0  ;;  %6409 = vmatmul.msk.bf16.vlgmr.msra.gmra.mxu0 %vm907_vm3, %v9176_v40  ;;  %v6473_v40 = vor.u32 %v7775_v32, %v6470_v33  ;;  %v7815_v0 = vld [vmem:[#allocation9 + $0x1b4] sm:$0xf]  ;;  %v6438_v33 = vld [vmem:[#allocation9 + $0x38] sm:$0xf0]  ;;  %v6558_v30 = vld [vmem:[#allocation9 + $0x128] sm:$0xf0] }
 0x3b0   :  { %2314 = vmatpush.bf16.msrb.mxu0 %v6437_v12  ;;  %2358 = vmatpush.bf16.msrb.mxu3 %v6613_v48  ;;  %v6630_v12 = vld [vmem:[#allocation9 + $0x1b8] sm:$0xf0]  ;;  %v7805_v48 = vld [vmem:[#allocation9 + $0x164] sm:$0xf]  ;;  %v6441_v53 = vor.u32 %v7767_v26, %v6438_v33  ;;  %v6750_v33 = vld [vmem:[#allocation9 + $0x460] sm:$0xf] }
 0x3b1   :  { %2341 = vmatpush.bf16.msra.mxu2 %v6573_v18  ;;  %v6633_v25 = vor.u32 %v7815_v0, %v6630_v12  ;;  %v6593_v32 = vor.u32 %v7805_v48, %v6590_v45  ;;  %v6422_v24 = vld [vmem:[#allocation9 + $0x18] sm:$0xf0]  ;;  %v7761_v0 = vld [vmem:[#allocation9 + $0x4] sm:$0xf]  ;;  %v6414_v12 = vld [vmem:[#allocation9 + $0x8] sm:$0xf0] }
 0x3b2   :  { %1979 = vmatmul.bf16.vlgmr.msrb.gmra.mxu1 %v9181_v61  ;;  %v6557_v61 = vor.u32 %v7798_v46, %v6556_v44  ;;  %v7785_v44 = vld [vmem:[#allocation9 + $0xc4] sm:$0xf]  ;;  %v6510_v46 = vld [vmem:[#allocation9 + $0xc8] sm:$0xf0]  ;;  %v7904_v48 = vld [vmem:[#allocation9 + $0x474] sm:$0xf0] }
 0x3b3   :  { %2328 = vmatpush.bf16.msra.mxu1 %v6501_v14  ;;  %v1486_v14 = vld [vmem:[#allocation3 + $0x10] sm:$0xff]  ;;  %v7902_v37 = vld [vmem:[#allocation9 + $0x464] sm:$0xf0]  ;;  %v6678_v38 = vld [vmem:[#allocation9 + $0x3d0] sm:$0xf] }
 0x3b4   :  { %2315 = vmatpush.bf16.msrb.mxu0 %v6429_v58  ;;  %2359 = vmatpush.bf16.msrb.mxu3 %v6605_v27  ;;  %v1487_v58 = vld [vmem:[#allocation3 + $0x18] sm:$0xff]  ;;  %v9196_v27 = vpack.c.bf16 %v1489_v17, %v1485_v5  ;;  %v6686_v45 = vld [vmem:[#allocation9 + $0x3e0] sm:$0xf]  ;;  %v6742_v4 = vld [vmem:[#allocation9 + $0x450] sm:$0xf] }
 0x3b5   :  { %1993 = vmatmul.bf16.vlgmr.msrb.gmra.mxu2 %v9185_v9  ;;  %v6454_v9 = vld [vmem:[#allocation9 + $0x58] sm:$0xf0]  ;;  %v9201_v63 = vpack.c.bf16 %v1491_v42, %v1487_v58  ;;  %v6822_v42 = vld [vmem:[#allocation9 + $0x4f0] sm:$0xf]  ;;  %v7900_v8 = vld [vmem:[#allocation9 + $0x454] sm:$0xf0] }
 0x3b6   :  { %2007 = vmatmul.bf16.vlgmr.msra.gmra.mxu3 %v9170_v6  ;;  %2342 = vmatpush.bf16.msra.mxu2 %v6565_v39  ;;  %v1484_v6 = vld [vmem:[#allocation3] sm:$0xff]  ;;  %v6457_v51 = vor.u32 %v7771_v19, %v6454_v9  ;;  %v6521_v39 = vor.u32 %v7787_v2, %v6518_v29  ;;  %v6486_v29 = vld [vmem:[#allocation9 + $0x98] sm:$0xf0] }
 0x3b7   :  { %2329 = vmatpush.bf16.msra.mxu1 %v6493_v41  ;;  %v9193_v18 = vpack.c.bf16 %v1488_v59, %v1484_v6  ;;  %v7803_v41 = vld [vmem:[#allocation9 + $0x154] sm:$0xf]  ;;  %v6606_v6 = vld [vmem:[#allocation9 + $0x188] sm:$0xf0]  ;;  %v6566_v59 = vld [vmem:[#allocation9 + $0x138] sm:$0xf0] }
 0x3b8   :  { %2366 = vmatpush.bf16.msra.mxu3 %v6473_v40  ;;  %2316 = vmatpush.bf16.msrb.mxu0 %v6421_v47  ;;  %v6582_v40 = vld [vmem:[#allocation9 + $0x158] sm:$0xf0]  ;;  %v9199_v47 = vpack.c.bf16 %v1490_v1, %v1486_v14  ;;  %v7799_v19 = vld [vmem:[#allocation9 + $0x134] sm:$0xf]  ;;  %v6609_v3 = vor.u32 %v7809_v10, %v6606_v6  ;;  %v6417_v14 = vor.u32 %v7761_v0, %v6414_v12  ;;  %v7898_v10 = vld [vmem:[#allocation9 + $0x444] sm:$0xf0] }
 0x3b9   :  { %v6585_v62 = vor.u32 %v7803_v41, %v6582_v40  ;;  %v7763_v9 = vld [vmem:[#allocation9 + $0x14] sm:$0xf]  ;;  %v6569_v28 = vor.u32 %v7799_v19, %v6566_v59  ;;  %v6550_v58 = vld [vmem:[#allocation9 + $0x118] sm:$0xf0]  ;;  %v7777_v41 = vld [vmem:[#allocation9 + $0x84] sm:$0xf] }
 0x3ba   :  { %2343 = vmatpush.bf16.msra.mxu2 %v6557_v61  ;;  %v6430_v61 = vld [vmem:[#allocation9 + $0x28] sm:$0xf0]  ;;  %v6425_v5 = vor.u32 %v7763_v9, %v6422_v24  ;;  %v7779_v2 = vld [vmem:[#allocation9 + $0x94] sm:$0xf]  ;;  %v6743_v9 = vor.u32 %v7900_v8, %v6742_v4  ;;  %v6734_v24 = vld [vmem:[#allocation9 + $0x440] sm:$0xf] }
 0x3bb   :  { %2330 = vmatpush.bf16.msra.mxu1 %v6485_v35  ;;  %v6513_v35 = vor.u32 %v7785_v44, %v6510_v46  ;;  %v7795_v1 = vld [vmem:[#allocation9 + $0x114] sm:$0xf]  ;;  %v6478_v40 = vld [vmem:[#allocation9 + $0x88] sm:$0xf0]  ;;  %v7920_v44 = vld [vmem:[#allocation9 + $0x4f4] sm:$0xf0] }
 0x3bc   :  { %2367 = vmatpush.bf16.msra.mxu3 %v6465_v34  ;;  %2317 = vmatpush.bf16.msrb.mxu0 %v6413_v16  ;;  %v7801_v34 = vld [vmem:[#allocation9 + $0x144] sm:$0xf]  ;;  %v6433_v16 = vor.u32 %v7765_v57, %v6430_v61  ;;  %v6553_v46 = vor.u32 %v7795_v1, %v6550_v58  ;;  %v6542_v61 = vld [vmem:[#allocation9 + $0x108] sm:$0xf0]  ;;  %v6662_v59 = vld [vmem:[#allocation9 + $0x3b0] sm:$0xf] }
 0x3bd   :  { %v7924_v0 = vld [vmem:[#allocation9 + $0x514] sm:$0xf0]  ;;  %v6654_v12 = vld [vmem:[#allocation9 + $0x3a0] sm:$0xf]  ;;  %v7922_v58 = vld [vmem:[#allocation9 + $0x504] sm:$0xf0] }
 0x3be   :  { %2344 = vmatpush.bf16.msra.mxu2 %v6549_v52  ;;  %v6505_v52 = vor.u32 %v7783_v11, %v6502_v13  ;;  %v6670_v11 = vld [vmem:[#allocation9 + $0x3c0] sm:$0xf]  ;;  %v7882_v13 = vld [vmem:[#allocation9 + $0x3c4] sm:$0xf0]  ;;  %v2423_v4 = vld [vmem:[#allocation3 + $0x8] sm:$0xf0] }
 0x3bf   :  { %2331 = vmatpush.bf16.msra.mxu1 %v6477_v20  ;;  %2318 = vmatmul.bf16.vlgmr.msrb.gmra.mxu0 %v9193_v18  ;;  %v7781_v20 = vld [vmem:[#allocation9 + $0xa4] sm:$0xf]  ;;  %v6830_v1 = vld [vmem:[#allocation9 + $0x500] sm:$0xf]  ;;  %v2431_v8 = vld [vmem:[#allocation3 + $0x48] sm:$0x3] }
 0x3c0   :  { %2380 = vmatpush.bf16.msra.mxu0 %v6537_v21  ;;  %2368 = vmatpush.bf16.msra.mxu3 %v6457_v51  ;;  %v6577_v21 = vor.u32 %v7801_v34, %v6574_v7  ;;  %v6494_v51 = vld [vmem:[#allocation9 + $0xa8] sm:$0xf0]  ;;  %v6854_v34 = vld [vmem:[#allocation9 + $0x530] sm:$0xf]  ;;  %v7928_v7 = vld [vmem:[#allocation9 + $0x534] sm:$0xf0] }
 0x3c1   :  { %v6497_v17 = vor.u32 %v7781_v20, %v6494_v51  ;;  %v7916_v20 = vld [vmem:[#allocation9 + $0x4d4] sm:$0xf0]  ;;  %v6735_v51 = vor.u32 %v7898_v10, %v6734_v24  ;;  %v6702_v24 = vld [vmem:[#allocation9 + $0x400] sm:$0xf]  ;;  %v7890_v10 = vld [vmem:[#allocation9 + $0x404] sm:$0xf0] }
 0x3c2   :  { %2332 = vmatmul.bf16.vlgmr.msra.gmra.mxu1 %v9196_v27  ;;  %2345 = vmatpush.bf16.msra.mxu2 %v6541_v31  ;;  %v7886_v31 = vld [vmem:[#allocation9 + $0x3e4] sm:$0xf0] }
 0x3c3   :  { %2394 = vmatpush.bf16.msrb.mxu1 %v6601_v50  ;;  %v6695_v50 = vor.u32 %v7888_v56, %v6694_v15  ;;  %v6687_v26 = vor.u32 %v7886_v31, %v6686_v45  ;;  %v7880_v15 = vld [vmem:[#allocation9 + $0x3b4] sm:$0xf0]  ;;  %v6806_v56 = vld [vmem:[#allocation9 + $0x4d0] sm:$0xf]  ;;  %v2425_v31 = vld [vmem:[#allocation3 + $0x18] sm:$0xf0] }
 0x3c4   :  { %2381 = vmatpush.bf16.msra.mxu0 %v6529_v36  ;;  %2369 = vmatpush.bf16.msra.mxu3 %v6449_v23  ;;  %v6758_v36 = vld [vmem:[#allocation9 + $0x470] sm:$0xf]  ;;  %v6561_v23 = vor.u32 %v7797_v60, %v6558_v30  ;;  %v7896_v60 = vld [vmem:[#allocation9 + $0x434] sm:$0xf0] }
 0x3c5   :  { %2346 = vmatmul.bf16.vlgmr.msra.gmra.mxu2 %v9199_v47  ;;  %v6838_v30 = vld [vmem:[#allocation9 + $0x510] sm:$0xf] }
 0x3c6   :  { %2412 = vmatpush.bf16.msrb.mxu2 %v6633_v25  ;;  %6634 = vmatmul.msk.bf16.vlgmr.msrb.gmra.mxu3 %vm907_vm3, %v9201_v63  ;;  %v6759_v25 = vor.u32 %v7904_v48, %v6758_v36  ;;  %v6798_v36 = vld [vmem:[#allocation9 + $0x4c0] sm:$0xf]  ;;  %v7914_v48 = vld [vmem:[#allocation9 + $0x4c4] sm:$0xf0] }
 0x3c7   :  { %2395 = vmatpush.bf16.msrb.mxu1 %v6593_v32  ;;  %v6489_v32 = vor.u32 %v7779_v2, %v6486_v29  ;;  %v6718_v2 = vld [vmem:[#allocation9 + $0x420] sm:$0xf]  ;;  %v7894_v29 = vld [vmem:[#allocation9 + $0x424] sm:$0xf0] }
 0x3c8   :  { %2382 = vmatpush.bf16.msra.mxu0 %v6521_v39  ;;  %2370 = vmatpush.bf16.msra.mxu3 %v6441_v53  ;;  %v7884_v39 = vld [vmem:[#allocation9 + $0x3d4] sm:$0xf0]  ;;  %v6751_v53 = vor.u32 %v7902_v37, %v6750_v33  ;;  %v6646_v33 = vld [vmem:[#allocation9 + $0x390] sm:$0xf] }
 0x3c9   :  { %v6679_v57 = vor.u32 %v7884_v39, %v6678_v38  ;;  %v7876_v37 = vld [vmem:[#allocation9 + $0x394] sm:$0xf0]  ;;  %v6719_v38 = vor.u32 %v7894_v29, %v6718_v2  ;;  %v6790_v39 = vld [vmem:[#allocation9 + $0x4b0] sm:$0xf]  ;;  %v7917_v29 = vld [vmem:[#allocation9 + $0x4e4] sm:$0xf] }
 0x3ca   :  { %2413 = vmatpush.bf16.msrb.mxu2 %v6625_v54  ;;  %v7793_v54 = vld [vmem:[#allocation9 + $0x104] sm:$0xf] }
 0x3cb   :  { %2396 = vmatpush.bf16.msrb.mxu1 %v6585_v62  ;;  %v6481_v62 = vor.u32 %v7777_v41, %v6478_v40  ;;  %v6545_v19 = vor.u32 %v7793_v54, %v6542_v61  ;;  %v7912_v41 = vld [vmem:[#allocation9 + $0x4b4] sm:$0xf0]  ;;  %v2430_v40 = vld [vmem:[#allocation3 + $0x40] sm:$0x3] }
 0x3cc   :  { %2383 = vmatpush.bf16.msra.mxu0 %v6513_v35  ;;  %2371 = vmatpush.bf16.msra.mxu3 %v6433_v16  ;;  %v6823_v35 = vor.u32 %v7920_v44, %v6822_v42  ;;  %v6814_v16 = vld [vmem:[#allocation9 + $0x4e0] sm:$0xf]  ;;  %v6831_v42 = vor.u32 %v7922_v58, %v6830_v1  ;;  %v6710_v44 = vld [vmem:[#allocation9 + $0x410] sm:$0xf]  ;;  %v7881_v1 = vld [vmem:[#allocation9 + $0x3c4] sm:$0xf] }
 0x3cd   :  { %v6672_v58 = vld [vmem:[#allocation9 + $0x3c8] sm:$0xf0] }
 0x3ce   :  { %2414 = vmatpush.bf16.msrb.mxu2 %v6617_v49  ;;  %v7918_v49 = vld [vmem:[#allocation9 + $0x4e4] sm:$0xf0] }
 0x3cf   :  { %2397 = vmatpush.bf16.msrb.mxu1 %v6577_v21  ;;  %v6855_v21 = vor.u32 %v7928_v7, %v6854_v34  ;;  %v6815_v6 = vor.u32 %v7918_v49, %v6814_v16  ;;  %v6688_v34 = vld [vmem:[#allocation9 + $0x3e8] sm:$0xf0]  ;;  %v6638_v7 = vld [vmem:[#allocation9 + $0x380] sm:$0xf]  ;;  %v2438_v16 = vpack.c.bf16 %v2430_v40, %v2430_v40 }
 0x3d0   :  { %2384 = vmatpush.bf16.msra.mxu0 %v6505_v52  ;;  %2372 = vmatpush.bf16.msra.mxu3 %v6425_v5  ;;  %v7926_v52 = vld [vmem:[#allocation9 + $0x524] sm:$0xf0] }
 0x3d2   :  { %2415 = vmatpush.bf16.msrb.mxu2 %v6609_v3  ;;  %v6726_v3 = vld [vmem:[#allocation9 + $0x430] sm:$0xf] }
 0x3d3   :  { %2398 = vmatpush.bf16.msrb.mxu1 %v6569_v28  ;;  %v6663_v28 = vor.u32 %v7880_v15, %v6662_v59  ;;  %v6727_v45 = vor.u32 %v7896_v60, %v6726_v3  ;;  %v7883_v3 = vld [vmem:[#allocation9 + $0x3d4] sm:$0xf]  ;;  %v6680_v60 = vld [vmem:[#allocation9 + $0x3d8] sm:$0xf0] }
 0x3d4   :  { %2385 = vmatpush.bf16.msra.mxu0 %v6497_v17  ;;  %2373 = vmatpush.bf16.msra.mxu3 %v6417_v14  ;;  %v7878_v17 = vld [vmem:[#allocation9 + $0x3a4] sm:$0xf0]  ;;  %v6683_v2 = vor.u32 %v7883_v3, %v6680_v60  ;;  %v7875_v60 = vld [vmem:[#allocation9 + $0x394] sm:$0xf] }
 0x3d5   :  { %6635 = vmatmul.msk.bf16.vlgmr.msrb.gmra.mxu2 %vm907_vm3, %v9201_v63  ;;  %v6846_v63 = vld [vmem:[#allocation9 + $0x520] sm:$0xf]  ;;  %v2433_v14 = vld [vmem:[#allocation3 + $0x58] sm:$0x3] }
 0x3d6   :  { %2806 = vmatpush.bf16.msra.mxu2 %v6695_v50  ;;  %v6847_v5 = vor.u32 %v7926_v52, %v6846_v63  ;;  %v6807_v50 = vor.u32 %v7916_v20, %v6806_v56  ;;  %v2441_v61 = vpack.c.bf16 %v2433_v14, %v2433_v14  ;;  %v6824_v56 = vld [vmem:[#allocation9 + $0x4f8] sm:$0xf0]  ;;  %v6816_v14 = vld [vmem:[#allocation9 + $0x4e8] sm:$0xf0] }
 0x3d7   :  { %2399 = vmatpush.bf16.msrb.mxu1 %v6561_v23  ;;  %2374 = vmatmul.bf16.vlgmr.msra.gmra.mxu3 %v9193_v18  ;;  %v6671_v18 = vor.u32 %v7882_v13, %v6670_v11  ;;  %v6655_v23 = vor.u32 %v7878_v17, %v6654_v12  ;;  %v7874_v11 = vld [vmem:[#allocation9 + $0x384] sm:$0xf0]  ;;  %v2428_v12 = vld [vmem:[#allocation3 + $0x30] sm:$0xff] }
 0x3d8   :  { %2820 = vmatpush.bf16.msrb.mxu3 %v6759_v25  ;;  %2386 = vmatpush.bf16.msra.mxu0 %v6489_v32  ;;  %v6799_v25 = vor.u32 %v7914_v48, %v6798_v36  ;;  %v2422_v32 = vld [vmem:[#allocation3] sm:$0xf0]  ;;  %v6639_v52 = vor.u32 %v7874_v11, %v6638_v7  ;;  %v2518_v15 = vrot.slane %v2441_v61, 2 }
 0x3d9   :  { %v2434_v13 = vpack.c.bf16 %v9163_v55, %v2422_v32  ;;  %v7919_v55 = vld [vmem:[#allocation9 + $0x4f4] sm:$0xf] }
 0x3da   :  { %2807 = vmatpush.bf16.msra.mxu2 %v6687_v26  ;;  %v7887_v26 = vld [vmem:[#allocation9 + $0x3f4] sm:$0xf]  ;;  %v6827_v17 = vor.u32 %v7919_v55, %v6824_v56 }
 0x3db   :  { %2400 = vmatpush.bf16.msrb.mxu1 %v6553_v46  ;;  %v7892_v46 = vld [vmem:[#allocation9 + $0x414] sm:$0xf0]  ;;  %v7879_v61 = vld [vmem:[#allocation9 + $0x3b4] sm:$0xf] }
 0x3dc   :  { %2821 = vmatpush.bf16.msrb.mxu3 %v6751_v53  ;;  %2387 = vmatpush.bf16.msra.mxu0 %v6481_v62  ;;  %v2437_v53 = vpack.c.bf16 %v9172_v43, %v2425_v31  ;;  %v7885_v62 = vld [vmem:[#allocation9 + $0x3e4] sm:$0xf]  ;;  %v6711_v49 = vor.u32 %v7892_v46, %v6710_v44  ;;  %v6782_v43 = vld [vmem:[#allocation9 + $0x4a0] sm:$0xf]  ;;  %v7908_v31 = vld [vmem:[#allocation9 + $0x494] sm:$0xf0]  ;;  %v6675_v46 = vor.u32 %v7881_v1, %v6672_v58 }
 0x3dd   :  { %v6691_v63 = vor.u32 %v7885_v62, %v6688_v34  ;;  %v6736_v34 = vld [vmem:[#allocation9 + $0x448] sm:$0xf0] }
 0x3de   :  { %2808 = vmatpush.bf16.msra.mxu2 %v6679_v57  ;;  %v6647_v57 = vor.u32 %v7876_v37, %v6646_v33  ;;  %v2517_v59 = vrot.slane %v2437_v53, 2  ;;  %v6744_v33 = vld [vmem:[#allocation9 + $0x458] sm:$0xf0]  ;;  %v6819_v37 = vor.u32 %v7917_v29, %v6816_v14  ;;  %v6640_v29 = vld [vmem:[#allocation9 + $0x388] sm:$0xf0] }
 0x3df   :  { %2401 = vmatpush.bf16.msrb.mxu1 %v6545_v19  ;;  %2388 = vmatmul.bf16.vlgmr.msra.gmra.mxu0 %v9196_v27  ;;  %v6839_v27 = vor.u32 %v7924_v0, %v6838_v30  ;;  %v7903_v19 = vld [vmem:[#allocation9 + $0x474] sm:$0xf]  ;;  %v7901_v30 = vld [vmem:[#allocation9 + $0x464] sm:$0xf]  ;;  %v6808_v53 = vld [vmem:[#allocation9 + $0x4d8] sm:$0xf0] }
 0x3e0   :  { %2834 = vmatpush.bf16.msrb.mxu0 %v6823_v35  ;;  %2822 = vmatpush.bf16.msrb.mxu3 %v6743_v9  ;;  %v6791_v35 = vor.u32 %v7912_v41, %v6790_v39  ;;  %v6760_v9 = vld [vmem:[#allocation9 + $0x478] sm:$0xf0]  ;;  %v2424_v0 = vld [vmem:[#allocation3 + $0x10] sm:$0xf0]  ;;  %v7906_v39 = vld [vmem:[#allocation9 + $0x484] sm:$0xf0] }
 0x3e1   :  { %v6763_v20 = vor.u32 %v7903_v19, %v6760_v9  ;;  %v7915_v41 = vld [vmem:[#allocation9 + $0x4d4] sm:$0xf]  ;;  %v2436_v40 = vpack.c.bf16 %v2428_v12, %v2424_v0  ;;  %v6800_v9 = vld [vmem:[#allocation9 + $0x4c8] sm:$0xf0]  ;;  %v7909_v12 = vld [vmem:[#allocation9 + $0x4a4] sm:$0xf] }
 0x3e2   :  { %2809 = vmatpush.bf16.msra.mxu2 %v6671_v18  ;;  %2402 = vmatmul.bf16.vlgmr.msrb.gmra.mxu1 %v9199_v47  ;;  %v6696_v47 = vld [vmem:[#allocation9 + $0x3f8] sm:$0xf0]  ;;  %v2435_v18 = vpack.c.bf16 %v9166_v22, %v2423_v4  ;;  %v6752_v22 = vld [vmem:[#allocation9 + $0x468] sm:$0xf0]  ;;  %v6811_v7 = vor.u32 %v7915_v41, %v6808_v53  ;;  %v7891_v14 = vld [vmem:[#allocation9 + $0x414] sm:$0xf] }
 0x3e3   :  { %2852 = vmatpush.bf16.msra.mxu1 %v6855_v21  ;;  %v6699_v54 = vor.u32 %v7887_v26, %v6696_v47  ;;  %v7910_v21 = vld [vmem:[#allocation9 + $0x4a4] sm:$0xf0]  ;;  %v7899_v47 = vld [vmem:[#allocation9 + $0x454] sm:$0xf]  ;;  %v6664_v4 = vld [vmem:[#allocation9 + $0x3b8] sm:$0xf0] }
 0x3e4   :  { %2835 = vmatpush.bf16.msrb.mxu0 %v6815_v6  ;;  %2823 = vmatpush.bf16.msrb.mxu3 %v6735_v51  ;;  %v2439_v6 = vpack.c.bf16 %v2431_v8, %v2431_v8  ;;  %v2508_v51 = vrot.slane %v2434_v13, 2  ;;  %v2511_v36 = vrot.slane %v2435_v18, 2  ;;  %v6747_v62 = vor.u32 %v7899_v47, %v6744_v33  ;;  %v6656_v18 = vld [vmem:[#allocation9 + $0x3a8] sm:$0xf0]  ;;  %v6776_v47 = vld [vmem:[#allocation9 + $0x498] sm:$0xf0] }
 0x3e5   :  { %v2514_v11 = vrot.slane %v2436_v40, 2  ;;  %v6667_v19 = vor.u32 %v7879_v61, %v6664_v4  ;;  %v7905_v41 = vld [vmem:[#allocation9 + $0x484] sm:$0xf]  ;;  %v6768_v40 = vld [vmem:[#allocation9 + $0x488] sm:$0xf0] }
 0x3e6   :  { %2810 = vmatpush.bf16.msra.mxu2 %v6663_v28  ;;  %v6783_v28 = vor.u32 %v7910_v21, %v6782_v43  ;;  %v2512_v48 = vrot.slane %v2439_v6, 2  ;;  %v7925_v43 = vld [vmem:[#allocation9 + $0x524] sm:$0xf]  ;;  %v6848_v21 = vld [vmem:[#allocation9 + $0x528] sm:$0xf0] }
 0x3e7   :  { %2853 = vmatpush.bf16.msra.mxu1 %v6847_v5  ;;  %v2509_v5 = vrot.slane %v2438_v16, 2  ;;  %v7895_v6 = vld [vmem:[#allocation9 + $0x434] sm:$0xf] }
 0x3e8   :  { %2836 = vmatpush.bf16.msrb.mxu0 %v6807_v50  ;;  %2824 = vmatpush.bf16.msrb.mxu3 %v6727_v45  ;;  %v6703_v50 = vor.u32 %v7890_v10, %v6702_v24  ;;  %v6774_v45 = vld [vmem:[#allocation9 + $0x490] sm:$0xf]  ;;  %v9224_v44 = vsel %vm882_vm6, %v2511_v36, %v2512_v48  ;;  %v7877_v10 = vld [vmem:[#allocation9 + $0x3a4] sm:$0xf]  ;;  %v6784_v36 = vld [vmem:[#allocation9 + $0x4a8] sm:$0xf0] }
 0x3e9   :  { %v9220_v26 = vsel %vm882_vm6, %v2508_v51, %v2509_v5  ;;  %v6775_v32 = vor.u32 %v7908_v31, %v6774_v45  ;;  %v6659_v56 = vor.u32 %v7877_v10, %v6656_v18  ;;  %v7923_v51 = vld [vmem:[#allocation9 + $0x514] sm:$0xf]  ;;  %v6840_v5 = vld [vmem:[#allocation9 + $0x518] sm:$0xf0]  ;;  %v7921_v48 = vld [vmem:[#allocation9 + $0x504] sm:$0xf] }
 0x3ea   :  { %2811 = vmatpush.bf16.msra.mxu2 %v6655_v23  ;;  %v2432_v23 = vld [vmem:[#allocation3 + $0x50] sm:$0x3]  ;;  %v6843_v0 = vor.u32 %v7923_v51, %v6840_v5  ;;  %v6832_v45 = vld [vmem:[#allocation9 + $0x508] sm:$0xf0] }
 0x3eb   :  { %2854 = vmatpush.bf16.msra.mxu1 %v6839_v27  ;;  %v9215_v27 = vsel %vm882_vm6, %v2517_v59, %v2518_v15  ;;  %v6851_v59 = vor.u32 %v7925_v43, %v6848_v21  ;;  %v7911_v15 = vld [vmem:[#allocation9 + $0x4b4] sm:$0xf]  ;;  %v6835_v1 = vor.u32 %v7921_v48, %v6832_v45  ;;  %v9304_v45 = vld [vmem:[%s10878_s12 + $0x48] sm:$0xff] }
 0x3ec   :  { %2837 = vmatpush.bf16.msrb.mxu0 %v6799_v25  ;;  %2825 = vmatpush.bf16.msrb.mxu3 %v6719_v38  ;;  %v6755_v25 = vor.u32 %v7901_v30, %v6752_v22  ;;  %v6766_v38 = vld [vmem:[#allocation9 + $0x480] sm:$0xf]  ;;  %v6720_v30 = vld [vmem:[#allocation9 + $0x428] sm:$0xf0] }
 0x3ed   :  { %v6767_v8 = vor.u32 %v7906_v39, %v6766_v38  ;;  %v6704_v38 = vld [vmem:[#allocation9 + $0x408] sm:$0xf0] }
 0x3ee   :  { %2812 = vmatpush.bf16.msra.mxu2 %v6647_v57  ;;  %v6856_v57 = vld [vmem:[#allocation9 + $0x538] sm:$0xf0] }
 0x3ef   :  { %2855 = vmatpush.bf16.msra.mxu1 %v6831_v42  ;;  %v2440_v42 = vpack.c.bf16 %v2432_v23, %v2432_v23  ;;  %v6712_v23 = vld [vmem:[#allocation9 + $0x418] sm:$0xf0] }
 0x3f0   :  { %2838 = vmatpush.bf16.msrb.mxu0 %v6791_v35  ;;  %2826 = vmatpush.bf16.msrb.mxu3 %v6711_v49  ;;  %v7897_v35 = vld [vmem:[#allocation9 + $0x444] sm:$0xf]  ;;  %v6715_v33 = vor.u32 %v7891_v14, %v6712_v23 }
 0x3f1   :  { %v2515_v13 = vrot.slane %v2440_v42, 2  ;;  %v7913_v49 = vld [vmem:[#allocation9 + $0x4c4] sm:$0xf]  ;;  %v6739_v24 = vor.u32 %v7897_v35, %v6736_v34 }
 0x3f2   :  { %2813 = vmatpush.bf16.msra.mxu2 %v6639_v52  ;;  %6860 = vmatmul.msk.bf16.vlgmr.msra.gmra.mxu1 %vm907_vm3, %v9215_v27  ;;  %v6803_v52 = vor.u32 %v7913_v49, %v6800_v9 }
 0x3f3   :  { %2862 = vmatpush.bf16.msrb.mxu1 %v6699_v54  ;;  %v7927_v54 = vld [vmem:[#allocation9 + $0x534] sm:$0xf]  ;;  %v2516_v55 = vsel %vm882_vm6, %v2514_v11, %v2515_v13 }
 0x3f4   :  { %2839 = vmatpush.bf16.msrb.mxu0 %v6783_v28  ;;  %2827 = vmatpush.bf16.msrb.mxu3 %v6703_v50  ;;  %v6859_v16 = vor.u32 %v7927_v54, %v6856_v57  ;;  %v6648_v28 = vld [vmem:[#allocation9 + $0x398] sm:$0xf0]  ;;  %v7893_v50 = vld [vmem:[#allocation9 + $0x424] sm:$0xf] }
 0x3f5   :  { %2814 = vmatmul.bf16.vlgmr.msra.gmra.mxu2 %v9220_v26  ;;  %v6723_v31 = vor.u32 %v7893_v50, %v6720_v30 }
 0x3f6   :  { %2876 = vmatpush.bf16.msrb.mxu2 %v6763_v20  ;;  %v6792_v20 = vld [vmem:[#allocation9 + $0x4b8] sm:$0xf0] }
 0x3f7   :  { %2863 = vmatpush.bf16.msrb.mxu1 %v6691_v63  ;;  %2828 = vmatmul.bf16.vlgmr.msrb.gmra.mxu3 %v9224_v44  ;;  %v6728_v63 = vld [vmem:[#allocation9 + $0x438] sm:$0xf0]  ;;  %v6795_v22 = vor.u32 %v7911_v15, %v6792_v20 }
 0x3f8   :  { %2890 = vmatpush.bf16.msra.mxu3 %v6827_v17  ;;  %2840 = vmatpush.bf16.msrb.mxu0 %v6775_v32  ;;  %v6731_v3 = vor.u32 %v7895_v6, %v6728_v63  ;;  %v6651_v17 = vor.u32 %v7875_v60, %v6648_v28  ;;  %v7907_v32 = vld [vmem:[#allocation9 + $0x494] sm:$0xf] }
 0x3f9   :  { %v6779_v39 = vor.u32 %v7907_v32, %v6776_v47  ;;  %v9319_v32 = vld [vmem:[#allocation4] sm:$0xff] }
 0x3fa   :  { %2877 = vmatpush.bf16.msrb.mxu2 %v6755_v25  ;;  %v6787_v25 = vor.u32 %v7909_v12, %v6784_v36  ;;  %v9298_v12 = vld [vmem:[%s10878_s12 + $0x50] sm:$0xff]  ;;  %3253 = vst.msk [vmem:[#allocation4 + $0x8] sm:$0xff] %vm2966_vm13, %v9319_v32 }
 0x3fb   :  { %2864 = vmatpush.bf16.msrb.mxu1 %v6683_v2  ;;  %v7873_v2 = vld [vmem:[#allocation9 + $0x384] sm:$0xf]  ;;  %3255 = vst.msk [vmem:[#allocation4 + $0x18] sm:$0xff] %vm2966_vm13, %v9319_v32 }
 0x3fc   :  { %2891 = vmatpush.bf16.msra.mxu3 %v6819_v37  ;;  %2841 = vmatpush.bf16.msrb.mxu0 %v6767_v8  ;;  %v6643_v58 = vor.u32 %v7873_v2, %v6640_v29  ;;  %v7889_v37 = vld [vmem:[#allocation9 + $0x404] sm:$0xf]  ;;  %v9310_v2 = vld [vmem:[%s10878_s12 + $0x40] sm:$0xff]  ;;  %3257 = vst.msk [vmem:[#allocation4 + $0x28] sm:$0xff] %vm2966_vm13, %v9319_v32 }
 0x3fd   :  { %v6707_v42 = vor.u32 %v7889_v37, %v6704_v38  ;;  %v9326_v37 = vld [vmem:[%s10878_s12 + $0x30] sm:$0xff]  ;;  %v9333_v38 = vld [vmem:[%s10878_s12 + $0xd8] sm:$0xff]  ;;  %3259 = vst.msk [vmem:[#allocation4 + $0x38] sm:$0xff] %vm2966_vm13, %v9319_v32 }
 0x3fe   :  { %2878 = vmatpush.bf16.msrb.mxu2 %v6747_v62  ;;  %4767 = vst.msk [vmem:[#allocation5 + $0x8] sm:$0xff] %vm2966_vm13, %v9319_v32 }
 0x3ff   :  { %2865 = vmatpush.bf16.msrb.mxu1 %v6675_v46  ;;  %2842 = vmatmul.bf16.vlgmr.msrb.gmra.mxu0 %v2516_v55  ;;  %v6771_v46 = vor.u32 %v7905_v41, %v6768_v40  ;;  %4769 = vst.msk [vmem:[#allocation5 + $0x18] sm:$0xff] %vm2966_vm13, %v9319_v32 }
 0x400   :  { %2892 = vmatpush.bf16.msra.mxu3 %v6811_v7  ;;  %2908 = vmatpush.bf16.msra.mxu0 %v6859_v16  ;;  %4771 = vst.msk [vmem:[#allocation5 + $0x28] sm:$0xff] %vm2966_vm13, %v9319_v32 }
 0x401   :  { %4773 = vst.msk [vmem:[#allocation5 + $0x38] sm:$0xff] %vm2966_vm13, %v9319_v32 }
 0x402   :  { %2879 = vmatpush.bf16.msrb.mxu2 %v6739_v24  ;;  %3262 = vst.msk [vmem:[#allocation4 + $0x48] sm:$0x3] %vm3261_vm4, %v9319_v32 }
 0x403   :  { %2866 = vmatpush.bf16.msrb.mxu1 %v6667_v19 }
 0x404   :  { %2893 = vmatpush.bf16.msra.mxu3 %v6803_v52  ;;  %2909 = vmatpush.bf16.msra.mxu0 %v6851_v59  ;;  %v9253_v52 = vld [vmem:[%s10878_s12 + $0x78] sm:$0xff]  ;;  %v9258_v59 = vld [vmem:[%s10878_s12 + $0x70] sm:$0xff] }
 0x406   :  { %2880 = vmatpush.bf16.msrb.mxu2 %v6731_v3 }
 0x407   :  { %2867 = vmatpush.bf16.msrb.mxu1 %v6659_v56  ;;  %v9270_v56 = vld [vmem:[%s10878_s12 + $0x60] sm:$0xff] }
 0x408   :  { %2894 = vmatpush.bf16.msra.mxu3 %v6795_v22  ;;  %2910 = vmatpush.bf16.msra.mxu0 %v6843_v0  ;;  %v9293_v0 = vld [vmem:[%s10878_s12 + $0x58] sm:$0xff] }
 0x40a   :  { %2881 = vmatpush.bf16.msrb.mxu2 %v6723_v31 }
 0x40b   :  { %2868 = vmatpush.bf16.msrb.mxu1 %v6651_v17 }
 0x40c   :  { %2895 = vmatpush.bf16.msra.mxu3 %v6787_v25  ;;  %2911 = vmatpush.bf16.msra.mxu0 %v6835_v1  ;;  %v9316_v1 = vld [vmem:[%s10878_s12 + $0x38] sm:$0xff] }
 0x40e   :  { %2882 = vmatpush.bf16.msrb.mxu2 %v6715_v33 }
 0x40f   :  { %2869 = vmatpush.bf16.msrb.mxu1 %v6643_v58  ;;  %6861 = vmatmul.msk.bf16.vlgmr.msra.gmra.mxu0 %vm907_vm3, %v9215_v27 }
 0x410   :  { %2896 = vmatpush.bf16.msra.mxu3 %v6779_v39  ;;  %2980 = vmatpush.msrb.mxu0 %v9253_v52  ;;  %v9342_v39 = vld [vmem:[%s10878_s12 + $0x28] sm:$0xff] }
 0x412   :  { %2870 = vmatmul.bf16.vlgmr.msrb.gmra.mxu1 %v9220_v26  ;;  %2883 = vmatpush.bf16.msrb.mxu2 %v6707_v42 }
 0x413   :  { %2981 = vmatpush.msrb.mxu0 %v9258_v59  ;;  %3004 = vmatpush.msra.mxu1 %v9333_v38 }
 0x414   :  { %2897 = vmatpush.bf16.msra.mxu3 %v6771_v46 }
 0x415   :  { %2884 = vmatmul.bf16.vlgmr.msrb.gmra.mxu2 %v9224_v44 }
 0x417   :  { %2898 = vmatmul.bf16.vlgmr.msra.gmra.mxu3 %v2516_v55  ;;  %v9264_v55 = vld [vmem:[%s10878_s12 + $0x68] sm:$0xff] }
 0x418   :  { %2982 = vmatpush.msrb.mxu0 %v9264_v55 }
 0x41a   :  { %2983 = vmatpush.msrb.mxu0 %v9270_v56 }
 0x41c   :  { %v1952_v61 = vpop.f32.mrf.mxu0  ;;  %2984 = vmatpush.msrb.mxu0 %v9293_v0 }
 0x41e   :  { %2985 = vmatpush.msrb.mxu0 %v9298_v12 }
 0x41f   :  { %v1966_v53 = vpop.f32.mrf.mxu1 }
 0x420   :  { %2986 = vmatpush.msrb.mxu0 %v9304_v45 }
 0x422   :  { %2987 = vmatpush.msrb.mxu0 %v9310_v2 }
 0x424   :  { %v1954_v34 = vpop.f32.mrf.mxu0  ;;  %2988 = vmatpush.msrb.mxu0 %v9316_v1 }
 0x426   :  { %2989 = vmatpush.msrb.mxu0 %v9326_v37 }
 0x427   :  { %v1924_v54 = vpop.f32.mrf.mxu2  ;;  %v1968_v4 = vpop.f32.mrf.mxu1 }
 0x428   :  { %2990 = vmatpush.msrb.mxu0 %v9342_v39 }
 0x429   :  { %v1938_v57 = vpop.f32.mrf.mxu3 }
 0x42a   :  { %v1939_v62 = vadd.f32 %v1938_v57, %v1924_v54  ;;  %v9352_v54 = vld [vmem:[%s10878_s12 + $0x20] sm:$0xff] }
 0x42b   :  { %2991 = vmatpush.msrb.mxu0 %v9352_v54 }
 0x42c   :  { %v9234_v27 = vpop.f32.mrf.mxu0  ;;  %v1953_v36 = vadd.f32 %v1952_v61, %v1939_v62 }
 0x42e   :  { %v1967_v14 = vadd.f32 %v1966_v53, %v1953_v36 }
 0x42f   :  { %v1926_v8 = vpop.f32.mrf.mxu2  ;;  %v1980_v26 = vpop.f32.mrf.mxu1 }
 0x431   :  { %v1940_v35 = vpop.f32.mrf.mxu3 }
 0x432   :  { %v1941_v30 = vadd.f32 %v1940_v35, %v1926_v8  ;;  %v9363_v8 = vld [vmem:[%s10878_s12 + $0x18] sm:$0xff] }
 0x433   :  { %2992 = vmatpush.msrb.mxu0 %v9363_v8 }
 0x434   :  { %v9242_v9 = vpop.f32.mrf.mxu0  ;;  %v1955_v17 = vadd.f32 %v1954_v34, %v1941_v30 }
 0x436   :  { %v1969_v29 = vadd.f32 %v1968_v4, %v1955_v17 }
 0x437   :  { %v9240_v19 = vpop.f32.mrf.mxu1 }
 0x438   :  { %v1994_v7 = vpop.f32.mrf.mxu2 }
 0x439   :  { %v1995_v11 = vadd.f32 %v1994_v7, %v1980_v26  ;;  %v2008_v13 = vpop.f32.mrf.mxu3  ;;  %v9371_v7 = vld [vmem:[%s10878_s12 + $0x10] sm:$0xff] }
 0x43a   :  { %2993 = vmatpush.msrb.mxu0 %v9371_v7 }
 0x43b   :  { %v9232_v16 = vadd.f32 %v2008_v13, %v1995_v11 }
 0x43c   :  { %v2319_v10 = vpop.f32.mrf.mxu0 }
 0x43d   :  { %v2320_v47 = vadd.f32 %v2319_v10, %v1967_v14  ;;  %v9404_v14 = vld [vmem:[%s10878_s12 + $0xd0] sm:$0xff] }
 0x43e   :  { %3005 = vmatpush.msra.mxu1 %v9404_v14 }
 0x43f   :  { %v2333_v24 = vpop.f32.mrf.mxu1 }
 0x440   :  { %v9236_v49 = vpop.f32.mrf.mxu2  ;;  %v2334_v40 = vadd.f32 %v2333_v24, %v2320_v47  ;;  %v9379_v24 = vld [vmem:[%s10878_s12 + $0x8] sm:$0xff] }
 0x441   :  { %v9238_v44 = vpop.f32.mrf.mxu3  ;;  %2994 = vmatpush.msrb.mxu0 %v9379_v24 }
 0x444   :  { %v2321_v15 = vpop.f32.mrf.mxu0 }
 0x445   :  { %v2322_v58 = vadd.f32 %v2321_v15, %v1969_v29 }
 0x447   :  { %v2335_v63 = vpop.f32.mrf.mxu1 }
 0x448   :  { %v9244_v43 = vpop.f32.mrf.mxu2  ;;  %v2336_v41 = vadd.f32 %v2335_v63, %v2322_v58 }
 0x449   :  { %v9246_v21 = vpop.f32.mrf.mxu3  ;;  %v2348_v61 = vadd.f32 %v9244_v43, %v2334_v40 }
 0x44b   :  { %v2362_v43 = vadd.f32 %v9246_v21, %v2348_v61  ;;  %v1997_v21 = vadd.f32 %v9236_v49, %v9240_v19  ;;  %v9409_v49 = vld [vmem:[%s10878_s12 + $0xc8] sm:$0xff]  ;;  %v9445_v61 = vld [vmem:[%s10878_s12 + $0xa0] sm:$0xff] }
 0x44c   :  { %3006 = vmatpush.msra.mxu1 %v9409_v49 }
 0x44d   :  { %v2011_v17 = vadd.f32 %v9238_v44, %v1997_v21 }
 0x44f   :  { %v2025_v44 = vadd.f32 %v9242_v9, %v2011_v17  ;;  %v9424_v9 = vld [vmem:[%s10878_s12 + $0xb8] sm:$0xff] }
 0x450   :  { %v2349_v18 = vpop.f32.mrf.mxu2 }
 0x451   :  { %v9248_v6 = vpop.f32.mrf.mxu3  ;;  %v2350_v57 = vadd.f32 %v2349_v18, %v2336_v41 }
 0x453   :  { %v2364_v11 = vadd.f32 %v9248_v6, %v2350_v57  ;;  %v9389_v6 = vld [vmem:[%s10878_s12] sm:$0xff] }
 0x454   :  { %2995 = vmatpush.msrb.mxu0 %v9389_v6 }
 0x458   :  { %v9272_v20 = vpop.f32.mrf.mxu2 }
 0x45a   :  { %v9275_v51 = vpop.f32.mrf.mxu3 }
 0x45c   :  { %v9280_v3 = vpop.f32.mrf.mxu0 }
 0x45f   :  { %v9277_v5 = vpop.f32.mrf.mxu1 }
 0x460   :  { %v9282_v60 = vpop.f32.mrf.mxu2 }
 0x462   :  { %v9284_v28 = vpop.f32.mrf.mxu3 }
 0x464   :  { %v9288_v22 = vpop.f32.mrf.mxu0 }
 0x467   :  { %v9286_v50 = vpop.f32.mrf.mxu1 }
 0x46f   :  { %v2857_v23 = vpop.f32.mrf.mxu1 }
 0x477   :  { %v2859_v34 = vpop.f32.mrf.mxu1 }
 0x478   :  { %v2815_v48 = vpop.f32.mrf.mxu2 }
 0x47a   :  { %v2829_v31 = vpop.f32.mrf.mxu3 }
 0x47b   :  { %v2830_v33 = vadd.f32 %v2829_v31, %v2815_v48  ;;  %v2023_v48 = vadd.f32 %v9234_v27, %v9232_v16  ;;  %v9417_v27 = vld [vmem:[%s10878_s12 + $0xc0] sm:$0xff] }
 0x47c   :  { %v2843_v25 = vpop.f32.mrf.mxu0  ;;  %3007 = vmatpush.msra.mxu1 %v9417_v27 }
 0x47d   :  { %v2844_v42 = vadd.f32 %v2843_v25, %v2830_v33  ;;  %v2376_v19 = vadd.f32 %v9275_v51, %v2023_v48  ;;  %v2378_v25 = vadd.f32 %v9284_v28, %v2025_v44  ;;  %v9431_v28 = vld [vmem:[%s10878_s12 + $0xb0] sm:$0xff] }
 0x47e   :  { %3008 = vmatpush.msra.mxu1 %v9424_v9 }
 0x47f   :  { %v2858_v26 = vadd.f32 %v2857_v23, %v2844_v42  ;;  %v2390_v51 = vadd.f32 %v9280_v3, %v2376_v19  ;;  %v2392_v42 = vadd.f32 %v9288_v22, %v2378_v25  ;;  %v2957_v25 = vld [vmem:[%s10879_s13 + $0x38] sm:$0xff] }
 0x480   :  { %v2817_v46 = vpop.f32.mrf.mxu2  ;;  %3009 = vmatpush.msra.mxu1 %v9431_v28  ;;  %3057 = vmatpush.msrb.mxu3 %v2957_v25 }
 0x481   :  { %v9384_v18 = vadd.f32 %v2858_v26, %v2362_v43  ;;  %v2404_v3 = vadd.f32 %v9277_v5, %v2390_v51  ;;  %v2406_v22 = vadd.f32 %v9286_v50, %v2392_v42  ;;  %v9452_v5 = vld [vmem:[%s10878_s12 + $0x98] sm:$0xff]  ;;  %v9459_v50 = vld [vmem:[%s10878_s12 + $0x90] sm:$0xff]  ;;  %3184 = vmatpush.msra.mxu0 %v2957_v25  ;;  %v2950_v51 = vld [vmem:[%s10879_s13] sm:$0xff] }
 0x482   :  { %v2831_v53 = vpop.f32.mrf.mxu3 }
 0x483   :  { %v2832_v62 = vadd.f32 %v2831_v53, %v2817_v46  ;;  %v9438_v53 = vld [vmem:[%s10878_s12 + $0xa8] sm:$0xff]  ;;  %v2418_v26 = vadd.f32 %v9272_v20, %v2404_v3  ;;  %v2420_v43 = vadd.f32 %v9282_v60, %v2406_v22 }
 0x484   :  { %v2845_v4 = vpop.f32.mrf.mxu0  ;;  %3010 = vmatpush.msra.mxu1 %v9438_v53  ;;  %v9468_v20 = vld [vmem:[%s10878_s12 + $0x88] sm:$0xff] }
 0x485   :  { %v2846_v35 = vadd.f32 %v2845_v4, %v2832_v62 }
 0x486   :  { %3011 = vmatpush.msra.mxu1 %v9445_v61 }
 0x487   :  { %v2860_v13 = vadd.f32 %v2859_v34, %v2846_v35 }
 0x488   :  { %3012 = vmatpush.msra.mxu1 %v9452_v5 }
 0x489   :  { %v9381_v10 = vadd.f32 %v2860_v13, %v2364_v11 }
 0x48a   :  { %3013 = vmatpush.msra.mxu1 %v9459_v50 }
 0x48b   :  { %v2958_v63 = vsel %vm882_vm6, %v9381_v10, 0.0 }
 0x48c   :  { %v2959_v15 = vadd.f32 %v2958_v63, %v9384_v18  ;;  %v2913_v33 = vpop.f32.mrf.mxu0  ;;  %3014 = vmatpush.msra.mxu1 %v9468_v20 }
 0x48e   :  { %v2960_v30 = vrot.slane %v2959_v15, 4 }
 0x48f   :  { %v2871_v29 = vpop.f32.mrf.mxu1 }
 0x490   :  { %v2961_v36 = vadd.f32 %v2960_v30, %v2959_v15  ;;  %v9476_v30 = vld [vmem:[%s10878_s12 + $0x80] sm:$0xff] }
 0x491   :  { %3015 = vmatpush.msra.mxu1 %v9476_v30 }
 0x492   :  { %v2962_v31 = vrot.slane %v2961_v36, 2 }
 0x494   :  { %v2963_v23 = vadd.f32 %v2962_v31, %v2961_v36  ;;  %v2915_v13 = vpop.f32.mrf.mxu0 }
 0x496   :  { %v2964_v58 = vrot.slane %v2963_v23, 1 }
 0x497   :  { %v2873_v57 = vpop.f32.mrf.mxu1 }
 0x498   :  { %v2885_v16 = vpop.f32.mrf.mxu2  ;;  %v2965_v40 = vadd.f32 %v2964_v58, %v2963_v23  ;;  %v2954_v58 = vld [vmem:[%s10879_s13 + $0x20] sm:$0xff] }
 0x499   :  { %v2886_v47 = vadd.f32 %v2885_v16, %v2871_v29  ;;  %v2956_v16 = vld [vmem:[%s10879_s13 + $0x30] sm:$0xff] }
 0x49a   :  { %v2899_v41 = vpop.f32.mrf.mxu3  ;;  %2996 = vmatmul.f32.vlgmr.msrb.gmra.mxu0 %v2965_v40  ;;  %3037 = vmatpush.msra.mxu2 %v2956_v16  ;;  %v2951_v40 = vld [vmem:[%s10879_s13 + $0x8] sm:$0xff] }
 0x49b   :  { %v2900_v46 = vadd.f32 %v2899_v41, %v2886_v47  ;;  %v2955_v47 = vld [vmem:[%s10879_s13 + $0x28] sm:$0xff]  ;;  %v2953_v41 = vld [vmem:[%s10879_s13 + $0x18] sm:$0xff]  ;;  %3164 = vmatpush.msrb.mxu1 %v2956_v16 }
 0x49c   :  { %3038 = vmatpush.msra.mxu2 %v2954_v58  ;;  %3058 = vmatpush.msrb.mxu3 %v2955_v47 }
 0x49d   :  { %v2914_v4 = vadd.f32 %v2913_v33, %v2900_v46  ;;  %v2952_v33 = vld [vmem:[%s10879_s13 + $0x10] sm:$0xff]  ;;  %3185 = vmatpush.msra.mxu0 %v2955_v47  ;;  %3165 = vmatpush.msrb.mxu1 %v2954_v58 }
 0x49e   :  { %3039 = vmatpush.msra.mxu2 %v2952_v33  ;;  %3059 = vmatpush.msrb.mxu3 %v2953_v41 }
 0x49f   :  { %v9462_v63 = vadd.f32 %v2914_v4, %v2418_v26  ;;  %3186 = vmatpush.msra.mxu0 %v2953_v41  ;;  %3166 = vmatpush.msrb.mxu1 %v2952_v33 }
 0x4a0   :  { %v2887_v62 = vpop.f32.mrf.mxu2  ;;  %3040 = vmatpush.msra.mxu2 %v2950_v51  ;;  %3060 = vmatpush.msrb.mxu3 %v2951_v40 }
 0x4a1   :  { %v2888_v35 = vadd.f32 %v2887_v62, %v2873_v57  ;;  %v2967_v60 = vsel %vm2966_vm13, %v9462_v63, 0.0  ;;  %3187 = vmatpush.msra.mxu0 %v2951_v40  ;;  %3167 = vmatpush.msrb.mxu1 %v2950_v51 }
 0x4a2   :  { %v2901_v34 = vpop.f32.mrf.mxu3  ;;  %3095 = vmatpush.msrb.mxu2 %v9253_v52  ;;  %3119 = vmatpush.msra.mxu3 %v9333_v38 }
 0x4a3   :  { %v2902_v11 = vadd.f32 %v2901_v34, %v2888_v35  ;;  %3234 = vmatpush.msrb.mxu0 %v2957_v25  ;;  %v7969_v25 = vld [vmem:[%s11017_s28 + $0x144] sm:$0xf] }
 0x4a4   :  { %3096 = vmatpush.msrb.mxu2 %v9258_v59  ;;  %3120 = vmatpush.msra.mxu3 %v9404_v14 }
 0x4a5   :  { %v2916_v21 = vadd.f32 %v2915_v13, %v2902_v11  ;;  %3235 = vmatpush.msrb.mxu0 %v2955_v47  ;;  %v6950_v47 = vld [vmem:[%s11017_s28 + $0x148] sm:$0xf0] }
 0x4a6   :  { %3097 = vmatpush.msrb.mxu2 %v9264_v55  ;;  %3121 = vmatpush.msra.mxu3 %v9409_v49 }
 0x4a7   :  { %v9470_v15 = vadd.f32 %v2916_v21, %v2420_v43  ;;  %3236 = vmatpush.msrb.mxu0 %v2953_v41  ;;  %v7968_v41 = vld [vmem:[%s11017_s28 + $0x134] sm:$0xf0] }
 0x4a8   :  { %3098 = vmatpush.msrb.mxu2 %v9270_v56  ;;  %3122 = vmatpush.msra.mxu3 %v9417_v27 }
 0x4a9   :  { %v2969_v17 = vsel %vm2968_vm14, %v9470_v15, 0.0  ;;  %3237 = vmatpush.msrb.mxu0 %v2951_v40  ;;  %v7004_v40 = vld [vmem:[%s11017_s28 + $0x1b0] sm:$0xf] }
 0x4aa   :  { %v2970_v36 = vadd.f32 %v2969_v17, %v2967_v60  ;;  %3099 = vmatpush.msrb.mxu2 %v9293_v0  ;;  %3123 = vmatpush.msra.mxu3 %v9424_v9  ;;  %v6958_v60 = vld [vmem:[%s11017_s28 + $0x158] sm:$0xf0]  ;;  %v3136_v17 = vld [vmem:[%s10876_s10] sm:$0x1] }
 0x4ac   :  { %v2971_v48 = vrot.slane %v2970_v36, 4  ;;  %3100 = vmatpush.msrb.mxu2 %v9298_v12  ;;  %3124 = vmatpush.msra.mxu3 %v9431_v28 }
 0x4ae   :  { %v2972_v31 = vadd.f32 %v2971_v48, %v2970_v36  ;;  %3101 = vmatpush.msrb.mxu2 %v9304_v45  ;;  %3125 = vmatpush.msra.mxu3 %v9438_v53 }
 0x4b0   :  { %v2973_v29 = vrot.slane %v2972_v31, 2  ;;  %3102 = vmatpush.msrb.mxu2 %v9310_v2  ;;  %3126 = vmatpush.msra.mxu3 %v9445_v61 }
 0x4b2   :  { %v2974_v19 = vadd.f32 %v2973_v29, %v2972_v31  ;;  %3103 = vmatpush.msrb.mxu2 %v9316_v1  ;;  %3127 = vmatpush.msra.mxu3 %v9452_v5 }
 0x4b4   :  { %v2975_v44 = vrot.slane %v2974_v19, 1  ;;  %3104 = vmatpush.msrb.mxu2 %v9326_v37  ;;  %3128 = vmatpush.msra.mxu3 %v9459_v50 }
 0x4b6   :  { %v2976_v23 = vadd.f32 %v2975_v44, %v2974_v19  ;;  %3105 = vmatpush.msrb.mxu2 %v9342_v39  ;;  %3129 = vmatpush.msra.mxu3 %v9468_v20  ;;  %v6956_v20 = vld [vmem:[%s11017_s28 + $0x150] sm:$0xf]  ;;  %v3198_v44 = vld [vmem:[%s10877_s11] sm:$0x1] }
 0x4b8   :  { %6862 = vmatmul.msk.f32.vlgmr.msra.gmra.mxu1 %vm2966_vm13, %v2976_v23  ;;  %3106 = vmatpush.msrb.mxu2 %v9352_v54  ;;  %v6948_v23 = vld [vmem:[%s11017_s28 + $0x140] sm:$0xf] }
 0x4b9   :  { %3214 = vmatpush.msra.mxu1 %v2956_v16  ;;  %3130 = vmatpush.msra.mxu3 %v9476_v30  ;;  %v7971_v30 = vld [vmem:[%s11017_s28 + $0x154] sm:$0xf]  ;;  %v7970_v16 = vld [vmem:[%s11017_s28 + $0x144] sm:$0xf0] }
 0x4ba   :  { %3107 = vmatpush.msrb.mxu2 %v9363_v8  ;;  %v6961_v29 = vor.u32 %v7971_v30, %v6958_v60  ;;  %v7961_v30 = vld [vmem:[%s11017_s28 + $0x104] sm:$0xf]  ;;  %v6918_v60 = vld [vmem:[%s11017_s28 + $0x108] sm:$0xf0] }
 0x4bb   :  { %3215 = vmatpush.msra.mxu1 %v2954_v58  ;;  %v6949_v58 = vor.u32 %v7970_v16, %v6948_v23  ;;  %v6972_v16 = vld [vmem:[%s11017_s28 + $0x170] sm:$0xf] }
 0x4bc   :  { %3108 = vmatpush.msrb.mxu2 %v9371_v7 }
 0x4bd   :  { %3216 = vmatpush.msra.mxu1 %v2952_v33  ;;  %v6940_v33 = vld [vmem:[%s11017_s28 + $0x130] sm:$0xf] }
 0x4be   :  { %3109 = vmatpush.msrb.mxu2 %v9379_v24 }
 0x4bf   :  { %3217 = vmatpush.msra.mxu1 %v2950_v51  ;;  %v6953_v51 = vor.u32 %v7969_v25, %v6950_v47  ;;  %v7976_v25 = vld [vmem:[%s11017_s28 + $0x174] sm:$0xf0]  ;;  %v6910_v47 = vld [vmem:[%s11017_s28 + $0xf8] sm:$0xf0] }
 0x4c0   :  { %3110 = vmatpush.msrb.mxu2 %v9389_v6 }
 0x517   :  { %v2997_v52 = vpop.f32.mrf.mxu0 }
 0x535   :  { %v3017_v59 = vpop.f32.mrf.mxu1 }
 0x536   :  { %v3018_v55 = vadd.f32 %v3017_v59, %v2997_v52  ;;  %v7984_v52 = vld [vmem:[%s11017_s28 + $0x1b4] sm:$0xf0]  ;;  %v7967_v59 = vld [vmem:[%s11017_s28 + $0x134] sm:$0xf] }
 0x538   :  { %v3020_v56 = vmul.f32 0.010204081, %v3018_v55  ;;  %v6941_v55 = vor.u32 %v7968_v41, %v6940_v33  ;;  %v7975_v33 = vld [vmem:[%s11017_s28 + $0x174] sm:$0xf]  ;;  %v6974_v41 = vld [vmem:[%s11017_s28 + $0x178] sm:$0xf0] }
 0x53a   :  { %6863 = vmatmul.msk.f32.vlgmr.msra.gmra.mxu2 %vm3021_vm15, %v3020_v56  ;;  %6864 = vmatmul.msk.f32.vlgmr.msrb.gmra.mxu3 %vm3021_vm15, %v3020_v56  ;;  %v7005_v56 = vor.u32 %v7984_v52, %v7004_v40 }
 0x53c   :  { %3559 = vmatpush.bf16.msrb.mxu3 %v7005_v56  ;;  %v6964_v56 = vld [vmem:[%s11017_s28 + $0x160] sm:$0xf] }
 0x5bd   :  { %v3042_v0 = vpop.f32.mrf.mxu2  ;;  %v3062_v12 = vpop.f32.mrf.mxu3 }
 0x5be   :  { %v3065_v45 = vperm.slane %v3042_v0, 0  ;;  %v3066_v2 = vperm.slane %v3062_v12, 0  ;;  %v6942_v0 = vld [vmem:[%s11017_s28 + $0x138] sm:$0xf0]  ;;  %v7983_v12 = vld [vmem:[%s11017_s28 + $0x1b4] sm:$0xf] }
 0x5c0   :  { %v9540_v1 = vsub.f32 %v9384_v18, %v3065_v45  ;;  %v9543_v37 = vsub.f32 %v9381_v10, %v3065_v45  ;;  %v9546_v38 = vsub.f32 %v9462_v63, %v3066_v2  ;;  %v9549_v39 = vsub.f32 %v9470_v15, %v3066_v2  ;;  %v7972_v15 = vld [vmem:[%s11017_s28 + $0x154] sm:$0xf0]  ;;  %v7006_v45 = vld [vmem:[%s11017_s28 + $0x1b8] sm:$0xf0] }
 0x5c1   :  { %v6957_v31 = vor.u32 %v7972_v15, %v6956_v20  ;;  %v6945_v2 = vor.u32 %v7967_v59, %v6942_v0  ;;  %v6980_v20 = vld [vmem:[%s11017_s28 + $0x180] sm:$0xf]  ;;  %v7978_v15 = vld [vmem:[%s11017_s28 + $0x184] sm:$0xf0] }
 0x5c2   :  { %v3071_v54 = vmul.f32 %v9540_v1, %v9540_v1  ;;  %v3073_v8 = vmul.f32 %v9543_v37, %v9543_v37  ;;  %v3072_v7 = vmul.f32 %v9546_v38, %v9546_v38  ;;  %v3074_v24 = vmul.f32 %v9549_v39, %v9549_v39  ;;  %v6900_v59 = vld [vmem:[%s11017_s28 + $0xe0] sm:$0xf] }
 0x5c4   :  { %v3075_v10 = vsel %vm882_vm6, %v3073_v8, 0.0  ;;  %v3083_v18 = vsel %vm2966_vm13, %v3072_v7, 0.0  ;;  %v3084_v6 = vsel %vm2968_vm14, %v3074_v24, 0.0  ;;  %v6932_v8 = vld [vmem:[%s11017_s28 + $0x120] sm:$0xf] }
 0x5c5   :  { %v3076_v14 = vadd.f32 %v3075_v10, %v3071_v54  ;;  %v3085_v49 = vadd.f32 %v3084_v6, %v3083_v18  ;;  %v7009_v54 = vor.u32 %v7983_v12, %v7006_v45  ;;  %v7966_v7 = vld [vmem:[%s11017_s28 + $0x124] sm:$0xf0]  ;;  %v6996_v24 = vld [vmem:[%s11017_s28 + $0x1a0] sm:$0xf]  ;;  %v7965_v6 = vld [vmem:[%s11017_s28 + $0x124] sm:$0xf] }
 0x5c6   :  { %v6933_v10 = vor.u32 %v7966_v7, %v6932_v8  ;;  %v7982_v18 = vld [vmem:[%s11017_s28 + $0x1a4] sm:$0xf0]  ;;  %v6902_v8 = vld [vmem:[%s11017_s28 + $0xe8] sm:$0xf0] }
 0x5c7   :  { %v3077_v27 = vrot.slane %v3076_v14, 4  ;;  %v3086_v9 = vrot.slane %v3085_v49, 4  ;;  %3597 = vmatpush.bf16.msra.mxu2 %v7009_v54  ;;  %v7957_v54 = vld [vmem:[%s11017_s28 + $0xe4] sm:$0xf] }
 0x5c9   :  { %v3078_v28 = vadd.f32 %v3077_v27, %v3076_v14  ;;  %v3087_v42 = vadd.f32 %v3086_v9, %v3085_v49  ;;  %v6934_v14 = vld [vmem:[%s11017_s28 + $0x128] sm:$0xf0]  ;;  %v6997_v49 = vor.u32 %v7982_v18, %v6996_v24  ;;  %v7981_v9 = vld [vmem:[%s11017_s28 + $0x1a4] sm:$0xf] }
 0x5ca   :  { %v6937_v27 = vor.u32 %v7965_v6, %v6934_v14  ;;  %v7973_v18 = vld [vmem:[%s11017_s28 + $0x164] sm:$0xf]  ;;  %v6966_v6 = vld [vmem:[%s11017_s28 + $0x168] sm:$0xf0] }
 0x5cb   :  { %v3079_v46 = vrot.slane %v3078_v28, 2  ;;  %v3088_v53 = vrot.slane %v3087_v42, 2  ;;  %3560 = vmatpush.bf16.msrb.mxu3 %v6997_v49 }
 0x5cd   :  { %v3080_v3 = vadd.f32 %v3079_v46, %v3078_v28  ;;  %v3089_v57 = vadd.f32 %v3088_v53, %v3087_v42  ;;  %v6998_v28 = vld [vmem:[%s11017_s28 + $0x1a8] sm:$0xf0]  ;;  %v6924_v42 = vld [vmem:[%s11017_s28 + $0x110] sm:$0xf]  ;;  %v7964_v53 = vld [vmem:[%s11017_s28 + $0x114] sm:$0xf0] }
 0x5ce   :  { %v7001_v46 = vor.u32 %v7981_v9, %v6998_v28 }
 0x5cf   :  { %v3081_v62 = vrot.slane %v3080_v3, 1  ;;  %v3090_v61 = vrot.slane %v3089_v57, 1 }
 0x5d0   :  { %3598 = vmatpush.bf16.msra.mxu2 %v7001_v46 }
 0x5d1   :  { %v3091_v22 = vadd.f32 %v3090_v61, %v3089_v57  ;;  %v3082_v4 = vadd.f32 %v3081_v62, %v3080_v3  ;;  %v6988_v3 = vld [vmem:[%s11017_s28 + $0x190] sm:$0xf]  ;;  %v7980_v57 = vld [vmem:[%s11017_s28 + $0x194] sm:$0xf0] }
 0x5d3   :  { %3111 = vmatmul.f32.vlgmr.msrb.gmra.mxu2 %v3082_v4  ;;  %6865 = vmatmul.msk.f32.vlgmr.msra.gmra.mxu3 %vm2966_vm13, %v3091_v22  ;;  %v6925_v22 = vor.u32 %v7964_v53, %v6924_v42  ;;  %v6989_v4 = vor.u32 %v7980_v57, %v6988_v3  ;;  %v7943_v53 = vld [vmem:[%s11017_s28 + $0x74] sm:$0xf]  ;;  %v7074_v3 = vld [vmem:[%s11017_s28 + $0x78] sm:$0xf0]  ;;  %v6905_v57 = vor.u32 %v7957_v54, %v6902_v8 }
 0x5d5   :  { %3561 = vmatpush.bf16.msrb.mxu3 %v6989_v4  ;;  %v7942_v4 = vld [vmem:[%s11017_s28 + $0x64] sm:$0xf0] }
 0x656   :  { %v3112_v35 = vpop.f32.mrf.mxu2  ;;  %v3132_v34 = vpop.f32.mrf.mxu3 }
 0x657   :  { %v3133_v5 = vadd.f32 %v3132_v34, %v3112_v35  ;;  %v7963_v35 = vld [vmem:[%s11017_s28 + $0x114] sm:$0xf]  ;;  %v6926_v34 = vld [vmem:[%s11017_s28 + $0x118] sm:$0xf0] }
 0x659   :  { %v3135_v26 = vmul.f32 0.010204081, %v3133_v5  ;;  %v7979_v5 = vld [vmem:[%s11017_s28 + $0x194] sm:$0xf] }
 0x65b   :  { %v3137_v11 = vadd.f32 1e-05, %v3135_v26 }
 0x65d   :  { %8127 = vrsqrt.f32 %v3137_v11  ;;  %vm3144_vm2 = vweird.f32 %v3137_v11 }
 0x663   :  { %v8128_v13 = vpop.eup %8127 }
 0x664   :  { %v3139_v50 = vmul.f32 %v8128_v13, %v3137_v11  ;;  %vm3145_vm1 = vweird.f32 %v8128_v13 }
 0x665   :  { %vm3146_vm3 = vmor %vm3144_vm2, %vm3145_vm1 }
 0x666   :  { %v3140_v43 = vmul.f32 %v8128_v13, %v3139_v50  ;;  %v6990_v50 = vld [vmem:[%s11017_s28 + $0x198] sm:$0xf0] }
 0x668   :  { %v3141_v63 = vmul.f32 0.5, %v3140_v43  ;;  %v6916_v43 = vld [vmem:[%s11017_s28 + $0x100] sm:$0xf] }
 0x66a   :  { %v3142_v21 = vsub.f32 1.5, %v3141_v63  ;;  %v6993_v63 = vor.u32 %v7979_v5, %v6990_v50  ;;  %v7066_v50 = vld [vmem:[%s11017_s28 + $0x68] sm:$0xf0] }
 0x66c   :  { %v3143_v36 = vmul.f32 %v8128_v13, %v3142_v21  ;;  %v7962_v21 = vld [vmem:[%s11017_s28 + $0x104] sm:$0xf0]  ;;  %3599 = vmatpush.bf16.msra.mxu2 %v6993_v63  ;;  %v7956_v63 = vld [vmem:[%s11017_s28 + $0xd4] sm:$0xf0] }
 0x66e   :  { %v3147_v48 = vsel %vm3146_vm3, %v8128_v13, %v3143_v36  ;;  %v6929_v13 = vor.u32 %v7963_v35, %v6926_v34  ;;  %v6917_v36 = vor.u32 %v7962_v21, %v6916_v43  ;;  %v7120_v43 = vld [vmem:[%s11017_s28 + $0xd0] sm:$0xf] }
 0x66f   :  { %v3148_v19 = vmul.f32 %v3147_v48, %v3136_v17  ;;  %v7977_v17 = vld [vmem:[%s11017_s28 + $0x184] sm:$0xf]  ;;  %v6981_v48 = vor.u32 %v7978_v15, %v6980_v20 }
 0x671   :  { %6866 = vmatmul.msk.f32.vlgmr.msrb.gmra.mxu1 %vm3021_vm15, %v3148_v19  ;;  %6867 = vmatmul.msk.f32.vlgmr.msra.gmra.mxu0 %vm3021_vm15, %v3148_v19  ;;  %v6908_v19 = vld [vmem:[%s11017_s28 + $0xf0] sm:$0xf] }
 0x672   :  { %3538 = vmatpush.bf16.msrb.mxu1 %v6957_v31  ;;  %3576 = vmatpush.bf16.msra.mxu0 %v6961_v29  ;;  %v6921_v31 = vor.u32 %v7961_v30, %v6918_v60  ;;  %v6982_v29 = vld [vmem:[%s11017_s28 + $0x188] sm:$0xf0] }
 0x673   :  { %v6985_v23 = vor.u32 %v7977_v17, %v6982_v29  ;;  %3562 = vmatpush.bf16.msrb.mxu3 %v6981_v48  ;;  %v7940_v29 = vld [vmem:[%s11017_s28 + $0x54] sm:$0xf0] }
 0x675   :  { %3600 = vmatpush.bf16.msra.mxu2 %v6985_v23 }
 0x676   :  { %3539 = vmatpush.bf16.msrb.mxu1 %v6949_v58  ;;  %3577 = vmatpush.bf16.msra.mxu0 %v6953_v51  ;;  %v7959_v58 = vld [vmem:[%s11017_s28 + $0xf4] sm:$0xf] }
 0x677   :  { %v6913_v45 = vor.u32 %v7959_v58, %v6910_v47  ;;  %v7939_v58 = vld [vmem:[%s11017_s28 + $0x54] sm:$0xf] }
 0x678   :  { %v7955_v47 = vld [vmem:[%s11017_s28 + $0xd4] sm:$0xf] }
 0x679   :  { %6868 = vmatmul.msk.f32.vlgmr.msra.gmra.mxu1 %vm3021_vm15, %v3198_v44  ;;  %6869 = vmatmul.msk.f32.vlgmr.msrb.gmra.mxu0 %vm3021_vm15, %v3198_v44  ;;  %v7960_v44 = vld [vmem:[%s11017_s28 + $0xf4] sm:$0xf0] }
 0x67a   :  { %3540 = vmatpush.bf16.msrb.mxu1 %v6941_v55  ;;  %3578 = vmatpush.bf16.msra.mxu0 %v6945_v2  ;;  %v6909_v52 = vor.u32 %v7960_v44, %v6908_v19  ;;  %v7958_v55 = vld [vmem:[%s11017_s28 + $0xe4] sm:$0xf0] }
 0x67b   :  { %v7974_v2 = vld [vmem:[%s11017_s28 + $0x164] sm:$0xf0]  ;;  %v6901_v14 = vor.u32 %v7958_v55, %v6900_v59 }
 0x67c   :  { %v6965_v49 = vor.u32 %v7974_v2, %v6964_v56  ;;  %v7938_v55 = vld [vmem:[%s11017_s28 + $0x44] sm:$0xf0]  ;;  %v7114_v2 = vld [vmem:[%s11017_s28 + $0xc8] sm:$0xf0] }
 0x67d   :  { %v7954_v56 = vld [vmem:[%s11017_s28 + $0xc4] sm:$0xf0] }
 0x67e   :  { %3541 = vmatpush.bf16.msrb.mxu1 %v6933_v10  ;;  %3579 = vmatpush.bf16.msra.mxu0 %v6937_v27  ;;  %v6977_v10 = vor.u32 %v7975_v33, %v6974_v41  ;;  %v7072_v27 = vld [vmem:[%s11017_s28 + $0x70] sm:$0xf]  ;;  %v7058_v33 = vld [vmem:[%s11017_s28 + $0x58] sm:$0xf0] }
 0x67f   :  { %v7122_v41 = vld [vmem:[%s11017_s28 + $0xd8] sm:$0xf0] }
 0x680   :  { %3601 = vmatpush.bf16.msra.mxu2 %v6977_v10 }
 0x682   :  { %3542 = vmatpush.bf16.msrb.mxu1 %v6925_v22  ;;  %3580 = vmatpush.bf16.msra.mxu0 %v6929_v13  ;;  %v7064_v22 = vld [vmem:[%s11017_s28 + $0x60] sm:$0xf]  ;;  %v7077_v13 = vor.u32 %v7943_v53, %v7074_v3  ;;  %v7935_v3 = vld [vmem:[%s11017_s28 + $0x34] sm:$0xf] }
 0x683   :  { %v7065_v30 = vor.u32 %v7942_v4, %v7064_v22  ;;  %v7032_v22 = vld [vmem:[%s11017_s28 + $0x20] sm:$0xf] }
 0x686   :  { %3543 = vmatpush.bf16.msrb.mxu1 %v6917_v36  ;;  %3581 = vmatpush.bf16.msra.mxu0 %v6921_v31  ;;  %v7056_v31 = vld [vmem:[%s11017_s28 + $0x50] sm:$0xf] }
 0x687   :  { %v7057_v59 = vor.u32 %v7940_v29, %v7056_v31  ;;  %v7024_v31 = vld [vmem:[%s11017_s28 + $0x10] sm:$0xf]  ;;  %v7932_v29 = vld [vmem:[%s11017_s28 + $0x14] sm:$0xf0] }
 0x68a   :  { %3544 = vmatpush.bf16.msrb.mxu1 %v6909_v52  ;;  %3582 = vmatpush.bf16.msra.mxu0 %v6913_v45  ;;  %v7112_v52 = vld [vmem:[%s11017_s28 + $0xc0] sm:$0xf]  ;;  %v7050_v45 = vld [vmem:[%s11017_s28 + $0x48] sm:$0xf0] }
 0x68e   :  { %3545 = vmatpush.bf16.msrb.mxu1 %v6901_v14  ;;  %3583 = vmatpush.bf16.msra.mxu0 %v6905_v57  ;;  %v7104_v14 = vld [vmem:[%s11017_s28 + $0xb0] sm:$0xf]  ;;  %v7042_v57 = vld [vmem:[%s11017_s28 + $0x38] sm:$0xf0] }
 0x6ee   :  { %v3169_v62 = vpop.f32.mrf.mxu1  ;;  %v3189_v61 = vpop.f32.mrf.mxu0 }
 0x6ef   :  { %v3192_v26 = vperm.slane %v3169_v62, 0  ;;  %v3193_v11 = vperm.slane %v3189_v61, 0  ;;  %v6969_v62 = vor.u32 %v7973_v18, %v6966_v6  ;;  %v7936_v6 = vld [vmem:[%s11017_s28 + $0x34] sm:$0xf0] }
 0x6f1   :  { %v3194_v51 = vmul.f32 %v3192_v26, %v9540_v1  ;;  %v3196_v40 = vmul.f32 %v3192_v26, %v9543_v37  ;;  %v3195_v0 = vmul.f32 %v3193_v11, %v9546_v38  ;;  %v6973_v37 = vor.u32 %v7976_v25, %v6972_v16  ;;  %3602 = vmatpush.bf16.msra.mxu2 %v6969_v62  ;;  %v7951_v62 = vld [vmem:[%s11017_s28 + $0xb4] sm:$0xf] }
 0x6f2   :  { %v3197_v38 = vmul.f32 %v3193_v11, %v9549_v39  ;;  %v7944_v39 = vld [vmem:[%s11017_s28 + $0x74] sm:$0xf0]  ;;  %v7941_v11 = vld [vmem:[%s11017_s28 + $0x64] sm:$0xf]  ;;  %v7121_v16 = vor.u32 %v7956_v63, %v7120_v43  ;;  %v7034_v63 = vld [vmem:[%s11017_s28 + $0x28] sm:$0xf0] }
 0x6f3   :  { %3563 = vmatpush.bf16.msrb.mxu3 %v6973_v37  ;;  %v7073_v61 = vor.u32 %v7944_v39, %v7072_v27  ;;  %v7069_v25 = vor.u32 %v7941_v11, %v7066_v50  ;;  %v7953_v37 = vld [vmem:[%s11017_s28 + $0xc4] sm:$0xf]  ;;  %v7952_v27 = vld [vmem:[%s11017_s28 + $0xb4] sm:$0xf0]  ;;  %v7096_v11 = vld [vmem:[%s11017_s28 + $0xa0] sm:$0xf] }
 0x6f4   :  { %3781 = vmatpush.bf16.msra.mxu1 %v7121_v16  ;;  %v7117_v8 = vor.u32 %v7953_v37, %v7114_v2  ;;  %v7950_v50 = vld [vmem:[%s11017_s28 + $0xa4] sm:$0xf0]  ;;  %v7933_v43 = vld [vmem:[%s11017_s28 + $0x24] sm:$0xf]  ;;  %v7948_v16 = vld [vmem:[%s11017_s28 + $0x94] sm:$0xf0] }
 0x6f5   :  { %3798 = vmatpush.bf16.msrb.mxu2 %v7077_v13 }
 0x6f6   :  { %v3219_v12 = vpop.f32.mrf.mxu1  ;;  %v3239_v1 = vpop.f32.mrf.mxu0 }
 0x6f7   :  { %v3242_v7 = vperm.slane %v3219_v12, 0  ;;  %v3243_v24 = vperm.slane %v3239_v1, 0  ;;  %3564 = vmatpush.bf16.msrb.mxu3 %v6965_v49  ;;  %v7113_v12 = vor.u32 %v7954_v56, %v7112_v52  ;;  %v7937_v1 = vld [vmem:[%s11017_s28 + $0x44] sm:$0xf]  ;;  %v7025_v52 = vor.u32 %v7932_v29, %v7024_v31  ;;  %v7946_v56 = vld [vmem:[%s11017_s28 + $0x84] sm:$0xf0] }
 0x6f8   :  { %v7053_v18 = vor.u32 %v7937_v1, %v7050_v45  ;;  %v7930_v1 = vld [vmem:[%s11017_s28 + $0x4] sm:$0xf0]  ;;  %v7945_v45 = vld [vmem:[%s11017_s28 + $0x84] sm:$0xf] }
 0x6f9   :  { %v3244_v9 = vadd.f32 %v3242_v7, %v3194_v51  ;;  %v3246_v28 = vadd.f32 %v3242_v7, %v3196_v40  ;;  %v3245_v42 = vadd.f32 %v3243_v24, %v3195_v0  ;;  %v3247_v46 = vadd.f32 %v3243_v24, %v3197_v38  ;;  %v7048_v40 = vld [vmem:[%s11017_s28 + $0x40] sm:$0xf]  ;;  %3799 = vmatpush.bf16.msrb.mxu2 %v7069_v25  ;;  %v7040_v24 = vld [vmem:[%s11017_s28 + $0x30] sm:$0xf] }
 0x6fa   :  { %v7125_v51 = vor.u32 %v7955_v47, %v7122_v41  ;;  %v7061_v0 = vor.u32 %v7939_v58, %v7058_v33  ;;  %3782 = vmatpush.bf16.msra.mxu1 %v7113_v12  ;;  %v7049_v7 = vor.u32 %v7938_v55, %v7048_v40  ;;  %v7041_v53 = vor.u32 %v7936_v6, %v7040_v24  ;;  %v7931_v47 = vld [vmem:[%s11017_s28 + $0x14] sm:$0xf]  ;;  %v7026_v33 = vld [vmem:[%s11017_s28 + $0x18] sm:$0xf0]  ;;  %v7080_v55 = vld [vmem:[%s11017_s28 + $0x80] sm:$0xf] }
 0x6fb   :  { %v3248_v35 = vmax.f32 %v3244_v9, 0.0  ;;  %v3250_v34 = vmax.f32 %v3246_v28, 0.0  ;;  %v9765_v5 = vmax.f32 %v3245_v42, 0.0  ;;  %v9767_v26 = vmax.f32 %v3247_v46, 0.0  ;;  %3760 = vmatpush.bf16.msra.mxu3 %v7073_v61  ;;  %v7106_v61 = vld [vmem:[%s11017_s28 + $0xb8] sm:$0xf0] }
 0x6fc   :  { %3819 = vmatpush.bf16.msrb.mxu0 %v7125_v51  ;;  %v7105_v28 = vor.u32 %v7952_v27, %v7104_v14  ;;  %v7947_v41 = vld [vmem:[%s11017_s28 + $0x94] sm:$0xf]  ;;  %v7090_v51 = vld [vmem:[%s11017_s28 + $0x98] sm:$0xf0]  ;;  %v7016_v12 = vld [vmem:[%s11017_s28] sm:$0xf]  ;;  %v7081_v37 = vor.u32 %v7946_v56, %v7080_v55 }
 0x6fd   :  { %v3265_v21 = vrot.slane %v3248_v35, 4  ;;  %v3272_v20 = vrot.slane %v3248_v35, 2  ;;  %3278 = vst [vmem:[#allocation4 + $0x10] sm:$0x30] %v3248_v35  ;;  %v3280_v15 = vrot.slane %v3248_v35, 6  ;;  %v3288_v60 = vrot.slane %v3250_v34, 4  ;;  %3800 = vmatpush.bf16.msrb.mxu2 %v7061_v0 }
 0x6fe   :  { %v3294_v17 = vrot.slane %v3250_v34, 2  ;;  %3300 = vst [vmem:[#allocation4 + $0x30] sm:$0x30] %v3250_v34  ;;  %v3266_v36 = vrot.slane %v9765_v5, 4  ;;  %v3273_v48 = vrot.slane %v9765_v5, 2  ;;  %v3281_v19 = vrot.slane %v9765_v5, 6  ;;  %3783 = vmatpush.bf16.msra.mxu1 %v7105_v28 }
 0x6ff   :  { %3269 = vst [vmem:[#allocation4] sm:$0x30] %v3265_v21  ;;  %v3289_v44 = vrot.slane %v9767_v26, 4  ;;  %v3295_v23 = vrot.slane %v9767_v26, 2  ;;  %3761 = vmatpush.bf16.msra.mxu3 %v7065_v30  ;;  %v7045_v34 = vor.u32 %v7935_v3, %v7042_v57  ;;  %v7097_v30 = vor.u32 %v7950_v50, %v7096_v11  ;;  %v7216_v24 = vld [vmem:[%s11017_s28 + $0x230] sm:$0xf] }
 0x700   :  { %3276 = vst [vmem:[#allocation4 + $0x10] sm:$0x3] %v3272_v20  ;;  %3820 = vmatpush.bf16.msrb.mxu0 %v7117_v8  ;;  %v7029_v0 = vor.u32 %v7931_v47, %v7026_v33  ;;  %v7018_v8 = vld [vmem:[%s11017_s28 + $0x8] sm:$0xf0]  ;;  %v7017_v6 = vor.u32 %v7930_v1, %v7016_v12  ;;  %v7218_v27 = vld [vmem:[%s11017_s28 + $0x238] sm:$0xf0] }
 0x701   :  { %3284 = vst [vmem:[#allocation4 + $0x20] sm:$0x3] %v3280_v15  ;;  %3801 = vmatpush.bf16.msrb.mxu2 %v7053_v18  ;;  %v7999_v18 = vld [vmem:[%s11017_s28 + $0x234] sm:$0xf]  ;;  %v7264_v28 = vld [vmem:[%s11017_s28 + $0x290] sm:$0xf] }
 0x702   :  { %3292 = vst [vmem:[#allocation4 + $0x20] sm:$0x30] %v3288_v60  ;;  %v7949_v60 = vld [vmem:[%s11017_s28 + $0xa4] sm:$0xf]  ;;  %3784 = vmatpush.bf16.msra.mxu1 %v7097_v30  ;;  %v7998_v3 = vld [vmem:[%s11017_s28 + $0x224] sm:$0xf0] }
 0x703   :  { %3298 = vst [vmem:[#allocation4 + $0x30] sm:$0x3] %v3294_v17  ;;  %3762 = vmatpush.bf16.msra.mxu3 %v7057_v59  ;;  %v7098_v17 = vld [vmem:[%s11017_s28 + $0xa8] sm:$0xf0]  ;;  %v7093_v59 = vor.u32 %v7947_v41, %v7090_v51  ;;  %v8012_v57 = vld [vmem:[%s11017_s28 + $0x294] sm:$0xf0] }
 0x704   :  { %3271 = vst.msk [vmem:[#allocation4 + $0x8] sm:$0x30] %vm3270_vm5, %v3266_v36  ;;  %v7192_v33 = vld [vmem:[%s11017_s28 + $0x200] sm:$0xf]  ;;  %v7993_v51 = vld [vmem:[%s11017_s28 + $0x204] sm:$0xf] }
 0x705   :  { %3277 = vst.msk [vmem:[#allocation4 + $0x18] sm:$0x3] %vm3261_vm4, %v3273_v48  ;;  %v7101_v48 = vor.u32 %v7949_v60, %v7098_v17  ;;  %3802 = vmatpush.bf16.msrb.mxu2 %v7045_v34  ;;  %v8011_v34 = vld [vmem:[%s11017_s28 + $0x294] sm:$0xf]  ;;  %v8009_v60 = vld [vmem:[%s11017_s28 + $0x284] sm:$0xf] }
 0x706   :  { %3279 = vst.msk [vmem:[#allocation4 + $0x18] sm:$0x30] %vm3270_vm5, %v9765_v5  ;;  %v3342_v54 = vld [vmem:[#allocation4] sm:$0xfc]  ;;  %v7109_v5 = vor.u32 %v7951_v62, %v7106_v61  ;;  %v7210_v61 = vld [vmem:[%s11017_s28 + $0x228] sm:$0xf0] }
 0x707   :  { %3285 = vst.msk [vmem:[#allocation4 + $0x28] sm:$0x3] %vm3261_vm4, %v3281_v19  ;;  %v9833_v38 = vld [vmem:[#allocation4 + $0x10] sm:$0xff]  ;;  %3763 = vmatpush.bf16.msra.mxu3 %v7049_v7  ;;  %v7082_v7 = vld [vmem:[%s11017_s28 + $0x88] sm:$0xf0] }
 0x708   :  { %3293 = vst.msk [vmem:[#allocation4 + $0x28] sm:$0x30] %vm3270_vm5, %v3289_v44  ;;  %v3346_v10 = vpack.c.bf16 %v9833_v38, %v3342_v54  ;;  %3821 = vmatpush.bf16.msrb.mxu0 %v7109_v5  ;;  %v7037_v44 = vor.u32 %v7933_v43, %v7034_v63  ;;  %v7929_v54 = vld [vmem:[%s11017_s28 + $0x4] sm:$0xf]  ;;  %v7085_v14 = vor.u32 %v7945_v45, %v7082_v7  ;;  %v7266_v5 = vld [vmem:[%s11017_s28 + $0x298] sm:$0xf0] }
 0x709   :  { %3299 = vst.msk [vmem:[#allocation4 + $0x38] sm:$0x3] %vm3261_vm4, %v3295_v23  ;;  %v9847_v49 = vld [vmem:[#allocation4 + $0x20] sm:$0xff]  ;;  %v7088_v23 = vld [vmem:[%s11017_s28 + $0x90] sm:$0xf]  ;;  %v7269_v50 = vor.u32 %v8011_v34, %v7266_v5  ;;  %vm5544_vm4 = vcmask 914432  }
 0x70a   :  { %3301 = vst.msk [vmem:[#allocation4 + $0x38] sm:$0x30] %vm3270_vm5, %v9767_v26  ;;  %v3344_v39 = vld [vmem:[#allocation4 + $0x30] sm:$0x3f]  ;;  %v3384_v9 = vrot.slane %v3346_v10, 1  ;;  %v7089_v58 = vor.u32 %v7948_v16, %v7088_v23  ;;  %3803 = vmatpush.bf16.msrb.mxu2 %v7037_v44  ;;  %vm5546_vm5 = vcmask 910336  }
 0x70b   :  { %v3348_v42 = vpack.c.bf16 %v3344_v39, %v9847_v49  ;;  %v3343_v46 = vld [vmem:[#allocation4 + $0x8] sm:$0xfc]  ;;  %3764 = vmatpush.bf16.msra.mxu3 %v7041_v53  ;;  %v8000_v10 = vld [vmem:[%s11017_s28 + $0x234] sm:$0xf0]  ;;  %v7021_v39 = vor.u32 %v7929_v54, %v7018_v8  ;;  %v7208_v53 = vld [vmem:[%s11017_s28 + $0x220] sm:$0xf] }
 0x70c   :  { %v7934_v26 = vld [vmem:[%s11017_s28 + $0x24] sm:$0xf0]  ;;  %3822 = vmatpush.bf16.msrb.mxu0 %v7101_v48  ;;  %3785 = vmatpush.bf16.msra.mxu1 %v7089_v58  ;;  %v7997_v62 = vld [vmem:[%s11017_s28 + $0x224] sm:$0xf]  ;;  %v7209_v11 = vor.u32 %v7998_v3, %v7208_v53  ;;  %v7256_v43 = vld [vmem:[%s11017_s28 + $0x280] sm:$0xf] }
 0x70d   :  { %v9870_v4 = vrot.slane %v3348_v42, 1  ;;  %v9872_v35 = vld [vmem:[#allocation4 + $0x18] sm:$0xff]  ;;  %v7033_v15 = vor.u32 %v7934_v26, %v7032_v22  ;;  %v3838_v42 = vld [vmem:[#allocation4 + $0x30] sm:$0xff]  ;;  %v7265_v22 = vor.u32 %v8012_v57, %v7264_v28  ;;  %v8010_v63 = vld [vmem:[%s11017_s28 + $0x284] sm:$0xf0] }
 0x70e   :  { %v3347_v13 = vpack.c.bf16 %v9872_v35, %v3343_v46  ;;  %3804 = vmatpush.bf16.msrb.mxu2 %v7029_v0  ;;  %v7221_v46 = vor.u32 %v7999_v18, %v7218_v27  ;;  %v9992_v26 = vpack.c.bf16 %v3838_v42, %v9847_v49  ;;  %v7257_v30 = vor.u32 %v8010_v63, %v7256_v43  ;;  %v7258_v17 = vld [vmem:[%s11017_s28 + $0x288] sm:$0xf0]  ;;  %v7202_v48 = vld [vmem:[%s11017_s28 + $0x218] sm:$0xf0]  ;;  %v3836_v29 = vld [vmem:[#allocation4] sm:$0xf0] }
 0x70f   :  { %v3386_v21 = vsel %vm3383_vm7, %v3384_v9, %v9870_v4  ;;  %v9892_v20 = vld [vmem:[#allocation4 + $0x28] sm:$0xff]  ;;  %3765 = vmatpush.bf16.msra.mxu3 %v7033_v15  ;;  %v7217_v9 = vor.u32 %v8000_v10, %v7216_v24  ;;  %v7996_v15 = vld [vmem:[%s11017_s28 + $0x214] sm:$0xf0]  ;;  %v7261_v31 = vor.u32 %v8009_v60, %v7258_v17  ;;  %v4115_v23 = vld [vmem:[#allocation4] sm:$0xc0] }
 0x710   :  { %3546 = vmatmul.bf16.vlgmr.msrb.gmra.mxu1 %v3386_v21  ;;  %v3387_v36 = vrot.slane %v3347_v13, 1  ;;  %3584 = vmatmul.bf16.vlgmr.msra.gmra.mxu0 %v3386_v21  ;;  %v7200_v13 = vld [vmem:[%s11017_s28 + $0x210] sm:$0xf]  ;;  %v7213_v21 = vor.u32 %v7997_v62, %v7210_v61  ;;  %v10022_v44 = vrot.slane %v9992_v26, 2  ;;  %v4168_v58 = vrot.slane %v9992_v26, 3  ;;  %v3303_v8 = vld [vmem:[#allocation4 + $0x8] sm:$0xff] }
 0x711   :  { %v3345_v19 = vld [vmem:[#allocation4 + $0x38] sm:$0x3f]  ;;  %3823 = vmatpush.bf16.msrb.mxu0 %v7093_v59  ;;  %3786 = vmatpush.bf16.msra.mxu1 %v7081_v37  ;;  %v7201_v16 = vor.u32 %v7996_v15, %v7200_v13  ;;  %v7184_v1 = vld [vmem:[%s11017_s28 + $0x1f0] sm:$0xf]  ;;  %v8007_v10 = vld [vmem:[%s11017_s28 + $0x274] sm:$0xf] }
 0x712   :  { %v3349_v25 = vpack.c.bf16 %v3345_v19, %v9892_v20  ;;  %3805 = vmatpush.bf16.msrb.mxu2 %v7021_v39  ;;  %v3840_v19 = vpack.c.bf16 %v9833_v38, %v3836_v29  ;;  %v7992_v37 = vld [vmem:[%s11017_s28 + $0x1f4] sm:$0xf0]  ;;  %v7248_v45 = vld [vmem:[%s11017_s28 + $0x270] sm:$0xf]  ;;  %v7186_v54 = vld [vmem:[%s11017_s28 + $0x1f8] sm:$0xf0] }
 0x713   :  { %3766 = vmatpush.bf16.msra.mxu3 %v7025_v52  ;;  %v7194_v52 = vld [vmem:[%s11017_s28 + $0x208] sm:$0xf0]  ;;  %v7185_v7 = vor.u32 %v7992_v37, %v7184_v1  ;;  %v7250_v18 = vld [vmem:[%s11017_s28 + $0x278] sm:$0xf0]  ;;  %v7990_v39 = vld [vmem:[%s11017_s28 + $0x1e4] sm:$0xf0] }
 0x714   :  { %v9925_v40 = vrot.slane %v3349_v25, 1  ;;  %v4125_v25 = vpack.c.bf16 %v9833_v38, %v4115_v23  ;;  %v3877_v41 = vrot.slane %v3840_v19, 2  ;;  %v7197_v12 = vor.u32 %v7993_v51, %v7194_v52  ;;  %v8006_v28 = vld [vmem:[%s11017_s28 + $0x264] sm:$0xf0]  ;;  %v7178_v53 = vld [vmem:[%s11017_s28 + $0x1e8] sm:$0xf0] }
 0x715   :  { %3824 = vmatpush.bf16.msrb.mxu0 %v7085_v14  ;;  %4052 = vmatpush.bf16.msrb.mxu1 %v7265_v22  ;;  %v7253_v27 = vor.u32 %v8007_v10, %v7250_v18  ;;  %v8005_v3 = vld [vmem:[%s11017_s28 + $0x264] sm:$0xf]  ;;  %v7242_v57 = vld [vmem:[%s11017_s28 + $0x268] sm:$0xf0]  ;;  %v7168_v22 = vld [vmem:[%s11017_s28 + $0x1d0] sm:$0xf] }
 0x716   :  { %v3389_v2 = vsel %vm3383_vm7, %v3387_v36, %v9925_v40  ;;  %v7995_v36 = vld [vmem:[%s11017_s28 + $0x214] sm:$0xf]  ;;  %v4167_v59 = vrot.slane %v4125_v25, 3  ;;  %v10040_v55 = vsel %vm882_vm6, %v3877_v41, %v10022_v44  ;;  %v7245_v61 = vor.u32 %v8005_v3, %v7242_v57  ;;  %v7232_v34 = vld [vmem:[%s11017_s28 + $0x250] sm:$0xf]  ;;  %v3302_v60 = vld [vmem:[#allocation4] sm:$0xff] }
 0x717   :  { %7010 = vmatmul.msk.bf16.vlgmr.msrb.gmra.mxu3 %vm2966_vm13, %v3389_v2  ;;  %7012 = vmatmul.msk.bf16.vlgmr.msra.gmra.mxu2 %vm2966_vm13, %v3389_v2  ;;  %v7205_v47 = vor.u32 %v7995_v36, %v7202_v48  ;;  %v8008_v2 = vld [vmem:[%s11017_s28 + $0x274] sm:$0xf0]  ;;  %v8003_v43 = vld [vmem:[%s11017_s28 + $0x254] sm:$0xf]  ;;  %v7234_v63 = vld [vmem:[%s11017_s28 + $0x258] sm:$0xf0]  ;;  %v3310_v41 = vpack.c.bf16 %v9833_v38, %v3302_v60 }
 0x718   :  { %3767 = vmatpush.bf16.msra.mxu3 %v7017_v6  ;;  %4069 = vmatpush.bf16.msra.mxu2 %v7221_v46  ;;  %v10045_v0 = vsel %vm4166_vm8, %v4167_v59, %v4168_v58  ;;  %v7249_v24 = vor.u32 %v8008_v2, %v7248_v45  ;;  %v7176_v6 = vld [vmem:[%s11017_s28 + $0x1e0] sm:$0xf]  ;;  %v7989_v46 = vld [vmem:[%s11017_s28 + $0x1e4] sm:$0xf]  ;;  %v8004_v5 = vld [vmem:[%s11017_s28 + $0x254] sm:$0xf0]  ;;  %v7237_v36 = vor.u32 %v8003_v43, %v7234_v63 }
 0x719   :  { %4090 = vmatpush.bf16.msra.mxu0 %v7269_v50  ;;  %4053 = vmatpush.bf16.msrb.mxu1 %v7257_v30  ;;  %v7177_v62 = vor.u32 %v7990_v39, %v7176_v6  ;;  %v7181_v13 = vor.u32 %v7989_v46, %v7178_v53  ;;  %v7988_v50 = vld [vmem:[%s11017_s28 + $0x1d4] sm:$0xf0]  ;;  %v7987_v15 = vld [vmem:[%s11017_s28 + $0x1d4] sm:$0xf]  ;;  %v7170_v30 = vld [vmem:[%s11017_s28 + $0x1d8] sm:$0xf0] }
 0x71a   :  { %v7169_v17 = vor.u32 %v7988_v50, %v7168_v22  ;;  %v7160_v48 = vld [vmem:[%s11017_s28 + $0x1c0] sm:$0xf]  ;;  %v8002_v29 = vld [vmem:[%s11017_s28 + $0x244] sm:$0xf0]  ;;  %v7173_v19 = vor.u32 %v7987_v15, %v7170_v30  ;;  %v7226_v25 = vld [vmem:[%s11017_s28 + $0x248] sm:$0xf0] }
 0x71b   :  { %v7986_v23 = vld [vmem:[%s11017_s28 + $0x1c4] sm:$0xf0]  ;;  %v8027_v38 = vld [vmem:[%s11017_s28 + $0x314] sm:$0xf]  ;;  %v7362_v37 = vld [vmem:[%s11017_s28 + $0x318] sm:$0xf0] }
 0x71c   :  { %4031 = vmatpush.bf16.msrb.mxu3 %v7217_v9  ;;  %4070 = vmatpush.bf16.msra.mxu2 %v7213_v21  ;;  %v7240_v9 = vld [vmem:[%s11017_s28 + $0x260] sm:$0xf]  ;;  %v7233_v21 = vor.u32 %v8004_v5, %v7232_v34  ;;  %v7161_v51 = vor.u32 %v7986_v23, %v7160_v48  ;;  %v8026_v2 = vld [vmem:[%s11017_s28 + $0x304] sm:$0xf0]  ;;  %v8040_v18 = vld [vmem:[%s11017_s28 + $0x374] sm:$0xf0] }
 0x71d   :  { %4091 = vmatpush.bf16.msra.mxu0 %v7261_v31  ;;  %4054 = vmatpush.bf16.msrb.mxu1 %v7249_v24  ;;  %v7241_v42 = vor.u32 %v8006_v28, %v7240_v9  ;;  %v7224_v31 = vld [vmem:[%s11017_s28 + $0x240] sm:$0xf]  ;;  %v3309_v24 = vld [vmem:[#allocation4 + $0x38] sm:$0xf]  ;;  %v8039_v9 = vld [vmem:[%s11017_s28 + $0x374] sm:$0xf] }
 0x71e   :  { %v7352_v45 = vld [vmem:[%s11017_s28 + $0x300] sm:$0xf]  ;;  %v8024_v39 = vld [vmem:[%s11017_s28 + $0x2f4] sm:$0xf0]  ;;  %v8023_v28 = vld [vmem:[%s11017_s28 + $0x2f4] sm:$0xf] }
 0x71f   :  { %v7353_v10 = vor.u32 %v8026_v2, %v7352_v45  ;;  %v7410_v46 = vld [vmem:[%s11017_s28 + $0x378] sm:$0xf0]  ;;  %v7400_v3 = vld [vmem:[%s11017_s28 + $0x360] sm:$0xf]  ;;  %v8038_v57 = vld [vmem:[%s11017_s28 + $0x364] sm:$0xf0] }
 0x720   :  { %3551 = vmatmul.bf16.gmra.mxu1 %v9870_v4  ;;  %3589 = vmatmul.bf16.gmra.mxu0 %v9870_v4  ;;  %v7994_v4 = vld [vmem:[%s11017_s28 + $0x204] sm:$0xf0]  ;;  %v7413_v53 = vor.u32 %v8039_v9, %v7410_v46  ;;  %v7401_v34 = vor.u32 %v8038_v57, %v7400_v3  ;;  %v8037_v5 = vld [vmem:[%s11017_s28 + $0x364] sm:$0xf]  ;;  %v7336_v43 = vld [vmem:[%s11017_s28 + $0x2e0] sm:$0xf] }
 0x721   :  { %4032 = vmatpush.bf16.msrb.mxu3 %v7209_v11  ;;  %v7193_v56 = vor.u32 %v7994_v4, %v7192_v33  ;;  %4071 = vmatpush.bf16.msra.mxu2 %v7205_v47  ;;  %v3311_v11 = vpack.c.bf16 %v9872_v35, %v3303_v8  ;;  %v7985_v47 = vld [vmem:[%s11017_s28 + $0x1c4] sm:$0xf]  ;;  %v7162_v33 = vld [vmem:[%s11017_s28 + $0x1c8] sm:$0xf0]  ;;  %v7225_v4 = vor.u32 %v8002_v29, %v7224_v31  ;;  %v8022_v63 = vld [vmem:[%s11017_s28 + $0x2e4] sm:$0xf0] }
 0x722   :  { %4092 = vmatpush.bf16.msra.mxu0 %v7253_v27  ;;  %4055 = vmatpush.bf16.msrb.mxu1 %v7241_v42  ;;  %v7165_v59 = vor.u32 %v7985_v47, %v7162_v33  ;;  %v7354_v8 = vld [vmem:[%s11017_s28 + $0x308] sm:$0xf0]  ;;  %v7344_v27 = vld [vmem:[%s11017_s28 + $0x2f0] sm:$0xf]  ;;  %v7346_v42 = vld [vmem:[%s11017_s28 + $0x2f8] sm:$0xf0]  ;;  %v7337_v48 = vor.u32 %v8022_v63, %v7336_v43 }
 0x723   :  { %v7345_v22 = vor.u32 %v8024_v39, %v7344_v27  ;;  %v7349_v50 = vor.u32 %v8023_v28, %v7346_v42  ;;  %v8021_v15 = vld [vmem:[%s11017_s28 + $0x2e4] sm:$0xf]  ;;  %v7338_v30 = vld [vmem:[%s11017_s28 + $0x2e8] sm:$0xf0]  ;;  %v3308_v60 = vld [vmem:[#allocation4 + $0x30] sm:$0xf] }
 0x724   :  { %v7341_v31 = vor.u32 %v8021_v15, %v7338_v30  ;;  %v3312_v29 = vpack.c.bf16 %v3308_v60, %v9847_v49  ;;  %v8036_v47 = vld [vmem:[%s11017_s28 + $0x354] sm:$0xf0]  ;;  %v8019_v33 = vld [vmem:[%s11017_s28 + $0x2d4] sm:$0xf]  ;;  %v7314_v28 = vld [vmem:[%s11017_s28 + $0x2b8] sm:$0xf0] }
 0x725   :  { %4033 = vmatpush.bf16.msrb.mxu3 %v7201_v16  ;;  %4072 = vmatpush.bf16.msra.mxu2 %v7197_v12  ;;  %v8001_v16 = vld [vmem:[%s11017_s28 + $0x244] sm:$0xf]  ;;  %v8028_v12 = vld [vmem:[%s11017_s28 + $0x314] sm:$0xf0]  ;;  %v8015_v39 = vld [vmem:[%s11017_s28 + $0x2b4] sm:$0xf] }
 0x726   :  { %4093 = vmatpush.bf16.msra.mxu0 %v7245_v61  ;;  %4056 = vmatpush.bf16.msrb.mxu1 %v7233_v21  ;;  %v7229_v52 = vor.u32 %v8001_v16, %v7226_v25  ;;  %v3839_v61 = vld [vmem:[#allocation4 + $0x38] sm:$0xff]  ;;  %v7328_v16 = vld [vmem:[%s11017_s28 + $0x2d0] sm:$0xf]  ;;  %v8031_v42 = vld [vmem:[%s11017_s28 + $0x334] sm:$0xf] }
 0x727   :  { %7011 = vmatmul.msk.bf16.gmra.mxu3 %vm2966_vm13, %v9925_v40  ;;  %7013 = vmatmul.msk.bf16.gmra.mxu2 %vm2966_vm13, %v9925_v40  ;;  %v7991_v40 = vld [vmem:[%s11017_s28 + $0x1f4] sm:$0xf]  ;;  %v7392_v25 = vld [vmem:[%s11017_s28 + $0x350] sm:$0xf]  ;;  %v8032_v27 = vld [vmem:[%s11017_s28 + $0x334] sm:$0xf0] }
 0x728   :  { %v7189_v14 = vor.u32 %v7991_v40, %v7186_v54  ;;  %v7365_v40 = vor.u32 %v8027_v38, %v7362_v37  ;;  %v8025_v54 = vld [vmem:[%s11017_s28 + $0x304] sm:$0xf]  ;;  %v8018_v38 = vld [vmem:[%s11017_s28 + $0x2c4] sm:$0xf0]  ;;  %v7378_v46 = vld [vmem:[%s11017_s28 + $0x338] sm:$0xf0] }
 0x729   :  { %4034 = vmatpush.bf16.msrb.mxu3 %v7193_v56  ;;  %v7360_v56 = vld [vmem:[%s11017_s28 + $0x310] sm:$0xf]  ;;  %v7357_v6 = vor.u32 %v8025_v54, %v7354_v8  ;;  %v8034_v37 = vld [vmem:[%s11017_s28 + $0x344] sm:$0xf0]  ;;  %v7322_v54 = vld [vmem:[%s11017_s28 + $0x2c8] sm:$0xf0] }
 0x72a   :  { %4073 = vmatpush.bf16.msra.mxu2 %v7189_v14  ;;  %4094 = vmatpush.bf16.msra.mxu0 %v7237_v36  ;;  %v7361_v1 = vor.u32 %v8028_v12, %v7360_v56  ;;  %v10228_v36 = vpack.c.bf16 %v3839_v61, %v9892_v20  ;;  %v7320_v56 = vld [vmem:[%s11017_s28 + $0x2c0] sm:$0xf]  ;;  %v8033_v8 = vld [vmem:[%s11017_s28 + $0x344] sm:$0xf]  ;;  %v7317_v61 = vor.u32 %v8015_v39, %v7314_v28  ;;  %v7370_v63 = vld [vmem:[%s11017_s28 + $0x328] sm:$0xf0] }
 0x72b   :  { %4057 = vmatpush.bf16.msrb.mxu1 %v7225_v4  ;;  %v7330_v4 = vld [vmem:[%s11017_s28 + $0x2d8] sm:$0xf0]  ;;  %v7321_v45 = vor.u32 %v8018_v38, %v7320_v56  ;;  %v7304_v57 = vld [vmem:[%s11017_s28 + $0x2a0] sm:$0xf]  ;;  %v8029_v43 = vld [vmem:[%s11017_s28 + $0x324] sm:$0xf] }
 0x72c   :  { %v10232_v23 = vrot.slane %v10228_v36, 2  ;;  %v7373_v30 = vor.u32 %v8029_v43, %v7370_v63  ;;  %v4116_v60 = vld [vmem:[#allocation4 + $0x8] sm:$0xc0]  ;;  %5545 = vst.msk [vmem:[#allocation6 + $0x38] sm:$0x3f] %vm5544_vm4, %v9319_v32 }
 0x72d   :  { %4035 = vmatpush.bf16.msrb.mxu3 %v7185_v7  ;;  %v7408_v7 = vld [vmem:[%s11017_s28 + $0x370] sm:$0xf] }
 0x72e   :  { %4074 = vmatpush.bf16.msra.mxu2 %v7181_v13  ;;  %4095 = vmatpush.bf16.msra.mxu0 %v7229_v52  ;;  %v7409_v14 = vor.u32 %v8040_v18, %v7408_v7  ;;  %v3837_v13 = vld [vmem:[#allocation4 + $0x8] sm:$0xf0]  ;;  %v8035_v52 = vld [vmem:[%s11017_s28 + $0x354] sm:$0xf] }
 0x72f   :  { %v7386_v7 = vld [vmem:[%s11017_s28 + $0x348] sm:$0xf0] }
 0x730   :  { %7126 = vmatmul.msk.bf16.vlgmr.msra.gmra.mxu1 %vm2966_vm13, %v3311_v11  ;;  %7128 = vmatmul.msk.bf16.vlgmr.msrb.gmra.mxu0 %vm2966_vm13, %v3311_v11  ;;  %v7402_v11 = vld [vmem:[%s11017_s28 + $0x368] sm:$0xf0] }
 0x731   :  { %4036 = vmatpush.bf16.msrb.mxu3 %v7177_v62  ;;  %4346 = vmatpush.bf16.msra.mxu1 %v7409_v14  ;;  %v3313_v62 = vpack.c.bf16 %v3309_v24, %v9892_v20  ;;  %v7405_v21 = vor.u32 %v8037_v5, %v7402_v11  ;;  %v8020_v20 = vld [vmem:[%s11017_s28 + $0x2d4] sm:$0xf0]  ;;  %v7312_v24 = vld [vmem:[%s11017_s28 + $0x2b0] sm:$0xf]  ;;  %v8030_v5 = vld [vmem:[%s11017_s28 + $0x324] sm:$0xf0] }
 0x732   :  { %4075 = vmatpush.bf16.msra.mxu2 %v7173_v19  ;;  %4384 = vmatpush.bf16.msrb.mxu0 %v7413_v53  ;;  %v7329_v49 = vor.u32 %v8020_v20, %v7328_v16  ;;  %v7376_v14 = vld [vmem:[%s11017_s28 + $0x330] sm:$0xf]  ;;  %v8013_v11 = vld [vmem:[%s11017_s28 + $0x2a4] sm:$0xf] }
 0x733   :  { %v7377_v3 = vor.u32 %v8032_v27, %v7376_v14 }
 0x735   :  { %4037 = vmatpush.bf16.msrb.mxu3 %v7169_v17  ;;  %4347 = vmatpush.bf16.msra.mxu1 %v7401_v34  ;;  %v3841_v17 = vpack.c.bf16 %v9872_v35, %v3837_v13  ;;  %v7368_v34 = vld [vmem:[%s11017_s28 + $0x320] sm:$0xf] }
 0x736   :  { %4076 = vmatpush.bf16.msra.mxu2 %v7165_v59  ;;  %4385 = vmatpush.bf16.msrb.mxu0 %v7405_v21  ;;  %v7394_v59 = vld [vmem:[%s11017_s28 + $0x358] sm:$0xf0]  ;;  %v7369_v21 = vor.u32 %v8030_v5, %v7368_v34 }
 0x737   :  { %3768 = vmatmul.bf16.vlgmr.msra.gmra.mxu3 %v3310_v41  ;;  %3806 = vmatmul.bf16.vlgmr.msrb.gmra.mxu2 %v3310_v41  ;;  %v3880_v19 = vrot.slane %v3841_v17, 2  ;;  %v7393_v41 = vor.u32 %v8036_v47, %v7392_v25  ;;  %v7397_v12 = vor.u32 %v8035_v52, %v7394_v59  ;;  %v4126_v17 = vpack.c.bf16 %v9872_v35, %v4116_v60 }
 0x739   :  { %4038 = vmatpush.bf16.msrb.mxu3 %v7161_v51  ;;  %v7333_v51 = vor.u32 %v8019_v33, %v7330_v4  ;;  %4348 = vmatpush.bf16.msra.mxu1 %v7393_v41  ;;  %v3882_v53 = vsel %vm882_vm6, %v3880_v19, %v10232_v23 }
 0x73a   :  { %4363 = vmatpush.bf16.msrb.mxu2 %v7365_v40  ;;  %v8017_v40 = vld [vmem:[%s11017_s28 + $0x2c4] sm:$0xf]  ;;  %4386 = vmatpush.bf16.msrb.mxu0 %v7397_v12 }
 0x73b   :  { %v7325_v18 = vor.u32 %v8017_v40, %v7322_v54 }
 0x73d   :  { %4325 = vmatpush.bf16.msra.mxu3 %v7361_v1  ;;  %v7384_v1 = vld [vmem:[%s11017_s28 + $0x340] sm:$0xf] }
 0x73e   :  { %4364 = vmatpush.bf16.msrb.mxu2 %v7357_v6  ;;  %v7385_v2 = vor.u32 %v8034_v37, %v7384_v1  ;;  %v7389_v6 = vor.u32 %v8033_v8, %v7386_v7 }
 0x740   :  { %7127 = vmatmul.msk.bf16.gmra.mxu1 %vm2966_vm13, %v3313_v62  ;;  %7129 = vmatmul.msk.bf16.gmra.mxu0 %vm2966_vm13, %v3313_v62  ;;  %v8014_v62 = vld [vmem:[%s11017_s28 + $0x2a4] sm:$0xf0] }
 0x741   :  { %4326 = vmatpush.bf16.msra.mxu3 %v7353_v10  ;;  %v8016_v10 = vld [vmem:[%s11017_s28 + $0x2b4] sm:$0xf0]  ;;  %4349 = vmatpush.bf16.msra.mxu1 %v7385_v2  ;;  %v7305_v13 = vor.u32 %v8014_v62, %v7304_v57 }
 0x742   :  { %4365 = vmatpush.bf16.msrb.mxu2 %v7349_v50  ;;  %v7313_v9 = vor.u32 %v8016_v10, %v7312_v24  ;;  %4387 = vmatpush.bf16.msrb.mxu0 %v7389_v6  ;;  %v7306_v50 = vld [vmem:[%s11017_s28 + $0x2a8] sm:$0xf0] }
 0x743   :  { %v7309_v15 = vor.u32 %v8013_v11, %v7306_v50 }
 0x745   :  { %4327 = vmatpush.bf16.msra.mxu3 %v7345_v22  ;;  %v7381_v22 = vor.u32 %v8031_v42, %v7378_v46  ;;  %4350 = vmatpush.bf16.msra.mxu1 %v7377_v3 }
 0x746   :  { %4366 = vmatpush.bf16.msrb.mxu2 %v7341_v31  ;;  %v4171_v31 = vrot.slane %v10228_v36, 3 }
 0x747   :  { %3773 = vmatmul.bf16.gmra.mxu3 %v3312_v29  ;;  %3811 = vmatmul.bf16.gmra.mxu2 %v3312_v29  ;;  %v4124_v29 = vld [vmem:[#allocation4 + $0x48] sm:$0x3] }
 0x748   :  { %4388 = vmatpush.bf16.msrb.mxu0 %v7381_v22  ;;  %v4130_v19 = vpack.c.bf16 %v4124_v29, %v4124_v29  ;;  %v4423_v29 = vld [vmem:[%s10882_s16 + $0x70] sm:$0xff] }
 0x749   :  { %4328 = vmatpush.bf16.msra.mxu3 %v7337_v48  ;;  %4351 = vmatpush.bf16.msra.mxu1 %v7369_v21  ;;  %v4170_v48 = vrot.slane %v4126_v17, 3 }
 0x74a   :  { %4367 = vmatpush.bf16.msrb.mxu2 %v7333_v51  ;;  %v4175_v16 = vrot.slane %v4130_v19, 3 }
 0x74c   :  { %4389 = vmatpush.bf16.msrb.mxu0 %v7373_v30  ;;  %v4176_v35 = vsel %vm4166_vm8, %v4171_v31, %v4175_v16 }
 0x74d   :  { %4329 = vmatpush.bf16.msra.mxu3 %v7329_v49 }
 0x74e   :  { %4368 = vmatpush.bf16.msrb.mxu2 %v7325_v18 }
 0x750   :  { %7270 = vmatmul.msk.bf16.vlgmr.msrb.gmra.mxu1 %vm2966_vm13, %v3882_v53  ;;  %7272 = vmatmul.msk.bf16.vlgmr.msra.gmra.mxu0 %vm2966_vm13, %v3882_v53 }
 0x751   :  { %4330 = vmatpush.bf16.msra.mxu3 %v7321_v45 }
 0x752   :  { %4369 = vmatpush.bf16.msrb.mxu2 %v7317_v61 }
 0x755   :  { %4331 = vmatpush.bf16.msra.mxu3 %v7313_v9 }
 0x756   :  { %4370 = vmatpush.bf16.msrb.mxu2 %v7309_v15 }
 0x757   :  { %4039 = vmatmul.bf16.vlgmr.msrb.gmra.mxu3 %v10040_v55  ;;  %4077 = vmatmul.bf16.vlgmr.msra.gmra.mxu2 %v10040_v55  ;;  %v4172_v55 = vsel %vm4166_vm8, %v4170_v48, %v4171_v31 }
 0x759   :  { %4332 = vmatpush.bf16.msra.mxu3 %v7305_v13 }
 0x760   :  { %7271 = vmatmul.msk.bf16.gmra.mxu1 %vm2966_vm13, %v10232_v23  ;;  %7273 = vmatmul.msk.bf16.gmra.mxu0 %vm2966_vm13, %v10232_v23  ;;  %v4123_v23 = vld [vmem:[#allocation4 + $0x40] sm:$0x3] }
 0x767   :  { %4044 = vmatmul.bf16.gmra.mxu3 %v10022_v44  ;;  %4082 = vmatmul.bf16.gmra.mxu2 %v10022_v44  ;;  %v4129_v44 = vpack.c.bf16 %v4123_v23, %v4123_v23 }
 0x769   :  { %v4173_v36 = vrot.slane %v4129_v44, 3 }
 0x76b   :  { %v4174_v20 = vsel %vm4166_vm8, %v4168_v58, %v4173_v36  ;;  %v4421_v36 = vld [vmem:[%s10882_s16 + $0x60] sm:$0xff]  ;;  %vm5550_vm8 = vcmask 914436  }
 0x770   :  { %7414 = vmatmul.msk.bf16.vlgmr.msra.gmra.mxu1 %vm2966_vm13, %v4172_v55  ;;  %7416 = vmatmul.msk.bf16.vlgmr.msrb.gmra.mxu0 %vm2966_vm13, %v4172_v55  ;;  %v4424_v55 = vld [vmem:[%s10882_s16 + $0x78] sm:$0xff] }
 0x771   :  { %4469 = vmatpush.msrb.mxu3 %v4424_v55  ;;  %4597 = vmatpush.msra.mxu0 %v4424_v55 }
 0x773   :  { %4470 = vmatpush.msrb.mxu3 %v4423_v29  ;;  %4598 = vmatpush.msra.mxu0 %v4423_v29 }
 0x777   :  { %4333 = vmatmul.bf16.vlgmr.msra.gmra.mxu3 %v10045_v0  ;;  %4371 = vmatmul.bf16.vlgmr.msrb.gmra.mxu2 %v10045_v0 }
 0x780   :  { %7415 = vmatmul.msk.bf16.gmra.mxu1 %vm2966_vm13, %v4176_v35  ;;  %7417 = vmatmul.msk.bf16.gmra.mxu0 %vm2966_vm13, %v4176_v35  ;;  %v4422_v35 = vld [vmem:[%s10882_s16 + $0x68] sm:$0xff] }
 0x781   :  { %4471 = vmatpush.msrb.mxu3 %v4422_v35  ;;  %4599 = vmatpush.msra.mxu0 %v4422_v35 }
 0x783   :  { %4472 = vmatpush.msrb.mxu3 %v4421_v36  ;;  %4600 = vmatpush.msra.mxu0 %v4421_v36  ;;  %v4413_v36 = vld [vmem:[%s10882_s16 + $0x20] sm:$0xff] }
 0x787   :  { %4338 = vmatmul.bf16.gmra.mxu3 %v4174_v20  ;;  %4376 = vmatmul.bf16.gmra.mxu2 %v4174_v20  ;;  %v10422_v20 = vld [vmem:[%s10882_s16 + $0xd8] sm:$0xff] }
 0x788   :  { %4493 = vmatpush.msrb.mxu1 %v10422_v20 }
 0x78d   :  { %v3547_v25 = vpop.f32.mrf.mxu1  ;;  %v10355_v49 = vpop.f32.mrf.mxu0 }
 0x795   :  { %v3549_v0 = vpop.f32.mrf.mxu1  ;;  %v3587_v47 = vpop.f32.mrf.mxu0 }
 0x79a   :  { %v3566_v33 = vpop.f32.mrf.mxu3  ;;  %v10357_v4 = vpop.f32.mrf.mxu2 }
 0x79b   :  { %v3567_v8 = vadd.f32 %v3566_v33, %v3547_v25  ;;  %v10428_v25 = vld [vmem:[%s10882_s16 + $0xd0] sm:$0xff]  ;;  %v4420_v33 = vld [vmem:[%s10882_s16 + $0x58] sm:$0xff] }
 0x79c   :  { %4494 = vmatpush.msrb.mxu1 %v10428_v25  ;;  %4473 = vmatpush.msrb.mxu3 %v4420_v33 }
 0x79d   :  { %v3552_v41 = vpop.f32.mrf.mxu1  ;;  %v10359_v51 = vpop.f32.mrf.mxu0  ;;  %4601 = vmatpush.msra.mxu0 %v4420_v33 }
 0x7a2   :  { %v3568_v52 = vpop.f32.mrf.mxu3  ;;  %v3606_v59 = vpop.f32.mrf.mxu2 }
 0x7a3   :  { %v3569_v27 = vadd.f32 %v3568_v52, %v3549_v0  ;;  %v3607_v39 = vadd.f32 %v3606_v59, %v3587_v47  ;;  %v4419_v59 = vld [vmem:[%s10882_s16 + $0x50] sm:$0xff] }
 0x7a4   :  { %4474 = vmatpush.msrb.mxu3 %v4419_v59  ;;  %4602 = vmatpush.msra.mxu0 %v4419_v59 }
 0x7a5   :  { %v10361_v56 = vpop.f32.mrf.mxu1  ;;  %v3592_v26 = vpop.f32.mrf.mxu0 }
 0x7aa   :  { %v3571_v12 = vpop.f32.mrf.mxu3  ;;  %v10363_v58 = vpop.f32.mrf.mxu2 }
 0x7ab   :  { %v3572_v62 = vadd.f32 %v3571_v12, %v3552_v41 }
 0x7ad   :  { %v3788_v38 = vpop.f32.mrf.mxu1  ;;  %v10365_v1 = vpop.f32.mrf.mxu0 }
 0x7b2   :  { %v10367_v37 = vpop.f32.mrf.mxu3  ;;  %v3611_v45 = vpop.f32.mrf.mxu2 }
 0x7b3   :  { %v10369_v2 = vadd.f32 %v3611_v45, %v3592_v26 }
 0x7b5   :  { %v10371_v40 = vpop.f32.mrf.mxu1  ;;  %v3828_v54 = vpop.f32.mrf.mxu0 }
 0x7ba   :  { %v3769_v7 = vpop.f32.mrf.mxu3  ;;  %v10373_v24 = vpop.f32.mrf.mxu2 }
 0x7bb   :  { %v3770_v10 = vadd.f32 %v3769_v7, %v3567_v8 }
 0x7bd   :  { %v10375_v18 = vadd.f32 %v3788_v38, %v3770_v10  ;;  %v3793_v6 = vpop.f32.mrf.mxu1  ;;  %v10377_v14 = vpop.f32.mrf.mxu0  ;;  %v3610_v10 = vadd.f32 %v10363_v58, %v10359_v51  ;;  %v10467_v51 = vld [vmem:[%s10882_s16 + $0xc0] sm:$0xff] }
 0x7c2   :  { %v3771_v9 = vpop.f32.mrf.mxu3  ;;  %v3809_v28 = vpop.f32.mrf.mxu2 }
 0x7c3   :  { %v10379_v42 = vadd.f32 %v3771_v9, %v3569_v27  ;;  %v3810_v46 = vadd.f32 %v3809_v28, %v3607_v39  ;;  %v4418_v39 = vld [vmem:[%s10882_s16 + $0x48] sm:$0xff] }
 0x7c4   :  { %v10458_v9 = vld [vmem:[%s10882_s16 + $0xc8] sm:$0xff]  ;;  %4475 = vmatpush.msrb.mxu3 %v4418_v39  ;;  %4603 = vmatpush.msra.mxu0 %v4418_v39 }
 0x7c5   :  { %v10381_v53 = vadd.f32 %v3828_v54, %v3810_v46  ;;  %v10383_v3 = vpop.f32.mrf.mxu1  ;;  %v10385_v57 = vpop.f32.mrf.mxu0  ;;  %v3605_v54 = vadd.f32 %v10357_v4, %v10355_v49  ;;  %v4417_v49 = vld [vmem:[%s10882_s16 + $0x40] sm:$0xff]  ;;  %4495 = vmatpush.msrb.mxu1 %v10458_v9 }
 0x7c6   :  { %4476 = vmatpush.msrb.mxu3 %v4417_v49  ;;  %4604 = vmatpush.msra.mxu0 %v4417_v49 }
 0x7c7   :  { %v3808_v27 = vadd.f32 %v10373_v24, %v3605_v54  ;;  %v10475_v24 = vld [vmem:[%s10882_s16 + $0xb8] sm:$0xff]  ;;  %4496 = vmatpush.msrb.mxu1 %v10467_v51  ;;  %v4411_v54 = vld [vmem:[%s10882_s16 + $0x10] sm:$0xff] }
 0x7c9   :  { %4497 = vmatpush.msrb.mxu1 %v10475_v24 }
 0x7ca   :  { %v3774_v61 = vpop.f32.mrf.mxu3  ;;  %v3812_v22 = vpop.f32.mrf.mxu2 }
 0x7cb   :  { %v3775_v34 = vadd.f32 %v3774_v61, %v3572_v62  ;;  %v3813_v4 = vadd.f32 %v3812_v22, %v3610_v10  ;;  %v3827_v61 = vadd.f32 %v10365_v1, %v3808_v27  ;;  %v3791_v22 = vadd.f32 %v10371_v40, %v10379_v42 }
 0x7cd   :  { %v10387_v5 = vadd.f32 %v3793_v6, %v3775_v34  ;;  %v10389_v11 = vpop.f32.mrf.mxu1  ;;  %v4097_v13 = vpop.f32.mrf.mxu0  ;;  %v3574_v6 = vadd.f32 %v10367_v37, %v10361_v56  ;;  %v4416_v37 = vld [vmem:[%s10882_s16 + $0x38] sm:$0xff] }
 0x7ce   :  { %4477 = vmatpush.msrb.mxu3 %v4416_v37  ;;  %4605 = vmatpush.msra.mxu0 %v4416_v37 }
 0x7d2   :  { %v3776_v50 = vpop.f32.mrf.mxu3  ;;  %v10391_v43 = vpop.f32.mrf.mxu2 }
 0x7d3   :  { %v3777_v56 = vadd.f32 %v3776_v50, %v3574_v6  ;;  %v10488_v50 = vld [vmem:[%s10882_s16 + $0xb0] sm:$0xff]  ;;  %v3815_v42 = vadd.f32 %v10391_v43, %v10369_v2 }
 0x7d4   :  { %4498 = vmatpush.msrb.mxu1 %v10488_v50 }
 0x7d5   :  { %v10393_v63 = vpop.f32.mrf.mxu1  ;;  %v4099_v21 = vpop.f32.mrf.mxu0  ;;  %v3796_v40 = vadd.f32 %v10383_v3, %v3777_v56  ;;  %v10509_v3 = vld [vmem:[%s10883_s17 + $0x10] sm:$0xff]  ;;  %v4426_v56 = vld [vmem:[%s10882_s16 + $0x88] sm:$0xff] }
 0x7d6   :  { %4527 = vmatpush.msra.mxu2 %v10509_v3 }
 0x7da   :  { %v10395_v15 = vpop.f32.mrf.mxu3  ;;  %v4078_v30 = vpop.f32.mrf.mxu2 }
 0x7db   :  { %v4098_v58 = vadd.f32 %v4097_v13, %v4078_v30  ;;  %v4415_v13 = vld [vmem:[%s10882_s16 + $0x30] sm:$0xff] }
 0x7dc   :  { %4478 = vmatpush.msrb.mxu3 %v4415_v13  ;;  %4606 = vmatpush.msra.mxu0 %v4415_v13 }
 0x7dd   :  { %v10397_v60 = vpop.f32.mrf.mxu1  ;;  %v10399_v17 = vpop.f32.mrf.mxu0 }
 0x7e2   :  { %v4042_v48 = vpop.f32.mrf.mxu3  ;;  %v4080_v31 = vpop.f32.mrf.mxu2 }
 0x7e3   :  { %v4100_v28 = vadd.f32 %v4099_v21, %v4080_v31  ;;  %v4062_v34 = vadd.f32 %v10393_v63, %v4042_v48  ;;  %v3832_v21 = vadd.f32 %v10377_v14, %v3813_v4  ;;  %v4060_v63 = vadd.f32 %v10389_v11, %v10395_v15  ;;  %v4414_v14 = vld [vmem:[%s10882_s16 + $0x28] sm:$0xff]  ;;  %v10516_v15 = vld [vmem:[%s10883_s17] sm:$0xff] }
 0x7e4   :  { %v4108_v48 = vadd.f32 %v4098_v58, %v3827_v61  ;;  %4479 = vmatpush.msrb.mxu3 %v4414_v14  ;;  %4528 = vmatpush.msra.mxu2 %v10516_v15  ;;  %v4410_v4 = vld [vmem:[%s10882_s16 + $0x8] sm:$0xff] }
 0x7e5   :  { %v10407_v19 = vpop.f32.mrf.mxu1  ;;  %v10409_v23 = vpop.f32.mrf.mxu0  ;;  %v4110_v2 = vadd.f32 %v4100_v28, %v10381_v53  ;;  %v4109_v29 = vadd.f32 %v4062_v34, %v3791_v22  ;;  %v10526_v53 = vld [vmem:[%s10882_s16 + $0xa0] sm:$0xff]  ;;  %4607 = vmatpush.msra.mxu0 %v4414_v14 }
 0x7e6   :  { %4480 = vmatpush.msrb.mxu3 %v4413_v36  ;;  %4668 = vmatpush.msrb.mxu2 %v10509_v3  ;;  %v4409_v22 = vld [vmem:[%s10882_s16] sm:$0xff] }
 0x7e7   :  { %4608 = vmatpush.msra.mxu0 %v4413_v36  ;;  %v4425_v34 = vld [vmem:[%s10882_s16 + $0x80] sm:$0xff] }
 0x7e8   :  { %4669 = vmatpush.msrb.mxu2 %v10516_v15 }
 0x7ea   :  { %v10411_v16 = vpop.f32.mrf.mxu3  ;;  %v4083_v44 = vpop.f32.mrf.mxu2 }
 0x7eb   :  { %v4103_v30 = vadd.f32 %v10399_v17, %v4083_v44  ;;  %v10504_v17 = vld [vmem:[%s10882_s16 + $0xa8] sm:$0xff]  ;;  %v4065_v44 = vadd.f32 %v10397_v60, %v10411_v16 }
 0x7ec   :  { %4499 = vmatpush.msrb.mxu1 %v10504_v17 }
 0x7ed   :  { %v10437_v41 = vpop.f32.mrf.mxu1  ;;  %v4391_v52 = vpop.f32.mrf.mxu0  ;;  %v4112_v33 = vadd.f32 %v4103_v30, %v3832_v21 }
 0x7ee   :  { %4500 = vmatpush.msrb.mxu1 %v10526_v53 }
 0x7f2   :  { %v10430_v0 = vpop.f32.mrf.mxu3  ;;  %v10432_v47 = vpop.f32.mrf.mxu2 }
 0x7f3   :  { %v4105_v60 = vadd.f32 %v10409_v23, %v10432_v47  ;;  %v4107_v47 = vadd.f32 %v4060_v63, %v10375_v18 }
 0x7f5   :  { %v4355_v38 = vpop.f32.mrf.mxu1  ;;  %v4393_v45 = vpop.f32.mrf.mxu0 }
 0x7fa   :  { %v10443_v26 = vpop.f32.mrf.mxu3  ;;  %v4372_v12 = vpop.f32.mrf.mxu2 }
 0x7fb   :  { %v4392_v11 = vadd.f32 %v4391_v52, %v4372_v12  ;;  %v4067_v52 = vadd.f32 %v10407_v19, %v10430_v0  ;;  %v4354_v16 = vadd.f32 %v10437_v41, %v10443_v26  ;;  %v10544_v19 = vld [vmem:[%s10882_s16 + $0x98] sm:$0xff]  ;;  %v3834_v0 = vadd.f32 %v10385_v57, %v3815_v42  ;;  %v10563_v57 = vld [vmem:[%s10882_s16 + $0x90] sm:$0xff] }
 0x7fc   :  { %v4111_v41 = vadd.f32 %v4065_v44, %v10387_v5  ;;  %4501 = vmatpush.msrb.mxu1 %v10544_v19 }
 0x7fd   :  { %v4358_v46 = vpop.f32.mrf.mxu1  ;;  %v4396_v62 = vpop.f32.mrf.mxu0  ;;  %v4114_v10 = vadd.f32 %v4105_v60, %v3834_v0  ;;  %v10569_v6 = vadd.f32 %v4354_v16, %v4107_v47 }
 0x7fe   :  { %4502 = vmatpush.msrb.mxu1 %v10563_v57 }
 0x800   :  { %4503 = vmatpush.msrb.mxu1 %v4426_v56 }
 0x802   :  { %v4336_v8 = vpop.f32.mrf.mxu3  ;;  %v4374_v7 = vpop.f32.mrf.mxu2  ;;  %4504 = vmatpush.msrb.mxu1 %v4425_v34 }
 0x803   :  { %v4394_v1 = vadd.f32 %v4393_v45, %v4374_v7  ;;  %v4356_v35 = vadd.f32 %v4355_v38, %v4336_v8  ;;  %v4412_v38 = vld [vmem:[%s10882_s16 + $0x18] sm:$0xff]  ;;  %v10548_v45 = vadd.f32 %v4392_v11, %v4108_v48  ;;  %v4113_v8 = vadd.f32 %v4067_v52, %v3796_v40 }
 0x804   :  { %4481 = vmatpush.msrb.mxu3 %v4412_v38  ;;  %4609 = vmatpush.msra.mxu0 %v4412_v38 }
 0x805   :  { %v10531_v59 = vadd.f32 %v4394_v1, %v4110_v2  ;;  %v10555_v26 = vadd.f32 %v4356_v35, %v4109_v29  ;;  %v4360_v7 = vpop.f32.mrf.mxu1  ;;  %v4398_v5 = vpop.f32.mrf.mxu0  ;;  %v4452_v58 = vsel %vm2966_vm13, %v10548_v45, 0.0  ;;  %4621 = vmatpush.msra.mxu1 %v10422_v20 }
 0x806   :  { %4482 = vmatpush.msrb.mxu3 %v4411_v54  ;;  %4610 = vmatpush.msra.mxu0 %v4411_v54 }
 0x807   :  { %v4453_v18 = vsel %vm2966_vm13, %v10531_v59, 0.0  ;;  %4622 = vmatpush.msra.mxu1 %v10428_v25 }
 0x808   :  { %v4454_v61 = vadd.f32 %v4453_v18, %v4452_v58  ;;  %4483 = vmatpush.msrb.mxu3 %v4410_v4  ;;  %4611 = vmatpush.msra.mxu0 %v4410_v4 }
 0x809   :  { %4623 = vmatpush.msra.mxu1 %v10458_v9  ;;  %v4440_v9 = vld [vmem:[%s10883_s17 + $0x18] sm:$0xff] }
 0x80a   :  { %v4339_v31 = vpop.f32.mrf.mxu3  ;;  %v4377_v55 = vpop.f32.mrf.mxu2  ;;  %4484 = vmatpush.msrb.mxu3 %v4409_v22  ;;  %4612 = vmatpush.msra.mxu0 %v4409_v22 }
 0x80b   :  { %v4397_v43 = vadd.f32 %v4396_v62, %v4377_v55  ;;  %v4359_v12 = vadd.f32 %v4358_v46, %v4339_v31  ;;  %v4441_v62 = vadd.f32 %v10555_v26, %v10569_v6  ;;  %4624 = vmatpush.msra.mxu1 %v10467_v51  ;;  %v4438_v51 = vld [vmem:[%s10883_s17 + $0x8] sm:$0xff] }
 0x80c   :  { %4722 = vmatpush.msrb.mxu0 %v10509_v3  ;;  %4547 = vmatpush.msra.mxu3 %v4440_v9 }
 0x80d   :  { %v10550_v23 = vadd.f32 %v4397_v43, %v4112_v33  ;;  %v10571_v27 = vadd.f32 %v4359_v12, %v4111_v41  ;;  %4625 = vmatpush.msra.mxu1 %v10475_v24 }
 0x80e   :  { %4723 = vmatpush.msrb.mxu0 %v10516_v15  ;;  %4548 = vmatpush.msra.mxu3 %v4438_v51 }
 0x80f   :  { %v4455_v37 = vsel %vm2966_vm13, %v10550_v23, 0.0  ;;  %v4442_v30 = vadd.f32 %v4441_v62, %v10571_v27  ;;  %4626 = vmatpush.msra.mxu1 %v10488_v50 }
 0x810   :  { %v4456_v1 = vadd.f32 %v4455_v37, %v4454_v61 }
 0x811   :  { %4627 = vmatpush.msra.mxu1 %v10504_v17 }
 0x812   :  { %v4341_v39 = vpop.f32.mrf.mxu3  ;;  %v4379_v49 = vpop.f32.mrf.mxu2 }
 0x813   :  { %v4361_v28 = vadd.f32 %v4360_v7, %v4341_v39  ;;  %v4399_v46 = vadd.f32 %v4398_v5, %v4379_v49  ;;  %4628 = vmatpush.msra.mxu1 %v10526_v53 }
 0x815   :  { %v10593_v13 = vadd.f32 %v4361_v28, %v4113_v8  ;;  %v10595_v21 = vadd.f32 %v4399_v46, %v4114_v10  ;;  %4629 = vmatpush.msra.mxu1 %v10544_v19 }
 0x817   :  { %v4444_v40 = vsel %vm4443_vm9, %v10593_v13, 0.0  ;;  %v4458_v42 = vsel %vm4457_vm10, %v10595_v21, 0.0  ;;  %4630 = vmatpush.msra.mxu1 %v10563_v57 }
 0x818   :  { %v4445_v63 = vadd.f32 %v4444_v40, %v4442_v30  ;;  %v4459_v48 = vadd.f32 %v4458_v42, %v4456_v1 }
 0x819   :  { %4631 = vmatpush.msra.mxu1 %v4426_v56 }
 0x81a   :  { %v4446_v31 = vrot.slane %v4445_v63, 4  ;;  %v4460_v55 = vrot.slane %v4459_v48, 4 }
 0x81b   :  { %4632 = vmatpush.msra.mxu1 %v4425_v34 }
 0x81c   :  { %v4447_v14 = vadd.f32 %v4446_v31, %v4445_v63  ;;  %v4461_v2 = vadd.f32 %v4460_v55, %v4459_v48  ;;  %v4704_v63 = vld [vmem:[%s10881_s15] sm:$0x1] }
 0x81e   :  { %v4448_v11 = vrot.slane %v4447_v14, 2  ;;  %v4462_v43 = vrot.slane %v4461_v2, 2 }
 0x820   :  { %v4449_v29 = vadd.f32 %v4448_v11, %v4447_v14  ;;  %v4463_v44 = vadd.f32 %v4462_v43, %v4461_v2  ;;  %v8062_v2 = vld [vmem:[#allocation11 + $0xa8] sm:$0xff]  ;;  %v8061_v43 = vld [vmem:[#allocation11 + $0xa0] sm:$0xff] }
 0x822   :  { %v4450_v20 = vrot.slane %v4449_v29, 1  ;;  %v4464_v3 = vrot.slane %v4463_v44, 1 }
 0x824   :  { %v4451_v35 = vadd.f32 %v4450_v20, %v4449_v29  ;;  %v4465_v25 = vadd.f32 %v4464_v3, %v4463_v44 }
 0x826   :  { %4485 = vmatmul.f32.vlgmr.msrb.gmra.mxu3 %v4451_v35  ;;  %7418 = vmatmul.msk.f32.vlgmr.msrb.gmra.mxu1 %vm2966_vm13, %v4465_v25  ;;  %v4638_v25 = vld [vmem:[%s10880_s14] sm:$0x1] }
 0x827   :  { %4688 = vmatpush.msrb.mxu3 %v4440_v9 }
 0x829   :  { %4689 = vmatpush.msrb.mxu3 %v4438_v51 }
 0x8a3   :  { %v4506_v24 = vpop.f32.mrf.mxu1 }
 0x8a9   :  { %v4486_v50 = vpop.f32.mrf.mxu3 }
 0x8aa   :  { %v4507_v17 = vadd.f32 %v4506_v24, %v4486_v50  ;;  %v8048_v24 = vld [vmem:[#allocation11 + $0x38] sm:$0xff] }
 0x8ac   :  { %v4509_v15 = vmul.f32 0.0025510204, %v4507_v17  ;;  %v8047_v17 = vld [vmem:[#allocation11 + $0x30] sm:$0xff] }
 0x8ae   :  { %7419 = vmatmul.msk.f32.vlgmr.msra.gmra.mxu2 %vm176_vm0, %v4509_v15  ;;  %7420 = vmatmul.msk.f32.vlgmr.msra.gmra.mxu3 %vm176_vm0, %v4509_v15  ;;  %v8046_v15 = vld [vmem:[#allocation11 + $0x28] sm:$0xff] }
 0x8af   :  { %4742 = vmatpush.msra.mxu2 %v4440_v9  ;;  %4992 = vmatpush.bf16.msra.mxu3 %v8062_v2 }
 0x8b1   :  { %4743 = vmatpush.msra.mxu2 %v4438_v51 }
 0x8b3   :  { %4993 = vmatpush.bf16.msra.mxu3 %v8061_v43 }
 0x931   :  { %v4530_v36 = vpop.f32.mrf.mxu2  ;;  %v4550_v53 = vpop.f32.mrf.mxu3 }
 0x932   :  { %v4553_v33 = vperm.slane %v4530_v36, 0  ;;  %v4554_v52 = vperm.slane %v4550_v53, 0  ;;  %v8060_v36 = vld [vmem:[#allocation11 + $0x98] sm:$0xff]  ;;  %v8045_v53 = vld [vmem:[#allocation11 + $0x20] sm:$0xff] }
 0x933   :  { %4994 = vmatpush.bf16.msra.mxu3 %v8060_v36 }
 0x934   :  { %v10624_v60 = vsub.f32 %v10569_v6, %v4553_v33  ;;  %v10627_v16 = vsub.f32 %v10555_v26, %v4553_v33  ;;  %v10630_v12 = vsub.f32 %v10571_v27, %v4553_v33  ;;  %v10633_v38 = vsub.f32 %v10593_v13, %v4553_v33  ;;  %v8054_v33 = vld [vmem:[#allocation11 + $0x68] sm:$0xff] }
 0x935   :  { %v10636_v19 = vsub.f32 %v10548_v45, %v4554_v52  ;;  %v10639_v0 = vsub.f32 %v10531_v59, %v4554_v52  ;;  %v10642_v47 = vsub.f32 %v10550_v23, %v4554_v52  ;;  %v10645_v41 = vsub.f32 %v10595_v21, %v4554_v52  ;;  %v8059_v52 = vld [vmem:[#allocation11 + $0x90] sm:$0xff]  ;;  %5141 = vmatpush.bf16.msrb.mxu1 %v8054_v33 }
 0x936   :  { %v4563_v26 = vmul.f32 %v10624_v60, %v10624_v60  ;;  %v4565_v54 = vmul.f32 %v10627_v16, %v10627_v16  ;;  %v4569_v57 = vmul.f32 %v10633_v38, %v10633_v38  ;;  %v4567_v8 = vmul.f32 %v10630_v12, %v10630_v12 }
 0x937   :  { %v4564_v45 = vmul.f32 %v10636_v19, %v10636_v19  ;;  %v4566_v59 = vmul.f32 %v10639_v0, %v10639_v0  ;;  %v4568_v23 = vmul.f32 %v10642_v47, %v10642_v47  ;;  %v4570_v7 = vmul.f32 %v10645_v41, %v10645_v41  ;;  %4995 = vmatpush.bf16.msra.mxu3 %v8059_v52 }
 0x938   :  { %v4571_v18 = vadd.f32 %v4565_v54, %v4563_v26  ;;  %v4573_v39 = vsel %vm4443_vm9, %v4569_v57, 0.0  ;;  %v8044_v26 = vld [vmem:[#allocation11 + $0x18] sm:$0xff]  ;;  %v8053_v57 = vld [vmem:[#allocation11 + $0x60] sm:$0xff]  ;;  %vm5552_vm9 = vcmask 916486  }
 0x939   :  { %v4581_v5 = vsel %vm2966_vm13, %v4564_v45, 0.0  ;;  %v4582_v10 = vsel %vm2966_vm13, %v4566_v59, 0.0  ;;  %v4584_v49 = vsel %vm2966_vm13, %v4568_v23, 0.0  ;;  %v4586_v58 = vsel %vm4457_vm10, %v4570_v7, 0.0  ;;  %v8068_v54 = vld [vmem:[#allocation11 + $0xd8] sm:$0xff]  ;;  %v8058_v45 = vld [vmem:[#allocation11 + $0x88] sm:$0xff]  ;;  %5142 = vmatpush.bf16.msrb.mxu1 %v8053_v57 }
 0x93a   :  { %v4572_v6 = vadd.f32 %v4571_v18, %v4567_v8  ;;  %v4583_v27 = vadd.f32 %v4582_v10, %v4581_v5  ;;  %v8043_v59 = vld [vmem:[#allocation11 + $0x10] sm:$0xff]  ;;  %v8052_v8 = vld [vmem:[#allocation11 + $0x58] sm:$0xff]  ;;  %v8057_v18 = vld [vmem:[#allocation11 + $0x80] sm:$0xff] }
 0x93b   :  { %v8067_v23 = vld [vmem:[#allocation11 + $0xd0] sm:$0xff]  ;;  %4996 = vmatpush.bf16.msra.mxu3 %v8058_v45  ;;  %v8042_v7 = vld [vmem:[#allocation11 + $0x8] sm:$0xff] }
 0x93c   :  { %v4574_v4 = vadd.f32 %v4573_v39, %v4572_v6  ;;  %v4585_v56 = vadd.f32 %v4584_v49, %v4583_v27  ;;  %v8066_v5 = vld [vmem:[#allocation11 + $0xc8] sm:$0xff]  ;;  %v8051_v10 = vld [vmem:[#allocation11 + $0x50] sm:$0xff]  ;;  %v8056_v6 = vld [vmem:[#allocation11 + $0x78] sm:$0xff] }
 0x93d   :  { %5143 = vmatpush.bf16.msrb.mxu1 %v8052_v8  ;;  %v8041_v27 = vld [vmem:[#allocation11] sm:$0xff] }
 0x93e   :  { %v4575_v37 = vrot.slane %v4574_v4, 4  ;;  %v4587_v28 = vadd.f32 %v4586_v58, %v4585_v56  ;;  %v8065_v49 = vld [vmem:[#allocation11 + $0xc0] sm:$0xff]  ;;  %v8050_v56 = vld [vmem:[#allocation11 + $0x48] sm:$0xff] }
 0x93f   :  { %4997 = vmatpush.bf16.msra.mxu3 %v8057_v18 }
 0x940   :  { %v4576_v46 = vadd.f32 %v4575_v37, %v4574_v4  ;;  %v4588_v62 = vrot.slane %v4587_v28, 4 }
 0x941   :  { %5144 = vmatpush.bf16.msrb.mxu1 %v8051_v10 }
 0x942   :  { %v4589_v61 = vadd.f32 %v4588_v62, %v4587_v28  ;;  %v4577_v22 = vrot.slane %v4576_v46, 2  ;;  %v8082_v62 = vld [vmem:[#allocation11 + $0x148] sm:$0xff] }
 0x943   :  { %4998 = vmatpush.bf16.msra.mxu3 %v8056_v6 }
 0x944   :  { %v4590_v34 = vrot.slane %v4589_v61, 2  ;;  %v4578_v13 = vadd.f32 %v4577_v22, %v4576_v46  ;;  %v8055_v46 = vld [vmem:[#allocation11 + $0x70] sm:$0xff] }
 0x945   :  { %5145 = vmatpush.bf16.msrb.mxu1 %v8050_v56 }
 0x946   :  { %v4591_v21 = vadd.f32 %v4590_v34, %v4589_v61  ;;  %v4579_v30 = vrot.slane %v4578_v13, 1 }
 0x947   :  { %4999 = vmatpush.bf16.msra.mxu3 %v8055_v46 }
 0x948   :  { %v4580_v1 = vadd.f32 %v4579_v30, %v4578_v13  ;;  %v4592_v40 = vrot.slane %v4591_v21, 1 }
 0x94a   :  { %4613 = vmatmul.f32.vlgmr.msra.gmra.mxu0 %v4580_v1  ;;  %v4593_v42 = vadd.f32 %v4592_v40, %v4591_v21  ;;  %v8064_v21 = vld [vmem:[#allocation11 + $0xb8] sm:$0xff]  ;;  %v8049_v1 = vld [vmem:[#allocation11 + $0x40] sm:$0xff] }
 0x94b   :  { %5013 = vmatpush.bf16.msra.mxu0 %v8068_v54  ;;  %5146 = vmatpush.bf16.msrb.mxu1 %v8049_v1 }
 0x94c   :  { %7421 = vmatmul.msk.f32.vlgmr.msra.gmra.mxu1 %vm2966_vm13, %v4593_v42 }
 0x94f   :  { %5014 = vmatpush.bf16.msra.mxu0 %v8067_v23  ;;  %v8074_v23 = vld [vmem:[#allocation11 + $0x108] sm:$0xff] }
 0x952   :  { %7424 = vmatmul.msk.f32.vlgmr.msrb.gmra.mxu0 %vm176_vm0, %v4704_v63 }
 0x953   :  { %5015 = vmatpush.bf16.msra.mxu0 %v8066_v5 }
 0x957   :  { %5016 = vmatpush.bf16.msra.mxu0 %v8065_v49 }
 0x95b   :  { %5017 = vmatpush.bf16.msra.mxu0 %v8064_v21 }
 0x9c7   :  { %v4614_v48 = vpop.f32.mrf.mxu0 }
 0x9c9   :  { %v4634_v31 = vpop.f32.mrf.mxu1 }
 0x9ca   :  { %v4635_v55 = vadd.f32 %v4634_v31, %v4614_v48  ;;  %v8081_v31 = vld [vmem:[#allocation11 + $0x140] sm:$0xff] }
 0x9cc   :  { %v4637_v14 = vmul.f32 0.0025510204, %v4635_v55 }
 0x9ce   :  { %v4639_v11 = vadd.f32 1e-05, %v4637_v14 }
 0x9cf   :  { %v4725_v39 = vpop.f32.mrf.mxu0 }
 0x9d0   :  { %8129 = vrsqrt.f32 %v4639_v11  ;;  %vm4646_vm15 = vweird.f32 %v4639_v11  ;;  %v4748_v28 = vperm.slane %v4725_v39, 0  ;;  %v8078_v39 = vld [vmem:[#allocation11 + $0x128] sm:$0xff] }
 0x9d6   :  { %v8130_v29 = vpop.eup %8129 }
 0x9d7   :  { %v4641_v44 = vmul.f32 %v8130_v29, %v4639_v11  ;;  %vm4647_vm12 = vweird.f32 %v8130_v29 }
 0x9d8   :  { %vm4648_vm1 = vmor %vm4646_vm15, %vm4647_vm12 }
 0x9d9   :  { %v4642_v20 = vmul.f32 %v8130_v29, %v4641_v44 }
 0x9db   :  { %v4643_v3 = vmul.f32 0.5, %v4642_v20  ;;  %v8076_v20 = vld [vmem:[#allocation11 + $0x118] sm:$0xff] }
 0x9dd   :  { %v4644_v35 = vsub.f32 1.5, %v4643_v3 }
 0x9df   :  { %v4645_v9 = vmul.f32 %v8130_v29, %v4644_v35 }
 0x9e1   :  { %v4649_v51 = vsel %vm4648_vm1, %v8130_v29, %v4645_v9 }
 0x9e2   :  { %v4650_v50 = vmul.f32 %v4649_v51, %v4638_v25  ;;  %v8080_v51 = vld [vmem:[#allocation11 + $0x138] sm:$0xff] }
 0x9e4   :  { %7422 = vmatmul.msk.f32.vlgmr.msrb.gmra.mxu2 %vm176_vm0, %v4650_v50  ;;  %7423 = vmatmul.msk.f32.vlgmr.msrb.gmra.mxu3 %vm176_vm0, %v4650_v50 }
 0x9e5   :  { %5120 = vmatpush.bf16.msrb.mxu2 %v8048_v24  ;;  %5318 = vmatpush.bf16.msrb.mxu3 %v8082_v62 }
 0x9e9   :  { %5121 = vmatpush.bf16.msrb.mxu2 %v8047_v17  ;;  %5319 = vmatpush.bf16.msrb.mxu3 %v8081_v31 }
 0x9ec   :  { %7425 = vmatmul.msk.f32.vlgmr.msra.gmra.mxu2 %vm176_vm0, %v4704_v63  ;;  %vm4805_vm0 = vcmask 785410  }
 0x9ed   :  { %5122 = vmatpush.bf16.msrb.mxu2 %v8046_v15  ;;  %5320 = vmatpush.bf16.msrb.mxu3 %v8080_v51 }
 0x9f1   :  { %5123 = vmatpush.bf16.msrb.mxu2 %v8045_v53 }
 0x9f5   :  { %5124 = vmatpush.bf16.msrb.mxu2 %v8044_v26 }
 0x9f9   :  { %5125 = vmatpush.bf16.msrb.mxu2 %v8043_v59 }
 0x9fd   :  { %5126 = vmatpush.bf16.msrb.mxu2 %v8042_v7 }
 0xa01   :  { %5127 = vmatpush.bf16.msrb.mxu2 %v8041_v27 }
 0xa67   :  { %v4671_v4 = vpop.f32.mrf.mxu2  ;;  %v4691_v37 = vpop.f32.mrf.mxu3 }
 0xa68   :  { %v4694_v58 = vperm.slane %v4671_v4, 0  ;;  %v4695_v30 = vperm.slane %v4691_v37, 0  ;;  %v8073_v4 = vld [vmem:[#allocation11 + $0x100] sm:$0xff] }
 0xa69   :  { %v8077_v37 = vld [vmem:[#allocation11 + $0x120] sm:$0xff] }
 0xa6a   :  { %v4696_v61 = vmul.f32 %v4694_v58, %v10624_v60  ;;  %v4698_v22 = vmul.f32 %v4694_v58, %v10627_v16  ;;  %v4700_v34 = vmul.f32 %v4694_v58, %v10630_v12  ;;  %v4702_v13 = vmul.f32 %v4694_v58, %v10633_v38  ;;  %v8063_v12 = vld [vmem:[#allocation11 + $0xb0] sm:$0xff] }
 0xa6b   :  { %v4697_v38 = vmul.f32 %v4695_v30, %v10636_v19  ;;  %v4699_v3 = vmul.f32 %v4695_v30, %v10639_v0  ;;  %v4701_v35 = vmul.f32 %v4695_v30, %v10642_v47  ;;  %v4703_v25 = vmul.f32 %v4695_v30, %v10645_v41  ;;  %5018 = vmatpush.bf16.msra.mxu0 %v8063_v12  ;;  %v8075_v47 = vld [vmem:[#allocation11 + $0x110] sm:$0xff] }
 0xa6c   :  { %v4750_v40 = vadd.f32 %v4748_v28, %v4696_v61  ;;  %v4752_v42 = vadd.f32 %v4748_v28, %v4698_v22  ;;  %v4754_v63 = vadd.f32 %v4748_v28, %v4700_v34  ;;  %v4756_v48 = vadd.f32 %v4748_v28, %v4702_v13  ;;  %v8079_v41 = vld [vmem:[#allocation11 + $0x130] sm:$0xff]  ;;  %v8072_v61 = vld [vmem:[#allocation11 + $0xf8] sm:$0xff] }
 0xa6d   :  { %5321 = vmatpush.bf16.msrb.mxu3 %v8079_v41  ;;  %v5351_v41 = vld [vmem:[%s10886_s20 + $0x60] sm:$0xff] }
 0xa6e   :  { %v4758_v55 = vmax.f32 %v4750_v40, 0.0  ;;  %v4760_v60 = vmax.f32 %v4752_v42, 0.0  ;;  %v4762_v14 = vmax.f32 %v4754_v63, 0.0  ;;  %v4764_v16 = vmax.f32 %v4756_v48, 0.0  ;;  %v8071_v63 = vld [vmem:[#allocation11 + $0xf0] sm:$0xff] }
 0xa6f   :  { %v4745_v2 = vpop.f32.mrf.mxu2  ;;  %5297 = vmatpush.bf16.msrb.mxu0 %v8076_v20 }
 0xa70   :  { %v4782_v11 = vrot.slane %v4758_v55, 6  ;;  %v4784_v43 = vrot.slane %v4760_v60, 6  ;;  %v4788_v29 = vrot.slane %v4762_v14, 6  ;;  %v4792_v44 = vrot.slane %v4764_v16, 6  ;;  %v8070_v60 = vld [vmem:[#allocation11 + $0xe8] sm:$0xff]  ;;  %v8069_v16 = vld [vmem:[#allocation11 + $0xe0] sm:$0xff] }
 0xa71   :  { %v4749_v9 = vperm.slane %v4745_v2, 0  ;;  %5322 = vmatpush.bf16.msrb.mxu3 %v8078_v39 }
 0xa72   :  { %v10688_v24 = vsel %vm1454_vm11, %v4782_v11, %v4784_v43  ;;  %v10691_v19 = vsel %vm1454_vm11, %v4784_v43, %v4788_v29  ;;  %v4793_v50 = vsel %vm1454_vm11, %v4788_v29, %v4792_v44  ;;  %4804 = vst [vmem:[#allocation5] sm:$0xfc] %v4782_v11 }
 0xa73   :  { %v4751_v17 = vadd.f32 %v4749_v9, %v4697_v38  ;;  %v4753_v15 = vadd.f32 %v4749_v9, %v4699_v3  ;;  %v4755_v0 = vadd.f32 %v4749_v9, %v4701_v35  ;;  %v4757_v36 = vadd.f32 %v4749_v9, %v4703_v25  ;;  %4811 = vst [vmem:[#allocation5 + $0x30] sm:$0x3f] %v4793_v50 }
 0xa74   :  { %5298 = vmatpush.bf16.msrb.mxu0 %v8075_v47  ;;  %v5352_v47 = vld [vmem:[%s10886_s20 + $0x68] sm:$0xff] }
 0xa75   :  { %v4759_v53 = vmax.f32 %v4751_v17, 0.0  ;;  %v4761_v33 = vmax.f32 %v4753_v15, 0.0  ;;  %v4763_v52 = vmax.f32 %v4755_v0, 0.0  ;;  %v4765_v26 = vmax.f32 %v4757_v36, 0.0  ;;  %5323 = vmatpush.bf16.msrb.mxu3 %v8077_v37  ;;  %5374 = vmatpush.msra.mxu1 %v5352_v47 }
 0xa77   :  { %v4783_v54 = vrot.slane %v4759_v53, 6  ;;  %v4786_v57 = vrot.slane %v4761_v33, 6  ;;  %v4790_v45 = vrot.slane %v4763_v52, 6  ;;  %v4794_v59 = vrot.slane %v4765_v26, 6  ;;  %5375 = vmatpush.msra.mxu1 %v5351_v41  ;;  %v5350_v26 = vld [vmem:[%s10886_s20 + $0x58] sm:$0xff] }
 0xa78   :  { %5299 = vmatpush.bf16.msrb.mxu0 %v8074_v23 }
 0xa79   :  { %v4787_v8 = vsel %vm1454_vm11, %v4783_v54, %v4786_v57  ;;  %v4791_v18 = vsel %vm1454_vm11, %v4786_v57, %v4790_v45  ;;  %v4795_v7 = vsel %vm1454_vm11, %v4790_v45, %v4794_v59  ;;  %4806 = vst.msk [vmem:[#allocation5 + $0x8] sm:$0xfc] %vm4805_vm0, %v4783_v54  ;;  %v4813_v5 = vld [vmem:[#allocation5] sm:$0xff]  ;;  %vm5354_vm11 = vcmask 916480   ;;  %5376 = vmatpush.msra.mxu1 %v5350_v26  ;;  %v5348_v59 = vld [vmem:[%s10886_s20 + $0x48] sm:$0xff] }
 0xa7a   :  { %v4853_v10 = vld [vmem:[#allocation5] sm:$0xfc]  ;;  %4808 = vst.msk [vmem:[#allocation5 + $0x18] sm:$0xff] %vm2966_vm13, %v4787_v8  ;;  %v4821_v6 = vpack.c.bf16 %v10688_v24, %v4813_v5  ;;  %v4855_v49 = vld [vmem:[#allocation5 + $0x30] sm:$0x3f] }
 0xa7b   :  { %v4857_v27 = vpack.c.bf16 %v10688_v24, %v4853_v10  ;;  %4810 = vst.msk [vmem:[#allocation5 + $0x28] sm:$0xff] %vm2966_vm13, %v4791_v18  ;;  %v4859_v56 = vpack.c.bf16 %v4855_v49, %v10691_v19  ;;  %v4819_v31 = vld [vmem:[#allocation5 + $0x30] sm:$0xf]  ;;  %v5158_v3 = vld [vmem:[#allocation5] sm:$0xf0] }
 0xa7c   :  { %4812 = vst.msk [vmem:[#allocation5 + $0x38] sm:$0x3f] %vm2968_vm14, %v4795_v7  ;;  %5128 = vmatmul.bf16.vlgmr.msrb.gmra.mxu2 %v4821_v6  ;;  %5300 = vmatpush.bf16.msrb.mxu0 %v8073_v4  ;;  %v4823_v14 = vpack.c.bf16 %v4819_v31, %v10691_v19  ;;  %v5160_v35 = vld [vmem:[#allocation5 + $0x30] sm:$0xff]  ;;  %v5162_v25 = vpack.c.bf16 %v10688_v24, %v5158_v3  ;;  %v5349_v54 = vld [vmem:[%s10886_s20 + $0x50] sm:$0xff]  ;;  %v5346_v4 = vld [vmem:[%s10886_s20 + $0x38] sm:$0xff] }
 0xa7d   :  { %v4894_v58 = vrot.slane %v4857_v27, 1  ;;  %v4895_v28 = vrot.slane %v4859_v56, 1  ;;  %v5164_v9 = vpack.c.bf16 %v5160_v35, %v10691_v19  ;;  %5537 = vst.msk [vmem:[#allocation6] sm:$0xff] %vm5354_vm11, %v9319_v32  ;;  %5377 = vmatpush.msra.mxu1 %v5349_v54  ;;  %v5347_v49 = vld [vmem:[%s10886_s20 + $0x40] sm:$0xff]  ;;  %v5342_v31 = vld [vmem:[%s10886_s20 + $0x18] sm:$0xff] }
 0xa7e   :  { %v5199_v50 = vrot.slane %v5162_v25, 2  ;;  %5538 = vst.msk [vmem:[#allocation6 + $0x8] sm:$0xff] %vm5354_vm11, %v9319_v32  ;;  %v5339_v35 = vld [vmem:[%s10886_s20] sm:$0xff] }
 0xa7f   :  { %v4896_v22 = vsel %vm3383_vm7, %v4894_v58, %v4895_v28  ;;  %v5200_v17 = vrot.slane %v5164_v9, 2  ;;  %5539 = vst.msk [vmem:[#allocation6 + $0x10] sm:$0xff] %vm5354_vm11, %v9319_v32  ;;  %5378 = vmatpush.msra.mxu1 %v5348_v59 }
 0xa80   :  { %v4814_v46 = vld [vmem:[#allocation5 + $0x8] sm:$0xff]  ;;  %5000 = vmatmul.bf16.vlgmr.msra.gmra.mxu3 %v4896_v22  ;;  %5301 = vmatpush.bf16.msrb.mxu0 %v8072_v61  ;;  %5540 = vst.msk [vmem:[#allocation6 + $0x18] sm:$0xff] %vm5354_vm11, %v9319_v32  ;;  %v5344_v61 = vld [vmem:[%s10886_s20 + $0x28] sm:$0xff] }
 0xa81   :  { %v4854_v62 = vld [vmem:[#allocation5 + $0x8] sm:$0xfc]  ;;  %v4816_v34 = vld [vmem:[#allocation5 + $0x18] sm:$0xff]  ;;  %v5201_v15 = vsel %vm882_vm6, %v5199_v50, %v5200_v17  ;;  %5541 = vst.msk [vmem:[#allocation6 + $0x20] sm:$0xff] %vm5354_vm11, %v9319_v32  ;;  %5379 = vmatpush.msra.mxu1 %v5347_v49 }
 0xa82   :  { %v4822_v13 = vpack.c.bf16 %v4816_v34, %v4814_v46  ;;  %v4818_v21 = vld [vmem:[#allocation5 + $0x28] sm:$0xff]  ;;  %v4858_v30 = vpack.c.bf16 %v4816_v34, %v4854_v62  ;;  %5542 = vst.msk [vmem:[#allocation6 + $0x28] sm:$0xff] %vm5354_vm11, %v9319_v32  ;;  %v5353_v46 = vld [vmem:[%s11018_s23] sm:$0xff] }
 0xa83   :  { %v4856_v1 = vld [vmem:[#allocation5 + $0x38] sm:$0x3f]  ;;  %v5159_v2 = vld [vmem:[#allocation5 + $0x8] sm:$0xf0]  ;;  %5543 = vst.msk [vmem:[#allocation6 + $0x30] sm:$0xff] %vm5354_vm11, %v9319_v32  ;;  %5380 = vmatpush.msra.mxu1 %v5346_v4  ;;  %5412 = vmatpush.msra.mxu2 %v5353_v46 }
 0xa84   :  { %7540 = vmatmul.msk.bf16.vlgmr.msrb.gmra.mxu1 %vm2966_vm13, %v4822_v13  ;;  %v4860_v40 = vpack.c.bf16 %v4856_v1, %v4818_v21  ;;  %v4897_v42 = vrot.slane %v4858_v30, 1  ;;  %5302 = vmatpush.bf16.msrb.mxu0 %v8071_v63  ;;  %v4820_v12 = vld [vmem:[#allocation5 + $0x38] sm:$0xf]  ;;  %v5163_v43 = vpack.c.bf16 %v4816_v34, %v5159_v2  ;;  %v8090_v32 = vld [vmem:[#allocation12 + $0x38] sm:$0xff] }
 0xa85   :  { %v4824_v38 = vpack.c.bf16 %v4820_v12, %v4818_v21  ;;  %v5161_v11 = vld [vmem:[#allocation5 + $0x38] sm:$0xff]  ;;  %5523 = vmatpush.msrb.mxu2 %v5353_v46  ;;  %v5341_v12 = vld [vmem:[%s10886_s20 + $0x10] sm:$0xff] }
 0xa86   :  { %v4898_v48 = vrot.slane %v4860_v40, 1  ;;  %v5165_v29 = vpack.c.bf16 %v5161_v11, %v4818_v21  ;;  %v5202_v44 = vrot.slane %v5163_v43, 2  ;;  %v5343_v40 = vld [vmem:[%s10886_s20 + $0x20] sm:$0xff]  ;;  %v5340_v43 = vld [vmem:[%s10886_s20 + $0x8] sm:$0xff] }
 0xa88   :  { %v4899_v55 = vsel %vm3383_vm7, %v4897_v42, %v4898_v48  ;;  %5303 = vmatpush.bf16.msrb.mxu0 %v8070_v60  ;;  %v5203_v20 = vrot.slane %v5165_v29, 2  ;;  %vm5548_vm7 = vcmask 912386  }
 0xa89   :  { %7482 = vmatmul.msk.bf16.vlgmr.msra.gmra.mxu0 %vm2966_vm13, %v4899_v55 }
 0xa8a   :  { %v5204_v51 = vsel %vm882_vm6, %v5202_v44, %v5203_v20  ;;  %vm5360_vm6 = vcmask 912384  }
 0xa8c   :  { %5133 = vmatmul.bf16.gmra.mxu2 %v4823_v14  ;;  %5304 = vmatpush.bf16.msrb.mxu0 %v8069_v16 }
 0xa90   :  { %5005 = vmatmul.bf16.gmra.mxu3 %v4895_v28  ;;  %5444 = vmatpush.msra.mxu0 %v5352_v47  ;;  %v5345_v28 = vld [vmem:[%s10886_s20 + $0x30] sm:$0xff] }
 0xa91   :  { %5381 = vmatpush.msra.mxu1 %v5345_v28 }
 0xa92   :  { %5445 = vmatpush.msra.mxu0 %v5351_v41 }
 0xa93   :  { %5382 = vmatpush.msra.mxu1 %v5344_v61 }
 0xa94   :  { %7541 = vmatmul.msk.bf16.gmra.mxu1 %vm2966_vm13, %v4824_v38  ;;  %5446 = vmatpush.msra.mxu0 %v5350_v26 }
 0xa95   :  { %5383 = vmatpush.msra.mxu1 %v5343_v40 }
 0xa96   :  { %5447 = vmatpush.msra.mxu0 %v5349_v54 }
 0xa97   :  { %5384 = vmatpush.msra.mxu1 %v5342_v31 }
 0xa98   :  { %5448 = vmatpush.msra.mxu0 %v5348_v59 }
 0xa99   :  { %7483 = vmatmul.msk.bf16.gmra.mxu0 %vm2966_vm13, %v4898_v48  ;;  %5385 = vmatpush.msra.mxu1 %v5341_v12 }
 0xa9a   :  { %5449 = vmatpush.msra.mxu0 %v5347_v49 }
 0xa9b   :  { %5386 = vmatpush.msra.mxu1 %v5340_v43 }
 0xa9c   :  { %5450 = vmatpush.msra.mxu0 %v5346_v4 }
 0xa9d   :  { %5387 = vmatpush.msra.mxu1 %v5339_v35 }
 0xa9e   :  { %5451 = vmatpush.msra.mxu0 %v5345_v28 }
 0xa9f   :  { %5494 = vmatpush.msrb.mxu1 %v5353_v46 }
 0xaa0   :  { %7598 = vmatmul.msk.bf16.vlgmr.msrb.gmra.mxu3 %vm2966_vm13, %v5204_v51  ;;  %5452 = vmatpush.msra.mxu0 %v5344_v61 }
 0xaa2   :  { %5453 = vmatpush.msra.mxu0 %v5343_v40  ;;  %v8110_v40 = vld [vmem:[#allocation12 + $0xd8] sm:$0xff] }
 0xaa4   :  { %5454 = vmatpush.msra.mxu0 %v5342_v31  ;;  %v8109_v31 = vld [vmem:[#allocation12 + $0xd0] sm:$0xff] }
 0xaa6   :  { %5455 = vmatpush.msra.mxu0 %v5341_v12 }
 0xaa8   :  { %5456 = vmatpush.msra.mxu0 %v5340_v43 }
 0xaa9   :  { %5305 = vmatmul.bf16.vlgmr.msrb.gmra.mxu0 %v5201_v15 }
 0xaaa   :  { %5457 = vmatpush.msra.mxu0 %v5339_v35  ;;  %v8087_v35 = vld [vmem:[#allocation12 + $0x20] sm:$0xff] }
 0xaac   :  { %5975 = vmatpush.bf16.msrb.mxu0 %v8110_v40 }
 0xab0   :  { %7599 = vmatmul.msk.bf16.gmra.mxu3 %vm2966_vm13, %v5203_v20  ;;  %vm5393_vm13 = vcmask 64512   ;;  %5976 = vmatpush.bf16.msrb.mxu0 %v8109_v31 }
 0xab9   :  { %5310 = vmatmul.bf16.gmra.mxu0 %v5200_v17 }
 0xaff   :  { %v5129_v52 = vpop.f32.mrf.mxu2 }
 0xb01   :  { %v5148_v23 = vpop.f32.mrf.mxu1 }
 0xb03   :  { %v5001_v0 = vpop.f32.mrf.mxu3 }
 0xb06   :  { %v5020_v36 = vpop.f32.mrf.mxu0 }
 0xb07   :  { %v5131_v18 = vpop.f32.mrf.mxu2  ;;  %v5021_v56 = vadd.f32 %v5020_v36, %v5001_v0 }
 0xb09   :  { %v5150_v5 = vpop.f32.mrf.mxu1  ;;  %v5130_v22 = vadd.f32 %v5129_v52, %v5021_v56 }
 0xb0b   :  { %v5003_v24 = vpop.f32.mrf.mxu3  ;;  %v5149_v55 = vadd.f32 %v5148_v23, %v5130_v22 }
 0xb0e   :  { %v5022_v19 = vpop.f32.mrf.mxu0 }
 0xb0f   :  { %v5023_v6 = vadd.f32 %v5022_v19, %v5003_v24  ;;  %v5134_v39 = vpop.f32.mrf.mxu2 }
 0xb11   :  { %v5132_v37 = vadd.f32 %v5131_v18, %v5023_v6  ;;  %v5153_v62 = vpop.f32.mrf.mxu1 }
 0xb13   :  { %v5006_v53 = vpop.f32.mrf.mxu3  ;;  %v5151_v30 = vadd.f32 %v5150_v5, %v5132_v37 }
 0xb16   :  { %v5025_v33 = vpop.f32.mrf.mxu0 }
 0xb17   :  { %v5026_v58 = vadd.f32 %v5025_v33, %v5006_v53  ;;  %v5136_v16 = vpop.f32.mrf.mxu2 }
 0xb19   :  { %v5135_v34 = vadd.f32 %v5134_v39, %v5026_v58  ;;  %v5155_v20 = vpop.f32.mrf.mxu1 }
 0xb1b   :  { %v5008_v57 = vpop.f32.mrf.mxu3  ;;  %v5154_v14 = vadd.f32 %v5153_v62, %v5135_v34 }
 0xb1e   :  { %v5027_v45 = vpop.f32.mrf.mxu0 }
 0xb1f   :  { %v5028_v42 = vadd.f32 %v5027_v45, %v5008_v57 }
 0xb21   :  { %v5137_v38 = vadd.f32 %v5136_v16, %v5028_v42  ;;  %v8095_v42 = vld [vmem:[#allocation12 + $0x60] sm:$0xff] }
 0xb23   :  { %v5325_v8 = vpop.f32.mrf.mxu3  ;;  %v5156_v51 = vadd.f32 %v5155_v20, %v5137_v38 }
 0xb26   :  { %v5306_v7 = vpop.f32.mrf.mxu0 }
 0xb27   :  { %v5326_v63 = vadd.f32 %v5325_v8, %v5306_v7 }
 0xb29   :  { %v5335_v2 = vadd.f32 %v5326_v63, %v5149_v55  ;;  %v8088_v63 = vld [vmem:[#allocation12 + $0x28] sm:$0xff]  ;;  %v8094_v55 = vld [vmem:[#allocation12 + $0x58] sm:$0xff] }
 0xb2b   :  { %v5327_v10 = vpop.f32.mrf.mxu3  ;;  %v5355_v25 = vsel %vm5354_vm11, %v5335_v2, 0.0 }
 0xb2e   :  { %v5308_v27 = vpop.f32.mrf.mxu0 }
 0xb2f   :  { %v5328_v13 = vadd.f32 %v5327_v10, %v5308_v27 }
 0xb31   :  { %v5336_v60 = vadd.f32 %v5328_v13, %v5151_v30  ;;  %v5504_v13 = vld [vmem:[%s11019_s18] sm:$0x1]  ;;  %v8089_v30 = vld [vmem:[#allocation12 + $0x30] sm:$0xff] }
 0xb33   :  { %v5330_v21 = vpop.f32.mrf.mxu3  ;;  %v5356_v29 = vsel %vm5354_vm11, %v5336_v60, 0.0 }
 0xb34   :  { %v5357_v17 = vadd.f32 %v5356_v29, %v5355_v25  ;;  %v5463_v29 = vld [vmem:[%s11020_s2] sm:$0x1]  ;;  %v8101_v25 = vld [vmem:[#allocation12 + $0x90] sm:$0xff] }
 0xb36   :  { %v5311_v1 = vpop.f32.mrf.mxu0 }
 0xb37   :  { %v5331_v48 = vadd.f32 %v5330_v21, %v5311_v1  ;;  %v8096_v21 = vld [vmem:[#allocation12 + $0x68] sm:$0xff]  ;;  %v8103_v1 = vld [vmem:[#allocation12 + $0xa0] sm:$0xff] }
 0xb38   :  { %5670 = vmatpush.bf16.msra.mxu3 %v8096_v21 }
 0xb39   :  { %v5337_v11 = vadd.f32 %v5331_v48, %v5154_v14  ;;  %v8102_v48 = vld [vmem:[#allocation12 + $0x98] sm:$0xff] }
 0xb3b   :  { %v5332_v44 = vpop.f32.mrf.mxu3  ;;  %v5358_v9 = vsel %vm5354_vm11, %v5337_v11, 0.0 }
 0xb3c   :  { %v5359_v0 = vadd.f32 %v5358_v9, %v5357_v17  ;;  %5671 = vmatpush.bf16.msra.mxu3 %v8095_v42  ;;  %v8108_v9 = vld [vmem:[#allocation12 + $0xc8] sm:$0xff] }
 0xb3d   :  { %5977 = vmatpush.bf16.msrb.mxu0 %v8108_v9  ;;  %v8100_v17 = vld [vmem:[#allocation12 + $0x88] sm:$0xff] }
 0xb3e   :  { %v5313_v3 = vpop.f32.mrf.mxu0 }
 0xb3f   :  { %v5333_v50 = vadd.f32 %v5332_v44, %v5313_v3 }
 0xb40   :  { %5672 = vmatpush.bf16.msra.mxu3 %v8094_v55 }
 0xb41   :  { %v5338_v15 = vadd.f32 %v5333_v50, %v5156_v51  ;;  %v8093_v51 = vld [vmem:[#allocation12 + $0x50] sm:$0xff]  ;;  %v8086_v50 = vld [vmem:[#allocation12 + $0x18] sm:$0xff] }
 0xb43   :  { %v5361_v36 = vsel %vm5360_vm6, %v5338_v15, 0.0 }
 0xb44   :  { %v5362_v24 = vadd.f32 %v5361_v36, %v5359_v0  ;;  %5673 = vmatpush.bf16.msra.mxu3 %v8093_v51  ;;  %v8092_v0 = vld [vmem:[#allocation12 + $0x48] sm:$0xff]  ;;  %v8085_v36 = vld [vmem:[#allocation12 + $0x10] sm:$0xff] }
 0xb46   :  { %v5363_v19 = vrot.slane %v5362_v24, 4 }
 0xb48   :  { %v5364_v47 = vadd.f32 %v5363_v19, %v5362_v24  ;;  %v8099_v24 = vld [vmem:[#allocation12 + $0x80] sm:$0xff]  ;;  %5674 = vmatpush.bf16.msra.mxu3 %v8092_v0  ;;  %v8106_v19 = vld [vmem:[#allocation12 + $0xb8] sm:$0xff] }
 0xb4a   :  { %v5365_v41 = vrot.slane %v5364_v47, 2 }
 0xb4c   :  { %v5366_v53 = vadd.f32 %v5365_v41, %v5364_v47  ;;  %v8091_v47 = vld [vmem:[#allocation12 + $0x40] sm:$0xff]  ;;  %v8084_v41 = vld [vmem:[#allocation12 + $0x8] sm:$0xff] }
 0xb4d   :  { %5675 = vmatpush.bf16.msra.mxu3 %v8091_v47 }
 0xb4e   :  { %v5367_v33 = vrot.slane %v5366_v53, 1 }
 0xb50   :  { %v5368_v52 = vadd.f32 %v5367_v33, %v5366_v53  ;;  %v8098_v53 = vld [vmem:[#allocation12 + $0x78] sm:$0xff]  ;;  %v8105_v33 = vld [vmem:[#allocation12 + $0xb0] sm:$0xff] }
 0xb51   :  { %5676 = vmatpush.bf16.msra.mxu3 %v8090_v32 }
 0xb52   :  { %7600 = vmatmul.msk.f32.vlgmr.msra.gmra.mxu1 %vm5354_vm11, %v5368_v52 }
 0xb53   :  { %5752 = vmatpush.bf16.msra.mxu1 %v8089_v30 }
 0xb57   :  { %5753 = vmatpush.bf16.msra.mxu1 %v8088_v63 }
 0xb5b   :  { %5754 = vmatpush.bf16.msra.mxu1 %v8087_v35 }
 0xb5f   :  { %5755 = vmatpush.bf16.msra.mxu1 %v8086_v50 }
 0xb63   :  { %5756 = vmatpush.bf16.msra.mxu1 %v8085_v36 }
 0xb67   :  { %5757 = vmatpush.bf16.msra.mxu1 %v8084_v41 }
 0xbcf   :  { %v5389_v26 = vpop.f32.mrf.mxu1 }
 0xbd0   :  { %v5392_v54 = vmul.f32 0.0025510204, %v5389_v26 }
 0xbd2   :  { %7601 = vmatmul.msk.f32.vlgmr.msra.gmra.mxu2 %vm5393_vm13, %v5392_v54  ;;  %v8083_v54 = vld [vmem:[#allocation12] sm:$0xff] }
 0xbd3   :  { %5860 = vmatpush.bf16.msra.mxu2 %v8103_v1  ;;  %5758 = vmatpush.bf16.msra.mxu1 %v8083_v54 }
 0xbd7   :  { %5861 = vmatpush.bf16.msra.mxu2 %v8102_v48 }
 0xbda   :  { %7604 = vmatmul.msk.f32.vlgmr.msrb.gmra.mxu2 %vm5393_vm13, %v5504_v13 }
 0xbdb   :  { %5862 = vmatpush.bf16.msra.mxu2 %v8101_v25 }
 0xbdf   :  { %5863 = vmatpush.bf16.msra.mxu2 %v8100_v17 }
 0xbe3   :  { %5864 = vmatpush.bf16.msra.mxu2 %v8099_v24 }
 0xbe7   :  { %5865 = vmatpush.bf16.msra.mxu2 %v8098_v53 }
 0xc55   :  { %v5414_v57 = vpop.f32.mrf.mxu2 }
 0xc56   :  { %v5417_v45 = vperm.slane %v5414_v57, 0  ;;  %v8097_v57 = vld [vmem:[#allocation12 + $0x70] sm:$0xff] }
 0xc57   :  { %5866 = vmatpush.bf16.msra.mxu2 %v8097_v57 }
 0xc58   :  { %v10781_v59 = vsub.f32 %v5335_v2, %v5417_v45  ;;  %v10783_v23 = vsub.f32 %v5336_v60, %v5417_v45  ;;  %v10785_v8 = vsub.f32 %v5337_v11, %v5417_v45  ;;  %v10787_v18 = vsub.f32 %v5338_v15, %v5417_v45  ;;  %v8107_v15 = vld [vmem:[#allocation12 + $0xc0] sm:$0xff] }
 0xc59   :  { %5978 = vmatpush.bf16.msrb.mxu0 %v8107_v15 }
 0xc5a   :  { %v5422_v7 = vmul.f32 %v10781_v59, %v10781_v59  ;;  %v5423_v5 = vmul.f32 %v10783_v23, %v10783_v23  ;;  %v5424_v10 = vmul.f32 %v10785_v8, %v10785_v8  ;;  %v5425_v6 = vmul.f32 %v10787_v18, %v10787_v18 }
 0xc5c   :  { %v5426_v27 = vsel %vm5354_vm11, %v5422_v7, 0.0  ;;  %v5427_v39 = vsel %vm5354_vm11, %v5423_v5, 0.0  ;;  %v5429_v4 = vsel %vm5354_vm11, %v5424_v10, 0.0  ;;  %v5431_v58 = vsel %vm5360_vm6, %v5425_v6, 0.0  ;;  %v8104_v5 = vld [vmem:[#allocation12 + $0xa8] sm:$0xff] }
 0xc5d   :  { %v5428_v49 = vadd.f32 %v5427_v39, %v5426_v27  ;;  %5979 = vmatpush.bf16.msrb.mxu0 %v8106_v19  ;;  %v5525_v52 = vpop.f32.mrf.mxu2 }
 0xc5e   :  { %v5528_v7 = vperm.slane %v5525_v52, 0 }
 0xc5f   :  { %v5430_v56 = vadd.f32 %v5429_v4, %v5428_v49 }
 0xc61   :  { %v5432_v37 = vadd.f32 %v5431_v58, %v5430_v56  ;;  %5980 = vmatpush.bf16.msrb.mxu0 %v8105_v33 }
 0xc63   :  { %v5433_v28 = vrot.slane %v5432_v37, 4 }
 0xc65   :  { %v5434_v46 = vadd.f32 %v5433_v28, %v5432_v37  ;;  %5981 = vmatpush.bf16.msrb.mxu0 %v8104_v5 }
 0xc67   :  { %v5435_v62 = vrot.slane %v5434_v46, 2 }
 0xc69   :  { %v5436_v61 = vadd.f32 %v5435_v62, %v5434_v46 }
 0xc6b   :  { %v5437_v22 = vrot.slane %v5436_v61, 1 }
 0xc6d   :  { %v5438_v34 = vadd.f32 %v5437_v22, %v5436_v61 }
 0xc6f   :  { %7602 = vmatmul.msk.f32.vlgmr.msra.gmra.mxu0 %vm5354_vm11, %v5438_v34 }
 0xcec   :  { %v5459_v60 = vpop.f32.mrf.mxu0 }
 0xced   :  { %v5462_v14 = vmul.f32 0.0025510204, %v5459_v60 }
 0xcef   :  { %v5464_v16 = vadd.f32 1e-05, %v5462_v14 }
 0xcf1   :  { %8131 = vrsqrt.f32 %v5464_v16  ;;  %vm5471_vm2 = vweird.f32 %v5464_v16 }
 0xcf7   :  { %v8132_v12 = vpop.eup %8131 }
 0xcf8   :  { %v5466_v38 = vmul.f32 %v8132_v12, %v5464_v16  ;;  %vm5472_vm14 = vweird.f32 %v8132_v12 }
 0xcf9   :  { %vm5473_vm3 = vmor %vm5471_vm2, %vm5472_vm14 }
 0xcfa   :  { %v5467_v2 = vmul.f32 %v8132_v12, %v5466_v38 }
 0xcfc   :  { %v5468_v11 = vmul.f32 0.5, %v5467_v2 }
 0xcfe   :  { %v5469_v43 = vsub.f32 1.5, %v5468_v11 }
 0xd00   :  { %v5470_v44 = vmul.f32 %v8132_v12, %v5469_v43 }
 0xd02   :  { %v5474_v20 = vsel %vm5473_vm3, %v8132_v12, %v5470_v44 }
 0xd03   :  { %v5475_v3 = vmul.f32 %v5474_v20, %v5463_v29 }
 0xd05   :  { %7603 = vmatmul.msk.f32.vlgmr.msrb.gmra.mxu1 %vm5393_vm13, %v5475_v3 }
 0xd82   :  { %v5496_v26 = vpop.f32.mrf.mxu1 }
 0xd83   :  { %v5499_v45 = vperm.slane %v5496_v26, 0 }
 0xd85   :  { %v5500_v10 = vmul.f32 %v5499_v45, %v10781_v59  ;;  %v5501_v6 = vmul.f32 %v5499_v45, %v10783_v23  ;;  %v5502_v27 = vmul.f32 %v5499_v45, %v10785_v8  ;;  %v5503_v56 = vmul.f32 %v5499_v45, %v10787_v18 }
 0xd87   :  { %v5529_v39 = vadd.f32 %v5528_v7, %v5500_v10  ;;  %v5530_v49 = vadd.f32 %v5528_v7, %v5501_v6  ;;  %v5531_v58 = vadd.f32 %v5528_v7, %v5502_v27  ;;  %v5532_v59 = vadd.f32 %v5528_v7, %v5503_v56 }
 0xd89   :  { %v5533_v4 = vmax.f32 %v5529_v39, 0.0  ;;  %v5534_v37 = vmax.f32 %v5530_v49, 0.0  ;;  %v5535_v23 = vmax.f32 %v5531_v58, 0.0  ;;  %v5536_v18 = vmax.f32 %v5532_v59, 0.0 }
 0xd8b   :  { %5547 = vst.msk [vmem:[#allocation6 + $0x4] sm:$0x3] %vm5546_vm5, %v5533_v4 }
 0xd8c   :  { %5549 = vst.msk [vmem:[#allocation6 + $0x6] sm:$0xc] %vm5548_vm7, %v5533_v4 }
 0xd8d   :  { %5551 = vst.msk [vmem:[#allocation6 + $0x8] sm:$0x30] %vm5550_vm8, %v5533_v4 }
 0xd8e   :  { %5553 = vst.msk [vmem:[#allocation6 + $0xa] sm:$0xc0] %vm5552_vm9, %v5533_v4 }
 0xd8f   :  { %5554 = vst.msk [vmem:[#allocation6 + $0x14] sm:$0x3] %vm5546_vm5, %v5534_v37 }
 0xd90   :  { %5555 = vst.msk [vmem:[#allocation6 + $0x16] sm:$0xc] %vm5548_vm7, %v5534_v37 }
 0xd91   :  { %5556 = vst.msk [vmem:[#allocation6 + $0x18] sm:$0x30] %vm5550_vm8, %v5534_v37 }
 0xd92   :  { %5557 = vst.msk [vmem:[#allocation6 + $0x1a] sm:$0xc0] %vm5552_vm9, %v5534_v37  ;;  %v5564_v8 = vld [vmem:[#allocation6] sm:$0xff] }
 0xd93   :  { %5558 = vst.msk [vmem:[#allocation6 + $0x24] sm:$0x3] %vm5546_vm5, %v5535_v23  ;;  %v5589_v28 = vld [vmem:[#allocation6 + $0x2] sm:$0xff] }
 0xd94   :  { %v5779_v46 = vld [vmem:[#allocation6 + $0x4] sm:$0xff]  ;;  %5559 = vst.msk [vmem:[#allocation6 + $0x26] sm:$0xc] %vm5548_vm7, %v5535_v23 }
 0xd95   :  { %v5565_v62 = vld [vmem:[#allocation6 + $0x8] sm:$0xff]  ;;  %5560 = vst.msk [vmem:[#allocation6 + $0x28] sm:$0x30] %vm5550_vm8, %v5535_v23 }
 0xd96   :  { %v5894_v61 = vld [vmem:[#allocation6 + $0x6] sm:$0xff]  ;;  %v5571_v34 = vpack.c.bf16 %v5565_v62, %v5564_v8  ;;  %5561 = vst.msk [vmem:[#allocation6 + $0x2a] sm:$0xc0] %vm5552_vm9, %v5535_v23  ;;  %v5895_v1 = vld [vmem:[#allocation6 + $0xe] sm:$0xff] }
 0xd97   :  { %v5590_v22 = vld [vmem:[#allocation6 + $0xa] sm:$0xff]  ;;  %5562 = vst.msk [vmem:[#allocation6 + $0x34] sm:$0x3] %vm5546_vm5, %v5536_v18  ;;  %v5901_v40 = vpack.c.bf16 %v5895_v1, %v5894_v61  ;;  %v5591_v42 = vld [vmem:[#allocation6 + $0x12] sm:$0xff] }
 0xd98   :  { %v5780_v13 = vld [vmem:[#allocation6 + $0xc] sm:$0xff]  ;;  %v5596_v21 = vpack.c.bf16 %v5590_v22, %v5589_v28  ;;  %7665 = vmatmul.msk.bf16.vlgmr.msra.gmra.mxu1 %vm5354_vm11, %v5571_v34  ;;  %5563 = vst.msk [vmem:[#allocation6 + $0x36] sm:$0xc] %vm5548_vm7, %v5536_v18  ;;  %v5567_v48 = vld [vmem:[#allocation6 + $0x18] sm:$0xff] }
 0xd99   :  { %v5786_v30 = vpack.c.bf16 %v5780_v13, %v5779_v46  ;;  %7729 = vmatmul.msk.bf16.vlgmr.msrb.gmra.mxu0 %vm5354_vm11, %v5901_v40  ;;  %v5566_v63 = vld [vmem:[#allocation6 + $0x10] sm:$0xff]  ;;  %v5592_v31 = vld [vmem:[#allocation6 + $0x1a] sm:$0xff] }
 0xd9a   :  { %7633 = vmatmul.msk.bf16.vlgmr.msra.gmra.mxu3 %vm5354_vm11, %v5596_v21  ;;  %v5781_v55 = vld [vmem:[#allocation6 + $0x14] sm:$0xff]  ;;  %v5782_v60 = vld [vmem:[#allocation6 + $0x1c] sm:$0xff]  ;;  %v5572_v12 = vpack.c.bf16 %v5567_v48, %v5566_v63  ;;  %v5597_v38 = vpack.c.bf16 %v5592_v31, %v5591_v42 }
 0xd9b   :  { %7697 = vmatmul.msk.bf16.vlgmr.msra.gmra.mxu2 %vm5354_vm11, %v5786_v30  ;;  %v5896_v14 = vld [vmem:[#allocation6 + $0x16] sm:$0xff]  ;;  %v5897_v16 = vld [vmem:[#allocation6 + $0x1e] sm:$0xff]  ;;  %v5787_v2 = vpack.c.bf16 %v5782_v60, %v5781_v55 }
 0xd9c   :  { %v5902_v11 = vpack.c.bf16 %v5897_v16, %v5896_v14  ;;  %v5593_v43 = vld [vmem:[#allocation6 + $0x22] sm:$0xff] }
 0xd9d   :  { %v5568_v29 = vld [vmem:[#allocation6 + $0x20] sm:$0xff]  ;;  %v5569_v44 = vld [vmem:[#allocation6 + $0x28] sm:$0xff] }
 0xd9e   :  { %v5594_v20 = vld [vmem:[#allocation6 + $0x2a] sm:$0xff]  ;;  %v5573_v51 = vpack.c.bf16 %v5569_v44, %v5568_v29 }
 0xd9f   :  { %v5783_v3 = vld [vmem:[#allocation6 + $0x24] sm:$0xff]  ;;  %v5784_v35 = vld [vmem:[#allocation6 + $0x2c] sm:$0xff]  ;;  %v5598_v50 = vpack.c.bf16 %v5594_v20, %v5593_v43  ;;  %v5785_v24 = vld [vmem:[#allocation6 + $0x34] sm:$0xff] }
 0xda0   :  { %v5898_v25 = vld [vmem:[#allocation6 + $0x26] sm:$0xff]  ;;  %v5899_v9 = vld [vmem:[#allocation6 + $0x2e] sm:$0xff]  ;;  %v5788_v17 = vpack.c.bf16 %v5784_v35, %v5783_v3  ;;  %v5900_v19 = vld [vmem:[#allocation6 + $0x36] sm:$0xff]  ;;  %v5789_v53 = vpack.c.bf16 %v5785_v24, %v5785_v24 }
 0xda1   :  { %v5903_v15 = vpack.c.bf16 %v5899_v9, %v5898_v25  ;;  %v5570_v0 = vld [vmem:[#allocation6 + $0x30] sm:$0xff]  ;;  %v5904_v33 = vpack.c.bf16 %v5900_v19, %v5900_v19 }
 0xda2   :  { %v5595_v36 = vld [vmem:[#allocation6 + $0x32] sm:$0xff]  ;;  %v5574_v47 = vpack.c.bf16 %v5570_v0, %v5570_v0 }
 0xda3   :  { %v5599_v41 = vpack.c.bf16 %v5595_v36, %v5595_v36 }
 0xda8   :  { %7666 = vmatmul.msk.bf16.gmra.mxu1 %vm5354_vm11, %v5572_v12 }
 0xda9   :  { %7730 = vmatmul.msk.bf16.gmra.mxu0 %vm5354_vm11, %v5902_v11 }
 0xdaa   :  { %7634 = vmatmul.msk.bf16.gmra.mxu3 %vm5354_vm11, %v5597_v38 }
 0xdab   :  { %7698 = vmatmul.msk.bf16.gmra.mxu2 %vm5354_vm11, %v5787_v2 }
 0xdb8   :  { %7667 = vmatmul.msk.bf16.gmra.mxu1 %vm5354_vm11, %v5573_v51 }
 0xdb9   :  { %7731 = vmatmul.msk.bf16.gmra.mxu0 %vm5354_vm11, %v5903_v15 }
 0xdba   :  { %7635 = vmatmul.msk.bf16.gmra.mxu3 %vm5354_vm11, %v5598_v50 }
 0xdbb   :  { %7699 = vmatmul.msk.bf16.gmra.mxu2 %vm5354_vm11, %v5788_v17 }
 0xdc8   :  { %7668 = vmatmul.msk.bf16.gmra.mxu1 %vm5354_vm11, %v5574_v47 }
 0xdc9   :  { %7732 = vmatmul.msk.bf16.gmra.mxu0 %vm5354_vm11, %v5904_v33 }
 0xdca   :  { %7636 = vmatmul.msk.bf16.gmra.mxu3 %vm5354_vm11, %v5599_v41 }
 0xdcb   :  { %7700 = vmatmul.msk.bf16.gmra.mxu2 %vm5354_vm11, %v5789_v53 }
 0xe15   :  { %v5760_v32 = vpop.f32.mrf.mxu1 }
 0xe16   :  { %v5983_v52 = vpop.f32.mrf.mxu0 }
 0xe1d   :  { %v5678_v26 = vpop.f32.mrf.mxu3  ;;  %v5762_v45 = vpop.f32.mrf.mxu1 }
 0xe1e   :  { %v5868_v54 = vpop.f32.mrf.mxu2  ;;  %v5761_v57 = vadd.f32 %v5760_v32, %v5678_v26  ;;  %v5985_v5 = vpop.f32.mrf.mxu0 }
 0xe20   :  { %v5887_v7 = vadd.f32 %v5868_v54, %v5761_v57 }
 0xe22   :  { %v6002_v10 = vadd.f32 %v5983_v52, %v5887_v7 }
 0xe24   :  { %8133 = vtanh.f32 %v6002_v10 }
 0xe25   :  { %v5680_v6 = vpop.f32.mrf.mxu3  ;;  %v5765_v49 = vpop.f32.mrf.mxu1 }
 0xe26   :  { %v5870_v27 = vpop.f32.mrf.mxu2  ;;  %v5763_v39 = vadd.f32 %v5762_v45, %v5680_v6  ;;  %v5988_v56 = vpop.f32.mrf.mxu0 }
 0xe28   :  { %v5888_v4 = vadd.f32 %v5870_v27, %v5763_v39 }
 0xe2a   :  { %v8134_v58 = vpop.eup %8133  ;;  %v6003_v37 = vadd.f32 %v5985_v5, %v5888_v4 }
 0xe2b   :  { %6016 = vst [vmem:[%s11021_s4] sm:$0xff] %v8134_v58 }
 0xe2c   :  { %8135 = vtanh.f32 %v6003_v37 }
 0xe2d   :  { %v5683_v59 = vpop.f32.mrf.mxu3  ;;  %v5767_v18 = vpop.f32.mrf.mxu1 }
 0xe2e   :  { %v5873_v23 = vpop.f32.mrf.mxu2  ;;  %v5766_v8 = vadd.f32 %v5765_v49, %v5683_v59  ;;  %v5990_v46 = vpop.f32.mrf.mxu0 }
 0xe30   :  { %v5889_v28 = vadd.f32 %v5873_v23, %v5766_v8 }
 0xe32   :  { %v8136_v62 = vpop.eup %8135  ;;  %v6004_v61 = vadd.f32 %v5988_v56, %v5889_v28 }
 0xe33   :  { %6017 = vst [vmem:[%s11021_s4 + $0x8] sm:$0xff] %v8136_v62 }
 0xe34   :  { %8137 = vtanh.f32 %v6004_v61 }
 0xe35   :  { %v5685_v22 = vpop.f32.mrf.mxu3  ;;  %v5770_v21 = vpop.f32.mrf.mxu1 }
 0xe36   :  { %v5875_v34 = vpop.f32.mrf.mxu2  ;;  %v5768_v13 = vadd.f32 %v5767_v18, %v5685_v22  ;;  %v5993_v1 = vpop.f32.mrf.mxu0 }
 0xe38   :  { %v5890_v30 = vadd.f32 %v5875_v34, %v5768_v13 }
 0xe3a   :  { %v8138_v40 = vpop.eup %8137  ;;  %v6005_v42 = vadd.f32 %v5990_v46, %v5890_v30 }
 0xe3b   :  { %6018 = vst [vmem:[%s11021_s4 + $0x10] sm:$0xff] %v8138_v40 }
 0xe3c   :  { %8139 = vtanh.f32 %v6005_v42 }
 0xe3d   :  { %v5688_v63 = vpop.f32.mrf.mxu3  ;;  %v5772_v55 = vpop.f32.mrf.mxu1 }
 0xe3e   :  { %v5878_v48 = vpop.f32.mrf.mxu2  ;;  %v5771_v31 = vadd.f32 %v5770_v21, %v5688_v63  ;;  %v5995_v14 = vpop.f32.mrf.mxu0 }
 0xe40   :  { %v5891_v60 = vadd.f32 %v5878_v48, %v5771_v31 }
 0xe42   :  { %v8140_v16 = vpop.eup %8139  ;;  %v6006_v12 = vadd.f32 %v5993_v1, %v5891_v60 }
 0xe43   :  { %6019 = vst [vmem:[%s11021_s4 + $0x18] sm:$0xff] %v8140_v16 }
 0xe44   :  { %8141 = vtanh.f32 %v6006_v12 }
 0xe45   :  { %v5690_v38 = vpop.f32.mrf.mxu3  ;;  %v5775_v43 = vpop.f32.mrf.mxu1 }
 0xe46   :  { %v5880_v2 = vpop.f32.mrf.mxu2  ;;  %v5773_v11 = vadd.f32 %v5772_v55, %v5690_v38  ;;  %v5998_v44 = vpop.f32.mrf.mxu0 }
 0xe48   :  { %v5892_v29 = vadd.f32 %v5880_v2, %v5773_v11 }
 0xe4a   :  { %v8142_v20 = vpop.eup %8141  ;;  %v6007_v3 = vadd.f32 %v5995_v14, %v5892_v29 }
 0xe4b   :  { %6020 = vst [vmem:[%s11021_s4 + $0x20] sm:$0xff] %v8142_v20 }
 0xe4c   :  { %8143 = vtanh.f32 %v6007_v3 }
 0xe4d   :  { %v5693_v35 = vpop.f32.mrf.mxu3  ;;  %v5777_v51 = vpop.f32.mrf.mxu1 }
 0xe4e   :  { %v5883_v25 = vpop.f32.mrf.mxu2  ;;  %v5776_v9 = vadd.f32 %v5775_v43, %v5693_v35  ;;  %v6000_v17 = vpop.f32.mrf.mxu0 }
 0xe50   :  { %v5893_v50 = vadd.f32 %v5883_v25, %v5776_v9 }
 0xe52   :  { %v8144_v15 = vpop.eup %8143  ;;  %v6008_v0 = vadd.f32 %v5998_v44, %v5893_v50 }
 0xe53   :  { %6021 = vst [vmem:[%s11021_s4 + $0x28] sm:$0xff] %v8144_v15 }
 0xe54   :  { %8145 = vtanh.f32 %v6008_v0 }
 0xe55   :  { %v5695_v36 = vpop.f32.mrf.mxu3 }
 0xe56   :  { %v5885_v24 = vpop.f32.mrf.mxu2 }
 0xe5a   :  { %v8146_v19 = vpop.eup %8145 }
 0xe5b   :  { %6022 = vst [vmem:[%s11021_s4 + $0x30] sm:$0xff] %v8146_v19 }
 0xe5c   :  { %6027 = vsyncpa [#allocation8], 1 }
 0xe5d   :  { %6028 = vsyncpa [#allocation10], 1 }
 0xe5e   :  { %6029 = vsyncpa [#allocation13], 1 }

</bundles_post_ra>
